<compile_context>
chip_gen: v6e
topology: v6e:2x2x1
jax: 0.10.0
libtpu: 0.0.40
codegen_flags: <defaults>
</compile_context>

<pallas_src>
import math
from functools import partial

import jax
import jax.numpy as jnp
from jax.experimental import pallas as pl
from jax.experimental.pallas import tpu as pltpu

H = 128          # LSTM / linear hidden size (fixed by the module)
H2 = 2 * H       # attention key width (la_* output = 256)


# -----------------------------------------------------------------------------
# Fused kernel: one grid step == one critic head.
#   LSTM(2 layers) -> attention -> scored seq   and   MLP(sa) -> q.
# Everything lives in VMEM (shapes are tiny); the time loop is unrolled.
# -----------------------------------------------------------------------------
def _critic_head_kernel(T, B,
                        hist_ref, sa_ref, h0_ref, c0_ref,
                        wih0_ref, whh0_ref, b0_ref,
                        w1_ref, b1_ref,
                        law_ref, lab_ref,
                        l1w_ref, l1b_ref,
                        l2w_ref, l2b_ref,
                        l3w_ref, l3b_ref,
                        q_ref, scored_ref,
                        x1_scr, sr_scr):
    f32 = jnp.float32

    # ---- MLP branch on [state, action] (independent of the recurrence) ----
    sa = sa_ref[...]
    a1 = jnp.maximum(
        jnp.dot(sa, l1w_ref[...], preferred_element_type=f32) + l1b_ref[...], 0.0)
    a2 = jnp.maximum(
        jnp.dot(a1, l2w_ref[...], preferred_element_type=f32) + l2b_ref[...], 0.0)
    # q = tanh(l3(cat([scored_x1, x2], dim=1)))[:, -1, :]
    # The last row of that concatenation is exactly x2 (= a2), so q depends
    # only on it; this matches the torch semantics exactly.
    q_ref[...] = jnp.tanh(
        jnp.dot(a2, l3w_ref[...], preferred_element_type=f32) + l3b_ref[...])

    # ---- hoisted layer-0 input projection: one (T*B, D)@(D, 4H) matmul ----
    g0_all = (jnp.dot(hist_ref[...], wih0_ref[...], preferred_element_type=f32)
              + b0_ref[...])                                   # (T*B, 4H)

    whh0 = whh0_ref[...]                                       # (H, 4H)
    w1 = w1_ref[...]                                           # (2H, 4H)
    b1 = b1_ref[...]                                           # (1, 4H)

    hl0 = h0_ref[0]; cl0 = c0_ref[0]                           # (B, H)
    hl1 = h0_ref[1]; cl1 = c0_ref[1]

    def act(g):
        # gate columns pre-permuted to [i, f, o | g]: one sigmoid + one tanh.
        s = jax.nn.sigmoid(g[:, :3 * H])
        gg = jnp.tanh(g[:, 3 * H:])
        return s[:, 0:H], s[:, H:2 * H], s[:, 2 * H:3 * H], gg

    # ---- 2-layer LSTM over time (unrolled, T is small & static) ----
    for t in range(T):
        # layer 0: only the recurrent matmul remains inside the loop
        g0 = g0_all[t * B:(t + 1) * B, :] + jnp.dot(
            hl0, whh0, preferred_element_type=f32)
        i0, f0, o0, gg0 = act(g0)
        cl0 = f0 * cl0 + i0 * gg0
        hl0 = o0 * jnp.tanh(cl0)

        # layer 1: single K=2H contraction over [h_layer0, h_layer1]
        g1 = jnp.dot(jnp.concatenate([hl0, hl1], axis=1), w1,
                     preferred_element_type=f32) + b1
        i1, f1, o1, gg1 = act(g1)
        cl1 = f1 * cl1 + i1 * gg1
        hl1 = o1 * jnp.tanh(cl1)

        x1_scr[pl.ds(t * B, B), :] = hl1                       # layer-2 output

    # ---- attention: u = tanh(la(x1)) as one batched matmul ----
    x1 = x1_scr[...]                                           # (T*B, H)
    u = jnp.tanh(jnp.dot(x1, law_ref[...], preferred_element_type=f32)
                 + lab_ref[...])                               # (T*B, 2H)
    # k = cat(ht0, ht1); fold the 1/sqrt(B) scale in here once.
    k = jnp.concatenate([hl0, hl1], axis=1) * (1.0 / math.sqrt(B))   # (B, 2H)

    att_cols = [jnp.sum(u[t * B:(t + 1) * B, :] * k, axis=1, keepdims=True)
                for t in range(T)]                             # T x (B, 1)
    att = jnp.concatenate(att_cols, axis=1)                    # (B, T)

    # softmax over the sequence axis (torch dim=1)
    m = jnp.max(att, axis=1, keepdims=True)
    e = jnp.exp(att - m)
    score = e * pl.reciprocal(jnp.sum(e, axis=1, keepdims=True), approx=True)

    # one dense (T*B, H) store for the scored sequence
    for t in range(T):
        sr_scr[pl.ds(t * B, B), :] = score[:, t:t + 1]
    scored_ref[...] = x1 * sr_scr[...]


# -----------------------------------------------------------------------------
# One fused pallas_call for both heads.
# -----------------------------------------------------------------------------
def critic_fused_pallas(history, sa, h0_stack, c0_stack, packed):
    """history: (B, T, D); sa: (B, D); h0/c0_stack: (2 heads, 2 layers, B, H);
    packed: output of pack_critic_params. Returns q (2, B, 1), scored (2, T*B, H)."""
    B, T, D = history.shape
    hist_flat = jnp.transpose(history, (1, 0, 2)).reshape(T * B, D)  # time-major

    args = (hist_flat, sa, h0_stack, c0_stack,
            packed['wih0_t'], packed['whh0_t'], packed['b0'],
            packed['w1_t'], packed['b1'],
            packed['law_t'], packed['lab'],
            packed['l1w_t'], packed['l1b'],
            packed['l2w_t'], packed['l2b'],
            packed['l3w_t'], packed['l3b'])

    def shared(shape):
        zeros = (0,) * len(shape)
        return pl.BlockSpec(tuple(shape), lambda h: zeros)

    def per_head(shape):
        zeros = (0,) * len(shape)
        return pl.BlockSpec((None,) + tuple(shape), lambda h: (h,) + zeros)

    in_specs = [
        shared((T * B, D)), shared((B, D)),
        per_head((2, B, H)), per_head((2, B, H)),
        per_head((D, 4 * H)), per_head((H, 4 * H)), per_head((1, 4 * H)),
        per_head((2 * H, 4 * H)), per_head((1, 4 * H)),
        per_head((H, H2)), per_head((1, H2)),
        per_head((D, H)), per_head((1, H)),
        per_head((H, H)), per_head((1, H)),
        per_head((H, 1)), per_head((1, 1)),
    ]

    q, scored = pl.pallas_call(
        partial(_critic_head_kernel, T, B),
        grid=(2,),
        in_specs=in_specs,
        out_specs=(per_head((B, 1)), per_head((T * B, H))),
        out_shape=(jax.ShapeDtypeStruct((2, B, 1), jnp.float32),
                   jax.ShapeDtypeStruct((2, T * B, H), jnp.float32)),
        scratch_shapes=[pltpu.VMEM((T * B, H), jnp.float32),
                        pltpu.VMEM((T * B, 1), jnp.float32)],
        compiler_params=pltpu.CompilerParams(
            dimension_semantics=("parallel",)),
    )(*args)
    return q, scored


def critic_forward(history, state, action, packed, h0_stack, c0_stack):
    sa = jnp.concatenate([state, action], axis=1)              # (B, D_in)
    q, _ = critic_fused_pallas(history, sa, h0_stack, c0_stack, packed)
    return q[0], q[1]


# -----------------------------------------------------------------------------
# Parameter init (deterministic, mirrors the shapes / init ranges of __init__).
# -----------------------------------------------------------------------------
def init_head_params(key, d_in, init_w=0.003):
    ks = jax.random.split(key, 16)

    def u(k, shape, bound):
        return jax.random.uniform(k, shape, jnp.float32, -bound, bound)

    bl = 1.0 / math.sqrt(H)       # torch LSTM default init bound
    p = {
        'wih0': u(ks[0], (4 * H, d_in), bl), 'whh0': u(ks[1], (4 * H, H), bl),
        'bih0': u(ks[2], (4 * H,), bl),      'bhh0': u(ks[3], (4 * H,), bl),
        'wih1': u(ks[4], (4 * H, H), bl),    'whh1': u(ks[5], (4 * H, H), bl),
        'bih1': u(ks[6], (4 * H,), bl),      'bhh1': u(ks[7], (4 * H,), bl),
        'l1w': u(ks[8], (H, d_in), 1.0 / math.sqrt(d_in)),
        'l1b': u(ks[9], (H,), 1.0 / math.sqrt(d_in)),
        'l2w': u(ks[10], (H, H), 1.0 / math.sqrt(H)),
        'l2b': u(ks[11], (H,), 1.0 / math.sqrt(H)),
        'l3w': u(ks[12], (1, H), init_w), 'l3b': u(ks[13], (1,), init_w),
        'law': u(ks[14], (H2, H), 0.1),   'lab': u(ks[15], (H2,), 0.1),
    }
    return p


# -----------------------------------------------------------------------------
# One-time weight packing: transpose, fuse biases, permute gate columns from
# PyTorch's [i | f | g | o] to [i | f | o | g] (sigmoid gates contiguous) and
# stack the two heads on a leading axis of size 2.
# -----------------------------------------------------------------------------
def _perm_gates_cols(w_t):
    return jnp.concatenate(
        [w_t[..., :2 * H], w_t[..., 3 * H:], w_t[..., 2 * H:3 * H]], axis=-1)


def pack_head_params(p):
    return dict(
        wih0_t=_perm_gates_cols(p['wih0'].T),                      # (D, 4H)
        whh0_t=_perm_gates_cols(p['whh0'].T),                      # (H, 4H)
        b0=_perm_gates_cols((p['bih0'] + p['bhh0']).reshape(1, 4 * H)),
        w1_t=jnp.concatenate([_perm_gates_cols(p['wih1'].T),
                              _perm_gates_cols(p['whh1'].T)], axis=0),  # (2H, 4H)
        b1=_perm_gates_cols((p['bih1'] + p['bhh1']).reshape(1, 4 * H)),
        law_t=p['law'].T, lab=p['lab'].reshape(1, H2),
        l1w_t=p['l1w'].T, l1b=p['l1b'].reshape(1, H),
        l2w_t=p['l2w'].T, l2b=p['l2b'].reshape(1, H),
        l3w_t=p['l3w'].T, l3b=p['l3b'].reshape(1, 1),
    )


def pack_critic_params(p1, p2):
    pk1, pk2 = pack_head_params(p1), pack_head_params(p2)
    return {k: jnp.stack([pk1[k], pk2[k]], axis=0) for k in pk1}


# -----------------------------------------------------------------------------
# Pure-JAX reference (same math, batch-first, unpermuted params).
# -----------------------------------------------------------------------------
def critic_head_ref(history, sa, h0, c0, p):
    B, T, D = history.shape

    def cell(x, h, c, wih, whh, bih, bhh):
        g = x @ wih.T + h @ whh.T + bih + bhh
        i, f, gg, o = jnp.split(g, 4, axis=1)
        c = jax.nn.sigmoid(f) * c + jax.nn.sigmoid(i) * jnp.tanh(gg)
        h = jax.nn.sigmoid(o) * jnp.tanh(c)
        return h, c

    hl0, cl0, hl1, cl1 = h0[0], c0[0], h0[1], c0[1]
    xs = []
    for t in range(T):
        hl0, cl0 = cell(history[:, t, :], hl0, cl0,
                        p['wih0'], p['whh0'], p['bih0'], p['bhh0'])
        hl1, cl1 = cell(hl0, hl1, cl1,
                        p['wih1'], p['whh1'], p['bih1'], p['bhh1'])
        xs.append(hl1)
    x1 = jnp.stack(xs, axis=1)                                   # (B, T, H)
    u = jnp.tanh(x1 @ p['law'].T + p['lab'])                     # (B, T, 2H)
    k = jnp.concatenate([hl0, hl1], axis=1)[:, :, None]          # (B, 2H, 1)
    att = jnp.matmul(u, k) / math.sqrt(B)                        # (B, T, 1)
    score = jax.nn.softmax(att, axis=1)
    scored = x1 * score
    a1 = jax.nn.relu(sa @ p['l1w'].T + p['l1b'])
    a2 = jax.nn.relu(a1 @ p['l2w'].T + p['l2b'])
    q = jnp.tanh(a2 @ p['l3w'].T + p['l3b'])                     # last row of x3
    return q, scored


if __name__ == "__main__":
    n_states, n_actions = 6, 2
    B, T = 2, 8
    D_in = n_states + n_actions

    root = jax.random.PRNGKey(0)
    k_hist, k_s, k_a, k_p1, k_p2, k_h1, k_c1, k_h2, k_c2 = jax.random.split(root, 9)

    history = jax.random.normal(k_hist, (B, T, D_in), jnp.float32)
    state = jax.random.normal(k_s, (B, n_states), jnp.float32)
    action = jax.random.normal(k_a, (B, n_actions), jnp.float32)

    params1 = init_head_params(k_p1, D_in)
    params2 = init_head_params(k_p2, D_in)
    packed = pack_critic_params(params1, params2)     # one-time packing

    # h0/c0: (num_layers*num_directions, B, H) = (2, B, 128), randn per forward
    h0_1 = jax.random.normal(k_h1, (2, B, H), jnp.float32)
    c0_1 = jax.random.normal(k_c1, (2, B, H), jnp.float32)
    h0_2 = jax.random.normal(k_h2, (2, B, H), jnp.float32)
    c0_2 = jax.random.normal(k_c2, (2, B, H), jnp.float32)
    h0_stack = jnp.stack([h0_1, h0_2], axis=0)        # (2 heads, 2 layers, B, H)
    c0_stack = jnp.stack([c0_1, c0_2], axis=0)

    fwd = jax.jit(critic_forward)
    q1, q2 = fwd(history, state, action, packed, h0_stack, c0_stack)
    jax.block_until_ready((q1, q2))

    # Sanity check against pure-JAX reference.
    sa = jnp.concatenate([state, action], axis=1)
    with jax.default_matmul_precision("float32"):
        q1_ref, scored1_ref = critic_head_ref(history, sa, h0_1, c0_1, params1)
        q2_ref, _ = critic_head_ref(history, sa, h0_2, c0_2, params2)

    q_k, scored_k = critic_fused_pallas(history, sa, h0_stack, c0_stack, packed)
    jax.block_until_ready((q_k, scored_k))
    scored1_k = scored_k[0].reshape(T, B, H).transpose(1, 0, 2)   # -> (B, T, H)

    assert q1.shape == (B, 1) and q2.shape == (B, 1)
    assert jnp.allclose(q1, q1_ref, atol=1e-3, rtol=1e-3)
    assert jnp.allclose(q2, q2_ref, atol=1e-3, rtol=1e-3)
    assert jnp.allclose(q_k[0], q1_ref, atol=1e-3, rtol=1e-3)
    # scored uses the approximate EUP reciprocal in the softmax -> looser tol.
    assert jnp.allclose(scored1_k, scored1_ref, atol=5e-3, rtol=5e-3)

    print("KERNEL_OK")
</pallas_src>

<mosaic_0001>
module attributes {stable_mosaic.version = 11 : i64} {
  func.func @_critic_head_kernel(%arg0: i32, %arg1: memref<16x8xf32, #tpu.memory_space<vmem>>, %arg2: memref<2x8xf32, #tpu.memory_space<vmem>>, %arg3: memref<1x2x2x128xf32, #tpu.memory_space<vmem>>, %arg4: memref<1x2x2x128xf32, #tpu.memory_space<vmem>>, %arg5: memref<1x8x512xf32, #tpu.memory_space<vmem>>, %arg6: memref<1x128x512xf32, #tpu.memory_space<vmem>>, %arg7: memref<1x1x512xf32, #tpu.memory_space<vmem>>, %arg8: memref<1x256x512xf32, #tpu.memory_space<vmem>>, %arg9: memref<1x1x512xf32, #tpu.memory_space<vmem>>, %arg10: memref<1x128x256xf32, #tpu.memory_space<vmem>>, %arg11: memref<1x1x256xf32, #tpu.memory_space<vmem>>, %arg12: memref<1x8x128xf32, #tpu.memory_space<vmem>>, %arg13: memref<1x1x128xf32, #tpu.memory_space<vmem>>, %arg14: memref<1x128x128xf32, #tpu.memory_space<vmem>>, %arg15: memref<1x1x128xf32, #tpu.memory_space<vmem>>, %arg16: memref<1x128x1xf32, #tpu.memory_space<vmem>>, %arg17: memref<1x1x1xf32, #tpu.memory_space<vmem>>, %arg18: memref<1x2x1xf32, #tpu.memory_space<vmem>>, %arg19: memref<1x16x128xf32, #tpu.memory_space<vmem>>, %arg20: memref<16x128xf32, #tpu.memory_space<vmem>>, %arg21: memref<16x1xf32, #tpu.memory_space<vmem>>) attributes {dimension_semantics = [#tpu.dimension_semantics<parallel>], iteration_bounds = array<i64: 2>, scalar_prefetch = 0 : i64, scratch_operands = 2 : i64, tpu.core_type = #tpu.core_type<tc>, window_params = [{pipeline_mode = #tpu.pipeline_mode<synchronous>, transform_indices = @transform_0, window_bounds = array<i64: 16, 8>}, {pipeline_mode = #tpu.pipeline_mode<synchronous>, transform_indices = @transform_1, window_bounds = array<i64: 2, 8>}, {transform_indices = @transform_2, window_bounds = array<i64: 1, 2, 2, 128>}, {transform_indices = @transform_3, window_bounds = array<i64: 1, 2, 2, 128>}, {transform_indices = @transform_4, window_bounds = array<i64: 1, 8, 512>}, {transform_indices = @transform_5, window_bounds = array<i64: 1, 128, 512>}, {transform_indices = @transform_6, window_bounds = array<i64: 1, 1, 512>}, {transform_indices = @transform_7, window_bounds = array<i64: 1, 256, 512>}, {transform_indices = @transform_8, window_bounds = array<i64: 1, 1, 512>}, {transform_indices = @transform_9, window_bounds = array<i64: 1, 128, 256>}, {transform_indices = @transform_10, window_bounds = array<i64: 1, 1, 256>}, {transform_indices = @transform_11, window_bounds = array<i64: 1, 8, 128>}, {transform_indices = @transform_12, window_bounds = array<i64: 1, 1, 128>}, {transform_indices = @transform_13, window_bounds = array<i64: 1, 128, 128>}, {transform_indices = @transform_14, window_bounds = array<i64: 1, 1, 128>}, {transform_indices = @transform_15, window_bounds = array<i64: 1, 128, 1>}, {transform_indices = @transform_16, window_bounds = array<i64: 1, 1, 1>}, {transform_indices = @transform_17, window_bounds = array<i64: 1, 2, 1>}, {transform_indices = @transform_18, window_bounds = array<i64: 1, 16, 128>}]} {
    %c0 = arith.constant 0 : index
    %c0_0 = arith.constant 0 : index
    %0 = vector.load %arg2[%c0, %c0_0] : memref<2x8xf32, #tpu.memory_space<vmem>>, vector<2x8xf32>
    %c0_1 = arith.constant 0 : index
    %c0_2 = arith.constant 0 : index
    %c0_3 = arith.constant 0 : index
    %1 = vector.load %arg12[%c0_1, %c0_2, %c0_3] : memref<1x8x128xf32, #tpu.memory_space<vmem>>, vector<1x8x128xf32>
    %2 = vector.shape_cast %1 : vector<1x8x128xf32> to vector<8x128xf32>
    %cst = arith.constant dense<0.000000e+00> : vector<2x128xf32>
    %3 = tpu.matmul %0, %2, %cst {dimension_numbers = #tpu.dot_dimension_numbers<[1], [0], [0], [1], [0, 0, 1, 1], [], []>} : vector<2x8xf32>, vector<8x128xf32>, vector<2x128xf32> -> vector<2x128xf32>
    %c0_4 = arith.constant 0 : index
    %c0_5 = arith.constant 0 : index
    %c0_6 = arith.constant 0 : index
    %4 = vector.load %arg13[%c0_4, %c0_5, %c0_6] : memref<1x1x128xf32, #tpu.memory_space<vmem>>, vector<1x1x128xf32>
    %5 = vector.shape_cast %4 : vector<1x1x128xf32> to vector<1x128xf32>
    %6 = vector.broadcast %5 : vector<1x128xf32> to vector<2x128xf32>
    %7 = arith.addf %3, %6 : vector<2x128xf32>
    %cst_7 = arith.constant 0.000000e+00 : f32
    %8 = vector.broadcast %cst_7 : f32 to vector<2x128xf32>
    %9 = arith.maximumf %7, %8 : vector<2x128xf32>
    %c0_8 = arith.constant 0 : index
    %c0_9 = arith.constant 0 : index
    %c0_10 = arith.constant 0 : index
    %10 = vector.load %arg14[%c0_8, %c0_9, %c0_10] : memref<1x128x128xf32, #tpu.memory_space<vmem>>, vector<1x128x128xf32>
    %11 = vector.shape_cast %10 : vector<1x128x128xf32> to vector<128x128xf32>
    %cst_11 = arith.constant dense<0.000000e+00> : vector<2x128xf32>
    %12 = tpu.matmul %9, %11, %cst_11 {dimension_numbers = #tpu.dot_dimension_numbers<[1], [0], [0], [1], [0, 0, 1, 1], [], []>} : vector<2x128xf32>, vector<128x128xf32>, vector<2x128xf32> -> vector<2x128xf32>
    %c0_12 = arith.constant 0 : index
    %c0_13 = arith.constant 0 : index
    %c0_14 = arith.constant 0 : index
    %13 = vector.load %arg15[%c0_12, %c0_13, %c0_14] : memref<1x1x128xf32, #tpu.memory_space<vmem>>, vector<1x1x128xf32>
    %14 = vector.shape_cast %13 : vector<1x1x128xf32> to vector<1x128xf32>
    %15 = vector.broadcast %14 : vector<1x128xf32> to vector<2x128xf32>
    %16 = arith.addf %12, %15 : vector<2x128xf32>
    %cst_15 = arith.constant 0.000000e+00 : f32
    %17 = vector.broadcast %cst_15 : f32 to vector<2x128xf32>
    %18 = arith.maximumf %16, %17 : vector<2x128xf32>
    %c0_16 = arith.constant 0 : index
    %c0_17 = arith.constant 0 : index
    %c0_18 = arith.constant 0 : index
    %19 = vector.load %arg16[%c0_16, %c0_17, %c0_18] : memref<1x128x1xf32, #tpu.memory_space<vmem>>, vector<1x128x1xf32>
    %20 = vector.shape_cast %19 : vector<1x128x1xf32> to vector<128x1xf32>
    %cst_19 = arith.constant dense<0.000000e+00> : vector<2x1xf32>
    %21 = tpu.matmul %18, %20, %cst_19 {dimension_numbers = #tpu.dot_dimension_numbers<[1], [0], [0], [1], [0, 0, 1, 1], [], []>} : vector<2x128xf32>, vector<128x1xf32>, vector<2x1xf32> -> vector<2x1xf32>
    %c0_20 = arith.constant 0 : index
    %c0_21 = arith.constant 0 : index
    %c0_22 = arith.constant 0 : index
    %22 = vector.load %arg17[%c0_20, %c0_21, %c0_22] : memref<1x1x1xf32, #tpu.memory_space<vmem>>, vector<1x1x1xf32>
    %23 = vector.shape_cast %22 : vector<1x1x1xf32> to vector<1x1xf32>
    %24 = vector.broadcast %23 : vector<1x1xf32> to vector<2x1xf32>
    %25 = arith.addf %21, %24 : vector<2x1xf32>
    %26 = math.tanh %25 : vector<2x1xf32>
    %c0_23 = arith.constant 0 : index
    %c0_24 = arith.constant 0 : index
    %c0_25 = arith.constant 0 : index
    %27 = vector.load %arg18[%c0_23, %c0_24, %c0_25] : memref<1x2x1xf32, #tpu.memory_space<vmem>>, vector<1x2x1xf32>
    %28 = vector.shape_cast %27 : vector<1x2x1xf32> to vector<2x1xf32>
    %29 = vector.shape_cast %26 : vector<2x1xf32> to vector<1x2x1xf32>
    tpu.vector_store %arg18[%c0_23, %c0_24, %c0_25], %29 {strides = array<i32>} : memref<1x2x1xf32, #tpu.memory_space<vmem>>, vector<1x2x1xf32>,
    %c0_26 = arith.constant 0 : index
    %c0_27 = arith.constant 0 : index
    %30 = vector.load %arg1[%c0_26, %c0_27] : memref<16x8xf32, #tpu.memory_space<vmem>>, vector<16x8xf32>
    %c0_28 = arith.constant 0 : index
    %c0_29 = arith.constant 0 : index
    %c0_30 = arith.constant 0 : index
    %31 = vector.load %arg5[%c0_28, %c0_29, %c0_30] : memref<1x8x512xf32, #tpu.memory_space<vmem>>, vector<1x8x512xf32>
    %32 = vector.shape_cast %31 : vector<1x8x512xf32> to vector<8x512xf32>
    %cst_31 = arith.constant dense<0.000000e+00> : vector<16x512xf32>
    %33 = tpu.matmul %30, %32, %cst_31 {dimension_numbers = #tpu.dot_dimension_numbers<[1], [0], [0], [1], [0, 0, 1, 1], [], []>} : vector<16x8xf32>, vector<8x512xf32>, vector<16x512xf32> -> vector<16x512xf32>
    %c0_32 = arith.constant 0 : index
    %c0_33 = arith.constant 0 : index
    %c0_34 = arith.constant 0 : index
    %34 = vector.load %arg7[%c0_32, %c0_33, %c0_34] : memref<1x1x512xf32, #tpu.memory_space<vmem>>, vector<1x1x512xf32>
    %35 = vector.shape_cast %34 : vector<1x1x512xf32> to vector<1x512xf32>
    %36 = vector.broadcast %35 : vector<1x512xf32> to vector<16x512xf32>
    %37 = arith.addf %33, %36 : vector<16x512xf32>
    %c0_35 = arith.constant 0 : index
    %c0_36 = arith.constant 0 : index
    %c0_37 = arith.constant 0 : index
    %38 = vector.load %arg6[%c0_35, %c0_36, %c0_37] : memref<1x128x512xf32, #tpu.memory_space<vmem>>, vector<1x128x512xf32>
    %39 = vector.shape_cast %38 : vector<1x128x512xf32> to vector<128x512xf32>
    %c0_38 = arith.constant 0 : index
    %c0_39 = arith.constant 0 : index
    %c0_40 = arith.constant 0 : index
    %40 = vector.load %arg8[%c0_38, %c0_39, %c0_40] : memref<1x256x512xf32, #tpu.memory_space<vmem>>, vector<1x256x512xf32>
    %41 = vector.shape_cast %40 : vector<1x256x512xf32> to vector<256x512xf32>
    %c0_41 = arith.constant 0 : index
    %c0_42 = arith.constant 0 : index
    %c0_43 = arith.constant 0 : index
    %42 = vector.load %arg9[%c0_41, %c0_42, %c0_43] : memref<1x1x512xf32, #tpu.memory_space<vmem>>, vector<1x1x512xf32>
    %43 = vector.shape_cast %42 : vector<1x1x512xf32> to vector<1x512xf32>
    %c0_44 = arith.constant 0 : index
    %c0_45 = arith.constant 0 : index
    %c0_46 = arith.constant 0 : index
    %c0_47 = arith.constant 0 : index
    %44 = vector.load %arg3[%c0_44, %c0_45, %c0_46, %c0_47] : memref<1x2x2x128xf32, #tpu.memory_space<vmem>>, vector<1x1x2x128xf32>
    %45 = vector.shape_cast %44 : vector<1x1x2x128xf32> to vector<2x128xf32>
    %c0_48 = arith.constant 0 : index
    %c0_49 = arith.constant 0 : index
    %c0_50 = arith.constant 0 : index
    %c0_51 = arith.constant 0 : index
    %46 = vector.load %arg4[%c0_48, %c0_49, %c0_50, %c0_51] : memref<1x2x2x128xf32, #tpu.memory_space<vmem>>, vector<1x1x2x128xf32>
    %47 = vector.shape_cast %46 : vector<1x1x2x128xf32> to vector<2x128xf32>
    %c0_52 = arith.constant 0 : index
    %c1 = arith.constant 1 : index
    %c0_53 = arith.constant 0 : index
    %c0_54 = arith.constant 0 : index
    %48 = vector.load %arg3[%c0_52, %c1, %c0_53, %c0_54] : memref<1x2x2x128xf32, #tpu.memory_space<vmem>>, vector<1x1x2x128xf32>
    %49 = vector.shape_cast %48 : vector<1x1x2x128xf32> to vector<2x128xf32>
    %c0_55 = arith.constant 0 : index
    %c1_56 = arith.constant 1 : index
    %c0_57 = arith.constant 0 : index
    %c0_58 = arith.constant 0 : index
    %50 = vector.load %arg4[%c0_55, %c1_56, %c0_57, %c0_58] : memref<1x2x2x128xf32, #tpu.memory_space<vmem>>, vector<1x1x2x128xf32>
    %51 = vector.shape_cast %50 : vector<1x1x2x128xf32> to vector<2x128xf32>
    %52 = vector.extract_strided_slice %37 {offsets = [0, 0], sizes = [2, 512], strides = [1, 1]} : vector<16x512xf32> to vector<2x512xf32>
    %cst_59 = arith.constant dense<0.000000e+00> : vector<2x512xf32>
    %53 = tpu.matmul %45, %39, %cst_59 {dimension_numbers = #tpu.dot_dimension_numbers<[1], [0], [0], [1], [0, 0, 1, 1], [], []>} : vector<2x128xf32>, vector<128x512xf32>, vector<2x512xf32> -> vector<2x512xf32>
    %54 = arith.addf %52, %53 : vector<2x512xf32>
    %55 = vector.extract_strided_slice %54 {offsets = [0, 0], sizes = [2, 384], strides = [1, 1]} : vector<2x512xf32> to vector<2x384xf32>
    %56 = arith.negf %55 : vector<2x384xf32>
    %57 = math.exp %56 : vector<2x384xf32>
    %cst_60 = arith.constant 1.000000e+00 : f32
    %58 = vector.broadcast %cst_60 : f32 to vector<2x384xf32>
    %59 = arith.addf %58, %57 : vector<2x384xf32>
    %60 = arith.divf %58, %59 : vector<2x384xf32>
    %61 = vector.extract_strided_slice %54 {offsets = [0, 384], sizes = [2, 128], strides = [1, 1]} : vector<2x512xf32> to vector<2x128xf32>
    %62 = math.tanh %61 : vector<2x128xf32>
    %63 = vector.extract_strided_slice %60 {offsets = [0, 0], sizes = [2, 128], strides = [1, 1]} : vector<2x384xf32> to vector<2x128xf32>
    %64 = vector.extract_strided_slice %60 {offsets = [0, 128], sizes = [2, 128], strides = [1, 1]} : vector<2x384xf32> to vector<2x128xf32>
    %65 = vector.extract_strided_slice %60 {offsets = [0, 256], sizes = [2, 128], strides = [1, 1]} : vector<2x384xf32> to vector<2x128xf32>
    %66 = arith.mulf %64, %47 : vector<2x128xf32>
    %67 = arith.mulf %63, %62 : vector<2x128xf32>
    %68 = arith.addf %66, %67 : vector<2x128xf32>
    %69 = math.tanh %68 : vector<2x128xf32>
    %70 = arith.mulf %65, %69 : vector<2x128xf32>
    %71 = tpu.concatenate %70, %49 in 1 : vector<2x128xf32>, vector<2x128xf32> -> vector<2x256xf32>
    %cst_61 = arith.constant dense<0.000000e+00> : vector<2x512xf32>
    %72 = tpu.matmul %71, %41, %cst_61 {dimension_numbers = #tpu.dot_dimension_numbers<[1], [0], [0], [1], [0, 0, 1, 1], [], []>} : vector<2x256xf32>, vector<256x512xf32>, vector<2x512xf32> -> vector<2x512xf32>
    %73 = vector.broadcast %43 : vector<1x512xf32> to vector<2x512xf32>
    %74 = arith.addf %72, %73 : vector<2x512xf32>
    %75 = vector.extract_strided_slice %74 {offsets = [0, 0], sizes = [2, 384], strides = [1, 1]} : vector<2x512xf32> to vector<2x384xf32>
    %76 = arith.negf %75 : vector<2x384xf32>
    %77 = math.exp %76 : vector<2x384xf32>
    %cst_62 = arith.constant 1.000000e+00 : f32
    %78 = vector.broadcast %cst_62 : f32 to vector<2x384xf32>
    %79 = arith.addf %78, %77 : vector<2x384xf32>
    %80 = arith.divf %78, %79 : vector<2x384xf32>
    %81 = vector.extract_strided_slice %74 {offsets = [0, 384], sizes = [2, 128], strides = [1, 1]} : vector<2x512xf32> to vector<2x128xf32>
    %82 = math.tanh %81 : vector<2x128xf32>
    %83 = vector.extract_strided_slice %80 {offsets = [0, 0], sizes = [2, 128], strides = [1, 1]} : vector<2x384xf32> to vector<2x128xf32>
    %84 = vector.extract_strided_slice %80 {offsets = [0, 128], sizes = [2, 128], strides = [1, 1]} : vector<2x384xf32> to vector<2x128xf32>
    %85 = vector.extract_strided_slice %80 {offsets = [0, 256], sizes = [2, 128], strides = [1, 1]} : vector<2x384xf32> to vector<2x128xf32>
    %86 = arith.mulf %84, %51 : vector<2x128xf32>
    %87 = arith.mulf %83, %82 : vector<2x128xf32>
    %88 = arith.addf %86, %87 : vector<2x128xf32>
    %89 = math.tanh %88 : vector<2x128xf32>
    %90 = arith.mulf %85, %89 : vector<2x128xf32>
    %c0_63 = arith.constant 0 : index
    %c0_64 = arith.constant 0 : index
    %91 = vector.load %arg20[%c0_63, %c0_64] : memref<16x128xf32, #tpu.memory_space<vmem>>, vector<2x128xf32>
    tpu.vector_store %arg20[%c0_63, %c0_64], %90 {strides = array<i32>} : memref<16x128xf32, #tpu.memory_space<vmem>>, vector<2x128xf32>,
    %92 = vector.extract_strided_slice %37 {offsets = [2, 0], sizes = [2, 512], strides = [1, 1]} : vector<16x512xf32> to vector<2x512xf32>
    %cst_65 = arith.constant dense<0.000000e+00> : vector<2x512xf32>
    %93 = tpu.matmul %70, %39, %cst_65 {dimension_numbers = #tpu.dot_dimension_numbers<[1], [0], [0], [1], [0, 0, 1, 1], [], []>} : vector<2x128xf32>, vector<128x512xf32>, vector<2x512xf32> -> vector<2x512xf32>
    %94 = arith.addf %92, %93 : vector<2x512xf32>
    %95 = vector.extract_strided_slice %94 {offsets = [0, 0], sizes = [2, 384], strides = [1, 1]} : vector<2x512xf32> to vector<2x384xf32>
    %96 = arith.negf %95 : vector<2x384xf32>
    %97 = math.exp %96 : vector<2x384xf32>
    %cst_66 = arith.constant 1.000000e+00 : f32
    %98 = vector.broadcast %cst_66 : f32 to vector<2x384xf32>
    %99 = arith.addf %98, %97 : vector<2x384xf32>
    %100 = arith.divf %98, %99 : vector<2x384xf32>
    %101 = vector.extract_strided_slice %94 {offsets = [0, 384], sizes = [2, 128], strides = [1, 1]} : vector<2x512xf32> to vector<2x128xf32>
    %102 = math.tanh %101 : vector<2x128xf32>
    %103 = vector.extract_strided_slice %100 {offsets = [0, 0], sizes = [2, 128], strides = [1, 1]} : vector<2x384xf32> to vector<2x128xf32>
    %104 = vector.extract_strided_slice %100 {offsets = [0, 128], sizes = [2, 128], strides = [1, 1]} : vector<2x384xf32> to vector<2x128xf32>
    %105 = vector.extract_strided_slice %100 {offsets = [0, 256], sizes = [2, 128], strides = [1, 1]} : vector<2x384xf32> to vector<2x128xf32>
    %106 = arith.mulf %104, %68 : vector<2x128xf32>
    %107 = arith.mulf %103, %102 : vector<2x128xf32>
    %108 = arith.addf %106, %107 : vector<2x128xf32>
    %109 = math.tanh %108 : vector<2x128xf32>
    %110 = arith.mulf %105, %109 : vector<2x128xf32>
    %111 = tpu.concatenate %110, %90 in 1 : vector<2x128xf32>, vector<2x128xf32> -> vector<2x256xf32>
    %cst_67 = arith.constant dense<0.000000e+00> : vector<2x512xf32>
    %112 = tpu.matmul %111, %41, %cst_67 {dimension_numbers = #tpu.dot_dimension_numbers<[1], [0], [0], [1], [0, 0, 1, 1], [], []>} : vector<2x256xf32>, vector<256x512xf32>, vector<2x512xf32> -> vector<2x512xf32>
    %113 = vector.broadcast %43 : vector<1x512xf32> to vector<2x512xf32>
    %114 = arith.addf %112, %113 : vector<2x512xf32>
    %115 = vector.extract_strided_slice %114 {offsets = [0, 0], sizes = [2, 384], strides = [1, 1]} : vector<2x512xf32> to vector<2x384xf32>
    %116 = arith.negf %115 : vector<2x384xf32>
    %117 = math.exp %116 : vector<2x384xf32>
    %cst_68 = arith.constant 1.000000e+00 : f32
    %118 = vector.broadcast %cst_68 : f32 to vector<2x384xf32>
    %119 = arith.addf %118, %117 : vector<2x384xf32>
    %120 = arith.divf %118, %119 : vector<2x384xf32>
    %121 = vector.extract_strided_slice %114 {offsets = [0, 384], sizes = [2, 128], strides = [1, 1]} : vector<2x512xf32> to vector<2x128xf32>
    %122 = math.tanh %121 : vector<2x128xf32>
    %123 = vector.extract_strided_slice %120 {offsets = [0, 0], sizes = [2, 128], strides = [1, 1]} : vector<2x384xf32> to vector<2x128xf32>
    %124 = vector.extract_strided_slice %120 {offsets = [0, 128], sizes = [2, 128], strides = [1, 1]} : vector<2x384xf32> to vector<2x128xf32>
    %125 = vector.extract_strided_slice %120 {offsets = [0, 256], sizes = [2, 128], strides = [1, 1]} : vector<2x384xf32> to vector<2x128xf32>
    %126 = arith.mulf %124, %88 : vector<2x128xf32>
    %127 = arith.mulf %123, %122 : vector<2x128xf32>
    %128 = arith.addf %126, %127 : vector<2x128xf32>
    %129 = math.tanh %128 : vector<2x128xf32>
    %130 = arith.mulf %125, %129 : vector<2x128xf32>
    %c2 = arith.constant 2 : index
    %c0_69 = arith.constant 0 : index
    %131 = vector.load %arg20[%c2, %c0_69] : memref<16x128xf32, #tpu.memory_space<vmem>>, vector<2x128xf32>
    tpu.vector_store %arg20[%c2, %c0_69], %130 {strides = array<i32>} : memref<16x128xf32, #tpu.memory_space<vmem>>, vector<2x128xf32>,
    %132 = vector.extract_strided_slice %37 {offsets = [4, 0], sizes = [2, 512], strides = [1, 1]} : vector<16x512xf32> to vector<2x512xf32>
    %cst_70 = arith.constant dense<0.000000e+00> : vector<2x512xf32>
    %133 = tpu.matmul %110, %39, %cst_70 {dimension_numbers = #tpu.dot_dimension_numbers<[1], [0], [0], [1], [0, 0, 1, 1], [], []>} : vector<2x128xf32>, vector<128x512xf32>, vector<2x512xf32> -> vector<2x512xf32>
    %134 = arith.addf %132, %133 : vector<2x512xf32>
    %135 = vector.extract_strided_slice %134 {offsets = [0, 0], sizes = [2, 384], strides = [1, 1]} : vector<2x512xf32> to vector<2x384xf32>
    %136 = arith.negf %135 : vector<2x384xf32>
    %137 = math.exp %136 : vector<2x384xf32>
    %cst_71 = arith.constant 1.000000e+00 : f32
    %138 = vector.broadcast %cst_71 : f32 to vector<2x384xf32>
    %139 = arith.addf %138, %137 : vector<2x384xf32>
    %140 = arith.divf %138, %139 : vector<2x384xf32>
    %141 = vector.extract_strided_slice %134 {offsets = [0, 384], sizes = [2, 128], strides = [1, 1]} : vector<2x512xf32> to vector<2x128xf32>
    %142 = math.tanh %141 : vector<2x128xf32>
    %143 = vector.extract_strided_slice %140 {offsets = [0, 0], sizes = [2, 128], strides = [1, 1]} : vector<2x384xf32> to vector<2x128xf32>
    %144 = vector.extract_strided_slice %140 {offsets = [0, 128], sizes = [2, 128], strides = [1, 1]} : vector<2x384xf32> to vector<2x128xf32>
    %145 = vector.extract_strided_slice %140 {offsets = [0, 256], sizes = [2, 128], strides = [1, 1]} : vector<2x384xf32> to vector<2x128xf32>
    %146 = arith.mulf %144, %108 : vector<2x128xf32>
    %147 = arith.mulf %143, %142 : vector<2x128xf32>
    %148 = arith.addf %146, %147 : vector<2x128xf32>
    %149 = math.tanh %148 : vector<2x128xf32>
    %150 = arith.mulf %145, %149 : vector<2x128xf32>
    %151 = tpu.concatenate %150, %130 in 1 : vector<2x128xf32>, vector<2x128xf32> -> vector<2x256xf32>
    %cst_72 = arith.constant dense<0.000000e+00> : vector<2x512xf32>
    %152 = tpu.matmul %151, %41, %cst_72 {dimension_numbers = #tpu.dot_dimension_numbers<[1], [0], [0], [1], [0, 0, 1, 1], [], []>} : vector<2x256xf32>, vector<256x512xf32>, vector<2x512xf32> -> vector<2x512xf32>
    %153 = vector.broadcast %43 : vector<1x512xf32> to vector<2x512xf32>
    %154 = arith.addf %152, %153 : vector<2x512xf32>
    %155 = vector.extract_strided_slice %154 {offsets = [0, 0], sizes = [2, 384], strides = [1, 1]} : vector<2x512xf32> to vector<2x384xf32>
    %156 = arith.negf %155 : vector<2x384xf32>
    %157 = math.exp %156 : vector<2x384xf32>
    %cst_73 = arith.constant 1.000000e+00 : f32
    %158 = vector.broadcast %cst_73 : f32 to vector<2x384xf32>
    %159 = arith.addf %158, %157 : vector<2x384xf32>
    %160 = arith.divf %158, %159 : vector<2x384xf32>
    %161 = vector.extract_strided_slice %154 {offsets = [0, 384], sizes = [2, 128], strides = [1, 1]} : vector<2x512xf32> to vector<2x128xf32>
    %162 = math.tanh %161 : vector<2x128xf32>
    %163 = vector.extract_strided_slice %160 {offsets = [0, 0], sizes = [2, 128], strides = [1, 1]} : vector<2x384xf32> to vector<2x128xf32>
    %164 = vector.extract_strided_slice %160 {offsets = [0, 128], sizes = [2, 128], strides = [1, 1]} : vector<2x384xf32> to vector<2x128xf32>
    %165 = vector.extract_strided_slice %160 {offsets = [0, 256], sizes = [2, 128], strides = [1, 1]} : vector<2x384xf32> to vector<2x128xf32>
    %166 = arith.mulf %164, %128 : vector<2x128xf32>
    %167 = arith.mulf %163, %162 : vector<2x128xf32>
    %168 = arith.addf %166, %167 : vector<2x128xf32>
    %169 = math.tanh %168 : vector<2x128xf32>
    %170 = arith.mulf %165, %169 : vector<2x128xf32>
    %c4 = arith.constant 4 : index
    %c0_74 = arith.constant 0 : index
    %171 = vector.load %arg20[%c4, %c0_74] : memref<16x128xf32, #tpu.memory_space<vmem>>, vector<2x128xf32>
    tpu.vector_store %arg20[%c4, %c0_74], %170 {strides = array<i32>} : memref<16x128xf32, #tpu.memory_space<vmem>>, vector<2x128xf32>,
    %172 = vector.extract_strided_slice %37 {offsets = [6, 0], sizes = [2, 512], strides = [1, 1]} : vector<16x512xf32> to vector<2x512xf32>
    %cst_75 = arith.constant dense<0.000000e+00> : vector<2x512xf32>
    %173 = tpu.matmul %150, %39, %cst_75 {dimension_numbers = #tpu.dot_dimension_numbers<[1], [0], [0], [1], [0, 0, 1, 1], [], []>} : vector<2x128xf32>, vector<128x512xf32>, vector<2x512xf32> -> vector<2x512xf32>
    %174 = arith.addf %172, %173 : vector<2x512xf32>
    %175 = vector.extract_strided_slice %174 {offsets = [0, 0], sizes = [2, 384], strides = [1, 1]} : vector<2x512xf32> to vector<2x384xf32>
    %176 = arith.negf %175 : vector<2x384xf32>
    %177 = math.exp %176 : vector<2x384xf32>
    %cst_76 = arith.constant 1.000000e+00 : f32
    %178 = vector.broadcast %cst_76 : f32 to vector<2x384xf32>
    %179 = arith.addf %178, %177 : vector<2x384xf32>
    %180 = arith.divf %178, %179 : vector<2x384xf32>
    %181 = vector.extract_strided_slice %174 {offsets = [0, 384], sizes = [2, 128], strides = [1, 1]} : vector<2x512xf32> to vector<2x128xf32>
    %182 = math.tanh %181 : vector<2x128xf32>
    %183 = vector.extract_strided_slice %180 {offsets = [0, 0], sizes = [2, 128], strides = [1, 1]} : vector<2x384xf32> to vector<2x128xf32>
    %184 = vector.extract_strided_slice %180 {offsets = [0, 128], sizes = [2, 128], strides = [1, 1]} : vector<2x384xf32> to vector<2x128xf32>
    %185 = vector.extract_strided_slice %180 {offsets = [0, 256], sizes = [2, 128], strides = [1, 1]} : vector<2x384xf32> to vector<2x128xf32>
    %186 = arith.mulf %184, %148 : vector<2x128xf32>
    %187 = arith.mulf %183, %182 : vector<2x128xf32>
    %188 = arith.addf %186, %187 : vector<2x128xf32>
    %189 = math.tanh %188 : vector<2x128xf32>
    %190 = arith.mulf %185, %189 : vector<2x128xf32>
    %191 = tpu.concatenate %190, %170 in 1 : vector<2x128xf32>, vector<2x128xf32> -> vector<2x256xf32>
    %cst_77 = arith.constant dense<0.000000e+00> : vector<2x512xf32>
    %192 = tpu.matmul %191, %41, %cst_77 {dimension_numbers = #tpu.dot_dimension_numbers<[1], [0], [0], [1], [0, 0, 1, 1], [], []>} : vector<2x256xf32>, vector<256x512xf32>, vector<2x512xf32> -> vector<2x512xf32>
    %193 = vector.broadcast %43 : vector<1x512xf32> to vector<2x512xf32>
    %194 = arith.addf %192, %193 : vector<2x512xf32>
    %195 = vector.extract_strided_slice %194 {offsets = [0, 0], sizes = [2, 384], strides = [1, 1]} : vector<2x512xf32> to vector<2x384xf32>
    %196 = arith.negf %195 : vector<2x384xf32>
    %197 = math.exp %196 : vector<2x384xf32>
    %cst_78 = arith.constant 1.000000e+00 : f32
    %198 = vector.broadcast %cst_78 : f32 to vector<2x384xf32>
    %199 = arith.addf %198, %197 : vector<2x384xf32>
    %200 = arith.divf %198, %199 : vector<2x384xf32>
    %201 = vector.extract_strided_slice %194 {offsets = [0, 384], sizes = [2, 128], strides = [1, 1]} : vector<2x512xf32> to vector<2x128xf32>
    %202 = math.tanh %201 : vector<2x128xf32>
    %203 = vector.extract_strided_slice %200 {offsets = [0, 0], sizes = [2, 128], strides = [1, 1]} : vector<2x384xf32> to vector<2x128xf32>
    %204 = vector.extract_strided_slice %200 {offsets = [0, 128], sizes = [2, 128], strides = [1, 1]} : vector<2x384xf32> to vector<2x128xf32>
    %205 = vector.extract_strided_slice %200 {offsets = [0, 256], sizes = [2, 128], strides = [1, 1]} : vector<2x384xf32> to vector<2x128xf32>
    %206 = arith.mulf %204, %168 : vector<2x128xf32>
    %207 = arith.mulf %203, %202 : vector<2x128xf32>
    %208 = arith.addf %206, %207 : vector<2x128xf32>
    %209 = math.tanh %208 : vector<2x128xf32>
    %210 = arith.mulf %205, %209 : vector<2x128xf32>
    %c6 = arith.constant 6 : index
    %c0_79 = arith.constant 0 : index
    %211 = vector.load %arg20[%c6, %c0_79] : memref<16x128xf32, #tpu.memory_space<vmem>>, vector<2x128xf32>
    tpu.vector_store %arg20[%c6, %c0_79], %210 {strides = array<i32>} : memref<16x128xf32, #tpu.memory_space<vmem>>, vector<2x128xf32>,
    %212 = vector.extract_strided_slice %37 {offsets = [8, 0], sizes = [2, 512], strides = [1, 1]} : vector<16x512xf32> to vector<2x512xf32>
    %cst_80 = arith.constant dense<0.000000e+00> : vector<2x512xf32>
    %213 = tpu.matmul %190, %39, %cst_80 {dimension_numbers = #tpu.dot_dimension_numbers<[1], [0], [0], [1], [0, 0, 1, 1], [], []>} : vector<2x128xf32>, vector<128x512xf32>, vector<2x512xf32> -> vector<2x512xf32>
    %214 = arith.addf %212, %213 : vector<2x512xf32>
    %215 = vector.extract_strided_slice %214 {offsets = [0, 0], sizes = [2, 384], strides = [1, 1]} : vector<2x512xf32> to vector<2x384xf32>
    %216 = arith.negf %215 : vector<2x384xf32>
    %217 = math.exp %216 : vector<2x384xf32>
    %cst_81 = arith.constant 1.000000e+00 : f32
    %218 = vector.broadcast %cst_81 : f32 to vector<2x384xf32>
    %219 = arith.addf %218, %217 : vector<2x384xf32>
    %220 = arith.divf %218, %219 : vector<2x384xf32>
    %221 = vector.extract_strided_slice %214 {offsets = [0, 384], sizes = [2, 128], strides = [1, 1]} : vector<2x512xf32> to vector<2x128xf32>
    %222 = math.tanh %221 : vector<2x128xf32>
    %223 = vector.extract_strided_slice %220 {offsets = [0, 0], sizes = [2, 128], strides = [1, 1]} : vector<2x384xf32> to vector<2x128xf32>
    %224 = vector.extract_strided_slice %220 {offsets = [0, 128], sizes = [2, 128], strides = [1, 1]} : vector<2x384xf32> to vector<2x128xf32>
    %225 = vector.extract_strided_slice %220 {offsets = [0, 256], sizes = [2, 128], strides = [1, 1]} : vector<2x384xf32> to vector<2x128xf32>
    %226 = arith.mulf %224, %188 : vector<2x128xf32>
    %227 = arith.mulf %223, %222 : vector<2x128xf32>
    %228 = arith.addf %226, %227 : vector<2x128xf32>
    %229 = math.tanh %228 : vector<2x128xf32>
    %230 = arith.mulf %225, %229 : vector<2x128xf32>
    %231 = tpu.concatenate %230, %210 in 1 : vector<2x128xf32>, vector<2x128xf32> -> vector<2x256xf32>
    %cst_82 = arith.constant dense<0.000000e+00> : vector<2x512xf32>
    %232 = tpu.matmul %231, %41, %cst_82 {dimension_numbers = #tpu.dot_dimension_numbers<[1], [0], [0], [1], [0, 0, 1, 1], [], []>} : vector<2x256xf32>, vector<256x512xf32>, vector<2x512xf32> -> vector<2x512xf32>
    %233 = vector.broadcast %43 : vector<1x512xf32> to vector<2x512xf32>
    %234 = arith.addf %232, %233 : vector<2x512xf32>
    %235 = vector.extract_strided_slice %234 {offsets = [0, 0], sizes = [2, 384], strides = [1, 1]} : vector<2x512xf32> to vector<2x384xf32>
    %236 = arith.negf %235 : vector<2x384xf32>
    %237 = math.exp %236 : vector<2x384xf32>
    %cst_83 = arith.constant 1.000000e+00 : f32
    %238 = vector.broadcast %cst_83 : f32 to vector<2x384xf32>
    %239 = arith.addf %238, %237 : vector<2x384xf32>
    %240 = arith.divf %238, %239 : vector<2x384xf32>
    %241 = vector.extract_strided_slice %234 {offsets = [0, 384], sizes = [2, 128], strides = [1, 1]} : vector<2x512xf32> to vector<2x128xf32>
    %242 = math.tanh %241 : vector<2x128xf32>
    %243 = vector.extract_strided_slice %240 {offsets = [0, 0], sizes = [2, 128], strides = [1, 1]} : vector<2x384xf32> to vector<2x128xf32>
    %244 = vector.extract_strided_slice %240 {offsets = [0, 128], sizes = [2, 128], strides = [1, 1]} : vector<2x384xf32> to vector<2x128xf32>
    %245 = vector.extract_strided_slice %240 {offsets = [0, 256], sizes = [2, 128], strides = [1, 1]} : vector<2x384xf32> to vector<2x128xf32>
    %246 = arith.mulf %244, %208 : vector<2x128xf32>
    %247 = arith.mulf %243, %242 : vector<2x128xf32>
    %248 = arith.addf %246, %247 : vector<2x128xf32>
    %249 = math.tanh %248 : vector<2x128xf32>
    %250 = arith.mulf %245, %249 : vector<2x128xf32>
    %c8 = arith.constant 8 : index
    %c0_84 = arith.constant 0 : index
    %251 = vector.load %arg20[%c8, %c0_84] : memref<16x128xf32, #tpu.memory_space<vmem>>, vector<2x128xf32>
    tpu.vector_store %arg20[%c8, %c0_84], %250 {strides = array<i32>} : memref<16x128xf32, #tpu.memory_space<vmem>>, vector<2x128xf32>,
    %252 = vector.extract_strided_slice %37 {offsets = [10, 0], sizes = [2, 512], strides = [1, 1]} : vector<16x512xf32> to vector<2x512xf32>
    %cst_85 = arith.constant dense<0.000000e+00> : vector<2x512xf32>
    %253 = tpu.matmul %230, %39, %cst_85 {dimension_numbers = #tpu.dot_dimension_numbers<[1], [0], [0], [1], [0, 0, 1, 1], [], []>} : vector<2x128xf32>, vector<128x512xf32>, vector<2x512xf32> -> vector<2x512xf32>
    %254 = arith.addf %252, %253 : vector<2x512xf32>
    %255 = vector.extract_strided_slice %254 {offsets = [0, 0], sizes = [2, 384], strides = [1, 1]} : vector<2x512xf32> to vector<2x384xf32>
    %256 = arith.negf %255 : vector<2x384xf32>
    %257 = math.exp %256 : vector<2x384xf32>
    %cst_86 = arith.constant 1.000000e+00 : f32
    %258 = vector.broadcast %cst_86 : f32 to vector<2x384xf32>
    %259 = arith.addf %258, %257 : vector<2x384xf32>
    %260 = arith.divf %258, %259 : vector<2x384xf32>
    %261 = vector.extract_strided_slice %254 {offsets = [0, 384], sizes = [2, 128], strides = [1, 1]} : vector<2x512xf32> to vector<2x128xf32>
    %262 = math.tanh %261 : vector<2x128xf32>
    %263 = vector.extract_strided_slice %260 {offsets = [0, 0], sizes = [2, 128], strides = [1, 1]} : vector<2x384xf32> to vector<2x128xf32>
    %264 = vector.extract_strided_slice %260 {offsets = [0, 128], sizes = [2, 128], strides = [1, 1]} : vector<2x384xf32> to vector<2x128xf32>
    %265 = vector.extract_strided_slice %260 {offsets = [0, 256], sizes = [2, 128], strides = [1, 1]} : vector<2x384xf32> to vector<2x128xf32>
    %266 = arith.mulf %264, %228 : vector<2x128xf32>
    %267 = arith.mulf %263, %262 : vector<2x128xf32>
    %268 = arith.addf %266, %267 : vector<2x128xf32>
    %269 = math.tanh %268 : vector<2x128xf32>
    %270 = arith.mulf %265, %269 : vector<2x128xf32>
    %271 = tpu.concatenate %270, %250 in 1 : vector<2x128xf32>, vector<2x128xf32> -> vector<2x256xf32>
    %cst_87 = arith.constant dense<0.000000e+00> : vector<2x512xf32>
    %272 = tpu.matmul %271, %41, %cst_87 {dimension_numbers = #tpu.dot_dimension_numbers<[1], [0], [0], [1], [0, 0, 1, 1], [], []>} : vector<2x256xf32>, vector<256x512xf32>, vector<2x512xf32> -> vector<2x512xf32>
    %273 = vector.broadcast %43 : vector<1x512xf32> to vector<2x512xf32>
    %274 = arith.addf %272, %273 : vector<2x512xf32>
    %275 = vector.extract_strided_slice %274 {offsets = [0, 0], sizes = [2, 384], strides = [1, 1]} : vector<2x512xf32> to vector<2x384xf32>
    %276 = arith.negf %275 : vector<2x384xf32>
    %277 = math.exp %276 : vector<2x384xf32>
    %cst_88 = arith.constant 1.000000e+00 : f32
    %278 = vector.broadcast %cst_88 : f32 to vector<2x384xf32>
    %279 = arith.addf %278, %277 : vector<2x384xf32>
    %280 = arith.divf %278, %279 : vector<2x384xf32>
    %281 = vector.extract_strided_slice %274 {offsets = [0, 384], sizes = [2, 128], strides = [1, 1]} : vector<2x512xf32> to vector<2x128xf32>
    %282 = math.tanh %281 : vector<2x128xf32>
    %283 = vector.extract_strided_slice %280 {offsets = [0, 0], sizes = [2, 128], strides = [1, 1]} : vector<2x384xf32> to vector<2x128xf32>
    %284 = vector.extract_strided_slice %280 {offsets = [0, 128], sizes = [2, 128], strides = [1, 1]} : vector<2x384xf32> to vector<2x128xf32>
    %285 = vector.extract_strided_slice %280 {offsets = [0, 256], sizes = [2, 128], strides = [1, 1]} : vector<2x384xf32> to vector<2x128xf32>
    %286 = arith.mulf %284, %248 : vector<2x128xf32>
    %287 = arith.mulf %283, %282 : vector<2x128xf32>
    %288 = arith.addf %286, %287 : vector<2x128xf32>
    %289 = math.tanh %288 : vector<2x128xf32>
    %290 = arith.mulf %285, %289 : vector<2x128xf32>
    %c10 = arith.constant 10 : index
    %c0_89 = arith.constant 0 : index
    %291 = vector.load %arg20[%c10, %c0_89] : memref<16x128xf32, #tpu.memory_space<vmem>>, vector<2x128xf32>
    tpu.vector_store %arg20[%c10, %c0_89], %290 {strides = array<i32>} : memref<16x128xf32, #tpu.memory_space<vmem>>, vector<2x128xf32>,
    %292 = vector.extract_strided_slice %37 {offsets = [12, 0], sizes = [2, 512], strides = [1, 1]} : vector<16x512xf32> to vector<2x512xf32>
    %cst_90 = arith.constant dense<0.000000e+00> : vector<2x512xf32>
    %293 = tpu.matmul %270, %39, %cst_90 {dimension_numbers = #tpu.dot_dimension_numbers<[1], [0], [0], [1], [0, 0, 1, 1], [], []>} : vector<2x128xf32>, vector<128x512xf32>, vector<2x512xf32> -> vector<2x512xf32>
    %294 = arith.addf %292, %293 : vector<2x512xf32>
    %295 = vector.extract_strided_slice %294 {offsets = [0, 0], sizes = [2, 384], strides = [1, 1]} : vector<2x512xf32> to vector<2x384xf32>
    %296 = arith.negf %295 : vector<2x384xf32>
    %297 = math.exp %296 : vector<2x384xf32>
    %cst_91 = arith.constant 1.000000e+00 : f32
    %298 = vector.broadcast %cst_91 : f32 to vector<2x384xf32>
    %299 = arith.addf %298, %297 : vector<2x384xf32>
    %300 = arith.divf %298, %299 : vector<2x384xf32>
    %301 = vector.extract_strided_slice %294 {offsets = [0, 384], sizes = [2, 128], strides = [1, 1]} : vector<2x512xf32> to vector<2x128xf32>
    %302 = math.tanh %301 : vector<2x128xf32>
    %303 = vector.extract_strided_slice %300 {offsets = [0, 0], sizes = [2, 128], strides = [1, 1]} : vector<2x384xf32> to vector<2x128xf32>
    %304 = vector.extract_strided_slice %300 {offsets = [0, 128], sizes = [2, 128], strides = [1, 1]} : vector<2x384xf32> to vector<2x128xf32>
    %305 = vector.extract_strided_slice %300 {offsets = [0, 256], sizes = [2, 128], strides = [1, 1]} : vector<2x384xf32> to vector<2x128xf32>
    %306 = arith.mulf %304, %268 : vector<2x128xf32>
    %307 = arith.mulf %303, %302 : vector<2x128xf32>
    %308 = arith.addf %306, %307 : vector<2x128xf32>
    %309 = math.tanh %308 : vector<2x128xf32>
    %310 = arith.mulf %305, %309 : vector<2x128xf32>
    %311 = tpu.concatenate %310, %290 in 1 : vector<2x128xf32>, vector<2x128xf32> -> vector<2x256xf32>
    %cst_92 = arith.constant dense<0.000000e+00> : vector<2x512xf32>
    %312 = tpu.matmul %311, %41, %cst_92 {dimension_numbers = #tpu.dot_dimension_numbers<[1], [0], [0], [1], [0, 0, 1, 1], [], []>} : vector<2x256xf32>, vector<256x512xf32>, vector<2x512xf32> -> vector<2x512xf32>
    %313 = vector.broadcast %43 : vector<1x512xf32> to vector<2x512xf32>
    %314 = arith.addf %312, %313 : vector<2x512xf32>
    %315 = vector.extract_strided_slice %314 {offsets = [0, 0], sizes = [2, 384], strides = [1, 1]} : vector<2x512xf32> to vector<2x384xf32>
    %316 = arith.negf %315 : vector<2x384xf32>
    %317 = math.exp %316 : vector<2x384xf32>
    %cst_93 = arith.constant 1.000000e+00 : f32
    %318 = vector.broadcast %cst_93 : f32 to vector<2x384xf32>
    %319 = arith.addf %318, %317 : vector<2x384xf32>
    %320 = arith.divf %318, %319 : vector<2x384xf32>
    %321 = vector.extract_strided_slice %314 {offsets = [0, 384], sizes = [2, 128], strides = [1, 1]} : vector<2x512xf32> to vector<2x128xf32>
    %322 = math.tanh %321 : vector<2x128xf32>
    %323 = vector.extract_strided_slice %320 {offsets = [0, 0], sizes = [2, 128], strides = [1, 1]} : vector<2x384xf32> to vector<2x128xf32>
    %324 = vector.extract_strided_slice %320 {offsets = [0, 128], sizes = [2, 128], strides = [1, 1]} : vector<2x384xf32> to vector<2x128xf32>
    %325 = vector.extract_strided_slice %320 {offsets = [0, 256], sizes = [2, 128], strides = [1, 1]} : vector<2x384xf32> to vector<2x128xf32>
    %326 = arith.mulf %324, %288 : vector<2x128xf32>
    %327 = arith.mulf %323, %322 : vector<2x128xf32>
    %328 = arith.addf %326, %327 : vector<2x128xf32>
    %329 = math.tanh %328 : vector<2x128xf32>
    %330 = arith.mulf %325, %329 : vector<2x128xf32>
    %c12 = arith.constant 12 : index
    %c0_94 = arith.constant 0 : index
    %331 = vector.load %arg20[%c12, %c0_94] : memref<16x128xf32, #tpu.memory_space<vmem>>, vector<2x128xf32>
    tpu.vector_store %arg20[%c12, %c0_94], %330 {strides = array<i32>} : memref<16x128xf32, #tpu.memory_space<vmem>>, vector<2x128xf32>,
    %332 = vector.extract_strided_slice %37 {offsets = [14, 0], sizes = [2, 512], strides = [1, 1]} : vector<16x512xf32> to vector<2x512xf32>
    %cst_95 = arith.constant dense<0.000000e+00> : vector<2x512xf32>
    %333 = tpu.matmul %310, %39, %cst_95 {dimension_numbers = #tpu.dot_dimension_numbers<[1], [0], [0], [1], [0, 0, 1, 1], [], []>} : vector<2x128xf32>, vector<128x512xf32>, vector<2x512xf32> -> vector<2x512xf32>
    %334 = arith.addf %332, %333 : vector<2x512xf32>
    %335 = vector.extract_strided_slice %334 {offsets = [0, 0], sizes = [2, 384], strides = [1, 1]} : vector<2x512xf32> to vector<2x384xf32>
    %336 = arith.negf %335 : vector<2x384xf32>
    %337 = math.exp %336 : vector<2x384xf32>
    %cst_96 = arith.constant 1.000000e+00 : f32
    %338 = vector.broadcast %cst_96 : f32 to vector<2x384xf32>
    %339 = arith.addf %338, %337 : vector<2x384xf32>
    %340 = arith.divf %338, %339 : vector<2x384xf32>
    %341 = vector.extract_strided_slice %334 {offsets = [0, 384], sizes = [2, 128], strides = [1, 1]} : vector<2x512xf32> to vector<2x128xf32>
    %342 = math.tanh %341 : vector<2x128xf32>
    %343 = vector.extract_strided_slice %340 {offsets = [0, 0], sizes = [2, 128], strides = [1, 1]} : vector<2x384xf32> to vector<2x128xf32>
    %344 = vector.extract_strided_slice %340 {offsets = [0, 128], sizes = [2, 128], strides = [1, 1]} : vector<2x384xf32> to vector<2x128xf32>
    %345 = vector.extract_strided_slice %340 {offsets = [0, 256], sizes = [2, 128], strides = [1, 1]} : vector<2x384xf32> to vector<2x128xf32>
    %346 = arith.mulf %344, %308 : vector<2x128xf32>
    %347 = arith.mulf %343, %342 : vector<2x128xf32>
    %348 = arith.addf %346, %347 : vector<2x128xf32>
    %349 = math.tanh %348 : vector<2x128xf32>
    %350 = arith.mulf %345, %349 : vector<2x128xf32>
    %351 = tpu.concatenate %350, %330 in 1 : vector<2x128xf32>, vector<2x128xf32> -> vector<2x256xf32>
    %cst_97 = arith.constant dense<0.000000e+00> : vector<2x512xf32>
    %352 = tpu.matmul %351, %41, %cst_97 {dimension_numbers = #tpu.dot_dimension_numbers<[1], [0], [0], [1], [0, 0, 1, 1], [], []>} : vector<2x256xf32>, vector<256x512xf32>, vector<2x512xf32> -> vector<2x512xf32>
    %353 = vector.broadcast %43 : vector<1x512xf32> to vector<2x512xf32>
    %354 = arith.addf %352, %353 : vector<2x512xf32>
    %355 = vector.extract_strided_slice %354 {offsets = [0, 0], sizes = [2, 384], strides = [1, 1]} : vector<2x512xf32> to vector<2x384xf32>
    %356 = arith.negf %355 : vector<2x384xf32>
    %357 = math.exp %356 : vector<2x384xf32>
    %cst_98 = arith.constant 1.000000e+00 : f32
    %358 = vector.broadcast %cst_98 : f32 to vector<2x384xf32>
    %359 = arith.addf %358, %357 : vector<2x384xf32>
    %360 = arith.divf %358, %359 : vector<2x384xf32>
    %361 = vector.extract_strided_slice %354 {offsets = [0, 384], sizes = [2, 128], strides = [1, 1]} : vector<2x512xf32> to vector<2x128xf32>
    %362 = math.tanh %361 : vector<2x128xf32>
    %363 = vector.extract_strided_slice %360 {offsets = [0, 0], sizes = [2, 128], strides = [1, 1]} : vector<2x384xf32> to vector<2x128xf32>
    %364 = vector.extract_strided_slice %360 {offsets = [0, 128], sizes = [2, 128], strides = [1, 1]} : vector<2x384xf32> to vector<2x128xf32>
    %365 = vector.extract_strided_slice %360 {offsets = [0, 256], sizes = [2, 128], strides = [1, 1]} : vector<2x384xf32> to vector<2x128xf32>
    %366 = arith.mulf %364, %328 : vector<2x128xf32>
    %367 = arith.mulf %363, %362 : vector<2x128xf32>
    %368 = arith.addf %366, %367 : vector<2x128xf32>
    %369 = math.tanh %368 : vector<2x128xf32>
    %370 = arith.mulf %365, %369 : vector<2x128xf32>
    %c14 = arith.constant 14 : index
    %c0_99 = arith.constant 0 : index
    %371 = vector.load %arg20[%c14, %c0_99] : memref<16x128xf32, #tpu.memory_space<vmem>>, vector<2x128xf32>
    tpu.vector_store %arg20[%c14, %c0_99], %370 {strides = array<i32>} : memref<16x128xf32, #tpu.memory_space<vmem>>, vector<2x128xf32>,
    %c0_100 = arith.constant 0 : index
    %c0_101 = arith.constant 0 : index
    %372 = vector.load %arg20[%c0_100, %c0_101] : memref<16x128xf32, #tpu.memory_space<vmem>>, vector<16x128xf32>
    %c0_102 = arith.constant 0 : index
    %c0_103 = arith.constant 0 : index
    %c0_104 = arith.constant 0 : index
    %373 = vector.load %arg10[%c0_102, %c0_103, %c0_104] : memref<1x128x256xf32, #tpu.memory_space<vmem>>, vector<1x128x256xf32>
    %374 = vector.shape_cast %373 : vector<1x128x256xf32> to vector<128x256xf32>
    %cst_105 = arith.constant dense<0.000000e+00> : vector<16x256xf32>
    %375 = tpu.matmul %372, %374, %cst_105 {dimension_numbers = #tpu.dot_dimension_numbers<[1], [0], [0], [1], [0, 0, 1, 1], [], []>} : vector<16x128xf32>, vector<128x256xf32>, vector<16x256xf32> -> vector<16x256xf32>
    %c0_106 = arith.constant 0 : index
    %c0_107 = arith.constant 0 : index
    %c0_108 = arith.constant 0 : index
    %376 = vector.load %arg11[%c0_106, %c0_107, %c0_108] : memref<1x1x256xf32, #tpu.memory_space<vmem>>, vector<1x1x256xf32>
    %377 = vector.shape_cast %376 : vector<1x1x256xf32> to vector<1x256xf32>
    %378 = vector.broadcast %377 : vector<1x256xf32> to vector<16x256xf32>
    %379 = arith.addf %375, %378 : vector<16x256xf32>
    %380 = math.tanh %379 : vector<16x256xf32>
    %381 = tpu.concatenate %350, %370 in 1 : vector<2x128xf32>, vector<2x128xf32> -> vector<2x256xf32>
    %cst_109 = arith.constant 0.707106769 : f32
    %382 = vector.broadcast %cst_109 : f32 to vector<2x256xf32>
    %383 = arith.mulf %381, %382 : vector<2x256xf32>
    %384 = vector.extract_strided_slice %380 {offsets = [0, 0], sizes = [2, 256], strides = [1, 1]} : vector<16x256xf32> to vector<2x256xf32>
    %385 = arith.mulf %384, %383 : vector<2x256xf32>
    %cst_110 = arith.constant dense<0.000000e+00> : vector<2xf32>
    %386 = vector.multi_reduction <add>, %385, %cst_110 [1] : vector<2x256xf32> to vector<2xf32>
    %387 = vector.shape_cast %386 : vector<2xf32> to vector<2x1xf32>
    %388 = vector.extract_strided_slice %380 {offsets = [2, 0], sizes = [2, 256], strides = [1, 1]} : vector<16x256xf32> to vector<2x256xf32>
    %389 = arith.mulf %388, %383 : vector<2x256xf32>
    %cst_111 = arith.constant dense<0.000000e+00> : vector<2xf32>
    %390 = vector.multi_reduction <add>, %389, %cst_111 [1] : vector<2x256xf32> to vector<2xf32>
    %391 = vector.shape_cast %390 : vector<2xf32> to vector<2x1xf32>
    %392 = vector.extract_strided_slice %380 {offsets = [4, 0], sizes = [2, 256], strides = [1, 1]} : vector<16x256xf32> to vector<2x256xf32>
    %393 = arith.mulf %392, %383 : vector<2x256xf32>
    %cst_112 = arith.constant dense<0.000000e+00> : vector<2xf32>
    %394 = vector.multi_reduction <add>, %393, %cst_112 [1] : vector<2x256xf32> to vector<2xf32>
    %395 = vector.shape_cast %394 : vector<2xf32> to vector<2x1xf32>
    %396 = vector.extract_strided_slice %380 {offsets = [6, 0], sizes = [2, 256], strides = [1, 1]} : vector<16x256xf32> to vector<2x256xf32>
    %397 = arith.mulf %396, %383 : vector<2x256xf32>
    %cst_113 = arith.constant dense<0.000000e+00> : vector<2xf32>
    %398 = vector.multi_reduction <add>, %397, %cst_113 [1] : vector<2x256xf32> to vector<2xf32>
    %399 = vector.shape_cast %398 : vector<2xf32> to vector<2x1xf32>
    %400 = vector.extract_strided_slice %380 {offsets = [8, 0], sizes = [2, 256], strides = [1, 1]} : vector<16x256xf32> to vector<2x256xf32>
    %401 = arith.mulf %400, %383 : vector<2x256xf32>
    %cst_114 = arith.constant dense<0.000000e+00> : vector<2xf32>
    %402 = vector.multi_reduction <add>, %401, %cst_114 [1] : vector<2x256xf32> to vector<2xf32>
    %403 = vector.shape_cast %402 : vector<2xf32> to vector<2x1xf32>
    %404 = vector.extract_strided_slice %380 {offsets = [10, 0], sizes = [2, 256], strides = [1, 1]} : vector<16x256xf32> to vector<2x256xf32>
    %405 = arith.mulf %404, %383 : vector<2x256xf32>
    %cst_115 = arith.constant dense<0.000000e+00> : vector<2xf32>
    %406 = vector.multi_reduction <add>, %405, %cst_115 [1] : vector<2x256xf32> to vector<2xf32>
    %407 = vector.shape_cast %406 : vector<2xf32> to vector<2x1xf32>
    %408 = vector.extract_strided_slice %380 {offsets = [12, 0], sizes = [2, 256], strides = [1, 1]} : vector<16x256xf32> to vector<2x256xf32>
    %409 = arith.mulf %408, %383 : vector<2x256xf32>
    %cst_116 = arith.constant dense<0.000000e+00> : vector<2xf32>
    %410 = vector.multi_reduction <add>, %409, %cst_116 [1] : vector<2x256xf32> to vector<2xf32>
    %411 = vector.shape_cast %410 : vector<2xf32> to vector<2x1xf32>
    %412 = vector.extract_strided_slice %380 {offsets = [14, 0], sizes = [2, 256], strides = [1, 1]} : vector<16x256xf32> to vector<2x256xf32>
    %413 = arith.mulf %412, %383 : vector<2x256xf32>
    %cst_117 = arith.constant dense<0.000000e+00> : vector<2xf32>
    %414 = vector.multi_reduction <add>, %413, %cst_117 [1] : vector<2x256xf32> to vector<2xf32>
    %415 = vector.shape_cast %414 : vector<2xf32> to vector<2x1xf32>
    %416 = tpu.concatenate %387, %391, %395, %399, %403, %407, %411, %415 in 1 : vector<2x1xf32>, vector<2x1xf32>, vector<2x1xf32>, vector<2x1xf32>, vector<2x1xf32>, vector<2x1xf32>, vector<2x1xf32>, vector<2x1xf32> -> vector<2x8xf32>
    %cst_118 = arith.constant dense<0xFF800000> : vector<2xf32>
    %417 = vector.multi_reduction <maximumf>, %416, %cst_118 [1] : vector<2x8xf32> to vector<2xf32>
    %418 = vector.shape_cast %417 : vector<2xf32> to vector<2x1xf32>
    %419 = vector.broadcast %418 : vector<2x1xf32> to vector<2x8xf32>
    %420 = arith.subf %416, %419 : vector<2x8xf32>
    %421 = math.exp %420 : vector<2x8xf32>
    %cst_119 = arith.constant dense<0.000000e+00> : vector<2xf32>
    %422 = vector.multi_reduction <add>, %421, %cst_119 [1] : vector<2x8xf32> to vector<2xf32>
    %423 = vector.shape_cast %422 : vector<2xf32> to vector<2x1xf32>
    %424 = tpu.reciprocal %423 {approx = true} : vector<2x1xf32> -> vector<2x1xf32>
    %425 = vector.broadcast %424 : vector<2x1xf32> to vector<2x8xf32>
    %426 = arith.mulf %421, %425 : vector<2x8xf32>
    %427 = vector.extract_strided_slice %426 {offsets = [0, 0], sizes = [2, 1], strides = [1, 1]} : vector<2x8xf32> to vector<2x1xf32>
    %c0_120 = arith.constant 0 : index
    %c0_121 = arith.constant 0 : index
    %428 = vector.load %arg21[%c0_120, %c0_121] : memref<16x1xf32, #tpu.memory_space<vmem>>, vector<2x1xf32>
    tpu.vector_store %arg21[%c0_120, %c0_121], %427 {strides = array<i32>} : memref<16x1xf32, #tpu.memory_space<vmem>>, vector<2x1xf32>,
    %429 = vector.extract_strided_slice %426 {offsets = [0, 1], sizes = [2, 1], strides = [1, 1]} : vector<2x8xf32> to vector<2x1xf32>
    %c2_122 = arith.constant 2 : index
    %c0_123 = arith.constant 0 : index
    %430 = vector.load %arg21[%c2_122, %c0_123] : memref<16x1xf32, #tpu.memory_space<vmem>>, vector<2x1xf32>
    tpu.vector_store %arg21[%c2_122, %c0_123], %429 {strides = array<i32>} : memref<16x1xf32, #tpu.memory_space<vmem>>, vector<2x1xf32>,
    %431 = vector.extract_strided_slice %426 {offsets = [0, 2], sizes = [2, 1], strides = [1, 1]} : vector<2x8xf32> to vector<2x1xf32>
    %c4_124 = arith.constant 4 : index
    %c0_125 = arith.constant 0 : index
    %432 = vector.load %arg21[%c4_124, %c0_125] : memref<16x1xf32, #tpu.memory_space<vmem>>, vector<2x1xf32>
    tpu.vector_store %arg21[%c4_124, %c0_125], %431 {strides = array<i32>} : memref<16x1xf32, #tpu.memory_space<vmem>>, vector<2x1xf32>,
    %433 = vector.extract_strided_slice %426 {offsets = [0, 3], sizes = [2, 1], strides = [1, 1]} : vector<2x8xf32> to vector<2x1xf32>
    %c6_126 = arith.constant 6 : index
    %c0_127 = arith.constant 0 : index
    %434 = vector.load %arg21[%c6_126, %c0_127] : memref<16x1xf32, #tpu.memory_space<vmem>>, vector<2x1xf32>
    tpu.vector_store %arg21[%c6_126, %c0_127], %433 {strides = array<i32>} : memref<16x1xf32, #tpu.memory_space<vmem>>, vector<2x1xf32>,
    %435 = vector.extract_strided_slice %426 {offsets = [0, 4], sizes = [2, 1], strides = [1, 1]} : vector<2x8xf32> to vector<2x1xf32>
    %c8_128 = arith.constant 8 : index
    %c0_129 = arith.constant 0 : index
    %436 = vector.load %arg21[%c8_128, %c0_129] : memref<16x1xf32, #tpu.memory_space<vmem>>, vector<2x1xf32>
    tpu.vector_store %arg21[%c8_128, %c0_129], %435 {strides = array<i32>} : memref<16x1xf32, #tpu.memory_space<vmem>>, vector<2x1xf32>,
    %437 = vector.extract_strided_slice %426 {offsets = [0, 5], sizes = [2, 1], strides = [1, 1]} : vector<2x8xf32> to vector<2x1xf32>
    %c10_130 = arith.constant 10 : index
    %c0_131 = arith.constant 0 : index
    %438 = vector.load %arg21[%c10_130, %c0_131] : memref<16x1xf32, #tpu.memory_space<vmem>>, vector<2x1xf32>
    tpu.vector_store %arg21[%c10_130, %c0_131], %437 {strides = array<i32>} : memref<16x1xf32, #tpu.memory_space<vmem>>, vector<2x1xf32>,
    %439 = vector.extract_strided_slice %426 {offsets = [0, 6], sizes = [2, 1], strides = [1, 1]} : vector<2x8xf32> to vector<2x1xf32>
    %c12_132 = arith.constant 12 : index
    %c0_133 = arith.constant 0 : index
    %440 = vector.load %arg21[%c12_132, %c0_133] : memref<16x1xf32, #tpu.memory_space<vmem>>, vector<2x1xf32>
    tpu.vector_store %arg21[%c12_132, %c0_133], %439 {strides = array<i32>} : memref<16x1xf32, #tpu.memory_space<vmem>>, vector<2x1xf32>,
    %441 = vector.extract_strided_slice %426 {offsets = [0, 7], sizes = [2, 1], strides = [1, 1]} : vector<2x8xf32> to vector<2x1xf32>
    %c14_134 = arith.constant 14 : index
    %c0_135 = arith.constant 0 : index
    %442 = vector.load %arg21[%c14_134, %c0_135] : memref<16x1xf32, #tpu.memory_space<vmem>>, vector<2x1xf32>
    tpu.vector_store %arg21[%c14_134, %c0_135], %441 {strides = array<i32>} : memref<16x1xf32, #tpu.memory_space<vmem>>, vector<2x1xf32>,
    %c0_136 = arith.constant 0 : index
    %c0_137 = arith.constant 0 : index
    %443 = vector.load %arg21[%c0_136, %c0_137] : memref<16x1xf32, #tpu.memory_space<vmem>>, vector<16x1xf32>
    %444 = vector.broadcast %443 : vector<16x1xf32> to vector<16x128xf32>
    %445 = arith.mulf %372, %444 : vector<16x128xf32>
    %c0_138 = arith.constant 0 : index
    %c0_139 = arith.constant 0 : index
    %c0_140 = arith.constant 0 : index
    %446 = vector.load %arg19[%c0_138, %c0_139, %c0_140] : memref<1x16x128xf32, #tpu.memory_space<vmem>>, vector<1x16x128xf32>
    %447 = vector.shape_cast %446 : vector<1x16x128xf32> to vector<16x128xf32>
    %448 = vector.shape_cast %445 : vector<16x128xf32> to vector<1x16x128xf32>
    tpu.vector_store %arg19[%c0_138, %c0_139, %c0_140], %448 {strides = array<i32>} : memref<1x16x128xf32, #tpu.memory_space<vmem>>, vector<1x16x128xf32>,
    return
  }
  func.func @transform_0(%arg0: i32) -> (i32, i32) {
    %c0_i32 = arith.constant 0 : i32
    %c0_i32_0 = arith.constant 0 : i32
    %c0_i32_1 = arith.constant 0 : i32
    return %c0_i32, %c0_i32_0 : i32, i32
  }
  func.func @transform_1(%arg0: i32) -> (i32, i32) {
    %c0_i32 = arith.constant 0 : i32
    %c0_i32_0 = arith.constant 0 : i32
    %c0_i32_1 = arith.constant 0 : i32
    return %c0_i32, %c0_i32_0 : i32, i32
  }
  func.func @transform_2(%arg0: i32) -> (i32, i32, i32, i32) {
    %c0_i32 = arith.constant 0 : i32
    %c0_i32_0 = arith.constant 0 : i32
    %c0_i32_1 = arith.constant 0 : i32
    %c0_i32_2 = arith.constant 0 : i32
    return %arg0, %c0_i32, %c0_i32_0, %c0_i32_1 : i32, i32, i32, i32
  }
  func.func @transform_3(%arg0: i32) -> (i32, i32, i32, i32) {
    %c0_i32 = arith.constant 0 : i32
    %c0_i32_0 = arith.constant 0 : i32
    %c0_i32_1 = arith.constant 0 : i32
    %c0_i32_2 = arith.constant 0 : i32
    return %arg0, %c0_i32, %c0_i32_0, %c0_i32_1 : i32, i32, i32, i32
  }
  func.func @transform_4(%arg0: i32) -> (i32, i32, i32) {
    %c0_i32 = arith.constant 0 : i32
    %c0_i32_0 = arith.constant 0 : i32
    %c0_i32_1 = arith.constant 0 : i32
    return %arg0, %c0_i32, %c0_i32_0 : i32, i32, i32
  }
  func.func @transform_5(%arg0: i32) -> (i32, i32, i32) {
    %c0_i32 = arith.constant 0 : i32
    %c0_i32_0 = arith.constant 0 : i32
    %c0_i32_1 = arith.constant 0 : i32
    return %arg0, %c0_i32, %c0_i32_0 : i32, i32, i32
  }
  func.func @transform_6(%arg0: i32) -> (i32, i32, i32) {
    %c0_i32 = arith.constant 0 : i32
    %c0_i32_0 = arith.constant 0 : i32
    %c0_i32_1 = arith.constant 0 : i32
    return %arg0, %c0_i32, %c0_i32_0 : i32, i32, i32
  }
  func.func @transform_7(%arg0: i32) -> (i32, i32, i32) {
    %c0_i32 = arith.constant 0 : i32
    %c0_i32_0 = arith.constant 0 : i32
    %c0_i32_1 = arith.constant 0 : i32
    return %arg0, %c0_i32, %c0_i32_0 : i32, i32, i32
  }
  func.func @transform_8(%arg0: i32) -> (i32, i32, i32) {
    %c0_i32 = arith.constant 0 : i32
    %c0_i32_0 = arith.constant 0 : i32
    %c0_i32_1 = arith.constant 0 : i32
    return %arg0, %c0_i32, %c0_i32_0 : i32, i32, i32
  }
  func.func @transform_9(%arg0: i32) -> (i32, i32, i32) {
    %c0_i32 = arith.constant 0 : i32
    %c0_i32_0 = arith.constant 0 : i32
    %c0_i32_1 = arith.constant 0 : i32
    return %arg0, %c0_i32, %c0_i32_0 : i32, i32, i32
  }
  func.func @transform_10(%arg0: i32) -> (i32, i32, i32) {
    %c0_i32 = arith.constant 0 : i32
    %c0_i32_0 = arith.constant 0 : i32
    %c0_i32_1 = arith.constant 0 : i32
    return %arg0, %c0_i32, %c0_i32_0 : i32, i32, i32
  }
  func.func @transform_11(%arg0: i32) -> (i32, i32, i32) {
    %c0_i32 = arith.constant 0 : i32
    %c0_i32_0 = arith.constant 0 : i32
    %c0_i32_1 = arith.constant 0 : i32
    return %arg0, %c0_i32, %c0_i32_0 : i32, i32, i32
  }
  func.func @transform_12(%arg0: i32) -> (i32, i32, i32) {
    %c0_i32 = arith.constant 0 : i32
    %c0_i32_0 = arith.constant 0 : i32
    %c0_i32_1 = arith.constant 0 : i32
    return %arg0, %c0_i32, %c0_i32_0 : i32, i32, i32
  }
  func.func @transform_13(%arg0: i32) -> (i32, i32, i32) {
    %c0_i32 = arith.constant 0 : i32
    %c0_i32_0 = arith.constant 0 : i32
    %c0_i32_1 = arith.constant 0 : i32
    return %arg0, %c0_i32, %c0_i32_0 : i32, i32, i32
  }
  func.func @transform_14(%arg0: i32) -> (i32, i32, i32) {
    %c0_i32 = arith.constant 0 : i32
    %c0_i32_0 = arith.constant 0 : i32
    %c0_i32_1 = arith.constant 0 : i32
    return %arg0, %c0_i32, %c0_i32_0 : i32, i32, i32
  }
  func.func @transform_15(%arg0: i32) -> (i32, i32, i32) {
    %c0_i32 = arith.constant 0 : i32
    %c0_i32_0 = arith.constant 0 : i32
    %c0_i32_1 = arith.constant 0 : i32
    return %arg0, %c0_i32, %c0_i32_0 : i32, i32, i32
  }
  func.func @transform_16(%arg0: i32) -> (i32, i32, i32) {
    %c0_i32 = arith.constant 0 : i32
    %c0_i32_0 = arith.constant 0 : i32
    %c0_i32_1 = arith.constant 0 : i32
    return %arg0, %c0_i32, %c0_i32_0 : i32, i32, i32
  }
  func.func @transform_17(%arg0: i32) -> (i32, i32, i32) {
    %c0_i32 = arith.constant 0 : i32
    %c0_i32_0 = arith.constant 0 : i32
    %c0_i32_1 = arith.constant 0 : i32
    return %arg0, %c0_i32, %c0_i32_0 : i32, i32, i32
  }
  func.func @transform_18(%arg0: i32) -> (i32, i32, i32) {
    %c0_i32 = arith.constant 0 : i32
    %c0_i32_0 = arith.constant 0 : i32
    %c0_i32_1 = arith.constant 0 : i32
    return %arg0, %c0_i32, %c0_i32_0 : i32, i32, i32
  }
}

</mosaic_0001>

<bundles_post_ra>
// kernel: critic_forward.1
= control target key start
LH: loop header
LB: loop body
LE: loop exit
PB: predicated region body
PF: predicated region fallthrough
CT: control target
= control target key end

     0   :  { %s11520_s0 = inlined_call_operand.vmem [shape: f32[16,8], index: 0, kind: input, shape index: {}]   ;;  %s11521_s1 = inlined_call_operand.vmem [shape: f32[2,8], index: 1, kind: input, shape index: {}]   ;;  %s11522_s2 = inlined_call_operand.vmem [shape: f32[2,2,2,128], index: 2, kind: input, shape index: {}]   ;;  %s11523_s3 = inlined_call_operand.hbm [shape: f32[2,2,2,128], index: 3, kind: input, shape index: {}]   ;;  %s11524_s4 = inlined_call_operand.vmem [shape: f32[2,8,512], index: 4, kind: input, shape index: {}]   ;;  %s11525_s5 = inlined_call_operand.hbm [shape: f32[2,128,512], index: 5, kind: input, shape index: {}]   ;;  %s11526_s6 = inlined_call_operand.hbm [shape: f32[2,1,512], index: 6, kind: input, shape index: {}]   ;;  %s11527_s7 = inlined_call_operand.hbm [shape: f32[2,256,512], index: 7, kind: input, shape index: {}]   ;;  %s11528_s8 = inlined_call_operand.hbm [shape: f32[2,1,512], index: 8, kind: input, shape index: {}]   ;;  %s11529_s9 = inlined_call_operand.hbm [shape: f32[2,128,256], index: 9, kind: input, shape index: {}]   ;;  %s11530_s10 = inlined_call_operand.hbm [shape: f32[2,1,256], index: 10, kind: input, shape index: {}]   ;;  %s11531_s11 = inlined_call_operand.hbm [shape: f32[2,8,128], index: 11, kind: input, shape index: {}]   ;;  %s11532_s12 = inlined_call_operand.vmem [shape: f32[2,1,128], index: 12, kind: input, shape index: {}]   ;;  %s11533_s13 = inlined_call_operand.vmem [shape: f32[2,128,128], index: 13, kind: input, shape index: {}]   ;;  %s11534_s14 = inlined_call_operand.hbm [shape: f32[2,1,128], index: 14, kind: input, shape index: {}]   ;;  %s11535_s15 = inlined_call_operand.vmem [shape: f32[2,128,1], index: 15, kind: input, shape index: {}]   ;;  %s11536_s16 = inlined_call_operand.vmem [shape: f32[2,1,1], index: 16, kind: input, shape index: {}]   ;;  %s11537_s17 = inlined_call_operand.vmem [shape: f32[2,2,1], index: 17, kind: output, shape index: {0}]   ;;  %s11538_s18 = inlined_call_operand.hbm [shape: f32[2,16,128], index: 18, kind: output, shape index: {1}]  }
   0x1   :  { %12185 = sst [smem:[#allocation193_spill]] %s11520_s0 }
   0x2   :  { %12186 = sst [smem:[#allocation194_spill]] %s11521_s1 }
   0x3   :  { %12187 = sst [smem:[#allocation195_spill]] %s11522_s2 }
   0x4   :  { %12188 = sst [smem:[#allocation196_spill]] %s11523_s3 }
   0x5   :  { %12189 = sst [smem:[#allocation197_spill]] %s11524_s4 }
   0x6   :  { %12190 = sst [smem:[#allocation198_spill]] %s11525_s5 }
   0x7   :  { %12191 = sst [smem:[#allocation199_spill]] %s11527_s7 }
   0x8   :  { %12192 = sst [smem:[#allocation200_spill]] %s11529_s9 }
   0x9   :  { %12193 = sst [smem:[#allocation201_spill]] %s11531_s11 }
   0xa   :  { %12194 = sst [smem:[#allocation202_spill]] %s11532_s12 }
   0xb   :  { %12195 = sst [smem:[#allocation203_spill]] %s11533_s13 }
   0xc   :  { %12196 = sst [smem:[#allocation204_spill]] %s11535_s15 }
   0xd   :  { %12197 = sst [smem:[#allocation205_spill]] %s11536_s16 }
   0xe   :  { %12198 = sst [smem:[#allocation206_spill]] %s11537_s17 }
   0xf   :  { %12199 = sst [smem:[#allocation207_spill]] %s11538_s18 }
  0x10   :  { %24 = vsyncpa [#allocation5], 0 }
  0x11   :  { %26 = vsyncpa [#allocation5 + $0x1], 0 }
  0x12   :  { %27 = vsyncpa [#allocation8], 0 }
  0x13   :  { %29 = vsyncpa [#allocation8 + $0x1], 0 }
  0x14   :  { %30 = vsyncpa [#allocation11], 0 }
  0x15   :  { %32 = vsyncpa [#allocation11 + $0x1], 0 }
  0x16   :  { %33 = vsyncpa [#allocation14], 0 }
  0x17   :  { %35 = vsyncpa [#allocation14 + $0x1], 0 }
  0x18   :  { %36 = vsyncpa [#allocation17], 0 }
  0x19   :  { %38 = vsyncpa [#allocation17 + $0x1], 0 }
  0x1a   :  { %39 = vsyncpa [#allocation6], 0 }
  0x1b   :  { %41 = vsyncpa [#allocation6 + $0x1], 0  ;;  %s6807_s27 = smov 0   ;;  %s6809_s28 = smov 0  }
  0x1c   :  { %s6811_s29 = smov 0   ;;  %s6813_s30 = smov 0  }
  0x1d LB: > { %12200 = sst [smem:[#allocation26_spill]] %s6671_s27  ;;  %s6828_s0 = sadd.s32 4294967295, %s6683_s30   ;;  %s6683_s30 = sphi %s6813_s30, %s13476_s30   ;;  %s6679_s29 = sphi %s6811_s29, %s13478_s29   ;;  %s6675_s28 = sphi %s6809_s28, %s13480_s28   ;;  %s6671_s27 = sphi %s6807_s27, %s13479_s27  }
  0x1e   : > { %12201 = sst [smem:[#allocation27_spill]] %s6679_s29  ;;  %s5168_s19 = sadd.s32 4294967294, %s6683_s30  }
  0x1f   : > { %s6832_s1 = sadd.s32 1, %s6683_s30   ;;  %s122_s20 = sadd.s32 1, %s6679_s29 }
  0x20   : > { %12202 = sst [smem:[#allocation28_spill]] %s6832_s1  ;;  %s119_s21 = ssub.s32 %s6683_s30, %s6832_s1 }
  0x21   : > { %p129_p0 = scmp.ne.s32.totalorder %s6679_s29, %s6675_s28  ;;  %p120_p1 = scmp.eq.s32.totalorder %s119_s21, 0 }
  0x22   : > { %p130_p2 = scmp.eq.s32.totalorder %s6683_s30, 0  ;;  %p135_p3 = scmp.ne.s32.totalorder %s6675_s28, %s6671_s27 }
  0x23   : > { %p136_p4 = scmp.eq.s32.totalorder %s6828_s0, 0  ;;  %p523_p7 = scmp.eq.s32.totalorder %s6828_s0, 1 }
  0x24   : > { %s6844_s22 = scalar_select %p120_p1, %s6679_s29, %s122_s20  }
  0x25   : > { %p131_p5 = por %p130_p2, %p129_p0  ;;  %p6846_p6 = por %p136_p4, %p135_p3 }
  0x26   : > { %12203 = sst [smem:[#allocation29_spill]] %s6844_s22  ;;  %p529_p8 = scmp.eq.s32.totalorder %s5168_s19, 1 }
  0x27   : > { %s12204_s2 = scalar_select %p6846_p6, 1, 0 }
  0x28   : > { %p5452_p10 = scmp.lt.s32.totalorder %s6683_s30, 2  ;;  %p6853_p11 = por %p523_p7, %p129_p0 }
  0x29   : > { %p6857_p12 = por %p529_p8, %p135_p3  ;;  %s6862_s25 = sand.u32 1, %s6679_s29  }
  0x2a   : > { %s12205_s23 = scalar_select %p6853_p11, 1, 0 }
  0x2b   : > { %s12207_s24 = scalar_select %p6857_p12, 1, 0 }
  0x2c   : > { %12206 = sst [smem:[#allocation30_spill]] %s12205_s23  ;;  %p6864_p13 = pnand %p5452_p10, %p131_p5 }
  0x2d   : > { %12208 = sst [smem:[#allocation31_spill]] %s12207_s24  ;;  %s6869_s20 = sand.u32 1, %s6683_s30  }
  0x2e   : > { %s5174_s19 = sshll.u32 %s6862_s25, 9  ;;  %s5278_s21 = sshll.u32 %s6683_s30, 13 }
  0x2f   : > { %s12210_s5 = sld [smem:[#allocation198_spill]]  ;;  %s596_s29 = scalar_lea.vmem [#allocation7], %s5174_s19 }
  0x30   : > { %s603_s24 = sshll.u32 %s596_s29, 4  ;;  %p6886_p2 = pneg %p6864_p13  ;;  %s6878_s24 = int_to_ptr.vmem [resolvable:$true] %s603_s24 }
  0x35   : > { %s6876_s27 = scalar_lea.hbm %s12210_s5, %s5278_s21  ;;  %s6356_s19 = scalar_lea.hbm %s12210_s5, 16384 }
  0x36   : > { %s6351_s23 = scalar_lea.hbm %s6876_s27, 8192  ;;  %p6357_p5 = scmp.lt.s32.totalorder %s6876_s27, %s12210_s5 }
  0x37   : > { %p6352_p1 = scmp.ne.s32.totalorder %s6876_s27, %s6351_s23  ;;  %p6358_p7 = scmp.lt.s32.totalorder %s6356_s19, %s6351_s23 }
  0x39   : > { %p6354_p3 = pnand %p6886_p2, %p6352_p1  ;;  %p6359_p8 = por %p6358_p7, %p6357_p5 }
  0x3b   : > { %p6355_p4 = pneg %p6354_p3 }
  0x3d   : > { %p6360_p10 = pnand %p6359_p8, %p6355_p4 }
  0x3f   : > { %6363 = shalt.err (!%p6360_p10)
}
  0x40   : > { %s6364_s18 = scalar_lea.vmem %s6878_s24, 8192  ;;  %s6685_s16 = smov [#allocation7]  }
  0x41   : > { %p6365_p9 = scmp.ne.s32.totalorder %s6878_s24, %s6364_s18  ;;  %s6369_s1 = sshll.u32 %s6685_s16, 4  ;;  %s6370_s1 = int_to_ptr.vmem [resolvable:$false] %s6369_s1 }
  0x42   : > { %s6371_s22 = scalar_lea.vmem %s6370_s1, 16384  ;;  %p6372_p0 = scmp.lt.s32.totalorder %s6878_s24, %s6370_s1 }
  0x43   : > { %p6367_p1 = pnand %p6365_p9, %p6886_p2  ;;  %p6373_p12 = scmp.lt.s32.totalorder %s6371_s22, %s6364_s18 }
  0x45   : > { %p6368_p3 = pneg %p6367_p1  ;;  %p6374_p11 = por %p6373_p12, %p6372_p0 }
  0x47   : > { %p6375_p6 = pnand %p6374_p11, %p6368_p3 }
  0x49   : > { %6378 = shalt.err (!%p6375_p6)
}
  0x4a   : > { %s11550_s23 = smov 512   ;;  %s11551_s19 = smov 32  }
  0x4b   : > { %s12212_s16 = scalar_lea.sflag [#allocation8], %s6869_s20  ;;  %p773_p9 = scmp.lt.s32.totalorder %s6683_s30, 3 }
  0x4c   : > { %5426 = dma.hbm_to_vmem [thread:$0]  (!%p6864_p13), %s6876_s27, 8192, %s6878_s24, %s12212_s16, %s11550_s23, %s11550_s23, %s11551_s19  }
  0x4d   : > { %s5180_s18 = sshll.u32 %s6862_s25, 10  ;;  %s5280_s29 = sshll.u32 %s6683_s30, 14 }
  0x4e   : > { %p12213_p6 = scmp.ge.s32.totalorder %s6683_s30, 1  ;;  %s12215_s7 = sld [smem:[#allocation199_spill]] }
  0x4f   : > { %s636_s4 = scalar_lea.vmem [#allocation10], %s5180_s18  ;;  %s11553_s27 = scalar_lea.sflag [#allocation11], %s6869_s20 }
  0x50   : > { %p6918_p11 = pnand %p12213_p6, %p773_p9  ;;  %s643_s12 = sshll.u32 %s636_s4, 4  ;;  %s6927_s12 = int_to_ptr.vmem [resolvable:$true] %s643_s12 }
  0x52   : > { %s12214_s21 = scalar_select %p6918_p11, 1, 0 }
  0x54   : > { %s6925_s5 = scalar_lea.hbm %s12215_s7, %s5280_s29  ;;  %s6384_s19 = scalar_lea.hbm %s12215_s7, 32768 }
  0x55   : > { %s6379_s24 = scalar_lea.hbm %s6925_s5, 16384  ;;  %p6385_p5 = scmp.lt.s32.totalorder %s6925_s5, %s12215_s7 }
  0x56   : > { %p6380_p12 = scmp.ne.s32.totalorder %s6925_s5, %s6379_s24  ;;  %p6386_p7 = scmp.lt.s32.totalorder %s6384_s19, %s6379_s24 }
  0x58   : > { %p6382_p0 = pnand %p6380_p12, %p6886_p2  ;;  %p6387_p8 = por %p6386_p7, %p6385_p5 }
  0x5a   : > { %p6383_p4 = pneg %p6382_p0 }
  0x5c   : > { %p6388_p10 = pnand %p6387_p8, %p6383_p4 }
  0x5e   : > { %6391 = shalt.err (!%p6388_p10)
}
  0x5f   : > { %s6392_s4 = scalar_lea.vmem %s6927_s12, 16384  ;;  %s6688_s18 = smov [#allocation10]  }
  0x60   : > { %p6393_p1 = scmp.ne.s32.totalorder %s6927_s12, %s6392_s4  ;;  %s6397_s23 = sshll.u32 %s6688_s18, 4  ;;  %s6398_s23 = int_to_ptr.vmem [resolvable:$false] %s6397_s23 }
  0x61   : > { %s6399_s22 = scalar_lea.vmem %s6398_s23, 32768  ;;  %p6400_p6 = scmp.lt.s32.totalorder %s6927_s12, %s6398_s23 }
  0x62   : > { %p6395_p3 = pnand %p6393_p1, %p6886_p2  ;;  %p6401_p12 = scmp.lt.s32.totalorder %s6399_s22, %s6392_s4 }
  0x64   : > { %p6396_p9 = pneg %p6395_p3  ;;  %p6402_p0 = por %p6401_p12, %p6400_p6 }
  0x66   : > { %p6403_p11 = pnand %p6402_p0, %p6396_p9 }
  0x68   : > { %6406 = shalt.err (!%p6403_p11)
}
  0x69   : > { %s12216_s19 = smov 32   ;;  %s12217_s24 = smov 512  }
  0x6a   : > { %5432 = dma.hbm_to_vmem [thread:$0]  (!%p6864_p13), %s6925_s5, 16384, %s6927_s12, %s11553_s27, %s12217_s24, %s12217_s24, %s12216_s19  }
  0x6b   : > { %s5186_s16 = sshll.u32 %s6862_s25, 8  ;;  %s5282_s1 = sshll.u32 %s6683_s30, 12 }
  0x6c   : > { %s12218_s9 = sld [smem:[#allocation200_spill]]  ;;  %s676_s23 = scalar_lea.vmem [#allocation13], %s5186_s16 }
  0x6d   : > { %s683_s22 = sshll.u32 %s676_s23, 4  ;;  %s11555_s7 = scalar_lea.sflag [#allocation14], %s6869_s20  ;;  %s6962_s22 = int_to_ptr.vmem [resolvable:$true] %s683_s22 }
  0x72   : > { %s6960_s18 = scalar_lea.hbm %s12218_s9, %s5282_s1  ;;  %s6412_s24 = scalar_lea.hbm %s12218_s9, 8192 }
  0x73   : > { %s6407_s15 = scalar_lea.hbm %s6960_s18, 4096  ;;  %p6413_p7 = scmp.lt.s32.totalorder %s6960_s18, %s12218_s9 }
  0x74   : > { %p6408_p11 = scmp.ne.s32.totalorder %s6960_s18, %s6407_s15  ;;  %p6414_p8 = scmp.lt.s32.totalorder %s6412_s24, %s6407_s15 }
  0x76   : > { %p6410_p4 = pnand %p6408_p11, %p6886_p2  ;;  %p6415_p10 = por %p6414_p8, %p6413_p7 }
  0x78   : > { %p6411_p5 = pneg %p6410_p4 }
  0x7a   : > { %p6416_p1 = pnand %p6415_p10, %p6411_p5 }
  0x7c   : > { %6419 = shalt.err (!%p6416_p1)
}
  0x7d   : > { %s6420_s16 = scalar_lea.vmem %s6962_s22, 4096  ;;  %s6689_s4 = smov [#allocation13]  }
  0x7e   : > { %p6421_p3 = scmp.ne.s32.totalorder %s6962_s22, %s6420_s16  ;;  %s6425_s23 = sshll.u32 %s6689_s4, 4  ;;  %s6426_s23 = int_to_ptr.vmem [resolvable:$false] %s6425_s23 }
  0x7f   : > { %s6427_s5 = scalar_lea.vmem %s6426_s23, 8192  ;;  %p6428_p12 = scmp.lt.s32.totalorder %s6962_s22, %s6426_s23 }
  0x80   : > { %p6423_p9 = pnand %p6421_p3, %p6886_p2  ;;  %p6429_p0 = scmp.lt.s32.totalorder %s6427_s5, %s6420_s16 }
  0x82   : > { %p6424_p6 = pneg %p6423_p9  ;;  %p6430_p11 = por %p6429_p0, %p6428_p12 }
  0x84   : > { %p6431_p4 = pnand %p6430_p11, %p6424_p6 }
  0x86   : > { %6434 = shalt.err (!%p6431_p4)
}
  0x87   : > { %s6690_s15 = smov 256   ;;  %s6691_s12 = smov 16  }
  0x88   : > { %5438 = dma.hbm_to_vmem [thread:$0]  (!%p6864_p13), %s6960_s18, 4096, %s6962_s22, %s11555_s7, %s6690_s15, %s6690_s15, %s6691_s12  }
  0x89   : > { %s5192_s24 = sshll.u32 %s6862_s25, 3  ;;  %s5193_s29 = sshll.u32 %s6683_s30, 7 }
  0x8a   : > { %s12219_s11 = sld [smem:[#allocation201_spill]]  ;;  %s716_s23 = scalar_lea.vmem [#allocation16], %s5192_s24 }
  0x8b   : > { %s723_s5 = sshll.u32 %s716_s23, 4  ;;  %s11554_s27 = scalar_lea.sflag [#allocation17], %s6869_s20  ;;  %s724_s5 = int_to_ptr.vmem [resolvable:$true] %s723_s5 }
  0x90   : > { %s6992_s4 = scalar_lea.hbm %s12219_s11, %s5193_s29  ;;  %s6440_s15 = scalar_lea.hbm %s12219_s11, 256 }
  0x91   : > { %s6435_s9 = scalar_lea.hbm %s6992_s4, 128  ;;  %p6441_p10 = scmp.lt.s32.totalorder %s6992_s4, %s12219_s11 }
  0x92   : > { %p6436_p5 = scmp.ne.s32.totalorder %s6992_s4, %s6435_s9  ;;  %p6442_p1 = scmp.lt.s32.totalorder %s6440_s15, %s6435_s9 }
  0x94   : > { %p6438_p7 = pnand %p6436_p5, %p6886_p2  ;;  %p6443_p3 = por %p6442_p1, %p6441_p10 }
  0x96   : > { %p6439_p8 = pneg %p6438_p7 }
  0x98   : > { %p6444_p9 = pnand %p6443_p3, %p6439_p8 }
  0x9a   : > { %6447 = shalt.err (!%p6444_p9)
}
  0x9b   : > { %s6448_s24 = scalar_lea.vmem %s724_s5, 128  ;;  %s6692_s29 = smov [#allocation16]  }
  0x9c   : > { %p6449_p6 = scmp.ne.s32.totalorder %s724_s5, %s6448_s24  ;;  %s6453_s16 = sshll.u32 %s6692_s29, 4  ;;  %s6454_s16 = int_to_ptr.vmem [resolvable:$false] %s6453_s16 }
  0x9d   : > { %s6455_s23 = scalar_lea.vmem %s6454_s16, 256  ;;  %p6456_p11 = scmp.lt.s32.totalorder %s724_s5, %s6454_s16 }
  0x9e   : > { %p6451_p12 = pnand %p6449_p6, %p6886_p2  ;;  %p6457_p4 = scmp.lt.s32.totalorder %s6455_s23, %s6448_s24 }
  0xa0   : > { %p6452_p0 = pneg %p6451_p12  ;;  %p6458_p5 = por %p6457_p4, %p6456_p11 }
  0xa2   : > { %p6459_p7 = pnand %p6458_p5, %p6452_p0 }
  0xa4   : > { %6462 = shalt.err (!%p6459_p7)
}
  0xa5   : > { %5444 = dma.hbm_to_vmem [thread:$0]  (!%p6864_p13), %s6992_s4, 128, %s724_s5, %s11554_s27  }
  0xa6   : > { %s7014_s9 = sshll.u32 %s6862_s25, 2  ;;  %s7017_s18 = sshll.u32 %s6683_s30, 6 }
  0xa7   : > { %s12220_s3 = sld [smem:[#allocation196_spill]]  ;;  %s567_s1 = scalar_lea.vmem [#allocation4], %s7014_s9 }
  0xa8   : > { %s574_s24 = sshll.u32 %s567_s1, 4  ;;  %s564_s29 = scalar_lea.sflag [#allocation5], %s6862_s25  ;;  %s7026_s24 = int_to_ptr.vmem [resolvable:$true] %s574_s24 }
  0xad   : > { %s7023_s12 = scalar_lea.hbm %s12220_s3, %s7017_s18  ;;  %s6468_s23 = scalar_lea.hbm %s12220_s3, 128 }
  0xae   : > { %s6463_s4 = scalar_lea.hbm %s7023_s12, 64  ;;  %p6469_p3 = scmp.lt.s32.totalorder %s7023_s12, %s12220_s3 }
  0xaf   : > { %p6464_p8 = scmp.ne.s32.totalorder %s7023_s12, %s6463_s4  ;;  %p6470_p9 = scmp.lt.s32.totalorder %s6468_s23, %s6463_s4 }
  0xb1   : > { %p6466_p10 = pnand %p6464_p8, %p6886_p2  ;;  %p6471_p6 = por %p6470_p9, %p6469_p3 }
  0xb3   : > { %p6467_p1 = pneg %p6466_p10 }
  0xb5   : > { %p6472_p12 = pnand %p6471_p6, %p6467_p1 }
  0xb7   : > { %6475 = shalt.err (!%p6472_p12)
}
  0xb8   : > { %s6476_s1 = scalar_lea.vmem %s7026_s24, 64  ;;  %s6693_s27 = smov [#allocation4]  }
  0xb9   : > { %p6477_p0 = scmp.ne.s32.totalorder %s7026_s24, %s6476_s1  ;;  %s6481_s5 = sshll.u32 %s6693_s27, 4  ;;  %s6482_s5 = int_to_ptr.vmem [resolvable:$false] %s6481_s5 }
  0xba   : > { %s6483_s16 = scalar_lea.vmem %s6482_s5, 128  ;;  %p6484_p5 = scmp.lt.s32.totalorder %s7026_s24, %s6482_s5 }
  0xbb   : > { %p6479_p11 = pnand %p6477_p0, %p6886_p2  ;;  %p6485_p7 = scmp.lt.s32.totalorder %s6483_s16, %s6476_s1 }
  0xbd   : > { %p6480_p4 = pneg %p6479_p11  ;;  %p6486_p8 = por %p6485_p7, %p6484_p5 }
  0xbf   : > { %p6487_p10 = pnand %p6486_p8, %p6480_p4 }
  0xc1   : > { %6490 = shalt.err (!%p6487_p10)
}
  0xc2   : > { %s6694_s4 = smov 2   ;;  %s623_s22 = scalar_lea.hbm %s11526_s6, %s7017_s18 }
  0xc3   : > { %5423 = dma.hbm_to_vmem [thread:$0]  (!%p6864_p13), %s7023_s12, 64, %s7026_s24, %s564_s29, %s12216_s19, %s12216_s19, %s6694_s4  }
  0xc4   : > { %s617_s15 = scalar_lea.vmem [#allocation9], %s7014_s9  ;;  %s6491_s5 = scalar_lea.hbm %s623_s22, 64 }
  0xc5   : > { %s625_s1 = sshll.u32 %s617_s15, 4  ;;  %p6492_p1 = scmp.ne.s32.totalorder %s623_s22, %s6491_s5  ;;  %s626_s1 = int_to_ptr.vmem [resolvable:$true] %s625_s1 }
  0xc6   : > { %s6496_s3 = scalar_lea.hbm %s11526_s6, 128  ;;  %p6497_p6 = scmp.lt.s32.totalorder %s623_s22, %s11526_s6 }
  0xc7   : > { %p6494_p3 = pnand %p6492_p1, %p6886_p2  ;;  %p6498_p12 = scmp.lt.s32.totalorder %s6496_s3, %s6491_s5 }
  0xc9   : > { %p6495_p9 = pneg %p6494_p3  ;;  %p6499_p0 = por %p6498_p12, %p6497_p6 }
  0xcb   : > { %p6500_p11 = pnand %p6499_p0, %p6495_p9 }
  0xcd   : > { %6503 = shalt.err (!%p6500_p11)
}
  0xce   : > { %s6504_s19 = scalar_lea.vmem %s626_s1, 64  ;;  %s6695_s12 = smov [#allocation9]  }
  0xcf   : > { %p6505_p4 = scmp.ne.s32.totalorder %s626_s1, %s6504_s19  ;;  %s6509_s24 = sshll.u32 %s6695_s12, 4  ;;  %s6510_s24 = int_to_ptr.vmem [resolvable:$false] %s6509_s24 }
  0xd0   : > { %s6511_s29 = scalar_lea.vmem %s6510_s24, 128  ;;  %p6512_p8 = scmp.lt.s32.totalorder %s626_s1, %s6510_s24 }
  0xd1   : > { %p6507_p5 = pnand %p6505_p4, %p6886_p2  ;;  %p6513_p10 = scmp.lt.s32.totalorder %s6511_s29, %s6504_s19 }
  0xd3   : > { %p6508_p7 = pneg %p6507_p5  ;;  %p6514_p1 = por %p6513_p10, %p6512_p8 }
  0xd5   : > { %p6515_p3 = pnand %p6514_p1, %p6508_p7 }
  0xd7   : > { %6518 = shalt.err (!%p6515_p3)
}
  0xd8   : > { %s12221_s3 = scalar_lea.sflag [#allocation8], %s6869_s20  ;;  %s7076_s13 = scalar_lea.hbm %s11528_s8, %s7017_s18 }
  0xd9   : > { %5429 = dma.hbm_to_vmem [thread:$0]  (!%p6864_p13), %s623_s22, 64, %s626_s1, %s12221_s3  }
  0xda   : > { %s657_s4 = scalar_lea.vmem [#allocation12], %s7014_s9  ;;  %s5189_s23 = sshll.u32 %s6862_s25, 1 }
  0xdb   : > { %s665_s27 = sshll.u32 %s657_s4, 4  ;;  %s6519_s15 = scalar_lea.hbm %s7076_s13, 64  ;;  %s666_s27 = int_to_ptr.vmem [resolvable:$true] %s665_s27 }
  0xdc   : > { %p6520_p9 = scmp.ne.s32.totalorder %s7076_s13, %s6519_s15  ;;  %s6524_s22 = scalar_lea.hbm %s11528_s8, 128 }
  0xdd   : > { %p6525_p0 = scmp.lt.s32.totalorder %s7076_s13, %s11528_s8  ;;  %p6526_p11 = scmp.lt.s32.totalorder %s6524_s22, %s6519_s15 }
  0xde   : > { %p6522_p6 = pnand %p6520_p9, %p6886_p2 }
  0xdf   : > { %p6527_p4 = por %p6526_p11, %p6525_p0 }
  0xe0   : > { %p6523_p12 = pneg %p6522_p6 }
  0xe2   : > { %p6528_p5 = pnand %p6527_p4, %p6523_p12 }
  0xe4   : > { %6531 = shalt.err (!%p6528_p5)
}
  0xe5   : > { %s6532_s9 = scalar_lea.vmem %s666_s27, 64  ;;  %s6696_s18 = smov [#allocation12]  }
  0xe6   : > { %p6533_p7 = scmp.ne.s32.totalorder %s666_s27, %s6532_s9  ;;  %s6537_s12 = sshll.u32 %s6696_s18, 4  ;;  %s6538_s12 = int_to_ptr.vmem [resolvable:$false] %s6537_s12 }
  0xe7   : > { %s6539_s24 = scalar_lea.vmem %s6538_s12, 128  ;;  %p6540_p1 = scmp.lt.s32.totalorder %s666_s27, %s6538_s12 }
  0xe8   : > { %p6535_p8 = pnand %p6533_p7, %p6886_p2  ;;  %p6541_p3 = scmp.lt.s32.totalorder %s6539_s24, %s6532_s9 }
  0xea   : > { %p6536_p10 = pneg %p6535_p8  ;;  %p6542_p9 = por %p6541_p3, %p6540_p1 }
  0xec   : > { %p6543_p6 = pnand %p6542_p9, %p6536_p10 }
  0xee   : > { %6546 = shalt.err (!%p6543_p6)
}
  0xef   : > { %s12222_s29 = scalar_lea.sflag [#allocation11], %s6869_s20  ;;  %s5283_s3 = sshll.u32 %s6683_s30, 5 }
  0xf0   : > { %5435 = dma.hbm_to_vmem [thread:$0]  (!%p6864_p13), %s7076_s13, 64, %s666_s27, %s12222_s29  }
  0xf1   : > { %s703_s4 = scalar_lea.hbm %s11530_s10, %s5283_s3  ;;  %s697_s15 = scalar_lea.vmem [#allocation15], %s5189_s23 }
  0xf2   : > { %s705_s5 = sshll.u32 %s697_s15, 4  ;;  %s6547_s16 = scalar_lea.hbm %s703_s4, 32  ;;  %s706_s5 = int_to_ptr.vmem [resolvable:$true] %s705_s5 }
  0xf3   : > { %p6548_p12 = scmp.ne.s32.totalorder %s703_s4, %s6547_s16  ;;  %s6552_s19 = scalar_lea.hbm %s11530_s10, 64 }
  0xf4   : > { %p6553_p4 = scmp.lt.s32.totalorder %s703_s4, %s11530_s10  ;;  %p6554_p5 = scmp.lt.s32.totalorder %s6552_s19, %s6547_s16 }
  0xf5   : > { %p6550_p0 = pnand %p6548_p12, %p6886_p2 }
  0xf6   : > { %p6555_p7 = por %p6554_p5, %p6553_p4 }
  0xf7   : > { %p6551_p11 = pneg %p6550_p0 }
  0xf9   : > { %p6556_p8 = pnand %p6555_p7, %p6551_p11 }
  0xfb   : > { %6559 = shalt.err (!%p6556_p8)
}
  0xfc   : > { %s6560_s13 = scalar_lea.vmem %s706_s5, 32  ;;  %s6697_s27 = smov [#allocation15]  }
  0xfd   : > { %p6561_p10 = scmp.ne.s32.totalorder %s706_s5, %s6560_s13  ;;  %s6565_s23 = sshll.u32 %s6697_s27, 4  ;;  %s6566_s23 = int_to_ptr.vmem [resolvable:$false] %s6565_s23 }
  0xfe   : > { %s6567_s12 = scalar_lea.vmem %s6566_s23, 64  ;;  %p6568_p9 = scmp.lt.s32.totalorder %s706_s5, %s6566_s23 }
  0xff   : > { %p6563_p1 = pnand %p6561_p10, %p6886_p2  ;;  %p6569_p6 = scmp.lt.s32.totalorder %s6567_s12, %s6560_s13 }
 0x101   : > { %p6564_p3 = pneg %p6563_p1  ;;  %p6570_p12 = por %p6569_p6, %p6568_p9 }
 0x103   : > { %p6571_p0 = pnand %p6570_p12, %p6564_p3 }
 0x105   : > { %6574 = shalt.err (!%p6571_p0)
}
 0x106   : > { %s12223_s24 = scalar_lea.sflag [#allocation14], %s6869_s20  ;;  %s5194_s29 = sshll.u32 %s6683_s30, 4 }
 0x107   : > { %5441 = dma.hbm_to_vmem [thread:$0]  (!%p6864_p13), %s703_s4, 32, %s706_s5, %s12223_s24  }
 0x108   : > { %s747_s3 = scalar_lea.vmem [#allocation18], %s6862_s25  ;;  %s752_s16 = scalar_lea.hbm %s11534_s14, %s5194_s29 }
 0x109   : > { %s754_s7 = sshll.u32 %s747_s3, 4  ;;  %s6575_s22 = scalar_lea.hbm %s752_s16, 16  ;;  %s755_s7 = int_to_ptr.vmem [resolvable:$true] %s754_s7 }
 0x10a   : > { %p6576_p11 = scmp.ne.s32.totalorder %s752_s16, %s6575_s22  ;;  %s6580_s9 = scalar_lea.hbm %s11534_s14, 32 }
 0x10b   : > { %p6581_p7 = scmp.lt.s32.totalorder %s752_s16, %s11534_s14  ;;  %p6582_p8 = scmp.lt.s32.totalorder %s6580_s9, %s6575_s22 }
 0x10c   : > { %p6578_p4 = pnand %p6576_p11, %p6886_p2 }
 0x10d   : > { %p6583_p10 = por %p6582_p8, %p6581_p7 }
 0x10e   : > { %p6579_p5 = pneg %p6578_p4 }
 0x110   : > { %p6584_p1 = pnand %p6583_p10, %p6579_p5 }
 0x112   : > { %6587 = shalt.err (!%p6584_p1)
}
 0x113   : > { %s6588_s25 = scalar_lea.vmem %s755_s7, 16  ;;  %s6698_s4 = smov [#allocation18]  }
 0x114   : > { %p6589_p3 = scmp.ne.s32.totalorder %s755_s7, %s6588_s25  ;;  %s6593_s5 = sshll.u32 %s6698_s4, 4  ;;  %s6594_s5 = int_to_ptr.vmem [resolvable:$false] %s6593_s5 }
 0x115   : > { %s6595_s27 = scalar_lea.vmem %s6594_s5, 32  ;;  %p6596_p12 = scmp.lt.s32.totalorder %s755_s7, %s6594_s5 }
 0x116   : > { %p6591_p9 = pnand %p6589_p3, %p6886_p2  ;;  %p6597_p0 = scmp.lt.s32.totalorder %s6595_s27, %s6588_s25 }
 0x118   : > { %p6592_p6 = pneg %p6591_p9  ;;  %p6598_p11 = por %p6597_p0, %p6596_p12 }
 0x11a   : > { %p6599_p4 = pnand %p6598_p11, %p6592_p6 }
 0x11c   : > { %6602 = shalt.err (!%p6599_p4)
}
 0x11d   : > { %s12224_s23 = scalar_lea.sflag [#allocation17], %s6869_s20  ;;  %p12225_p5 = scmp.ne.s32.totalorder %s12214_s21, 0 }
 0x11e   : > { %5447 = dma.hbm_to_vmem [thread:$0]  (!%p6864_p13), %s752_s16, 16, %s755_s7, %s12224_s23  }
 0x11f   : > { %777 = sbr.rel (%p12225_p5) target bundleno = 4191 (0x105f), region = 88 }
 0x124   : > { %s7138_s17 = sand.u32 1, %s6675_s28   ;;  %p12226_p2 = scmp.ne.s32.totalorder %s12204_s2, 0 }
 0x125   : > { %s7141_s12 = sshll.u32 %s7138_s17, 2  ;;  %s780_s24 = scalar_lea.sflag [#allocation5], %s7138_s17 }
 0x126   : > { %s783_s29 = scalar_lea.vmem [#allocation4], %s7141_s12 }
 0x127   : > { %6646 = dma.done.wait (%p12226_p2), %s780_s24, 64  }
 0x128   : > { %6648 = vsyncadd (%p12226_p2), %s780_s24, 4294967232  ;;  %s788_s26 = sand.u32 1, %s6828_s0   ;;  %s5197_s20 = sshll.u32 %s7138_s17, 9 }
 0x129   : > { %s789_s21 = scalar_lea.sflag [#allocation8], %s788_s26  ;;  %s7151_s3 = scalar_lea.vmem [#allocation7], %s5197_s20 }
 0x12a   : > { %6650 = dma.done.wait (%p12226_p2), %s789_s21, 8256  }
 0x12b   : > { %6652 = vsyncadd (%p12226_p2), %s789_s21, 4294959040  ;;  %s5199_s7 = sshll.u32 %s7138_s17, 10  ;;  %s801_s11 = scalar_lea.vmem [#allocation9], %s7141_s12 }
 0x12c   : > { %s807_s15 = scalar_lea.sflag [#allocation11], %s788_s26  ;;  %s7159_s16 = scalar_lea.vmem [#allocation10], %s5199_s7 }
 0x12d   : > { %6654 = dma.done.wait (%p12226_p2), %s807_s15, 16448  }
 0x12e   : > { %6656 = vsyncadd (%p12226_p2), %s807_s15, 4294950848  ;;  %s5201_s22 = sshll.u32 %s7138_s17, 8  ;;  %s819_s1 = scalar_lea.vmem [#allocation12], %s7141_s12 }
 0x12f   : > { %s825_s19 = scalar_lea.sflag [#allocation14], %s788_s26  ;;  %s7167_s9 = scalar_lea.vmem [#allocation13], %s5201_s22 }
 0x130   : > { %6658 = dma.done.wait (%p12226_p2), %s825_s19, 4128  }
 0x131   : > { %6660 = vsyncadd (%p12226_p2), %s825_s19, 4294963168  ;;  %s5202_s18 = sshll.u32 %s7138_s17, 1  ;;  %s5203_s13 = sshll.u32 %s7138_s17, 3 }
 0x132   : > { %s7175_s25 = scalar_lea.vmem [#allocation15], %s5202_s18  ;;  %s843_s4 = scalar_lea.sflag [#allocation17], %s788_s26 }
 0x133   : > { %s846_s5 = scalar_lea.vmem [#allocation16], %s5203_s13 }
 0x134   : > { %6662 = dma.done.wait (%p12226_p2), %s843_s4, 144  }
 0x135   : > { %6664 = vsyncadd (%p12226_p2), %s843_s4, 4294967152  ;;  %p976_p13 = scmp.lt.s32.totalorder %s6828_s0, 1  ;;  %v11556_v0 = vmov 0.0   ;;  %vm6700_vm0 = vmmov 0   ;;  %s12227_s26 = sld [smem:[#allocation203_spill]]  ;;  %vm1015_vm1 = vcmask 64512  }
 0x136   : > { %5325 = vmatprep.subr.mxu0 %v11556_v0  ;;  %5327 = vmatprep.mubr.msk.f32.mxu0 %vm6700_vm0, %v11556_v0  ;;  %v1007_v1 = vld [vmem:[%s846_s5] sm:$0xff]  ;;  %s12228_s15 = sld [smem:[#allocation194_spill]]  ;;  %v7247_v21 = vld [vmem:[%s7151_s3 + $0x1e8] sm:$0xff]  ;;  %s854_s4 = scalar_lea.vmem [#allocation18], %s7138_s17  ;;  %vm1278_vm2 = vcmask 1024   ;;  %vm4691_vm3 = vcmask 1047558  }
 0x137   : > { %5330 = vmatprep.subr.mxu1 %v11556_v0  ;;  %s7187_s27 = scalar_select %p976_p13, %s6828_s0, 1  ;;  %5362 = vmatprep.mubr.msk.f32.mxu1 %vm6700_vm0, %v11556_v0  ;;  %v7281_v39 = vld [vmem:[%s7151_s3 + $0x1e0] sm:$0xff]  ;;  %v7284_v40 = vld [vmem:[%s7151_s3 + $0x1c8] sm:$0xff]  ;;  %vm4671_vm4 = vcmask 1043458   ;;  %vm4659_vm5 = vcmask 1041408   ;;  %vm4683_vm6 = vcmask 1045508  }
 0x138   : > { %5326 = vmatpush3.msra.mxu0 %v1007_v1  ;;  %s12229_s18 = sld [smem:[#allocation204_spill]]  ;;  %v7287_v41 = vld [vmem:[%s7151_s3 + $0x1c0] sm:$0xff]  ;;  %v7291_v42 = vld [vmem:[%s7151_s3 + $0x1a8] sm:$0xff]  ;;  %vm4743_vm7 = vcmask 7168   ;;  %vm4745_vm8 = vcmask 15360   ;;  %vm4747_vm9 = vcmask 23552  }
 0x139   : > { %s5286_s2 = sshll.u32 %s7187_s27, 7  ;;  %5365 = vmatprep.subr.mxu0 %v11556_v0  ;;  %v7296_v43 = vld [vmem:[%s7151_s3 + $0x1a0] sm:$0xff]  ;;  %v7300_v44 = vld [vmem:[%s7151_s3 + $0x188] sm:$0xff]  ;;  %s5285_s24 = sshll.u32 %s7187_s27, 5  ;;  %vm4749_vm10 = vcmask 31744   ;;  %vm4751_vm11 = vcmask 39936  }
 0x13a   : > { %v7304_v45 = vld [vmem:[%s7151_s3 + $0x180] sm:$0xff]  ;;  %v7308_v46 = vld [vmem:[%s7151_s3 + $0x168] sm:$0xff]  ;;  %s12235_s21 = sld [smem:[#allocation197_spill]]  ;;  %s5213_s22 = sshll.u32 %s7187_s27, 1  ;;  %vm4753_vm12 = vcmask 48128   ;;  %vm4755_vm13 = vcmask 56320  }
 0x13b   : > { %s7197_s20 = scalar_lea.vmem %s12227_s26, %s5286_s2  ;;  %v7312_v47 = vld [vmem:[%s7151_s3 + $0x160] sm:$0xff]  ;;  %v7316_v48 = vld [vmem:[%s7151_s3 + $0x148] sm:$0xff]  ;;  %vm4757_vm14 = vcmask 58368   ;;  %s6702_s12 = smov 126  }
 0x13c   : > { %v1006_v2 = vld [vmem:[%s12228_s15] sm:$0x3]  ;;  %v1105_v3 = vld [vmem:[%s7197_s20 + $0x78] sm:$0xff]  ;;  %v1104_v4 = vld [vmem:[%s7197_s20 + $0x70] sm:$0xff]  ;;  %s5284_s15 = sshll.u32 %s7187_s27, 2 }
 0x13d   : > { %5331 = vmatpush3.msra.mxu1 %v1105_v3  ;;  %5328 = vmatmul.mubr.msk.f32.vlgmr.msra.gmra.mxu0 %vm1015_vm1, %v1006_v2  ;;  %v1103_v5 = vld [vmem:[%s7197_s20 + $0x68] sm:$0xff]  ;;  %v1102_v6 = vld [vmem:[%s7197_s20 + $0x60] sm:$0xff]  ;;  %v1101_v7 = vld [vmem:[%s7197_s20 + $0x58] sm:$0xff] }
 0x13e   : > { %5332 = vmatprep.subr.mxu1 %v11556_v0  ;;  %5397 = vmatprep.mubr.msk.f32.mxu0 %vm6700_vm0, %v11556_v0  ;;  %v1100_v8 = vld [vmem:[%s7197_s20 + $0x50] sm:$0xff]  ;;  %v1099_v9 = vld [vmem:[%s7197_s20 + $0x48] sm:$0xff]  ;;  %v1098_v10 = vld [vmem:[%s7197_s20 + $0x40] sm:$0xff]  ;;  %s7240_s13 = scalar_lea.vmem %s12229_s18, %s5286_s2  ;;  %s12230_s2 = sld [smem:[#allocation202_spill]] }
 0x13f   : > { %5333 = vmatpush3.msra.mxu1 %v1104_v4  ;;  %v1097_v11 = vld [vmem:[%s7197_s20 + $0x38] sm:$0xff]  ;;  %v1096_v12 = vld [vmem:[%s7197_s20 + $0x30] sm:$0xff]  ;;  %v1095_v13 = vld [vmem:[%s7197_s20 + $0x28] sm:$0xff]  ;;  %s12242_s18 = sld [smem:[#allocation195_spill]] }
 0x140   : > { %5334 = vmatprep.subr.mxu1 %v11556_v0  ;;  %v1094_v14 = vld [vmem:[%s7197_s20 + $0x20] sm:$0xff]  ;;  %v1093_v15 = vld [vmem:[%s7197_s20 + $0x18] sm:$0xff]  ;;  %v1092_v16 = vld [vmem:[%s7197_s20 + $0x10] sm:$0xff]  ;;  %s7387_s7 = scalar_lea.vmem %s12235_s21, %s5285_s24  ;;  %s5288_s24 = sshll.u32 %s6828_s0, 8 }
 0x141   : > { %5335 = vmatpush3.msra.mxu1 %v1103_v5  ;;  %v1091_v17 = vld [vmem:[%s7197_s20 + $0x8] sm:$0xff]  ;;  %v1090_v18 = vld [vmem:[%s7197_s20] sm:$0xff]  ;;  %v1199_v19 = vld [vmem:[%s7240_s13 + $0x78] sm:$0xff]  ;;  %s13470_s21 = sld [smem:[#allocation207_spill]]  ;;  %s6709_s0 = smov [#allocation19]  }
 0x142   : > { %5336 = vmatprep.subr.mxu1 %v11556_v0  ;;  %v1198_v20 = vld [vmem:[%s7240_s13 + $0x70] sm:$0xff]  ;;  %5366 = vmatpush3.msra.mxu0 %v1199_v19  ;;  %v1197_v22 = vld [vmem:[%s7240_s13 + $0x68] sm:$0xff]  ;;  %v1196_v23 = vld [vmem:[%s7240_s13 + $0x60] sm:$0xff] }
 0x143   : > { %5337 = vmatpush3.msra.mxu1 %v1102_v6  ;;  %5367 = vmatprep.subr.mxu0 %v11556_v0  ;;  %v1195_v24 = vld [vmem:[%s7240_s13 + $0x58] sm:$0xff]  ;;  %v1194_v25 = vld [vmem:[%s7240_s13 + $0x50] sm:$0xff]  ;;  %v1193_v26 = vld [vmem:[%s7240_s13 + $0x48] sm:$0xff] }
 0x144   : > { %5338 = vmatprep.subr.mxu1 %v11556_v0  ;;  %5368 = vmatpush3.msra.mxu0 %v1198_v20  ;;  %v1192_v27 = vld [vmem:[%s7240_s13 + $0x40] sm:$0xff]  ;;  %v1191_v28 = vld [vmem:[%s7240_s13 + $0x38] sm:$0xff]  ;;  %v1190_v29 = vld [vmem:[%s7240_s13 + $0x30] sm:$0xff]  ;;  %s988_s23 = scalar_lea.vmem %s12230_s2, %s7187_s27 }
 0x145   : > { %5339 = vmatpush3.msra.mxu1 %v1101_v7  ;;  %5369 = vmatprep.subr.mxu0 %v11556_v0  ;;  %v1189_v30 = vld [vmem:[%s7240_s13 + $0x28] sm:$0xff]  ;;  %v1188_v31 = vld [vmem:[%s7240_s13 + $0x20] sm:$0xff]  ;;  %v1187_v32 = vld [vmem:[%s7240_s13 + $0x18] sm:$0xff] }
 0x146   : > { %5340 = vmatprep.subr.mxu1 %v11556_v0  ;;  %5370 = vmatpush3.msra.mxu0 %v1197_v22  ;;  %v1186_v33 = vld [vmem:[%s7240_s13 + $0x10] sm:$0xff]  ;;  %v5214_v34 = vld [vmem:[%s988_s23] ss:$0 sm:$0xff]  ;;  %v7320_v49 = vld [vmem:[%s7151_s3 + $0x140] sm:$0xff]  ;;  %s12243_s23 = sld [smem:[#allocation193_spill]] }
 0x147   : > { %5341 = vmatpush3.msra.mxu1 %v1100_v8  ;;  %5371 = vmatprep.subr.mxu0 %v11556_v0  ;;  %v7324_v50 = vld [vmem:[%s7151_s3 + $0x128] sm:$0xff]  ;;  %v7328_v51 = vld [vmem:[%s7151_s3 + $0x120] sm:$0xff]  ;;  %v1184_v1 = vld [vmem:[%s7240_s13] sm:$0xff] }
 0x148   : > { %5342 = vmatprep.subr.mxu1 %v11556_v0  ;;  %5372 = vmatpush3.msra.mxu0 %v1196_v23  ;;  %v7332_v52 = vld [vmem:[%s7151_s3 + $0x108] sm:$0xff]  ;;  %v7336_v53 = vld [vmem:[%s7151_s3 + $0x100] sm:$0xff]  ;;  %v7434_v20 = vld [vmem:[%s7151_s3 + $0x1f8] sm:$0xff] }
 0x149   : > { %5343 = vmatpush3.msra.mxu1 %v1099_v9  ;;  %5373 = vmatprep.subr.mxu0 %v11556_v0  ;;  %v7340_v54 = vld [vmem:[%s7151_s3 + $0xe8] sm:$0xff]  ;;  %v7344_v55 = vld [vmem:[%s7151_s3 + $0xe0] sm:$0xff]  ;;  %v7445_v23 = vld [vmem:[%s7151_s3 + $0x1f0] sm:$0xff] }
 0x14a   : > { %5344 = vmatprep.subr.mxu1 %v11556_v0  ;;  %5374 = vmatpush3.msra.mxu0 %v1195_v24  ;;  %v7348_v56 = vld [vmem:[%s7151_s3 + $0xc8] sm:$0xff]  ;;  %v7352_v57 = vld [vmem:[%s7151_s3 + $0xc0] sm:$0xff]  ;;  %v7448_v24 = vld [vmem:[%s7151_s3 + $0x1d8] sm:$0xff] }
 0x14b   : > { %5345 = vmatpush3.msra.mxu1 %v1098_v10  ;;  %5375 = vmatprep.subr.mxu0 %v11556_v0  ;;  %v7356_v58 = vld [vmem:[%s7151_s3 + $0xa8] sm:$0xff]  ;;  %v7362_v59 = vld [vmem:[%s7151_s3 + $0xa0] sm:$0xff] }
 0x14c   : > { %5346 = vmatprep.subr.mxu1 %v11556_v0  ;;  %5376 = vmatpush3.msra.mxu0 %v1194_v25  ;;  %v7366_v60 = vld [vmem:[%s7151_s3 + $0x88] sm:$0xff]  ;;  %v1185_v61 = vld [vmem:[%s7240_s13 + $0x8] sm:$0xff]  ;;  %s7418_s13 = scalar_lea.vmem %s12242_s18, %s5284_s15  ;;  %v7452_v25 = vld [vmem:[%s7151_s3 + $0x1d0] sm:$0xff]  ;;  %s12388_s18 = sld [smem:[#allocation206_spill]] }
 0x14d   : > { %5347 = vmatpush3.msra.mxu1 %v1097_v11  ;;  %5377 = vmatprep.subr.mxu0 %v11556_v0  ;;  %12231 = vst [vmem:[#allocation32_spill] sm:$0xff] %v7366_v60  ;;  %v7371_v62 = vld [vmem:[%s7151_s3 + $0x80] sm:$0xff]  ;;  %v7375_v63 = vld [vmem:[%s7151_s3 + $0x68] sm:$0xff]  ;;  %v7422_v10 = vld [vmem:[%s7418_s13] sm:$0x3] }
 0x14e   : > { %5348 = vmatprep.subr.mxu1 %v11556_v0  ;;  %5378 = vmatpush3.msra.mxu0 %v1193_v26  ;;  %12232 = vst [vmem:[#allocation33_spill] sm:$0xff] %v7371_v62  ;;  %12233 = vst [vmem:[#allocation34_spill] sm:$0xff] %v7375_v63  ;;  %v7382_v2 = vld [vmem:[%s7151_s3 + $0x60] sm:$0xff]  ;;  %v7391_v3 = vld [vmem:[%s7151_s3 + $0x48] sm:$0xff] }
 0x14f   : > { %5349 = vmatpush3.msra.mxu1 %v1096_v12  ;;  %5379 = vmatprep.subr.mxu0 %v11556_v0  ;;  %12234 = vst [vmem:[#allocation35_spill] sm:$0xff] %v7382_v2  ;;  %12236 = vst [vmem:[#allocation36_spill] sm:$0xff] %v7391_v3  ;;  %v1283_v4 = vld [vmem:[%s7387_s7 + $0x8] sm:$0xff]  ;;  %v7400_v6 = vld [vmem:[%s7151_s3 + $0x28] sm:$0xff] }
 0x150   : > { %5350 = vmatprep.subr.mxu1 %v11556_v0  ;;  %5380 = vmatpush3.msra.mxu0 %v1192_v27  ;;  %v7396_v5 = vld [vmem:[%s7151_s3 + $0x40] sm:$0xff]  ;;  %12238 = vst [vmem:[#allocation38_spill] sm:$0xff] %v7400_v6  ;;  %v7408_v8 = vld [vmem:[%s7151_s3 + $0x8] sm:$0xff]  ;;  %v5216_v11 = vld [vmem:[%s854_s4] ss:$0 sm:$0xff]  ;;  %s5204_s4 = sshll.u32 %s7138_s17, 4 }
 0x151   : > { %5351 = vmatpush3.msra.mxu1 %v1095_v13  ;;  %5381 = vmatprep.subr.mxu0 %v11556_v0  ;;  %12237 = vst [vmem:[#allocation37_spill] sm:$0xff] %v7396_v5  ;;  %v7404_v7 = vld [vmem:[%s7151_s3 + $0x20] sm:$0xff]  ;;  %12240 = vst [vmem:[#allocation40_spill] sm:$0xff] %v7408_v8  ;;  %v1284_v19 = vld [vmem:[%s7387_s7 + $0x10] sm:$0xff]  ;;  %s975_s5 = scalar_lea.vmem [#allocation19], %s5204_s4 }
 0x152   : > { %5352 = vmatprep.subr.mxu1 %v11556_v0  ;;  %5382 = vmatpush3.msra.mxu0 %v1191_v28  ;;  %12239 = vst [vmem:[#allocation39_spill] sm:$0xff] %v7404_v7  ;;  %v7413_v9 = vld [vmem:[%s7151_s3] sm:$0xff]  ;;  %v7456_v26 = vld [vmem:[%s7151_s3 + $0x1b8] sm:$0xff]  ;;  %v7461_v27 = vld [vmem:[%s7151_s3 + $0x1b0] sm:$0xff]  ;;  %s4836_s2 = sshll.u32 %s975_s5, 4  ;;  %s11471_s2 = int_to_ptr.vmem [resolvable:$true] %s4836_s2 }
 0x153   : > { %5353 = vmatpush3.msra.mxu1 %v1094_v14  ;;  %5383 = vmatprep.subr.mxu0 %v11556_v0  ;;  %12241 = vst [vmem:[#allocation41_spill] sm:$0xff] %v7413_v9  ;;  %v1281_v22 = vld [vmem:[%s12243_s23 + $0x8] sm:$0xff]  ;;  %v7465_v28 = vld [vmem:[%s7151_s3 + $0x198] sm:$0xff] }
 0x154   : > { %5354 = vmatprep.subr.mxu1 %v11556_v0  ;;  %5384 = vmatpush3.msra.mxu0 %v1190_v29  ;;  %v7469_v29 = vld [vmem:[%s7151_s3 + $0x190] sm:$0xff] }
 0x155   : > { %5355 = vmatpush3.msra.mxu1 %v1093_v15  ;;  %5385 = vmatprep.subr.mxu0 %v11556_v0 }
 0x156   : > { %5356 = vmatprep.subr.mxu1 %v11556_v0  ;;  %5386 = vmatpush3.msra.mxu0 %v1189_v30  ;;  %v7474_v30 = vld [vmem:[%s7151_s3 + $0x178] sm:$0xff] }
 0x157   : > { %5357 = vmatpush3.msra.mxu1 %v1092_v16  ;;  %5387 = vmatprep.subr.mxu0 %v11556_v0  ;;  %v1282_v16 = vld [vmem:[%s7387_s7] sm:$0xff] }
 0x158   : > { %5358 = vmatprep.subr.mxu1 %v11556_v0  ;;  %5388 = vmatpush3.msra.mxu0 %v1188_v31  ;;  %v7479_v31 = vld [vmem:[%s7151_s3 + $0x170] sm:$0xff] }
 0x159   : > { %5359 = vmatpush3.msra.mxu1 %v1091_v17  ;;  %5389 = vmatprep.subr.mxu0 %v11556_v0  ;;  %v1285_v17 = vld [vmem:[%s7387_s7 + $0x18] sm:$0xff]  ;;  %s12382_s7 = sld [smem:[#allocation205_spill]] }
 0x15a   : > { %5360 = vmatprep.subr.mxu1 %v11556_v0  ;;  %5390 = vmatpush3.msra.mxu0 %v1187_v32  ;;  %v7483_v32 = vld [vmem:[%s7151_s3 + $0x158] sm:$0xff] }
 0x15b   : > { %5361 = vmatpush3.msra.mxu1 %v1090_v18  ;;  %5391 = vmatprep.subr.mxu0 %v11556_v0  ;;  %v1280_v18 = vld [vmem:[%s12243_s23] sm:$0xff] }
 0x15c   : > { %1667 = vmatprep.subr.mxu1 %v7247_v21  ;;  %5392 = vmatpush3.msra.mxu0 %v1186_v33  ;;  %v7487_v33 = vld [vmem:[%s7151_s3 + $0x150] sm:$0xff] }
 0x15d   : > { %5393 = vmatprep.subr.mxu0 %v11556_v0 }
 0x15e   : > { %5394 = vmatpush3.msra.mxu0 %v1185_v61  ;;  %v7511_v61 = vld [vmem:[%s7151_s3 + $0xf0] sm:$0xff] }
 0x15f   : > { %5395 = vmatprep.subr.mxu0 %v11556_v0  ;;  %s1001_s15 = scalar_lea.vmem %s12382_s7, %s7187_s27  ;;  %s13469_s27 = sld [smem:[#allocation30_spill]] }
 0x160   : > { %5396 = vmatpush3.msra.mxu0 %v1184_v1  ;;  %v7515_v1 = vld [vmem:[%s7151_s3 + $0xd8] sm:$0xff]  ;;  %s11476_s7 = scalar_lea.hbm %s13470_s21, %s5288_s24 }
 0x161   : > { %1344 = vmatprep.subr.mxu0 %v1283_v4  ;;  %v7519_v4 = vld [vmem:[%s7151_s3 + $0xd0] sm:$0xff] }
 0x165   : > { %p13471_p8 = scmp.ne.s32.totalorder %s13469_s27, 0 }
 0x1fd   : > { %v1085_v35 = vpop.f32.mrf.mxu0 }
 0x1fe   : > { %v1086_v36 = vadd.f32 %v5214_v34, %v1085_v35  ;;  %v7491_v34 = vld [vmem:[%s7151_s3 + $0x138] sm:$0xff]  ;;  %v7495_v35 = vld [vmem:[%s7151_s3 + $0x130] sm:$0xff] }
 0x1ff   : > { %v5329_v37 = vpop.f32.mrf.mxu0 }
 0x200   : > { %v1089_v38 = vmax.f32 %v1086_v36, 0.0  ;;  %v7499_v36 = vld [vmem:[%s7151_s3 + $0x118] sm:$0xff]  ;;  %v7503_v37 = vld [vmem:[%s7151_s3 + $0x110] sm:$0xff] }
 0x202   : > { %5363 = vmatmul.mubr.f32.vlgmr.msra.gmra.mxu1 %v1089_v38  ;;  %v7507_v38 = vld [vmem:[%s7151_s3 + $0xf8] sm:$0xff] }
 0x203   : > { %1668 = vmatpush1.msra.mxu1 %v7281_v39  ;;  %1731 = vmatprep.mubr.f32.mxu1 %v11556_v0 }
 0x204   : > { %1669 = vmatprep.subr.mxu1 %v7284_v40 }
 0x205   : > { %1670 = vmatpush1.msra.mxu1 %v7287_v41 }
 0x206   : > { %1671 = vmatprep.subr.mxu1 %v7291_v42 }
 0x207   : > { %1672 = vmatpush1.msra.mxu1 %v7296_v43 }
 0x208   : > { %1673 = vmatprep.subr.mxu1 %v7300_v44 }
 0x209   : > { %1674 = vmatpush1.msra.mxu1 %v7304_v45 }
 0x20a   : > { %1675 = vmatprep.subr.mxu1 %v7308_v46 }
 0x20b   : > { %1676 = vmatpush1.msra.mxu1 %v7312_v47 }
 0x20c   : > { %1677 = vmatprep.subr.mxu1 %v7316_v48 }
 0x20d   : > { %1678 = vmatpush1.msra.mxu1 %v7320_v49 }
 0x20e   : > { %1679 = vmatprep.subr.mxu1 %v7324_v50 }
 0x20f   : > { %1680 = vmatpush1.msra.mxu1 %v7328_v51 }
 0x210   : > { %1681 = vmatprep.subr.mxu1 %v7332_v52 }
 0x211   : > { %1682 = vmatpush1.msra.mxu1 %v7336_v53 }
 0x212   : > { %1683 = vmatprep.subr.mxu1 %v7340_v54 }
 0x213   : > { %1684 = vmatpush1.msra.mxu1 %v7344_v55 }
 0x214   : > { %1685 = vmatprep.subr.mxu1 %v7348_v56 }
 0x215   : > { %1686 = vmatpush1.msra.mxu1 %v7352_v57 }
 0x216   : > { %1687 = vmatprep.subr.mxu1 %v7356_v58 }
 0x217   : > { %1688 = vmatpush1.msra.mxu1 %v7362_v59 }
 0x218   : > { %1689 = vmatprep.subr.mxu1 %v7366_v60 }
 0x219   : > { %1690 = vmatpush1.msra.mxu1 %v7371_v62 }
 0x21a   : > { %1691 = vmatprep.subr.mxu1 %v7375_v63 }
 0x21b   : > { %1692 = vmatpush1.msra.mxu1 %v7382_v2 }
 0x21c   : > { %1693 = vmatprep.subr.mxu1 %v7391_v3 }
 0x21d   : > { %1694 = vmatpush1.msra.mxu1 %v7396_v5  ;;  %v7713_v5 = vld [vmem:[%s7159_s16 + $0xc8] sm:$0xff] }
 0x21e   : > { %1695 = vmatprep.subr.mxu1 %v7400_v6  ;;  %v7694_v6 = vld [vmem:[%s7159_s16 + $0x110] sm:$0xff]  ;;  %12290 = vst [vmem:[#allocation88_spill] sm:$0xff] %v7713_v5 }
 0x21f   : > { %1696 = vmatpush1.msra.mxu1 %v7404_v7  ;;  %v7577_v7 = vld [vmem:[%s7159_s16 + $0x1f8] sm:$0xff]  ;;  %12285 = vst [vmem:[#allocation83_spill] sm:$0xff] %v7694_v6 }
 0x220   : > { %1697 = vmatprep.subr.mxu1 %v7408_v8  ;;  %v7574_v8 = vld [vmem:[%s7159_s16 + $0x1e8] sm:$0xff]  ;;  %12255 = vst [vmem:[#allocation53_spill] sm:$0xff] %v7577_v7 }
 0x221   : > { %1698 = vmatpush1.msra.mxu1 %v7413_v9  ;;  %v7567_v9 = vld [vmem:[%s7151_s3 + $0x10] sm:$0xff]  ;;  %12254 = vst [vmem:[#allocation52_spill] sm:$0xff] %v7574_v8 }
 0x222   : > { %1732 = vmatmul.mubr.f32.vlgmr.msra.gmra.mxu1 %v7422_v10  ;;  %12253 = vst [vmem:[#allocation51_spill] sm:$0xff] %v7567_v9  ;;  %1858 = vmatprep.subr.mxu1 %v7574_v8  ;;  %v7601_v8 = vld [vmem:[%s7159_s16 + $0x1d0] sm:$0xff] }
 0x223   : > { %12261 = vst [vmem:[#allocation59_spill] sm:$0xff] %v7601_v8 }
 0x2c2   : > { %v1179_v12 = vpop.f32.mrf.mxu1 }
 0x2c3   : > { %v1180_v13 = vadd.f32 %v5216_v11, %v1179_v12  ;;  %v7523_v11 = vld [vmem:[%s7151_s3 + $0xb8] sm:$0xff]  ;;  %v7527_v12 = vld [vmem:[%s7151_s3 + $0xb0] sm:$0xff] }
 0x2c4   : > { %v5364_v14 = vpop.f32.mrf.mxu1 }
 0x2c5   : > { %v1183_v15 = vmax.f32 %v1180_v13, 0.0  ;;  %v7531_v13 = vld [vmem:[%s7151_s3 + $0x98] sm:$0xff]  ;;  %v7535_v14 = vld [vmem:[%s7151_s3 + $0x90] sm:$0xff] }
 0x2c6   : > { %12244 = vst [vmem:[#allocation42_spill] sm:$0xff] %v7531_v13  ;;  %12245 = vst [vmem:[#allocation43_spill] sm:$0xff] %v7535_v14 }
 0x2c7   : > { %5398 = vmatmul.mubr.f32.vlgmr.msra.gmra.mxu0 %v1183_v15  ;;  %v7539_v15 = vld [vmem:[%s7151_s3 + $0x78] sm:$0xff] }
 0x2c8   : > { %1345 = vmatpush1.msra.mxu0 %v1282_v16  ;;  %1378 = vmatprep.mubr.f32.mxu0 %v11556_v0  ;;  %12246 = vst [vmem:[#allocation44_spill] sm:$0xff] %v7539_v15  ;;  %v7543_v16 = vld [vmem:[%s7151_s3 + $0x70] sm:$0xff] }
 0x2c9   : > { %1421 = vmatprep.subr.mxu0 %v1285_v17  ;;  %12247 = vst [vmem:[#allocation45_spill] sm:$0xff] %v7543_v16  ;;  %v7547_v17 = vld [vmem:[%s7151_s3 + $0x58] sm:$0xff] }
 0x2ca   : > { %12248 = vst [vmem:[#allocation46_spill] sm:$0xff] %v7547_v17 }
 0x2cb   : > { %5218 = vmatmul.mubr.msk.f32.vlgmr.msra.gmra.mxu0 %vm1015_vm1, %v1280_v18 }
 0x2cc   : > { %1422 = vmatpush1.msra.mxu0 %v1284_v19  ;;  %1384 = vmatprep.mubr.f32.mxu0 %v11556_v0  ;;  %v7555_v19 = vld [vmem:[%s7151_s3 + $0x38] sm:$0xff] }
 0x2cd   : > { %1738 = vmatprep.subr.mxu0 %v7434_v20  ;;  %12250 = vst [vmem:[#allocation48_spill] sm:$0xff] %v7555_v19 }
 0x2cf   : > { %5219 = vmatmul.mubr.msk.f32.gmra.mxu0 %vm1015_vm1, %v1281_v22 }
 0x2d0   : > { %1455 = vmatprep.mubr.f32.mxu0 %v11556_v0 }
 0x2d3   : > { %5220 = vmatmul.mubr.msk.f32.vlgmr.msra.gmra.mxu0 %vm1015_vm1, %v1280_v18  ;;  %v7551_v18 = vld [vmem:[%s7151_s3 + $0x50] sm:$0xff] }
 0x2d4   : > { %1739 = vmatpush1.msra.mxu0 %v7445_v23  ;;  %1461 = vmatprep.mubr.f32.mxu0 %v11556_v0  ;;  %12249 = vst [vmem:[#allocation47_spill] sm:$0xff] %v7551_v18 }
 0x2d5   : > { %1740 = vmatprep.subr.mxu0 %v7448_v24 }
 0x2d6   : > { %1741 = vmatpush1.msra.mxu0 %v7452_v25 }
 0x2d7   : > { %1742 = vmatprep.subr.mxu0 %v7456_v26  ;;  %5221 = vmatmul.mubr.msk.f32.gmra.mxu0 %vm1015_vm1, %v1281_v22  ;;  %v7559_v22 = vld [vmem:[%s7151_s3 + $0x30] sm:$0xff] }
 0x2d8   : > { %1743 = vmatpush1.msra.mxu0 %v7461_v27  ;;  %1802 = vmatprep.mubr.f32.mxu0 %v11556_v0  ;;  %12251 = vst [vmem:[#allocation49_spill] sm:$0xff] %v7559_v22  ;;  %v7563_v0 = vld [vmem:[%s7151_s3 + $0x18] sm:$0xff] }
 0x2d9   : > { %1744 = vmatprep.subr.mxu0 %v7465_v28  ;;  %12252 = vst [vmem:[#allocation50_spill] sm:$0xff] %v7563_v0 }
 0x2da   : > { %1745 = vmatpush1.msra.mxu0 %v7469_v29 }
 0x2db   : > { %1746 = vmatprep.subr.mxu0 %v7474_v30 }
 0x2dc   : > { %1747 = vmatpush1.msra.mxu0 %v7479_v31 }
 0x2dd   : > { %1748 = vmatprep.subr.mxu0 %v7483_v32 }
 0x2de   : > { %1749 = vmatpush1.msra.mxu0 %v7487_v33 }
 0x2df   : > { %1750 = vmatprep.subr.mxu0 %v7491_v34 }
 0x2e0   : > { %1751 = vmatpush1.msra.mxu0 %v7495_v35 }
 0x2e1   : > { %1752 = vmatprep.subr.mxu0 %v7499_v36 }
 0x2e2   : > { %1753 = vmatpush1.msra.mxu0 %v7503_v37 }
 0x2e3   : > { %1754 = vmatprep.subr.mxu0 %v7507_v38 }
 0x2e4   : > { %1755 = vmatpush1.msra.mxu0 %v7511_v61 }
 0x2e5   : > { %1756 = vmatprep.subr.mxu0 %v7515_v1 }
 0x2e6   : > { %1757 = vmatpush1.msra.mxu0 %v7519_v4 }
 0x2e7   : > { %1758 = vmatprep.subr.mxu0 %v7523_v11 }
 0x2e8   : > { %1759 = vmatpush1.msra.mxu0 %v7527_v12 }
 0x2e9   : > { %1760 = vmatprep.subr.mxu0 %v7531_v13 }
 0x2ea   : > { %1761 = vmatpush1.msra.mxu0 %v7535_v14 }
 0x2eb   : > { %1762 = vmatprep.subr.mxu0 %v7539_v15 }
 0x2ec   : > { %1763 = vmatpush1.msra.mxu0 %v7543_v16  ;;  %v1733_v16 = vpop.f32.mrf.mxu1 }
 0x2ed   : > { %1764 = vmatprep.subr.mxu0 %v7547_v17 }
 0x2ee   : > { %1765 = vmatpush1.msra.mxu0 %v7551_v18  ;;  %v7702_v18 = vld [vmem:[%s7159_s16 + $0xf8] sm:$0xff] }
 0x2ef   : > { %1766 = vmatprep.subr.mxu0 %v7555_v19  ;;  %v7582_v19 = vld [vmem:[%s7159_s16 + $0x1e0] sm:$0xff]  ;;  %12287 = vst [vmem:[#allocation85_spill] sm:$0xff] %v7702_v18 }
 0x2f0   : > { %1767 = vmatpush1.msra.mxu0 %v7559_v22  ;;  %12256 = vst [vmem:[#allocation54_spill] sm:$0xff] %v7582_v19  ;;  %v7585_v22 = vld [vmem:[%s7159_s16 + $0x1f0] sm:$0xff]  ;;  %1859 = vmatpush1.msra.mxu1 %v7582_v19  ;;  %v7609_v19 = vld [vmem:[%s7159_s16 + $0x1b8] sm:$0xff] }
 0x2f1   : > { %1768 = vmatprep.subr.mxu0 %v7563_v0  ;;  %12257 = vst [vmem:[#allocation55_spill] sm:$0xff] %v7585_v22  ;;  %12263 = vst [vmem:[#allocation61_spill] sm:$0xff] %v7609_v19  ;;  %v7683_v0 = vld [vmem:[%s7159_s16 + $0x108] sm:$0xff] }
 0x2f2   : > { %1769 = vmatpush1.msra.mxu0 %v7567_v9  ;;  %v7593_v9 = vld [vmem:[%s7159_s16 + $0x1d8] sm:$0xff]  ;;  %12282 = vst [vmem:[#allocation80_spill] sm:$0xff] %v7683_v0 }
 0x2f3   : > { %1803 = vmatmul.mubr.f32.vlgmr.msra.gmra.mxu0 %v7422_v10  ;;  %1929 = vmatprep.subr.mxu0 %v7577_v7  ;;  %v7590_v10 = vld [vmem:[%s7159_s16 + $0x1c8] sm:$0xff]  ;;  %12259 = vst [vmem:[#allocation57_spill] sm:$0xff] %v7593_v9  ;;  %v7598_v7 = vld [vmem:[%s7159_s16 + $0x1c0] sm:$0xff] }
 0x2f4   : > { %1930 = vmatpush1.msra.mxu0 %v7585_v22  ;;  %12258 = vst [vmem:[#allocation56_spill] sm:$0xff] %v7590_v10  ;;  %1860 = vmatprep.subr.mxu1 %v7590_v10  ;;  %12260 = vst [vmem:[#allocation58_spill] sm:$0xff] %v7598_v7  ;;  %v7606_v22 = vld [vmem:[%s7159_s16 + $0x1a8] sm:$0xff]  ;;  %v7617_v10 = vld [vmem:[%s7159_s16 + $0x1b0] sm:$0xff] }
 0x2f5   : > { %1931 = vmatprep.subr.mxu0 %v7593_v9  ;;  %1861 = vmatpush1.msra.mxu1 %v7598_v7  ;;  %12262 = vst [vmem:[#allocation60_spill] sm:$0xff] %v7606_v22  ;;  %v7614_v9 = vld [vmem:[%s7159_s16 + $0x1a0] sm:$0xff]  ;;  %12265 = vst [vmem:[#allocation63_spill] sm:$0xff] %v7617_v10  ;;  %v7625_v7 = vld [vmem:[%s7159_s16 + $0x198] sm:$0xff] }
 0x2f6   : > { %1932 = vmatpush1.msra.mxu0 %v7601_v8  ;;  %1862 = vmatprep.subr.mxu1 %v7606_v22  ;;  %12264 = vst [vmem:[#allocation62_spill] sm:$0xff] %v7614_v9  ;;  %v7622_v8 = vld [vmem:[%s7159_s16 + $0x188] sm:$0xff]  ;;  %12267 = vst [vmem:[#allocation65_spill] sm:$0xff] %v7625_v7  ;;  %v7633_v22 = vld [vmem:[%s7159_s16 + $0x190] sm:$0xff] }
 0x2f7   : > { %1933 = vmatprep.subr.mxu0 %v7609_v19  ;;  %1863 = vmatpush1.msra.mxu1 %v7614_v9  ;;  %12266 = vst [vmem:[#allocation64_spill] sm:$0xff] %v7622_v8  ;;  %v7630_v19 = vld [vmem:[%s7159_s16 + $0x180] sm:$0xff]  ;;  %12269 = vst [vmem:[#allocation67_spill] sm:$0xff] %v7633_v22  ;;  %v7641_v9 = vld [vmem:[%s7159_s16 + $0x178] sm:$0xff] }
 0x2f8   : > { %1934 = vmatpush1.msra.mxu0 %v7617_v10  ;;  %1864 = vmatprep.subr.mxu1 %v7622_v8  ;;  %12268 = vst [vmem:[#allocation66_spill] sm:$0xff] %v7630_v19  ;;  %v7638_v10 = vld [vmem:[%s7159_s16 + $0x168] sm:$0xff]  ;;  %12271 = vst [vmem:[#allocation69_spill] sm:$0xff] %v7641_v9  ;;  %v7649_v8 = vld [vmem:[%s7159_s16 + $0x170] sm:$0xff] }
 0x2f9   : > { %1935 = vmatprep.subr.mxu0 %v7625_v7  ;;  %1865 = vmatpush1.msra.mxu1 %v7630_v19  ;;  %12270 = vst [vmem:[#allocation68_spill] sm:$0xff] %v7638_v10  ;;  %v7646_v7 = vld [vmem:[%s7159_s16 + $0x160] sm:$0xff]  ;;  %12273 = vst [vmem:[#allocation71_spill] sm:$0xff] %v7649_v8  ;;  %v7657_v19 = vld [vmem:[%s7159_s16 + $0x158] sm:$0xff] }
 0x2fa   : > { %1936 = vmatpush1.msra.mxu0 %v7633_v22  ;;  %1866 = vmatprep.subr.mxu1 %v7638_v10  ;;  %12272 = vst [vmem:[#allocation70_spill] sm:$0xff] %v7646_v7  ;;  %v7654_v22 = vld [vmem:[%s7159_s16 + $0x148] sm:$0xff]  ;;  %12275 = vst [vmem:[#allocation73_spill] sm:$0xff] %v7657_v19  ;;  %v7665_v10 = vld [vmem:[%s7159_s16 + $0x150] sm:$0xff] }
 0x2fb   : > { %1937 = vmatprep.subr.mxu0 %v7641_v9  ;;  %1867 = vmatpush1.msra.mxu1 %v7646_v7  ;;  %12274 = vst [vmem:[#allocation72_spill] sm:$0xff] %v7654_v22  ;;  %v7662_v9 = vld [vmem:[%s7159_s16 + $0x140] sm:$0xff]  ;;  %12277 = vst [vmem:[#allocation75_spill] sm:$0xff] %v7665_v10  ;;  %v7673_v7 = vld [vmem:[%s7159_s16 + $0x138] sm:$0xff] }
 0x2fc   : > { %1938 = vmatpush1.msra.mxu0 %v7649_v8  ;;  %1868 = vmatprep.subr.mxu1 %v7654_v22  ;;  %12276 = vst [vmem:[#allocation74_spill] sm:$0xff] %v7662_v9  ;;  %v7670_v8 = vld [vmem:[%s7159_s16 + $0x128] sm:$0xff]  ;;  %12279 = vst [vmem:[#allocation77_spill] sm:$0xff] %v7673_v7  ;;  %v7677_v22 = vld [vmem:[%s7159_s16 + $0x120] sm:$0xff] }
 0x2fd   : > { %1939 = vmatprep.subr.mxu0 %v7657_v19  ;;  %1869 = vmatpush1.msra.mxu1 %v7662_v9  ;;  %12278 = vst [vmem:[#allocation76_spill] sm:$0xff] %v7670_v8  ;;  %12280 = vst [vmem:[#allocation78_spill] sm:$0xff] %v7677_v22  ;;  %v7680_v19 = vld [vmem:[%s7159_s16 + $0x130] sm:$0xff]  ;;  %v7691_v9 = vld [vmem:[%s7159_s16 + $0x100] sm:$0xff] }
 0x2fe   : > { %1940 = vmatpush1.msra.mxu0 %v7665_v10  ;;  %1870 = vmatprep.subr.mxu1 %v7670_v8  ;;  %12281 = vst [vmem:[#allocation79_spill] sm:$0xff] %v7680_v19  ;;  %v7688_v10 = vld [vmem:[%s7159_s16 + $0x118] sm:$0xff]  ;;  %12284 = vst [vmem:[#allocation82_spill] sm:$0xff] %v7691_v9  ;;  %v7699_v8 = vld [vmem:[%s7159_s16 + $0xe8] sm:$0xff] }
 0x2ff   : > { %1941 = vmatprep.subr.mxu0 %v7673_v7  ;;  %1871 = vmatpush1.msra.mxu1 %v7677_v22  ;;  %12283 = vst [vmem:[#allocation81_spill] sm:$0xff] %v7688_v10  ;;  %12286 = vst [vmem:[#allocation84_spill] sm:$0xff] %v7699_v8  ;;  %v7705_v7 = vld [vmem:[%s7159_s16 + $0xe0] sm:$0xff]  ;;  %v7710_v22 = vld [vmem:[%s7159_s16 + $0xf0] sm:$0xff] }
 0x300   : > { %1942 = vmatpush1.msra.mxu0 %v7680_v19  ;;  %1872 = vmatprep.subr.mxu1 %v7683_v0  ;;  %12288 = vst [vmem:[#allocation86_spill] sm:$0xff] %v7705_v7  ;;  %12289 = vst [vmem:[#allocation87_spill] sm:$0xff] %v7710_v22  ;;  %v7718_v0 = vld [vmem:[%s7159_s16 + $0xd8] sm:$0xff]  ;;  %v7721_v19 = vld [vmem:[%s7159_s16 + $0xc0] sm:$0xff] }
 0x301   : > { %1943 = vmatprep.subr.mxu0 %v7688_v10  ;;  %1873 = vmatpush1.msra.mxu1 %v7691_v9  ;;  %12291 = vst [vmem:[#allocation89_spill] sm:$0xff] %v7718_v0  ;;  %12292 = vst [vmem:[#allocation90_spill] sm:$0xff] %v7721_v19  ;;  %v7726_v9 = vld [vmem:[%s7159_s16 + $0xd0] sm:$0xff]  ;;  %v7729_v10 = vld [vmem:[%s7159_s16 + $0xa8] sm:$0xff] }
 0x302   : > { %1944 = vmatpush1.msra.mxu0 %v7694_v6  ;;  %1874 = vmatprep.subr.mxu1 %v7699_v8  ;;  %12293 = vst [vmem:[#allocation91_spill] sm:$0xff] %v7726_v9  ;;  %12294 = vst [vmem:[#allocation92_spill] sm:$0xff] %v7729_v10  ;;  %v7734_v8 = vld [vmem:[%s7159_s16 + $0xb8] sm:$0xff]  ;;  %v7737_v6 = vld [vmem:[%s7159_s16 + $0xa0] sm:$0xff] }
 0x303   : > { %1945 = vmatprep.subr.mxu0 %v7702_v18  ;;  %1875 = vmatpush1.msra.mxu1 %v7705_v7  ;;  %12295 = vst [vmem:[#allocation93_spill] sm:$0xff] %v7734_v8  ;;  %12296 = vst [vmem:[#allocation94_spill] sm:$0xff] %v7737_v6  ;;  %v7742_v7 = vld [vmem:[%s7159_s16 + $0xb0] sm:$0xff]  ;;  %v7745_v18 = vld [vmem:[%s7159_s16 + $0x88] sm:$0xff] }
 0x304   : > { %1946 = vmatpush1.msra.mxu0 %v7710_v22  ;;  %1876 = vmatprep.subr.mxu1 %v7713_v5  ;;  %12297 = vst [vmem:[#allocation95_spill] sm:$0xff] %v7742_v7  ;;  %12298 = vst [vmem:[#allocation96_spill] sm:$0xff] %v7745_v18  ;;  %v7750_v5 = vld [vmem:[%s7159_s16 + $0x98] sm:$0xff]  ;;  %v7753_v22 = vld [vmem:[%s7159_s16 + $0x80] sm:$0xff] }
 0x305   : > { %1947 = vmatprep.subr.mxu0 %v7718_v0  ;;  %1877 = vmatpush1.msra.mxu1 %v7721_v19  ;;  %12299 = vst [vmem:[#allocation97_spill] sm:$0xff] %v7750_v5  ;;  %12300 = vst [vmem:[#allocation98_spill] sm:$0xff] %v7753_v22  ;;  %v7758_v19 = vld [vmem:[%s7159_s16 + $0x90] sm:$0xff]  ;;  %v7761_v0 = vld [vmem:[%s7159_s16 + $0x68] sm:$0xff] }
 0x306   : > { %1948 = vmatpush1.msra.mxu0 %v7726_v9  ;;  %1878 = vmatprep.subr.mxu1 %v7729_v10  ;;  %12301 = vst [vmem:[#allocation99_spill] sm:$0xff] %v7758_v19  ;;  %12302 = vst [vmem:[#allocation100_spill] sm:$0xff] %v7761_v0  ;;  %v7766_v10 = vld [vmem:[%s7159_s16 + $0x78] sm:$0xff]  ;;  %v7769_v9 = vld [vmem:[%s7159_s16 + $0x60] sm:$0xff] }
 0x307   : > { %1949 = vmatprep.subr.mxu0 %v7734_v8  ;;  %1879 = vmatpush1.msra.mxu1 %v7737_v6  ;;  %12303 = vst [vmem:[#allocation101_spill] sm:$0xff] %v7766_v10  ;;  %12304 = vst [vmem:[#allocation102_spill] sm:$0xff] %v7769_v9  ;;  %v7774_v6 = vld [vmem:[%s7159_s16 + $0x70] sm:$0xff]  ;;  %v8021_v8 = vld [vmem:[%s7159_s16 + $0x278] sm:$0xff] }
 0x308   : > { %1950 = vmatpush1.msra.mxu0 %v7742_v7  ;;  %1880 = vmatprep.subr.mxu1 %v7745_v18  ;;  %12305 = vst [vmem:[#allocation103_spill] sm:$0xff] %v7774_v6  ;;  %v7781_v18 = vld [vmem:[%s7159_s16 + $0x48] sm:$0xff]  ;;  %v7784_v7 = vld [vmem:[%s7159_s16 + $0x58] sm:$0xff]  ;;  %12367 = vst [vmem:[#allocation165_spill] sm:$0xff] %v8021_v8 }
 0x309   : > { %1951 = vmatprep.subr.mxu0 %v7750_v5  ;;  %1881 = vmatpush1.msra.mxu1 %v7753_v22  ;;  %12306 = vst [vmem:[#allocation104_spill] sm:$0xff] %v7781_v18  ;;  %12307 = vst [vmem:[#allocation105_spill] sm:$0xff] %v7784_v7  ;;  %v7789_v22 = vld [vmem:[%s7159_s16 + $0x40] sm:$0xff] }
 0x30a   : > { %1952 = vmatpush1.msra.mxu0 %v7758_v19  ;;  %1882 = vmatprep.subr.mxu1 %v7761_v0  ;;  %12308 = vst [vmem:[#allocation106_spill] sm:$0xff] %v7789_v22  ;;  %v7792_v19 = vld [vmem:[%s7159_s16 + $0x50] sm:$0xff]  ;;  %v8010_v5 = vld [vmem:[%s7159_s16 + $0x280] sm:$0xff] }
 0x30b   : > { %1953 = vmatprep.subr.mxu0 %v7766_v10  ;;  %1883 = vmatpush1.msra.mxu1 %v7769_v9  ;;  %12309 = vst [vmem:[#allocation107_spill] sm:$0xff] %v7792_v19  ;;  %v7798_v9 = vld [vmem:[%s7159_s16 + $0x28] sm:$0xff]  ;;  %v7801_v10 = vld [vmem:[%s7159_s16 + $0x38] sm:$0xff]  ;;  %v7999_v0 = vld [vmem:[%s7159_s16 + $0x2b0] sm:$0xff] }
 0x30c   : > { %1954 = vmatpush1.msra.mxu0 %v7774_v6  ;;  %1884 = vmatprep.subr.mxu1 %v7781_v18  ;;  %12310 = vst [vmem:[#allocation108_spill] sm:$0xff] %v7798_v9  ;;  %12311 = vst [vmem:[#allocation109_spill] sm:$0xff] %v7801_v10  ;;  %v7806_v18 = vld [vmem:[%s7159_s16 + $0x20] sm:$0xff]  ;;  %v7809_v6 = vld [vmem:[%s7159_s16 + $0x30] sm:$0xff] }
 0x30d   : > { %1955 = vmatprep.subr.mxu0 %v7784_v7  ;;  %1885 = vmatpush1.msra.mxu1 %v7789_v22  ;;  %12312 = vst [vmem:[#allocation110_spill] sm:$0xff] %v7806_v18  ;;  %12313 = vst [vmem:[#allocation111_spill] sm:$0xff] %v7809_v6  ;;  %v7817_v22 = vld [vmem:[%s7159_s16 + $0x18] sm:$0xff]  ;;  %v7996_v7 = vld [vmem:[%s7159_s16 + $0x2a0] sm:$0xff] }
 0x30e   : > { %1956 = vmatpush1.msra.mxu0 %v7792_v19  ;;  %1886 = vmatprep.subr.mxu1 %v7798_v9  ;;  %v7814_v19 = vld [vmem:[%s7159_s16 + $0x8] sm:$0xff]  ;;  %12315 = vst [vmem:[#allocation113_spill] sm:$0xff] %v7817_v22  ;;  %v7825_v9 = vld [vmem:[%s7159_s16 + $0x10] sm:$0xff]  ;;  %12360 = vst [vmem:[#allocation158_spill] sm:$0xff] %v7996_v7 }
 0x30f   : > { %1957 = vmatprep.subr.mxu0 %v7801_v10  ;;  %1887 = vmatpush1.msra.mxu1 %v7806_v18  ;;  %12314 = vst [vmem:[#allocation112_spill] sm:$0xff] %v7814_v19  ;;  %v7822_v10 = vld [vmem:[%s7159_s16] sm:$0xff]  ;;  %12317 = vst [vmem:[#allocation115_spill] sm:$0xff] %v7825_v9  ;;  %v7833_v18 = vld [vmem:[%s7159_s16 + $0x3f8] sm:$0xff] }
 0x310   : > { %1958 = vmatpush1.msra.mxu0 %v7809_v6  ;;  %1888 = vmatprep.subr.mxu1 %v7814_v19  ;;  %12316 = vst [vmem:[#allocation114_spill] sm:$0xff] %v7822_v10  ;;  %v7830_v6 = vld [vmem:[%s7159_s16 + $0x3e8] sm:$0xff]  ;;  %12319 = vst [vmem:[#allocation117_spill] sm:$0xff] %v7833_v18  ;;  %v7841_v19 = vld [vmem:[%s7159_s16 + $0x3f0] sm:$0xff] }
 0x311   : > { %1959 = vmatprep.subr.mxu0 %v7817_v22  ;;  %1889 = vmatpush1.msra.mxu1 %v7822_v10  ;;  %12318 = vst [vmem:[#allocation116_spill] sm:$0xff] %v7830_v6  ;;  %v7838_v22 = vld [vmem:[%s7159_s16 + $0x3e0] sm:$0xff]  ;;  %12321 = vst [vmem:[#allocation119_spill] sm:$0xff] %v7841_v19  ;;  %v7849_v10 = vld [vmem:[%s7159_s16 + $0x3d8] sm:$0xff] }
 0x312   : > { %1960 = vmatpush1.msra.mxu0 %v7825_v9  ;;  %1890 = vmatprep.subr.mxu1 %v7830_v6  ;;  %12320 = vst [vmem:[#allocation118_spill] sm:$0xff] %v7838_v22  ;;  %v7846_v9 = vld [vmem:[%s7159_s16 + $0x3c8] sm:$0xff]  ;;  %12323 = vst [vmem:[#allocation121_spill] sm:$0xff] %v7849_v10  ;;  %v7857_v6 = vld [vmem:[%s7159_s16 + $0x3d0] sm:$0xff] }
 0x313   : > { %1961 = vmatprep.subr.mxu0 %v7833_v18  ;;  %1891 = vmatpush2.msra.mxu1 %v7838_v22  ;;  %12322 = vst [vmem:[#allocation120_spill] sm:$0xff] %v7846_v9  ;;  %v7854_v18 = vld [vmem:[%s7159_s16 + $0x3c0] sm:$0xff]  ;;  %12325 = vst [vmem:[#allocation123_spill] sm:$0xff] %v7857_v6  ;;  %v7865_v22 = vld [vmem:[%s7159_s16 + $0x3b8] sm:$0xff] }
 0x314   : > { %1962 = vmatpush2.msra.mxu0 %v7841_v19  ;;  %1892 = vmatprep.subr.mxu1 %v7846_v9  ;;  %12324 = vst [vmem:[#allocation122_spill] sm:$0xff] %v7854_v18  ;;  %v7862_v19 = vld [vmem:[%s7159_s16 + $0x3a8] sm:$0xff]  ;;  %12327 = vst [vmem:[#allocation125_spill] sm:$0xff] %v7865_v22  ;;  %v7873_v9 = vld [vmem:[%s7159_s16 + $0x3b0] sm:$0xff] }
 0x315   : > { %1963 = vmatprep.subr.mxu0 %v7849_v10  ;;  %1893 = vmatpush2.msra.mxu1 %v7854_v18  ;;  %12326 = vst [vmem:[#allocation124_spill] sm:$0xff] %v7862_v19  ;;  %v7870_v10 = vld [vmem:[%s7159_s16 + $0x3a0] sm:$0xff]  ;;  %12329 = vst [vmem:[#allocation127_spill] sm:$0xff] %v7873_v9  ;;  %v7881_v18 = vld [vmem:[%s7159_s16 + $0x398] sm:$0xff] }
 0x316   : > { %1964 = vmatpush2.msra.mxu0 %v7857_v6  ;;  %1894 = vmatprep.subr.mxu1 %v7862_v19  ;;  %12328 = vst [vmem:[#allocation126_spill] sm:$0xff] %v7870_v10  ;;  %v7878_v6 = vld [vmem:[%s7159_s16 + $0x388] sm:$0xff]  ;;  %12331 = vst [vmem:[#allocation129_spill] sm:$0xff] %v7881_v18  ;;  %v7889_v19 = vld [vmem:[%s7159_s16 + $0x390] sm:$0xff] }
 0x317   : > { %1965 = vmatprep.subr.mxu0 %v7865_v22  ;;  %1895 = vmatpush2.msra.mxu1 %v7870_v10  ;;  %12330 = vst [vmem:[#allocation128_spill] sm:$0xff] %v7878_v6  ;;  %v7886_v22 = vld [vmem:[%s7159_s16 + $0x380] sm:$0xff]  ;;  %12333 = vst [vmem:[#allocation131_spill] sm:$0xff] %v7889_v19  ;;  %v7897_v10 = vld [vmem:[%s7159_s16 + $0x378] sm:$0xff] }
 0x318   : > { %1966 = vmatpush2.msra.mxu0 %v7873_v9  ;;  %1896 = vmatprep.subr.mxu1 %v7878_v6  ;;  %12332 = vst [vmem:[#allocation130_spill] sm:$0xff] %v7886_v22  ;;  %v7894_v9 = vld [vmem:[%s7159_s16 + $0x368] sm:$0xff]  ;;  %12335 = vst [vmem:[#allocation133_spill] sm:$0xff] %v7897_v10  ;;  %v7905_v6 = vld [vmem:[%s7159_s16 + $0x370] sm:$0xff] }
 0x319   : > { %1967 = vmatprep.subr.mxu0 %v7881_v18  ;;  %1897 = vmatpush2.msra.mxu1 %v7886_v22  ;;  %12334 = vst [vmem:[#allocation132_spill] sm:$0xff] %v7894_v9  ;;  %v7902_v18 = vld [vmem:[%s7159_s16 + $0x360] sm:$0xff]  ;;  %12337 = vst [vmem:[#allocation135_spill] sm:$0xff] %v7905_v6  ;;  %v7913_v22 = vld [vmem:[%s7159_s16 + $0x358] sm:$0xff] }
 0x31a   : > { %1968 = vmatpush2.msra.mxu0 %v7889_v19  ;;  %1898 = vmatprep.subr.mxu1 %v7894_v9  ;;  %12336 = vst [vmem:[#allocation134_spill] sm:$0xff] %v7902_v18  ;;  %v7910_v19 = vld [vmem:[%s7159_s16 + $0x348] sm:$0xff]  ;;  %12339 = vst [vmem:[#allocation137_spill] sm:$0xff] %v7913_v22  ;;  %v7921_v9 = vld [vmem:[%s7159_s16 + $0x350] sm:$0xff] }
 0x31b   : > { %1969 = vmatprep.subr.mxu0 %v7897_v10  ;;  %1899 = vmatpush2.msra.mxu1 %v7902_v18  ;;  %12338 = vst [vmem:[#allocation136_spill] sm:$0xff] %v7910_v19  ;;  %v7918_v10 = vld [vmem:[%s7159_s16 + $0x340] sm:$0xff]  ;;  %12341 = vst [vmem:[#allocation139_spill] sm:$0xff] %v7921_v9  ;;  %v7929_v18 = vld [vmem:[%s7159_s16 + $0x338] sm:$0xff] }
 0x31c   : > { %1970 = vmatpush2.msra.mxu0 %v7905_v6  ;;  %1900 = vmatprep.subr.mxu1 %v7910_v19  ;;  %12340 = vst [vmem:[#allocation138_spill] sm:$0xff] %v7918_v10  ;;  %v7926_v6 = vld [vmem:[%s7159_s16 + $0x328] sm:$0xff]  ;;  %12343 = vst [vmem:[#allocation141_spill] sm:$0xff] %v7929_v18  ;;  %v7937_v19 = vld [vmem:[%s7159_s16 + $0x330] sm:$0xff] }
 0x31d   : > { %1971 = vmatprep.subr.mxu0 %v7913_v22  ;;  %1901 = vmatpush2.msra.mxu1 %v7918_v10  ;;  %12342 = vst [vmem:[#allocation140_spill] sm:$0xff] %v7926_v6  ;;  %v7934_v22 = vld [vmem:[%s7159_s16 + $0x320] sm:$0xff]  ;;  %12345 = vst [vmem:[#allocation143_spill] sm:$0xff] %v7937_v19  ;;  %v7945_v10 = vld [vmem:[%s7159_s16 + $0x318] sm:$0xff] }
 0x31e   : > { %1972 = vmatpush2.msra.mxu0 %v7921_v9  ;;  %1902 = vmatprep.subr.mxu1 %v7926_v6  ;;  %12344 = vst [vmem:[#allocation142_spill] sm:$0xff] %v7934_v22  ;;  %v7942_v9 = vld [vmem:[%s7159_s16 + $0x308] sm:$0xff]  ;;  %12347 = vst [vmem:[#allocation145_spill] sm:$0xff] %v7945_v10  ;;  %v7953_v6 = vld [vmem:[%s7159_s16 + $0x310] sm:$0xff] }
 0x31f   : > { %1973 = vmatprep.subr.mxu0 %v7929_v18  ;;  %1903 = vmatpush2.msra.mxu1 %v7934_v22  ;;  %12346 = vst [vmem:[#allocation144_spill] sm:$0xff] %v7942_v9  ;;  %v7950_v18 = vld [vmem:[%s7159_s16 + $0x300] sm:$0xff]  ;;  %12349 = vst [vmem:[#allocation147_spill] sm:$0xff] %v7953_v6  ;;  %v7961_v22 = vld [vmem:[%s7159_s16 + $0x2f8] sm:$0xff] }
 0x320   : > { %1974 = vmatpush2.msra.mxu0 %v7937_v19  ;;  %1904 = vmatprep.subr.mxu1 %v7942_v9  ;;  %12348 = vst [vmem:[#allocation146_spill] sm:$0xff] %v7950_v18  ;;  %v7958_v19 = vld [vmem:[%s7159_s16 + $0x2e8] sm:$0xff]  ;;  %12351 = vst [vmem:[#allocation149_spill] sm:$0xff] %v7961_v22  ;;  %v7969_v9 = vld [vmem:[%s7159_s16 + $0x2f0] sm:$0xff] }
 0x321   : > { %1975 = vmatprep.subr.mxu0 %v7945_v10  ;;  %1905 = vmatpush2.msra.mxu1 %v7950_v18  ;;  %12350 = vst [vmem:[#allocation148_spill] sm:$0xff] %v7958_v19  ;;  %v7966_v10 = vld [vmem:[%s7159_s16 + $0x2e0] sm:$0xff]  ;;  %12353 = vst [vmem:[#allocation151_spill] sm:$0xff] %v7969_v9  ;;  %v7977_v18 = vld [vmem:[%s7159_s16 + $0x2d8] sm:$0xff] }
 0x322   : > { %1976 = vmatpush2.msra.mxu0 %v7953_v6  ;;  %1906 = vmatprep.subr.mxu1 %v7958_v19  ;;  %12352 = vst [vmem:[#allocation150_spill] sm:$0xff] %v7966_v10  ;;  %v7974_v6 = vld [vmem:[%s7159_s16 + $0x2c8] sm:$0xff]  ;;  %12355 = vst [vmem:[#allocation153_spill] sm:$0xff] %v7977_v18  ;;  %v7980_v19 = vld [vmem:[%s7159_s16 + $0x2c0] sm:$0xff] }
 0x323   : > { %1977 = vmatprep.subr.mxu0 %v7961_v22  ;;  %1907 = vmatpush2.msra.mxu1 %v7966_v10  ;;  %12354 = vst [vmem:[#allocation152_spill] sm:$0xff] %v7974_v6  ;;  %12356 = vst [vmem:[#allocation154_spill] sm:$0xff] %v7980_v19  ;;  %v7985_v22 = vld [vmem:[%s7159_s16 + $0x2d0] sm:$0xff]  ;;  %v7988_v10 = vld [vmem:[%s7159_s16 + $0x2a8] sm:$0xff] }
 0x324   : > { %1978 = vmatpush2.msra.mxu0 %v7969_v9  ;;  %1908 = vmatprep.subr.mxu1 %v7974_v6  ;;  %12357 = vst [vmem:[#allocation155_spill] sm:$0xff] %v7985_v22  ;;  %12358 = vst [vmem:[#allocation156_spill] sm:$0xff] %v7988_v10  ;;  %v7991_v9 = vld [vmem:[%s7159_s16 + $0x2b8] sm:$0xff]  ;;  %v8002_v6 = vld [vmem:[%s7159_s16 + $0x288] sm:$0xff] }
 0x325   : > { %1979 = vmatprep.subr.mxu0 %v7977_v18  ;;  %12359 = vst [vmem:[#allocation157_spill] sm:$0xff] %v7991_v9  ;;  %1909 = vmatpush2.msra.mxu1 %v7980_v19  ;;  %12361 = vst [vmem:[#allocation159_spill] sm:$0xff] %v7999_v0  ;;  %v8007_v18 = vld [vmem:[%s7159_s16 + $0x298] sm:$0xff]  ;;  %v8013_v19 = vld [vmem:[%s7159_s16 + $0x290] sm:$0xff] }
 0x326   : > { %1980 = vmatpush2.msra.mxu0 %v7985_v22  ;;  %12362 = vst [vmem:[#allocation160_spill] sm:$0xff] %v8002_v6  ;;  %1910 = vmatprep.subr.mxu1 %v7988_v10  ;;  %12363 = vst [vmem:[#allocation161_spill] sm:$0xff] %v8007_v18  ;;  %v8018_v22 = vld [vmem:[%s7159_s16 + $0x268] sm:$0xff]  ;;  %v8029_v10 = vld [vmem:[%s7159_s16 + $0x270] sm:$0xff] }
 0x327   : > { %1981 = vmatprep.subr.mxu0 %v7991_v9  ;;  %12364 = vst [vmem:[#allocation162_spill] sm:$0xff] %v8010_v5  ;;  %12365 = vst [vmem:[#allocation163_spill] sm:$0xff] %v8013_v19  ;;  %1911 = vmatpush2.msra.mxu1 %v7996_v7  ;;  %v8026_v9 = vld [vmem:[%s7159_s16 + $0x260] sm:$0xff]  ;;  %v8037_v7 = vld [vmem:[%s7159_s16 + $0x258] sm:$0xff] }
 0x328   : > { %1982 = vmatpush2.msra.mxu0 %v7999_v0  ;;  %12366 = vst [vmem:[#allocation164_spill] sm:$0xff] %v8018_v22  ;;  %1912 = vmatprep.subr.mxu1 %v8002_v6  ;;  %12368 = vst [vmem:[#allocation166_spill] sm:$0xff] %v8026_v9  ;;  %v8034_v0 = vld [vmem:[%s7159_s16 + $0x248] sm:$0xff]  ;;  %v8045_v6 = vld [vmem:[%s7159_s16 + $0x250] sm:$0xff] }
 0x329   : > { %1983 = vmatprep.subr.mxu0 %v8007_v18  ;;  %12369 = vst [vmem:[#allocation167_spill] sm:$0xff] %v8029_v10  ;;  %1913 = vmatpush2.msra.mxu1 %v8010_v5  ;;  %12370 = vst [vmem:[#allocation168_spill] sm:$0xff] %v8034_v0  ;;  %v8042_v18 = vld [vmem:[%s7159_s16 + $0x240] sm:$0xff]  ;;  %v8053_v5 = vld [vmem:[%s7159_s16 + $0x238] sm:$0xff] }
 0x32a   : > { %1984 = vmatpush2.msra.mxu0 %v8013_v19  ;;  %12371 = vst [vmem:[#allocation169_spill] sm:$0xff] %v8037_v7  ;;  %1914 = vmatprep.subr.mxu1 %v8018_v22  ;;  %12372 = vst [vmem:[#allocation170_spill] sm:$0xff] %v8042_v18  ;;  %v8050_v19 = vld [vmem:[%s7159_s16 + $0x228] sm:$0xff]  ;;  %v8061_v22 = vld [vmem:[%s7159_s16 + $0x230] sm:$0xff] }
 0x32b   : > { %1985 = vmatprep.subr.mxu0 %v8021_v8  ;;  %12373 = vst [vmem:[#allocation171_spill] sm:$0xff] %v8045_v6  ;;  %1915 = vmatpush2.msra.mxu1 %v8026_v9  ;;  %12374 = vst [vmem:[#allocation172_spill] sm:$0xff] %v8050_v19  ;;  %v8058_v8 = vld [vmem:[%s7159_s16 + $0x220] sm:$0xff]  ;;  %v8066_v9 = vld [vmem:[%s7159_s16 + $0x208] sm:$0xff] }
 0x32c   : > { %1986 = vmatpush2.msra.mxu0 %v8029_v10  ;;  %12375 = vst [vmem:[#allocation173_spill] sm:$0xff] %v8053_v5  ;;  %1916 = vmatprep.subr.mxu1 %v8034_v0  ;;  %12376 = vst [vmem:[#allocation174_spill] sm:$0xff] %v8058_v8  ;;  %v8069_v10 = vld [vmem:[%s7159_s16 + $0x218] sm:$0xff]  ;;  %v8074_v0 = vld [vmem:[%s7159_s16 + $0x200] sm:$0xff] }
 0x32d   : > { %1987 = vmatprep.subr.mxu0 %v8037_v7  ;;  %12377 = vst [vmem:[#allocation175_spill] sm:$0xff] %v8061_v22  ;;  %1917 = vmatpush2.msra.mxu1 %v8042_v18  ;;  %12378 = vst [vmem:[#allocation176_spill] sm:$0xff] %v8066_v9  ;;  %v8077_v7 = vld [vmem:[%s7159_s16 + $0x210] sm:$0xff] }
 0x32e   : > { %1988 = vmatpush2.msra.mxu0 %v8045_v6  ;;  %12379 = vst [vmem:[#allocation177_spill] sm:$0xff] %v8069_v10  ;;  %1918 = vmatprep.subr.mxu1 %v8050_v19  ;;  %12380 = vst [vmem:[#allocation178_spill] sm:$0xff] %v8074_v0  ;;  %v5222_v18 = vld [vmem:[%s7418_s13 + $0x2] sm:$0x3]  ;;  %s1005_s13 = scalar_lea.vmem %s12388_s18, %s5213_s22  ;;  %s6603_s22 = scalar_lea.vmem %s11471_s2, 256 }
 0x32f   : > { %1989 = vmatprep.subr.mxu0 %v8053_v5  ;;  %12381 = vst [vmem:[#allocation179_spill] sm:$0xff] %v8077_v7  ;;  %1919 = vmatpush2.msra.mxu1 %v8058_v8  ;;  %v5217_v8 = vld [vmem:[%s1001_s15] ss:$0 sm:$0xff]  ;;  %s4820_s15 = scalar_lea.sflag [#allocation6], %s7138_s17  ;;  %p6604_p7 = scmp.ne.s32.totalorder %s11471_s2, %s6603_s22 }
 0x330   : > { %1990 = vmatpush2.msra.mxu0 %v8061_v22  ;;  %1920 = vmatprep.subr.mxu1 %v8066_v9  ;;  %v1288_v22 = vlaneseq }
 0x331   : > { %1991 = vmatprep.subr.mxu0 %v8069_v10  ;;  %1921 = vmatpush2.msra.mxu1 %v8074_v0  ;;  %p6605_p10 = pnand %p6604_p7, %p13471_p8 }
 0x332   : > { %1992 = vmatpush2.msra.mxu0 %v8077_v7  ;;  %1922 = vmatprep.mubr.f32.mxu1 %v5222_v18  ;;  %v8092_v9 = vshrl.u32 %v1288_v22, 7 }
 0x333   : > { %1993 = vmatprep.mubr.f32.mxu0 %v5222_v18  ;;  %2025 = vmatprep.subr.mxu1 %v7247_v21  ;;  %v1286_v21 = vld [vmem:[%s801_s11] sm:$0xf]  ;;  %p6606_p1 = pneg %p6605_p10  ;;  %s6607_s11 = sshll.u32 %s6709_s0, 4  ;;  %s6608_s11 = int_to_ptr.vmem [resolvable:$false] %s6607_s11 }
 0x334   : > { %2096 = vmatprep.subr.mxu0 %v7434_v20  ;;  %12383 = vst [vmem:[#allocation180_spill] sm:$0xff] %v8092_v9  ;;  %v8095_v7 = vsub.s32 0, %v8092_v9  ;;  %v8100_v20 = vsub.s32 1, %v8092_v9  ;;  %v11715_v2 = vsub.s32 3, %v8092_v9  ;;  %s6609_s19 = scalar_lea.vmem %s6608_s11, 512  ;;  %p6610_p3 = scmp.lt.s32.totalorder %s11471_s2, %s6608_s11 }
 0x335   : > { %p6611_p9 = scmp.lt.s32.totalorder %s6609_s19, %s6603_s22 }
 0x336   : > { %12384 = vst [vmem:[#allocation181_spill] sm:$0xff] %v8095_v7  ;;  %12385 = vst [vmem:[#allocation182_spill] sm:$0xff] %v8100_v20  ;;  %v1291_v6 = vrot.slane %v1286_v21, %v8095_v7  ;;  %v1295_v22 = vrot.slane %v1286_v21, %v8100_v20  ;;  %v1735_v20 = vpop.f32.mrf.mxu1  ;;  %v1303_v63 = vrot.slane %v1286_v21, %v11715_v2 }
 0x337   : > { %p6612_p6 = por %p6611_p9, %p6610_p3 }
 0x339   : > { %p6613_p12 = pnand %p6612_p6, %p6606_p1 }
 0x387   : > { %v1273_v10 = vpop.f32.mrf.mxu0 }
 0x388   : > { %v1274_v5 = vadd.f32 %v5217_v8, %v1273_v10 }
 0x389   : > { %v5399_v0 = vpop.f32.mrf.mxu0 }
 0x38a   : > { %5505 = vtanh.f32 %v1274_v5  ;;  %v11711_v5 = vsub.s32 2, %v8092_v9 }
 0x38b   : > { %v1380_v18 = vpop.f32.mrf.mxu0 }
 0x38c   : > { %v8114_v7 = vadd.f32 %v1380_v18, %v1291_v6 }
 0x38d   : > { %v1382_v19 = vpop.f32.mrf.mxu0 }
 0x38e   : > { %12389 = vst [vmem:[#allocation185_spill] sm:$0xff] %v8114_v7  ;;  %v1809_v13 = vadd.f32 %v1733_v16, %v8114_v7 }
 0x38f   : > { %v1386_v17 = vpop.f32.mrf.mxu0 }
 0x390   : > { %v8104_v3 = vadd.f32 %v1386_v17, %v1291_v6  ;;  %v1299_v17 = vrot.slane %v1286_v21, %v11711_v5  ;;  %v5224_v5 = vmul.f32 -1.442695, %v1809_v13 }
 0x391   : > { %v1388_v8 = vpop.f32.mrf.mxu0 }
 0x392   : > { %12386 = vst [vmem:[#allocation183_spill] sm:$0xff] %v8104_v3  ;;  %v8106_v0 = vadd.f32 %v1388_v8, %v1295_v22  ;;  %5507 = vpow2.f32 %v5224_v5  ;;  %v1662_v5 = vld [vmem:[%s783_s29] sm:$0x3] }
 0x393   : > { %v1457_v10 = vpop.f32.mrf.mxu0 }
 0x394   : > { %12387 = vst [vmem:[#allocation184_spill] sm:$0xff] %v8106_v0  ;;  %v8118_v0 = vadd.f32 %v1382_v19, %v1295_v22  ;;  %v8129_v21 = vadd.f32 %v1457_v10, %v1299_v17 }
 0x395   : > { %v1459_v15 = vpop.f32.mrf.mxu0 }
 0x396   : > { %v1810_v18 = vadd.f32 %v1735_v20, %v8118_v0 }
 0x397   : > { %v5506_v8 = vpop.eup %5505  ;;  %v1463_v3 = vpop.f32.mrf.mxu0 }
 0x398   : > { %v8122_v14 = vadd.f32 %v1463_v3, %v1299_v17  ;;  %1279 = vst.msk [vmem:[%s1005_s13] sm:$0x3] %vm1278_vm2, %v5506_v8  ;;  %v5225_v60 = vmul.f32 -1.442695, %v1810_v18  ;;  %v8131_v8 = vadd.f32 %v1459_v15, %v1303_v63 }
 0x399   : > { %v1465_v62 = vpop.f32.mrf.mxu0 }
 0x39a   : > { %12390 = vst [vmem:[#allocation186_spill] sm:$0xff] %v8122_v14  ;;  %v8126_v6 = vadd.f32 %v1465_v62, %v1303_v63  ;;  %5509 = vpow2.f32 %v5225_v60  ;;  %v8580_v14 = vld [vmem:[%s7151_s3 + $0x70] sm:$0xff] }
 0x39c   : > { %12391 = vst [vmem:[#allocation187_spill] sm:$0xff] %v8126_v6 }
 0x39f   : > { %v5508_v19 = vpop.eup %5507 }
 0x3a0   : > { %v1822_v9 = vadd.f32 1.0, %v5508_v19 }
 0x3a2   : > { %5511 = vrcp.f32 %v1822_v9 }
 0x3a7   : > { %v5510_v22 = vpop.eup %5509 }
 0x3a8   : > { %v1823_v3 = vadd.f32 1.0, %v5510_v22 }
 0x3aa   : > { %5513 = vrcp.f32 %v1823_v3  ;;  %v12435_v3 = vld [vmem:[#allocation74_spill] sm:$0xff] }
 0x3af   : > { %v5512_v60 = vpop.eup %5511 }
 0x3b3   : > { %v1804_v2 = vpop.f32.mrf.mxu0 }
 0x3b4   : > { %v1811_v16 = vadd.f32 %v1804_v2, %v8129_v21 }
 0x3b5   : > { %v1806_v62 = vpop.f32.mrf.mxu0 }
 0x3b6   : > { %v5226_v6 = vmul.f32 -1.442695, %v1811_v16  ;;  %v1812_v13 = vadd.f32 %v1806_v62, %v8131_v8  ;;  %v12436_v16 = vld [vmem:[#allocation75_spill] sm:$0xff]  ;;  %v12437_v62 = vld [vmem:[#allocation76_spill] sm:$0xff] }
 0x3b7   : > { %v5514_v20 = vpop.eup %5513 }
 0x3b8   : > { %5515 = vpow2.f32 %v5226_v6  ;;  %v1832_v19 = vmul.f32 %v5514_v20, %v1662_v5  ;;  %v12434_v6 = vld [vmem:[#allocation73_spill] sm:$0xff]  ;;  %v12440_v20 = vld [vmem:[#allocation79_spill] sm:$0xff]  ;;  %v12441_v5 = vld [vmem:[#allocation80_spill] sm:$0xff] }
 0x3b9   : > { %5517 = vtanh.f32 %v1812_v13  ;;  %v12438_v13 = vld [vmem:[#allocation77_spill] sm:$0xff] }
 0x3c5   : > { %v5516_v10 = vpop.eup %5515 }
 0x3c6   : > { %v5518_v17 = vpop.eup %5517  ;;  %v1824_v18 = vadd.f32 1.0, %v5516_v10  ;;  %v12442_v10 = vld [vmem:[#allocation81_spill] sm:$0xff] }
 0x3c7   : > { %v1833_v63 = vmul.f32 %v5518_v17, %v5512_v60  ;;  %v12439_v60 = vld [vmem:[#allocation78_spill] sm:$0xff] }
 0x3c8   : > { %5519 = vrcp.f32 %v1824_v18  ;;  %v12443_v17 = vld [vmem:[#allocation82_spill] sm:$0xff]  ;;  %v12444_v18 = vld [vmem:[#allocation83_spill] sm:$0xff] }
 0x3c9   : > { %v8137_v15 = vadd.f32 %v1833_v63, %v1832_v19  ;;  %v12445_v19 = vld [vmem:[#allocation84_spill] sm:$0xff]  ;;  %v12446_v63 = vld [vmem:[#allocation85_spill] sm:$0xff] }
 0x3cb   : > { %5521 = vtanh.f32 %v8137_v15 }
 0x3d5   : > { %v5520_v2 = vpop.eup %5519 }
 0x3d8   : > { %v5522_v9 = vpop.eup %5521 }
 0x3d9   : > { %v8140_v22 = vmul.f32 %v5522_v9, %v5520_v2  ;;  %v12447_v2 = vld [vmem:[#allocation86_spill] sm:$0xff]  ;;  %v12448_v9 = vld [vmem:[#allocation87_spill] sm:$0xff] }
 0x3db   : > { %1923 = vmatmul.mubr.f32.vlgmr.msra.gmra.mxu1 %v8140_v22  ;;  %1994 = vmatmul.mubr.f32.vlgmr.msra.gmra.mxu0 %v8140_v22 }
 0x3dc   : > { %2026 = vmatpush1.msra.mxu1 %v7281_v39  ;;  %2097 = vmatpush1.msra.mxu0 %v7445_v23  ;;  %v12392_v39 = vld [vmem:[#allocation32_spill] sm:$0xff] }
 0x3dd   : > { %2027 = vmatprep.subr.mxu1 %v7284_v40  ;;  %2098 = vmatprep.subr.mxu0 %v7448_v24  ;;  %v12393_v40 = vld [vmem:[#allocation42_spill] sm:$0xff]  ;;  %v12413_v23 = vld [vmem:[#allocation52_spill] sm:$0xff]  ;;  %v12414_v24 = vld [vmem:[#allocation53_spill] sm:$0xff] }
 0x3de   : > { %2028 = vmatpush1.msra.mxu1 %v7287_v41  ;;  %2099 = vmatpush1.msra.mxu0 %v7452_v25  ;;  %v12394_v41 = vld [vmem:[#allocation33_spill] sm:$0xff]  ;;  %v12415_v25 = vld [vmem:[#allocation54_spill] sm:$0xff] }
 0x3df   : > { %2029 = vmatprep.subr.mxu1 %v7291_v42  ;;  %2100 = vmatprep.subr.mxu0 %v7456_v26  ;;  %v12395_v42 = vld [vmem:[#allocation43_spill] sm:$0xff] }
 0x3e0   : > { %2030 = vmatpush1.msra.mxu1 %v7296_v43  ;;  %2101 = vmatpush1.msra.mxu0 %v7461_v27  ;;  %v12396_v43 = vld [vmem:[#allocation34_spill] sm:$0xff]  ;;  %v12416_v26 = vld [vmem:[#allocation55_spill] sm:$0xff]  ;;  %v12417_v27 = vld [vmem:[#allocation56_spill] sm:$0xff] }
 0x3e1   : > { %2031 = vmatprep.subr.mxu1 %v7300_v44  ;;  %2102 = vmatprep.subr.mxu0 %v7465_v28  ;;  %v12397_v44 = vld [vmem:[#allocation44_spill] sm:$0xff]  ;;  %v12418_v28 = vld [vmem:[#allocation57_spill] sm:$0xff] }
 0x3e2   : > { %2032 = vmatpush1.msra.mxu1 %v7304_v45  ;;  %2103 = vmatpush1.msra.mxu0 %v7469_v29  ;;  %v12398_v45 = vld [vmem:[#allocation35_spill] sm:$0xff]  ;;  %v12419_v29 = vld [vmem:[#allocation58_spill] sm:$0xff] }
 0x3e3   : > { %2033 = vmatprep.subr.mxu1 %v7308_v46  ;;  %2104 = vmatprep.subr.mxu0 %v7474_v30  ;;  %v12399_v46 = vld [vmem:[#allocation45_spill] sm:$0xff]  ;;  %v12420_v30 = vld [vmem:[#allocation59_spill] sm:$0xff] }
 0x3e4   : > { %2034 = vmatpush1.msra.mxu1 %v7312_v47  ;;  %2105 = vmatpush1.msra.mxu0 %v7479_v31  ;;  %v12400_v47 = vld [vmem:[#allocation36_spill] sm:$0xff] }
 0x3e5   : > { %2035 = vmatprep.subr.mxu1 %v7316_v48  ;;  %2106 = vmatprep.subr.mxu0 %v7483_v32  ;;  %v12401_v48 = vld [vmem:[#allocation46_spill] sm:$0xff]  ;;  %v12421_v31 = vld [vmem:[#allocation60_spill] sm:$0xff]  ;;  %v12422_v32 = vld [vmem:[#allocation61_spill] sm:$0xff] }
 0x3e6   : > { %2036 = vmatpush1.msra.mxu1 %v7320_v49  ;;  %2107 = vmatpush1.msra.mxu0 %v7487_v33  ;;  %v12402_v49 = vld [vmem:[#allocation37_spill] sm:$0xff]  ;;  %v12423_v33 = vld [vmem:[#allocation62_spill] sm:$0xff] }
 0x3e7   : > { %2037 = vmatprep.subr.mxu1 %v7324_v50  ;;  %2108 = vmatprep.subr.mxu0 %v7491_v34  ;;  %v12403_v50 = vld [vmem:[#allocation47_spill] sm:$0xff] }
 0x3e8   : > { %2038 = vmatpush1.msra.mxu1 %v7328_v51  ;;  %2109 = vmatpush1.msra.mxu0 %v7495_v35  ;;  %v12404_v51 = vld [vmem:[#allocation38_spill] sm:$0xff]  ;;  %v12424_v34 = vld [vmem:[#allocation63_spill] sm:$0xff]  ;;  %v12425_v35 = vld [vmem:[#allocation64_spill] sm:$0xff] }
 0x3e9   : > { %2039 = vmatprep.subr.mxu1 %v7332_v52  ;;  %2110 = vmatprep.subr.mxu0 %v7499_v36  ;;  %v12405_v52 = vld [vmem:[#allocation48_spill] sm:$0xff]  ;;  %v12426_v36 = vld [vmem:[#allocation65_spill] sm:$0xff] }
 0x3ea   : > { %2040 = vmatpush1.msra.mxu1 %v7336_v53  ;;  %2111 = vmatpush1.msra.mxu0 %v7503_v37  ;;  %v12406_v53 = vld [vmem:[#allocation39_spill] sm:$0xff]  ;;  %v12427_v37 = vld [vmem:[#allocation66_spill] sm:$0xff]  ;;  %12559 = vst [vmem:[#allocation48_spill] sm:$0xff] %v8580_v14 }
 0x3eb   : > { %2041 = vmatprep.subr.mxu1 %v7340_v54  ;;  %2112 = vmatprep.subr.mxu0 %v7507_v38  ;;  %v12407_v54 = vld [vmem:[#allocation49_spill] sm:$0xff]  ;;  %v12428_v38 = vld [vmem:[#allocation67_spill] sm:$0xff] }
 0x3ec   : > { %2042 = vmatpush1.msra.mxu1 %v7344_v55  ;;  %2113 = vmatpush1.msra.mxu0 %v7511_v61  ;;  %v12408_v55 = vld [vmem:[#allocation40_spill] sm:$0xff] }
 0x3ed   : > { %2043 = vmatprep.subr.mxu1 %v7348_v56  ;;  %2114 = vmatprep.subr.mxu0 %v7515_v1  ;;  %v12409_v56 = vld [vmem:[#allocation50_spill] sm:$0xff]  ;;  %v12429_v61 = vld [vmem:[#allocation68_spill] sm:$0xff]  ;;  %v12430_v1 = vld [vmem:[#allocation69_spill] sm:$0xff] }
 0x3ee   : > { %2044 = vmatpush1.msra.mxu1 %v7352_v57  ;;  %2115 = vmatpush1.msra.mxu0 %v7519_v4  ;;  %v12410_v57 = vld [vmem:[#allocation41_spill] sm:$0xff]  ;;  %v12431_v4 = vld [vmem:[#allocation70_spill] sm:$0xff] }
 0x3ef   : > { %2045 = vmatprep.subr.mxu1 %v7356_v58  ;;  %2116 = vmatprep.subr.mxu0 %v7523_v11  ;;  %v12411_v58 = vmov 0.0   ;;  %v12432_v11 = vld [vmem:[#allocation71_spill] sm:$0xff] }
 0x3f0   : > { %2046 = vmatpush1.msra.mxu1 %v7362_v59  ;;  %2117 = vmatpush1.msra.mxu0 %v7527_v12  ;;  %v12412_v59 = vld [vmem:[#allocation51_spill] sm:$0xff]  ;;  %v12433_v12 = vld [vmem:[#allocation72_spill] sm:$0xff] }
 0x3f1   : > { %2047 = vmatprep.subr.mxu1 %v12392_v39  ;;  %2118 = vmatprep.subr.mxu0 %v12393_v40  ;;  %v12450_v39 = vld [vmem:[#allocation89_spill] sm:$0xff]  ;;  %v12451_v40 = vld [vmem:[#allocation90_spill] sm:$0xff] }
 0x3f2   : > { %2048 = vmatpush1.msra.mxu1 %v12394_v41  ;;  %2119 = vmatpush1.msra.mxu0 %v12395_v42  ;;  %v12452_v41 = vld [vmem:[#allocation91_spill] sm:$0xff]  ;;  %v12453_v42 = vld [vmem:[#allocation92_spill] sm:$0xff] }
 0x3f3   : > { %2049 = vmatprep.subr.mxu1 %v12396_v43  ;;  %2120 = vmatprep.subr.mxu0 %v12397_v44  ;;  %v12454_v43 = vld [vmem:[#allocation93_spill] sm:$0xff]  ;;  %v12455_v44 = vld [vmem:[#allocation94_spill] sm:$0xff] }
 0x3f4   : > { %2050 = vmatpush1.msra.mxu1 %v12398_v45  ;;  %2121 = vmatpush1.msra.mxu0 %v12399_v46  ;;  %v12456_v45 = vld [vmem:[#allocation95_spill] sm:$0xff]  ;;  %v12457_v46 = vld [vmem:[#allocation96_spill] sm:$0xff] }
 0x3f5   : > { %2051 = vmatprep.subr.mxu1 %v12400_v47  ;;  %2122 = vmatprep.subr.mxu0 %v12401_v48  ;;  %v12458_v47 = vld [vmem:[#allocation97_spill] sm:$0xff]  ;;  %v12459_v48 = vld [vmem:[#allocation98_spill] sm:$0xff] }
 0x3f6   : > { %2052 = vmatpush1.msra.mxu1 %v12402_v49  ;;  %2123 = vmatpush1.msra.mxu0 %v12403_v50  ;;  %v12460_v49 = vld [vmem:[#allocation99_spill] sm:$0xff]  ;;  %v12461_v50 = vld [vmem:[#allocation100_spill] sm:$0xff] }
 0x3f7   : > { %2053 = vmatprep.subr.mxu1 %v12404_v51  ;;  %2124 = vmatprep.subr.mxu0 %v12405_v52  ;;  %v12462_v51 = vld [vmem:[#allocation101_spill] sm:$0xff]  ;;  %v12463_v52 = vld [vmem:[#allocation102_spill] sm:$0xff] }
 0x3f8   : > { %2054 = vmatpush1.msra.mxu1 %v12406_v53  ;;  %2125 = vmatpush1.msra.mxu0 %v12407_v54  ;;  %v12464_v53 = vld [vmem:[#allocation103_spill] sm:$0xff]  ;;  %v12465_v54 = vld [vmem:[#allocation104_spill] sm:$0xff] }
 0x3f9   : > { %2055 = vmatprep.subr.mxu1 %v12408_v55  ;;  %2126 = vmatprep.subr.mxu0 %v12409_v56  ;;  %v12466_v55 = vld [vmem:[#allocation105_spill] sm:$0xff]  ;;  %v12467_v56 = vld [vmem:[#allocation106_spill] sm:$0xff] }
 0x3fa   : > { %2056 = vmatpush1.msra.mxu1 %v12410_v57  ;;  %2089 = vmatprep.mubr.f32.mxu1 %v12411_v58  ;;  %v12468_v57 = vld [vmem:[#allocation107_spill] sm:$0xff] }
 0x3fb   : > { %2127 = vmatpush1.msra.mxu0 %v12412_v59  ;;  %2160 = vmatprep.mubr.f32.mxu0 %v12411_v58  ;;  %v12469_v59 = vld [vmem:[#allocation108_spill] sm:$0xff] }
 0x3fc   : > { %2090 = vmatmul.mubr.f32.vlgmr.msra.gmra.mxu1 %v8140_v22  ;;  %2161 = vmatmul.mubr.f32.vlgmr.msra.gmra.mxu0 %v8140_v22  ;;  %v12449_v22 = vld [vmem:[#allocation88_spill] sm:$0xff] }
 0x3fd   : > { %2217 = vmatprep.subr.mxu1 %v12413_v23  ;;  %2288 = vmatprep.subr.mxu0 %v12414_v24  ;;  %v12470_v23 = vld [vmem:[#allocation109_spill] sm:$0xff]  ;;  %v12471_v24 = vld [vmem:[#allocation110_spill] sm:$0xff] }
 0x3fe   : > { %2218 = vmatpush1.msra.mxu1 %v12415_v25  ;;  %2289 = vmatpush1.msra.mxu0 %v12416_v26  ;;  %v12472_v25 = vld [vmem:[#allocation111_spill] sm:$0xff]  ;;  %v12473_v26 = vld [vmem:[#allocation112_spill] sm:$0xff] }
 0x3ff   : > { %2219 = vmatprep.subr.mxu1 %v12417_v27  ;;  %2290 = vmatprep.subr.mxu0 %v12418_v28  ;;  %v12474_v27 = vld [vmem:[#allocation113_spill] sm:$0xff]  ;;  %v12475_v28 = vld [vmem:[#allocation114_spill] sm:$0xff] }
 0x400   : > { %2220 = vmatpush1.msra.mxu1 %v12419_v29  ;;  %2291 = vmatpush1.msra.mxu0 %v12420_v30  ;;  %v12476_v29 = vld [vmem:[#allocation115_spill] sm:$0xff]  ;;  %v12477_v30 = vld [vmem:[#allocation116_spill] sm:$0xff] }
 0x401   : > { %2221 = vmatprep.subr.mxu1 %v12421_v31  ;;  %2292 = vmatprep.subr.mxu0 %v12422_v32  ;;  %v12478_v31 = vld [vmem:[#allocation117_spill] sm:$0xff]  ;;  %v12479_v32 = vld [vmem:[#allocation118_spill] sm:$0xff] }
 0x402   : > { %2222 = vmatpush1.msra.mxu1 %v12423_v33  ;;  %2293 = vmatpush1.msra.mxu0 %v12424_v34  ;;  %v12480_v33 = vld [vmem:[#allocation119_spill] sm:$0xff]  ;;  %v12481_v34 = vld [vmem:[#allocation120_spill] sm:$0xff] }
 0x403   : > { %2223 = vmatprep.subr.mxu1 %v12425_v35  ;;  %2294 = vmatprep.subr.mxu0 %v12426_v36  ;;  %v12482_v35 = vld [vmem:[#allocation121_spill] sm:$0xff]  ;;  %v12483_v36 = vld [vmem:[#allocation122_spill] sm:$0xff] }
 0x404   : > { %2224 = vmatpush1.msra.mxu1 %v12427_v37  ;;  %2295 = vmatpush1.msra.mxu0 %v12428_v38  ;;  %v12484_v37 = vld [vmem:[#allocation123_spill] sm:$0xff]  ;;  %v12485_v38 = vld [vmem:[#allocation124_spill] sm:$0xff] }
 0x405   : > { %2225 = vmatprep.subr.mxu1 %v12429_v61  ;;  %2296 = vmatprep.subr.mxu0 %v12430_v1  ;;  %v12486_v61 = vld [vmem:[#allocation125_spill] sm:$0xff]  ;;  %v12487_v1 = vld [vmem:[#allocation126_spill] sm:$0xff] }
 0x406   : > { %2226 = vmatpush1.msra.mxu1 %v12431_v4  ;;  %2297 = vmatpush1.msra.mxu0 %v12432_v11  ;;  %v12488_v4 = vld [vmem:[#allocation127_spill] sm:$0xff]  ;;  %v12489_v11 = vld [vmem:[#allocation128_spill] sm:$0xff] }
 0x407   : > { %2227 = vmatprep.subr.mxu1 %v12433_v12  ;;  %2298 = vmatprep.subr.mxu0 %v12434_v6  ;;  %v12490_v12 = vld [vmem:[#allocation129_spill] sm:$0xff]  ;;  %v12491_v6 = vld [vmem:[#allocation130_spill] sm:$0xff] }
 0x408   : > { %2228 = vmatpush1.msra.mxu1 %v12435_v3  ;;  %2299 = vmatpush1.msra.mxu0 %v12436_v16  ;;  %v12492_v3 = vld [vmem:[#allocation131_spill] sm:$0xff]  ;;  %v12493_v16 = vld [vmem:[#allocation132_spill] sm:$0xff] }
 0x409   : > { %2229 = vmatprep.subr.mxu1 %v12437_v62  ;;  %2300 = vmatprep.subr.mxu0 %v12438_v13  ;;  %v12494_v62 = vld [vmem:[#allocation133_spill] sm:$0xff]  ;;  %v12495_v13 = vld [vmem:[#allocation134_spill] sm:$0xff] }
 0x40a   : > { %2230 = vmatpush1.msra.mxu1 %v12439_v60  ;;  %2301 = vmatpush1.msra.mxu0 %v12440_v20  ;;  %v12496_v60 = vld [vmem:[#allocation135_spill] sm:$0xff]  ;;  %v12497_v20 = vld [vmem:[#allocation136_spill] sm:$0xff] }
 0x40b   : > { %2231 = vmatprep.subr.mxu1 %v12441_v5  ;;  %2302 = vmatprep.subr.mxu0 %v12442_v10  ;;  %v12498_v5 = vld [vmem:[#allocation137_spill] sm:$0xff]  ;;  %v12499_v10 = vld [vmem:[#allocation138_spill] sm:$0xff] }
 0x40c   : > { %2232 = vmatpush1.msra.mxu1 %v12443_v17  ;;  %2303 = vmatpush1.msra.mxu0 %v12444_v18  ;;  %v12500_v17 = vld [vmem:[#allocation139_spill] sm:$0xff]  ;;  %v12501_v18 = vld [vmem:[#allocation140_spill] sm:$0xff] }
 0x40d   : > { %2233 = vmatprep.subr.mxu1 %v12445_v19  ;;  %2304 = vmatprep.subr.mxu0 %v12446_v63  ;;  %v12502_v19 = vld [vmem:[#allocation141_spill] sm:$0xff]  ;;  %v12503_v63 = vld [vmem:[#allocation142_spill] sm:$0xff] }
 0x40e   : > { %2234 = vmatpush1.msra.mxu1 %v12447_v2  ;;  %2305 = vmatpush1.msra.mxu0 %v12448_v9  ;;  %v12504_v2 = vld [vmem:[#allocation143_spill] sm:$0xff]  ;;  %v12505_v9 = vld [vmem:[#allocation144_spill] sm:$0xff] }
 0x40f   : > { %2235 = vmatprep.subr.mxu1 %v12449_v22  ;;  %2306 = vmatprep.subr.mxu0 %v12450_v39  ;;  %v12506_v22 = vld [vmem:[#allocation145_spill] sm:$0xff]  ;;  %v12507_v39 = vld [vmem:[#allocation146_spill] sm:$0xff] }
 0x410   : > { %2236 = vmatpush1.msra.mxu1 %v12451_v40  ;;  %2307 = vmatpush1.msra.mxu0 %v12452_v41  ;;  %v12508_v40 = vld [vmem:[#allocation147_spill] sm:$0xff]  ;;  %v12509_v41 = vld [vmem:[#allocation148_spill] sm:$0xff] }
 0x411   : > { %2237 = vmatprep.subr.mxu1 %v12453_v42  ;;  %2308 = vmatprep.subr.mxu0 %v12454_v43  ;;  %v12510_v42 = vld [vmem:[#allocation149_spill] sm:$0xff]  ;;  %v12511_v43 = vld [vmem:[#allocation150_spill] sm:$0xff] }
 0x412   : > { %2238 = vmatpush1.msra.mxu1 %v12455_v44  ;;  %2309 = vmatpush1.msra.mxu0 %v12456_v45  ;;  %v12512_v44 = vld [vmem:[#allocation151_spill] sm:$0xff]  ;;  %v12513_v45 = vld [vmem:[#allocation152_spill] sm:$0xff] }
 0x413   : > { %2239 = vmatprep.subr.mxu1 %v12457_v46  ;;  %2310 = vmatprep.subr.mxu0 %v12458_v47  ;;  %v12514_v46 = vld [vmem:[#allocation153_spill] sm:$0xff]  ;;  %v12515_v47 = vld [vmem:[#allocation154_spill] sm:$0xff] }
 0x414   : > { %2240 = vmatpush1.msra.mxu1 %v12459_v48  ;;  %2311 = vmatpush1.msra.mxu0 %v12460_v49  ;;  %v12516_v48 = vld [vmem:[#allocation155_spill] sm:$0xff]  ;;  %v12517_v49 = vld [vmem:[#allocation156_spill] sm:$0xff] }
 0x415   : > { %2241 = vmatprep.subr.mxu1 %v12461_v50  ;;  %2312 = vmatprep.subr.mxu0 %v12462_v51  ;;  %v12518_v50 = vld [vmem:[#allocation157_spill] sm:$0xff]  ;;  %v12519_v51 = vld [vmem:[#allocation158_spill] sm:$0xff] }
 0x416   : > { %2242 = vmatpush1.msra.mxu1 %v12463_v52  ;;  %2313 = vmatpush1.msra.mxu0 %v12464_v53  ;;  %v12520_v52 = vld [vmem:[#allocation159_spill] sm:$0xff]  ;;  %v12521_v53 = vld [vmem:[#allocation160_spill] sm:$0xff] }
 0x417   : > { %2243 = vmatprep.subr.mxu1 %v12465_v54  ;;  %2314 = vmatprep.subr.mxu0 %v12466_v55  ;;  %v12522_v54 = vld [vmem:[#allocation161_spill] sm:$0xff]  ;;  %v12523_v55 = vld [vmem:[#allocation162_spill] sm:$0xff] }
 0x418   : > { %2244 = vmatpush1.msra.mxu1 %v12467_v56  ;;  %2315 = vmatpush1.msra.mxu0 %v12468_v57  ;;  %v12524_v56 = vld [vmem:[#allocation163_spill] sm:$0xff]  ;;  %v12525_v57 = vld [vmem:[#allocation164_spill] sm:$0xff] }
 0x419   : > { %2245 = vmatprep.subr.mxu1 %v12469_v59  ;;  %2316 = vmatprep.subr.mxu0 %v12470_v23  ;;  %v12526_v59 = vld [vmem:[#allocation165_spill] sm:$0xff]  ;;  %v12527_v23 = vld [vmem:[#allocation166_spill] sm:$0xff] }
 0x41a   : > { %2246 = vmatpush1.msra.mxu1 %v12471_v24  ;;  %2317 = vmatpush1.msra.mxu0 %v12472_v25  ;;  %v12528_v24 = vld [vmem:[#allocation167_spill] sm:$0xff]  ;;  %v12529_v25 = vld [vmem:[#allocation168_spill] sm:$0xff] }
 0x41b   : > { %2247 = vmatprep.subr.mxu1 %v12473_v26  ;;  %2318 = vmatprep.subr.mxu0 %v12474_v27  ;;  %v12530_v26 = vld [vmem:[#allocation169_spill] sm:$0xff]  ;;  %v12531_v27 = vld [vmem:[#allocation170_spill] sm:$0xff] }
 0x41c   : > { %2248 = vmatpush1.msra.mxu1 %v12475_v28  ;;  %2319 = vmatpush1.msra.mxu0 %v12476_v29  ;;  %v12532_v28 = vld [vmem:[#allocation171_spill] sm:$0xff]  ;;  %v12533_v29 = vld [vmem:[#allocation172_spill] sm:$0xff] }
 0x41d   : > { %2249 = vmatprep.subr.mxu1 %v12477_v30  ;;  %2320 = vmatprep.subr.mxu0 %v12478_v31  ;;  %v12534_v30 = vld [vmem:[#allocation173_spill] sm:$0xff]  ;;  %v12535_v31 = vld [vmem:[#allocation174_spill] sm:$0xff] }
 0x41e   : > { %2250 = vmatpush2.msra.mxu1 %v12479_v32  ;;  %2321 = vmatpush2.msra.mxu0 %v12480_v33  ;;  %v12536_v32 = vld [vmem:[#allocation175_spill] sm:$0xff]  ;;  %v12537_v33 = vld [vmem:[#allocation176_spill] sm:$0xff] }
 0x41f   : > { %2251 = vmatprep.subr.mxu1 %v12481_v34  ;;  %2322 = vmatprep.subr.mxu0 %v12482_v35  ;;  %v12538_v34 = vld [vmem:[#allocation177_spill] sm:$0xff]  ;;  %v12539_v35 = vld [vmem:[#allocation178_spill] sm:$0xff] }
 0x420   : > { %2252 = vmatpush2.msra.mxu1 %v12483_v36  ;;  %2323 = vmatpush2.msra.mxu0 %v12484_v37  ;;  %v12540_v36 = vld [vmem:[#allocation179_spill] sm:$0xff]  ;;  %v8339_v37 = vld [vmem:[%s7151_s3 + $0x1e8] sm:$0xff] }
 0x421   : > { %2253 = vmatprep.subr.mxu1 %v12485_v38  ;;  %2324 = vmatprep.subr.mxu0 %v12486_v61  ;;  %v8343_v38 = vld [vmem:[%s7151_s3 + $0x1f8] sm:$0xff]  ;;  %v1660_v61 = vld [vmem:[%s819_s1] sm:$0xf]  ;;  %s6706_s1 = smov 124  }
 0x422   : > { %2254 = vmatpush2.msra.mxu1 %v12487_v1  ;;  %2325 = vmatpush2.msra.mxu0 %v12488_v4  ;;  %v12541_v1 = vld [vmem:[#allocation181_spill] sm:$0xff] }
 0x423   : > { %2255 = vmatprep.subr.mxu1 %v12489_v11  ;;  %2326 = vmatprep.subr.mxu0 %v12490_v12  ;;  %v8349_v4 = vrot.slane %v1660_v61, %v12541_v1  ;;  %v12543_v11 = vld [vmem:[#allocation182_spill] sm:$0xff]  ;;  %v8576_v1 = vld [vmem:[%s7151_s3 + $0x60] sm:$0xff] }
 0x424   : > { %2256 = vmatpush2.msra.mxu1 %v12491_v6  ;;  %2327 = vmatpush2.msra.mxu0 %v12492_v3  ;;  %v8352_v12 = vrot.slane %v1660_v61, %v12543_v11  ;;  %v8572_v11 = vld [vmem:[%s7151_s3 + $0x78] sm:$0xff]  ;;  %12558 = vst [vmem:[#allocation38_spill] sm:$0xff] %v8576_v1 }
 0x425   : > { %2257 = vmatprep.subr.mxu1 %v12493_v16  ;;  %2328 = vmatprep.subr.mxu0 %v12494_v62  ;;  %12542 = vst [vmem:[#allocation32_spill] sm:$0xff] %v8349_v4  ;;  %12557 = vst [vmem:[#allocation47_spill] sm:$0xff] %v8572_v11 }
 0x426   : > { %2258 = vmatpush2.msra.mxu1 %v12495_v13  ;;  %2329 = vmatpush2.msra.mxu0 %v12496_v60  ;;  %12544 = vst [vmem:[#allocation42_spill] sm:$0xff] %v8352_v12 }
 0x427   : > { %2259 = vmatprep.subr.mxu1 %v12497_v20  ;;  %2330 = vmatprep.subr.mxu0 %v12498_v5  ;;  %v12545_v20 = vld [vmem:[#allocation180_spill] sm:$0xff] }
 0x428   : > { %2260 = vmatpush2.msra.mxu1 %v12499_v10  ;;  %2331 = vmatpush2.msra.mxu0 %v12500_v17  ;;  %v12546_v5 = vsub.s32 2, %v12545_v20 }
 0x429   : > { %2261 = vmatprep.subr.mxu1 %v12501_v18  ;;  %2332 = vmatprep.subr.mxu0 %v12502_v19  ;;  %v12548_v19 = vsub.s32 3, %v12545_v20 }
 0x42a   : > { %2262 = vmatpush2.msra.mxu1 %v12503_v63  ;;  %2333 = vmatpush2.msra.mxu0 %v12504_v2  ;;  %v8358_v10 = vrot.slane %v1660_v61, %v12546_v5 }
 0x42b   : > { %2263 = vmatprep.subr.mxu1 %v12505_v9  ;;  %2334 = vmatprep.subr.mxu0 %v12506_v22  ;;  %v8363_v63 = vrot.slane %v1660_v61, %v12548_v19 }
 0x42c   : > { %2264 = vmatpush2.msra.mxu1 %v12507_v39  ;;  %2335 = vmatpush2.msra.mxu0 %v12508_v40  ;;  %12547 = vst [vmem:[#allocation33_spill] sm:$0xff] %v8358_v10 }
 0x42d   : > { %2265 = vmatprep.subr.mxu1 %v12509_v41  ;;  %2336 = vmatprep.subr.mxu0 %v12510_v42  ;;  %12549 = vst [vmem:[#allocation43_spill] sm:$0xff] %v8363_v63 }
 0x42e   : > { %2266 = vmatpush2.msra.mxu1 %v12511_v43  ;;  %2337 = vmatpush2.msra.mxu0 %v12512_v44 }
 0x42f   : > { %2267 = vmatprep.subr.mxu1 %v12513_v45  ;;  %2338 = vmatprep.subr.mxu0 %v12514_v46  ;;  %v5223_v46 = vld [vmem:[%s783_s29 + $0x2] sm:$0x3]  ;;  %s6703_s29 = smov 127  }
 0x430   : > { %2268 = vmatpush2.msra.mxu1 %v12515_v47  ;;  %2339 = vmatpush2.msra.mxu0 %v12516_v48 }
 0x431   : > { %2269 = vmatprep.subr.mxu1 %v12517_v49  ;;  %2340 = vmatprep.subr.mxu0 %v12518_v50 }
 0x432   : > { %2270 = vmatpush2.msra.mxu1 %v12519_v51  ;;  %2341 = vmatpush2.msra.mxu0 %v12520_v52 }
 0x433   : > { %2271 = vmatprep.subr.mxu1 %v12521_v53  ;;  %2342 = vmatprep.subr.mxu0 %v12522_v54 }
 0x434   : > { %2272 = vmatpush2.msra.mxu1 %v12523_v55  ;;  %2343 = vmatpush2.msra.mxu0 %v12524_v56 }
 0x435   : > { %2273 = vmatprep.subr.mxu1 %v12525_v57  ;;  %2344 = vmatprep.subr.mxu0 %v12526_v59 }
 0x436   : > { %2274 = vmatpush2.msra.mxu1 %v12527_v23  ;;  %2345 = vmatpush2.msra.mxu0 %v12528_v24 }
 0x437   : > { %2275 = vmatprep.subr.mxu1 %v12529_v25  ;;  %2346 = vmatprep.subr.mxu0 %v12530_v26 }
 0x438   : > { %2276 = vmatpush2.msra.mxu1 %v12531_v27  ;;  %2347 = vmatpush2.msra.mxu0 %v12532_v28 }
 0x439   : > { %2277 = vmatprep.subr.mxu1 %v12533_v29  ;;  %2348 = vmatprep.subr.mxu0 %v12534_v30 }
 0x43a   : > { %2278 = vmatpush2.msra.mxu1 %v12535_v31  ;;  %2349 = vmatpush2.msra.mxu0 %v12536_v32 }
 0x43b   : > { %2279 = vmatprep.subr.mxu1 %v12537_v33  ;;  %2350 = vmatprep.subr.mxu0 %v12538_v34 }
 0x43c   : > { %2280 = vmatpush2.msra.mxu1 %v12539_v35  ;;  %2351 = vmatpush2.msra.mxu0 %v12540_v36 }
 0x43d   : > { %2384 = vmatprep.subr.mxu1 %v8339_v37  ;;  %2455 = vmatprep.subr.mxu0 %v8343_v38 }
 0x49b   : > { %v1924_v6 = vpop.f32.mrf.mxu1  ;;  %v1995_v17 = vpop.f32.mrf.mxu0 }
 0x49c   : > { %v1925_v3 = vadd.f32 %v1924_v6, %v8349_v4  ;;  %v1996_v18 = vadd.f32 %v1995_v17, %v8358_v10 }
 0x49d   : > { %v1926_v16 = vpop.f32.mrf.mxu1  ;;  %v1997_v9 = vpop.f32.mrf.mxu0 }
 0x49e   : > { %v5227_v62 = vmul.f32 -1.442695, %v1925_v3  ;;  %v1927_v13 = vadd.f32 %v1926_v16, %v8352_v12  ;;  %v5229_v2 = vmul.f32 -1.442695, %v1996_v18  ;;  %v1998_v39 = vadd.f32 %v1997_v9, %v8363_v63 }
 0x4a0   : > { %5523 = vpow2.f32 %v5227_v62  ;;  %v5228_v60 = vmul.f32 -1.442695, %v1927_v13 }
 0x4a2   : > { %5525 = vpow2.f32 %v5228_v60  ;;  %v2203_v60 = vrot.slane %v8137_v15, 6  ;;  %v8384_v15 = vld [vmem:[%s7151_s3 + $0x1e0] sm:$0xff] }
 0x4a3   : > { %5527 = vpow2.f32 %v5229_v2 }
 0x4ad   : > { %v5524_v22 = vpop.eup %5523 }
 0x4ae   : > { %v2009_v40 = vadd.f32 1.0, %v5524_v22 }
 0x4af   : > { %v5526_v41 = vpop.eup %5525 }
 0x4b0   : > { %5529 = vrcp.f32 %v2009_v40  ;;  %v2010_v42 = vadd.f32 1.0, %v5526_v41  ;;  %v5528_v43 = vpop.eup %5527  ;;  %v8388_v40 = vld [vmem:[%s7151_s3 + $0x1f0] sm:$0xff]  ;;  %v8392_v41 = vld [vmem:[%s7151_s3 + $0x1c8] sm:$0xff] }
 0x4b1   : > { %5531 = vtanh.f32 %v1998_v39  ;;  %v2011_v49 = vadd.f32 1.0, %v5528_v43  ;;  %v8400_v43 = vld [vmem:[%s7151_s3 + $0x1c0] sm:$0xff] }
 0x4b2   : > { %5533 = vrcp.f32 %v2010_v42  ;;  %v8396_v42 = vld [vmem:[%s7151_s3 + $0x1d8] sm:$0xff] }
 0x4b3   : > { %5535 = vrcp.f32 %v2011_v49  ;;  %v8424_v49 = vld [vmem:[%s7151_s3 + $0x188] sm:$0xff] }
 0x4bc   : > { %v2091_v44 = vpop.f32.mrf.mxu1  ;;  %v2162_v24 = vpop.f32.mrf.mxu0 }
 0x4bd   : > { %v5530_v45 = vpop.eup %5529  ;;  %v2171_v47 = vrot.slane %v2091_v44, 6  ;;  %v2173_v25 = vrot.slane %v2162_v24, 6  ;;  %v8404_v44 = vld [vmem:[%s7151_s3 + $0x1d0] sm:$0xff]  ;;  %v8464_v24 = vld [vmem:[%s7151_s3 + $0x140] sm:$0xff] }
 0x4be   : > { %v5532_v48 = vpop.eup %5531  ;;  %v2093_v50 = vpop.f32.mrf.mxu1 }
 0x4bf   : > { %v5534_v51 = vpop.eup %5533  ;;  %v2179_v52 = vadd.f32 %v2171_v47, %v8114_v7  ;;  %v2172_v53 = vrot.slane %v2093_v50, 6  ;;  %v2020_v55 = vmul.f32 %v5532_v48, %v5530_v45  ;;  %v2164_v26 = vpop.f32.mrf.mxu0  ;;  %v2181_v27 = vadd.f32 %v2173_v25, %v8129_v21  ;;  %v8408_v45 = vld [vmem:[%s7151_s3 + $0x1a8] sm:$0xff]  ;;  %v8416_v47 = vld [vmem:[%s7151_s3 + $0x1a0] sm:$0xff]  ;;  %v8420_v48 = vld [vmem:[%s7151_s3 + $0x1b0] sm:$0xff] }
 0x4c0   : > { %v2019_v54 = vmul.f32 %v5534_v51, %v5223_v46  ;;  %v2174_v28 = vrot.slane %v2164_v26, 6  ;;  %v5536_v29 = vpop.eup %5535  ;;  %v8412_v46 = vld [vmem:[%s7151_s3 + $0x1b8] sm:$0xff]  ;;  %v8432_v51 = vld [vmem:[%s7151_s3 + $0x180] sm:$0xff]  ;;  %v8468_v25 = vld [vmem:[%s7151_s3 + $0x150] sm:$0xff] }
 0x4c1   : > { %v5230_v56 = vmul.f32 -1.442695, %v2179_v52  ;;  %v2180_v57 = vadd.f32 %v2172_v53, %v8118_v0  ;;  %v5232_v30 = vmul.f32 -1.442695, %v2181_v27  ;;  %v8428_v50 = vld [vmem:[%s7151_s3 + $0x198] sm:$0xff]  ;;  %v8436_v52 = vld [vmem:[%s7151_s3 + $0x190] sm:$0xff] }
 0x4c2   : > { %v8370_v59 = vadd.f32 %v2020_v55, %v2019_v54  ;;  %v2182_v34 = vadd.f32 %v2174_v28, %v8131_v8  ;;  %v8440_v53 = vld [vmem:[%s7151_s3 + $0x168] sm:$0xff]  ;;  %v8444_v54 = vld [vmem:[%s7151_s3 + $0x178] sm:$0xff]  ;;  %v8448_v55 = vld [vmem:[%s7151_s3 + $0x160] sm:$0xff] }
 0x4c3   : > { %5537 = vpow2.f32 %v5230_v56  ;;  %v5231_v23 = vmul.f32 -1.442695, %v2180_v57  ;;  %v8452_v56 = vld [vmem:[%s7151_s3 + $0x170] sm:$0xff]  ;;  %v8456_v57 = vld [vmem:[%s7151_s3 + $0x148] sm:$0xff]  ;;  %v8476_v27 = vld [vmem:[%s7151_s3 + $0x138] sm:$0xff] }
 0x4c4   : > { %5539 = vtanh.f32 %v8370_v59  ;;  %v8472_v26 = vld [vmem:[%s7151_s3 + $0x128] sm:$0xff]  ;;  %v8480_v28 = vld [vmem:[%s7151_s3 + $0x120] sm:$0xff] }
 0x4c5   : > { %5541 = vpow2.f32 %v5231_v23  ;;  %v8460_v23 = vld [vmem:[%s7151_s3 + $0x158] sm:$0xff] }
 0x4c6   : > { %5543 = vpow2.f32 %v5232_v30  ;;  %v8488_v30 = vld [vmem:[%s7151_s3 + $0x108] sm:$0xff] }
 0x4d0   : > { %v5538_v31 = vpop.eup %5537 }
 0x4d1   : > { %v5540_v32 = vpop.eup %5539  ;;  %v2192_v33 = vadd.f32 1.0, %v5538_v31  ;;  %v8492_v31 = vld [vmem:[%s7151_s3 + $0x118] sm:$0xff] }
 0x4d2   : > { %v2023_v35 = vmul.f32 %v5540_v32, %v5536_v29  ;;  %v5542_v36 = vpop.eup %5541  ;;  %v8484_v29 = vld [vmem:[%s7151_s3 + $0x130] sm:$0xff]  ;;  %v8496_v32 = vld [vmem:[%s7151_s3 + $0x100] sm:$0xff] }
 0x4d3   : > { %5545 = vrcp.f32 %v2192_v33  ;;  %v2193_v61 = vadd.f32 1.0, %v5542_v36  ;;  %v5544_v16 = vpop.eup %5543  ;;  %v8500_v33 = vld [vmem:[%s7151_s3 + $0x110] sm:$0xff]  ;;  %v8512_v36 = vld [vmem:[%s7151_s3 + $0xe0] sm:$0xff] }
 0x4d4   : > { %2024 = vst [vmem:[#allocation2] sm:$0x3] %v2023_v35  ;;  %v2211_v6 = vrot.slane %v2023_v35, 6  ;;  %5547 = vtanh.f32 %v2182_v34  ;;  %v2194_v5 = vadd.f32 1.0, %v5544_v16  ;;  %v8504_v34 = vld [vmem:[%s7151_s3 + $0xe8] sm:$0xff]  ;;  %v8508_v35 = vld [vmem:[%s7151_s3 + $0xf8] sm:$0xff] }
 0x4d5   : > { %5549 = vrcp.f32 %v2193_v61  ;;  %v8516_v61 = vld [vmem:[%s7151_s3 + $0xf0] sm:$0xff]  ;;  %v8528_v16 = vld [vmem:[%s7151_s3 + $0xc0] sm:$0xff] }
 0x4d6   : > { %v2214_v3 = vrot.slane %v2211_v6, 2  ;;  %5551 = vrcp.f32 %v2194_v5  ;;  %v8520_v6 = vld [vmem:[%s7151_s3 + $0xc8] sm:$0xff]  ;;  %v8548_v5 = vld [vmem:[%s7151_s3 + $0xb0] sm:$0xff] }
 0x4d7   : > { %12551 = vst [vmem:[#allocation44_spill] sm:$0xff] %v8548_v5 }
 0x4d8   : > { %2281 = vmatprep.mubr.f32.mxu1 %v2214_v3  ;;  %2352 = vmatprep.mubr.f32.mxu0 %v2214_v3  ;;  %v8524_v3 = vld [vmem:[%s7151_s3 + $0xd8] sm:$0xff] }
 0x4e0   : > { %v5546_v62 = vpop.eup %5545 }
 0x4e1   : > { %v5548_v13 = vpop.eup %5547 }
 0x4e2   : > { %v5550_v20 = vpop.eup %5549  ;;  %v2206_v18 = vmul.f32 %v5548_v13, %v5546_v62  ;;  %v8532_v62 = vld [vmem:[%s7151_s3 + $0xd0] sm:$0xff]  ;;  %v8536_v13 = vld [vmem:[%s7151_s3 + $0xa8] sm:$0xff] }
 0x4e3   : > { %v2205_v17 = vmul.f32 %v5550_v20, %v2203_v60  ;;  %v5552_v2 = vpop.eup %5551  ;;  %v8540_v60 = vld [vmem:[%s7151_s3 + $0xb8] sm:$0xff]  ;;  %v8544_v20 = vld [vmem:[%s7151_s3 + $0xa0] sm:$0xff] }
 0x4e4   : > { %12550 = vst [vmem:[#allocation34_spill] sm:$0xff] %v8544_v20 }
 0x4e5   : > { %v8376_v19 = vadd.f32 %v2206_v18, %v2205_v17  ;;  %v8552_v17 = vld [vmem:[%s7151_s3 + $0x88] sm:$0xff]  ;;  %v8556_v18 = vld [vmem:[%s7151_s3 + $0x98] sm:$0xff] }
 0x4e6   : > { %12552 = vst [vmem:[#allocation35_spill] sm:$0xff] %v8552_v17  ;;  %12553 = vst [vmem:[#allocation45_spill] sm:$0xff] %v8556_v18 }
 0x4e7   : > { %5553 = vtanh.f32 %v8376_v19 }
 0x4f4   : > { %v5554_v9 = vpop.eup %5553 }
 0x4f5   : > { %v2209_v22 = vmul.f32 %v5554_v9, %v5552_v2  ;;  %v8560_v2 = vld [vmem:[%s7151_s3 + $0x80] sm:$0xff]  ;;  %v8564_v9 = vld [vmem:[%s7151_s3 + $0x90] sm:$0xff] }
 0x4f6   : > { %12554 = vst [vmem:[#allocation36_spill] sm:$0xff] %v8560_v2  ;;  %12555 = vst [vmem:[#allocation46_spill] sm:$0xff] %v8564_v9 }
 0x4f7   : > { %v8379_v39 = vrot.slane %v2209_v22, 2  ;;  %v8568_v22 = vld [vmem:[%s7151_s3 + $0x68] sm:$0xff] }
 0x4f8   : > { %12556 = vst [vmem:[#allocation37_spill] sm:$0xff] %v8568_v22 }
 0x4f9   : > { %2282 = vmatmul.mubr.f32.vlgmr.msra.gmra.mxu1 %v8379_v39  ;;  %2353 = vmatmul.mubr.f32.vlgmr.msra.gmra.mxu0 %v8379_v39 }
 0x4fa   : > { %2385 = vmatpush1.msra.mxu1 %v8384_v15  ;;  %2456 = vmatpush1.msra.mxu0 %v8388_v40 }
 0x4fb   : > { %2386 = vmatprep.subr.mxu1 %v8392_v41  ;;  %2457 = vmatprep.subr.mxu0 %v8396_v42 }
 0x4fc   : > { %2387 = vmatpush1.msra.mxu1 %v8400_v43  ;;  %2458 = vmatpush1.msra.mxu0 %v8404_v44 }
 0x4fd   : > { %2388 = vmatprep.subr.mxu1 %v8408_v45  ;;  %2459 = vmatprep.subr.mxu0 %v8412_v46 }
 0x4fe   : > { %2389 = vmatpush1.msra.mxu1 %v8416_v47  ;;  %2460 = vmatpush1.msra.mxu0 %v8420_v48 }
 0x4ff   : > { %2390 = vmatprep.subr.mxu1 %v8424_v49  ;;  %2461 = vmatprep.subr.mxu0 %v8428_v50 }
 0x500   : > { %2391 = vmatpush1.msra.mxu1 %v8432_v51  ;;  %2462 = vmatpush1.msra.mxu0 %v8436_v52 }
 0x501   : > { %2392 = vmatprep.subr.mxu1 %v8440_v53  ;;  %2463 = vmatprep.subr.mxu0 %v8444_v54 }
 0x502   : > { %2393 = vmatpush1.msra.mxu1 %v8448_v55  ;;  %2464 = vmatpush1.msra.mxu0 %v8452_v56 }
 0x503   : > { %2394 = vmatprep.subr.mxu1 %v8456_v57  ;;  %2465 = vmatprep.subr.mxu0 %v8460_v23 }
 0x504   : > { %2395 = vmatpush1.msra.mxu1 %v8464_v24  ;;  %2466 = vmatpush1.msra.mxu0 %v8468_v25 }
 0x505   : > { %2396 = vmatprep.subr.mxu1 %v8472_v26  ;;  %2467 = vmatprep.subr.mxu0 %v8476_v27 }
 0x506   : > { %2397 = vmatpush1.msra.mxu1 %v8480_v28  ;;  %2468 = vmatpush1.msra.mxu0 %v8484_v29 }
 0x507   : > { %2398 = vmatprep.subr.mxu1 %v8488_v30  ;;  %2469 = vmatprep.subr.mxu0 %v8492_v31 }
 0x508   : > { %2399 = vmatpush1.msra.mxu1 %v8496_v32  ;;  %2470 = vmatpush1.msra.mxu0 %v8500_v33 }
 0x509   : > { %2400 = vmatprep.subr.mxu1 %v8504_v34  ;;  %2471 = vmatprep.subr.mxu0 %v8508_v35 }
 0x50a   : > { %2401 = vmatpush1.msra.mxu1 %v8512_v36  ;;  %2472 = vmatpush1.msra.mxu0 %v8516_v61 }
 0x50b   : > { %2402 = vmatprep.subr.mxu1 %v8520_v6  ;;  %2473 = vmatprep.subr.mxu0 %v8524_v3 }
 0x50c   : > { %2403 = vmatpush1.msra.mxu1 %v8528_v16  ;;  %2474 = vmatpush1.msra.mxu0 %v8532_v62 }
 0x50d   : > { %2404 = vmatprep.subr.mxu1 %v8536_v13  ;;  %2475 = vmatprep.subr.mxu0 %v8540_v60 }
 0x50e   : > { %2405 = vmatpush1.msra.mxu1 %v8544_v20  ;;  %2476 = vmatpush1.msra.mxu0 %v8548_v5 }
 0x50f   : > { %2406 = vmatprep.subr.mxu1 %v8552_v17  ;;  %2477 = vmatprep.subr.mxu0 %v8556_v18 }
 0x510   : > { %2407 = vmatpush1.msra.mxu1 %v8560_v2  ;;  %2478 = vmatpush1.msra.mxu0 %v8564_v9  ;;  %v8584_v9 = vld [vmem:[%s7151_s3 + $0x48] sm:$0xff]  ;;  %v8608_v2 = vld [vmem:[%s7151_s3 + $0x20] sm:$0xff] }
 0x511   : > { %2408 = vmatprep.subr.mxu1 %v8568_v22  ;;  %2479 = vmatprep.subr.mxu0 %v8572_v11  ;;  %12560 = vst [vmem:[#allocation39_spill] sm:$0xff] %v8584_v9  ;;  %v8588_v22 = vld [vmem:[%s7151_s3 + $0x58] sm:$0xff]  ;;  %v8592_v11 = vld [vmem:[%s7151_s3 + $0x40] sm:$0xff]  ;;  %12566 = vst [vmem:[#allocation52_spill] sm:$0xff] %v8608_v2 }
 0x512   : > { %2409 = vmatpush1.msra.mxu1 %v8576_v1  ;;  %2480 = vmatpush1.msra.mxu0 %v8580_v14  ;;  %12561 = vst [vmem:[#allocation49_spill] sm:$0xff] %v8588_v22  ;;  %12562 = vst [vmem:[#allocation40_spill] sm:$0xff] %v8592_v11  ;;  %v8596_v1 = vld [vmem:[%s7151_s3 + $0x50] sm:$0xff]  ;;  %v8600_v14 = vld [vmem:[%s7151_s3 + $0x28] sm:$0xff] }
 0x513   : > { %2410 = vmatprep.subr.mxu1 %v8584_v9  ;;  %2481 = vmatprep.subr.mxu0 %v8588_v22  ;;  %12563 = vst [vmem:[#allocation50_spill] sm:$0xff] %v8596_v1  ;;  %12564 = vst [vmem:[#allocation41_spill] sm:$0xff] %v8600_v14  ;;  %v8604_v9 = vld [vmem:[%s7151_s3 + $0x38] sm:$0xff]  ;;  %v8612_v22 = vld [vmem:[%s7151_s3 + $0x30] sm:$0xff] }
 0x514   : > { %2411 = vmatpush1.msra.mxu1 %v8592_v11  ;;  %2482 = vmatpush1.msra.mxu0 %v8596_v1  ;;  %12565 = vst [vmem:[#allocation51_spill] sm:$0xff] %v8604_v9  ;;  %12567 = vst [vmem:[#allocation53_spill] sm:$0xff] %v8612_v22  ;;  %v8616_v1 = vld [vmem:[%s7151_s3 + $0x8] sm:$0xff] }
 0x515   : > { %2412 = vmatprep.subr.mxu1 %v8600_v14  ;;  %2483 = vmatprep.subr.mxu0 %v8604_v9  ;;  %12568 = vst [vmem:[#allocation54_spill] sm:$0xff] %v8616_v1  ;;  %v8620_v14 = vld [vmem:[%s7151_s3 + $0x18] sm:$0xff]  ;;  %v8624_v9 = vld [vmem:[%s7151_s3] sm:$0xff] }
 0x516   : > { %2413 = vmatpush1.msra.mxu1 %v8608_v2  ;;  %2484 = vmatpush1.msra.mxu0 %v8612_v22  ;;  %12569 = vst [vmem:[#allocation55_spill] sm:$0xff] %v8620_v14  ;;  %12570 = vst [vmem:[#allocation56_spill] sm:$0xff] %v8624_v9  ;;  %v8629_v2 = vld [vmem:[%s7151_s3 + $0x10] sm:$0xff] }
 0x517   : > { %2414 = vmatprep.subr.mxu1 %v8616_v1  ;;  %2485 = vmatprep.subr.mxu0 %v8620_v14  ;;  %12571 = vst [vmem:[#allocation57_spill] sm:$0xff] %v8629_v2  ;;  %v8636_v14 = vld [vmem:[%s7159_s16 + $0x1e8] sm:$0xff]  ;;  %v8644_v1 = vld [vmem:[%s7159_s16 + $0x1e0] sm:$0xff] }
 0x518   : > { %2415 = vmatpush1.msra.mxu1 %v8624_v9  ;;  %2448 = vmatprep.mubr.f32.mxu1 %v12411_v58  ;;  %12572 = vst [vmem:[#allocation58_spill] sm:$0xff] %v8636_v14  ;;  %v8640_v9 = vld [vmem:[%s7159_s16 + $0x1f8] sm:$0xff]  ;;  %12574 = vst [vmem:[#allocation60_spill] sm:$0xff] %v8644_v1 }
 0x519   : > { %2486 = vmatpush1.msra.mxu0 %v8629_v2  ;;  %2519 = vmatprep.mubr.f32.mxu0 %v12411_v58  ;;  %12573 = vst [vmem:[#allocation59_spill] sm:$0xff] %v8640_v9  ;;  %v8648_v2 = vld [vmem:[%s7159_s16 + $0x1f0] sm:$0xff]  ;;  %v9124_v58 = vld [vmem:[%s7159_s16 + $0x220] sm:$0xff] }
 0x51a   : > { %2449 = vmatmul.mubr.f32.vlgmr.msra.gmra.mxu1 %v8379_v39  ;;  %2520 = vmatmul.mubr.f32.vlgmr.msra.gmra.mxu0 %v8379_v39  ;;  %12575 = vst [vmem:[#allocation61_spill] sm:$0xff] %v8648_v2  ;;  %v8652_v39 = vld [vmem:[%s7159_s16 + $0x1c8] sm:$0xff]  ;;  %12694 = vst [vmem:[#allocation180_spill] sm:$0xff] %v9124_v58 }
 0x51b   : > { %2576 = vmatprep.subr.mxu1 %v8636_v14  ;;  %2647 = vmatprep.subr.mxu0 %v8640_v9  ;;  %12576 = vst [vmem:[#allocation62_spill] sm:$0xff] %v8652_v39  ;;  %v8656_v14 = vld [vmem:[%s7159_s16 + $0x1d8] sm:$0xff]  ;;  %v8660_v9 = vld [vmem:[%s7159_s16 + $0x1c0] sm:$0xff] }
 0x51c   : > { %2577 = vmatpush1.msra.mxu1 %v8644_v1  ;;  %2648 = vmatpush1.msra.mxu0 %v8648_v2  ;;  %12577 = vst [vmem:[#allocation63_spill] sm:$0xff] %v8656_v14  ;;  %12578 = vst [vmem:[#allocation64_spill] sm:$0xff] %v8660_v9  ;;  %v8664_v1 = vld [vmem:[%s7159_s16 + $0x1d0] sm:$0xff]  ;;  %v8668_v2 = vld [vmem:[%s7159_s16 + $0x1a8] sm:$0xff] }
 0x51d   : > { %2578 = vmatprep.subr.mxu1 %v8652_v39  ;;  %2649 = vmatprep.subr.mxu0 %v8656_v14  ;;  %12579 = vst [vmem:[#allocation65_spill] sm:$0xff] %v8664_v1  ;;  %12580 = vst [vmem:[#allocation66_spill] sm:$0xff] %v8668_v2  ;;  %v8672_v39 = vld [vmem:[%s7159_s16 + $0x1b8] sm:$0xff]  ;;  %v8676_v14 = vld [vmem:[%s7159_s16 + $0x1a0] sm:$0xff] }
 0x51e   : > { %2579 = vmatpush1.msra.mxu1 %v8660_v9  ;;  %2650 = vmatpush1.msra.mxu0 %v8664_v1  ;;  %12581 = vst [vmem:[#allocation67_spill] sm:$0xff] %v8672_v39  ;;  %12582 = vst [vmem:[#allocation68_spill] sm:$0xff] %v8676_v14  ;;  %v8680_v9 = vld [vmem:[%s7159_s16 + $0x1b0] sm:$0xff]  ;;  %v8684_v1 = vld [vmem:[%s7159_s16 + $0x188] sm:$0xff] }
 0x51f   : > { %2580 = vmatprep.subr.mxu1 %v8668_v2  ;;  %2651 = vmatprep.subr.mxu0 %v8672_v39  ;;  %12583 = vst [vmem:[#allocation69_spill] sm:$0xff] %v8680_v9  ;;  %12584 = vst [vmem:[#allocation70_spill] sm:$0xff] %v8684_v1  ;;  %v8688_v2 = vld [vmem:[%s7159_s16 + $0x198] sm:$0xff]  ;;  %v8692_v39 = vld [vmem:[%s7159_s16 + $0x180] sm:$0xff] }
 0x520   : > { %2581 = vmatpush1.msra.mxu1 %v8676_v14  ;;  %2652 = vmatpush1.msra.mxu0 %v8680_v9  ;;  %12585 = vst [vmem:[#allocation71_spill] sm:$0xff] %v8688_v2  ;;  %12586 = vst [vmem:[#allocation72_spill] sm:$0xff] %v8692_v39  ;;  %v8696_v14 = vld [vmem:[%s7159_s16 + $0x190] sm:$0xff]  ;;  %v8700_v9 = vld [vmem:[%s7159_s16 + $0x168] sm:$0xff] }
 0x521   : > { %2582 = vmatprep.subr.mxu1 %v8684_v1  ;;  %2653 = vmatprep.subr.mxu0 %v8688_v2  ;;  %12587 = vst [vmem:[#allocation73_spill] sm:$0xff] %v8696_v14  ;;  %12588 = vst [vmem:[#allocation74_spill] sm:$0xff] %v8700_v9  ;;  %v8704_v1 = vld [vmem:[%s7159_s16 + $0x178] sm:$0xff]  ;;  %v8708_v2 = vld [vmem:[%s7159_s16 + $0x160] sm:$0xff] }
 0x522   : > { %2583 = vmatpush1.msra.mxu1 %v8692_v39  ;;  %2654 = vmatpush1.msra.mxu0 %v8696_v14  ;;  %12589 = vst [vmem:[#allocation75_spill] sm:$0xff] %v8704_v1  ;;  %12590 = vst [vmem:[#allocation76_spill] sm:$0xff] %v8708_v2  ;;  %v8712_v39 = vld [vmem:[%s7159_s16 + $0x170] sm:$0xff]  ;;  %v8716_v14 = vld [vmem:[%s7159_s16 + $0x148] sm:$0xff] }
 0x523   : > { %2584 = vmatprep.subr.mxu1 %v8700_v9  ;;  %2655 = vmatprep.subr.mxu0 %v8704_v1  ;;  %12591 = vst [vmem:[#allocation77_spill] sm:$0xff] %v8712_v39  ;;  %12592 = vst [vmem:[#allocation78_spill] sm:$0xff] %v8716_v14  ;;  %v8720_v9 = vld [vmem:[%s7159_s16 + $0x158] sm:$0xff]  ;;  %v8724_v1 = vld [vmem:[%s7159_s16 + $0x140] sm:$0xff] }
 0x524   : > { %2585 = vmatpush1.msra.mxu1 %v8708_v2  ;;  %2656 = vmatpush1.msra.mxu0 %v8712_v39  ;;  %12593 = vst [vmem:[#allocation79_spill] sm:$0xff] %v8720_v9  ;;  %12594 = vst [vmem:[#allocation80_spill] sm:$0xff] %v8724_v1  ;;  %v8728_v2 = vld [vmem:[%s7159_s16 + $0x150] sm:$0xff]  ;;  %v8732_v39 = vld [vmem:[%s7159_s16 + $0x128] sm:$0xff] }
 0x525   : > { %2586 = vmatprep.subr.mxu1 %v8716_v14  ;;  %2657 = vmatprep.subr.mxu0 %v8720_v9  ;;  %12595 = vst [vmem:[#allocation81_spill] sm:$0xff] %v8728_v2  ;;  %12596 = vst [vmem:[#allocation82_spill] sm:$0xff] %v8732_v39  ;;  %v8736_v14 = vld [vmem:[%s7159_s16 + $0x138] sm:$0xff]  ;;  %v8740_v9 = vld [vmem:[%s7159_s16 + $0x120] sm:$0xff] }
 0x526   : > { %2587 = vmatpush1.msra.mxu1 %v8724_v1  ;;  %2658 = vmatpush1.msra.mxu0 %v8728_v2  ;;  %12597 = vst [vmem:[#allocation83_spill] sm:$0xff] %v8736_v14  ;;  %12598 = vst [vmem:[#allocation84_spill] sm:$0xff] %v8740_v9  ;;  %v8744_v1 = vld [vmem:[%s7159_s16 + $0x130] sm:$0xff]  ;;  %v8748_v2 = vld [vmem:[%s7159_s16 + $0x108] sm:$0xff] }
 0x527   : > { %2588 = vmatprep.subr.mxu1 %v8732_v39  ;;  %2659 = vmatprep.subr.mxu0 %v8736_v14  ;;  %12599 = vst [vmem:[#allocation85_spill] sm:$0xff] %v8744_v1  ;;  %12600 = vst [vmem:[#allocation86_spill] sm:$0xff] %v8748_v2  ;;  %v8752_v39 = vld [vmem:[%s7159_s16 + $0x118] sm:$0xff]  ;;  %v8756_v14 = vld [vmem:[%s7159_s16 + $0x100] sm:$0xff] }
 0x528   : > { %2589 = vmatpush1.msra.mxu1 %v8740_v9  ;;  %2660 = vmatpush1.msra.mxu0 %v8744_v1  ;;  %12601 = vst [vmem:[#allocation87_spill] sm:$0xff] %v8752_v39  ;;  %12602 = vst [vmem:[#allocation88_spill] sm:$0xff] %v8756_v14  ;;  %v8760_v9 = vld [vmem:[%s7159_s16 + $0x110] sm:$0xff]  ;;  %v8764_v1 = vld [vmem:[%s7159_s16 + $0xe8] sm:$0xff] }
 0x529   : > { %2590 = vmatprep.subr.mxu1 %v8748_v2  ;;  %2661 = vmatprep.subr.mxu0 %v8752_v39  ;;  %12603 = vst [vmem:[#allocation89_spill] sm:$0xff] %v8760_v9  ;;  %12604 = vst [vmem:[#allocation90_spill] sm:$0xff] %v8764_v1  ;;  %v8768_v2 = vld [vmem:[%s7159_s16 + $0xf8] sm:$0xff]  ;;  %v8772_v39 = vld [vmem:[%s7159_s16 + $0xe0] sm:$0xff] }
 0x52a   : > { %2591 = vmatpush1.msra.mxu1 %v8756_v14  ;;  %2662 = vmatpush1.msra.mxu0 %v8760_v9  ;;  %12605 = vst [vmem:[#allocation91_spill] sm:$0xff] %v8768_v2  ;;  %12606 = vst [vmem:[#allocation92_spill] sm:$0xff] %v8772_v39  ;;  %v8776_v14 = vld [vmem:[%s7159_s16 + $0xf0] sm:$0xff]  ;;  %v8780_v9 = vld [vmem:[%s7159_s16 + $0xc8] sm:$0xff] }
 0x52b   : > { %2592 = vmatprep.subr.mxu1 %v8764_v1  ;;  %2663 = vmatprep.subr.mxu0 %v8768_v2  ;;  %12607 = vst [vmem:[#allocation93_spill] sm:$0xff] %v8776_v14  ;;  %12608 = vst [vmem:[#allocation94_spill] sm:$0xff] %v8780_v9  ;;  %v8784_v1 = vld [vmem:[%s7159_s16 + $0xd8] sm:$0xff]  ;;  %v8788_v2 = vld [vmem:[%s7159_s16 + $0xc0] sm:$0xff] }
 0x52c   : > { %2593 = vmatpush1.msra.mxu1 %v8772_v39  ;;  %2664 = vmatpush1.msra.mxu0 %v8776_v14  ;;  %12609 = vst [vmem:[#allocation95_spill] sm:$0xff] %v8784_v1  ;;  %12610 = vst [vmem:[#allocation96_spill] sm:$0xff] %v8788_v2  ;;  %v8792_v39 = vld [vmem:[%s7159_s16 + $0xd0] sm:$0xff]  ;;  %v8796_v14 = vld [vmem:[%s7159_s16 + $0xa8] sm:$0xff] }
 0x52d   : > { %2594 = vmatprep.subr.mxu1 %v8780_v9  ;;  %2665 = vmatprep.subr.mxu0 %v8784_v1  ;;  %12611 = vst [vmem:[#allocation97_spill] sm:$0xff] %v8792_v39  ;;  %12612 = vst [vmem:[#allocation98_spill] sm:$0xff] %v8796_v14  ;;  %v8800_v9 = vld [vmem:[%s7159_s16 + $0xb8] sm:$0xff]  ;;  %v8804_v1 = vld [vmem:[%s7159_s16 + $0xa0] sm:$0xff] }
 0x52e   : > { %2595 = vmatpush1.msra.mxu1 %v8788_v2  ;;  %2666 = vmatpush1.msra.mxu0 %v8792_v39  ;;  %12613 = vst [vmem:[#allocation99_spill] sm:$0xff] %v8800_v9  ;;  %12614 = vst [vmem:[#allocation100_spill] sm:$0xff] %v8804_v1  ;;  %v8808_v2 = vld [vmem:[%s7159_s16 + $0xb0] sm:$0xff]  ;;  %v8812_v39 = vld [vmem:[%s7159_s16 + $0x88] sm:$0xff] }
 0x52f   : > { %2596 = vmatprep.subr.mxu1 %v8796_v14  ;;  %2667 = vmatprep.subr.mxu0 %v8800_v9  ;;  %12615 = vst [vmem:[#allocation101_spill] sm:$0xff] %v8808_v2  ;;  %12616 = vst [vmem:[#allocation102_spill] sm:$0xff] %v8812_v39  ;;  %v8816_v14 = vld [vmem:[%s7159_s16 + $0x98] sm:$0xff]  ;;  %v8820_v9 = vld [vmem:[%s7159_s16 + $0x80] sm:$0xff] }
 0x530   : > { %2597 = vmatpush1.msra.mxu1 %v8804_v1  ;;  %2668 = vmatpush1.msra.mxu0 %v8808_v2  ;;  %12617 = vst [vmem:[#allocation103_spill] sm:$0xff] %v8816_v14  ;;  %12618 = vst [vmem:[#allocation104_spill] sm:$0xff] %v8820_v9  ;;  %v8824_v1 = vld [vmem:[%s7159_s16 + $0x90] sm:$0xff]  ;;  %v8828_v2 = vld [vmem:[%s7159_s16 + $0x68] sm:$0xff] }
 0x531   : > { %2598 = vmatprep.subr.mxu1 %v8812_v39  ;;  %2669 = vmatprep.subr.mxu0 %v8816_v14  ;;  %12619 = vst [vmem:[#allocation105_spill] sm:$0xff] %v8824_v1  ;;  %12620 = vst [vmem:[#allocation106_spill] sm:$0xff] %v8828_v2  ;;  %v8832_v39 = vld [vmem:[%s7159_s16 + $0x78] sm:$0xff]  ;;  %v8836_v14 = vld [vmem:[%s7159_s16 + $0x60] sm:$0xff] }
 0x532   : > { %2599 = vmatpush1.msra.mxu1 %v8820_v9  ;;  %2670 = vmatpush1.msra.mxu0 %v8824_v1  ;;  %12621 = vst [vmem:[#allocation107_spill] sm:$0xff] %v8832_v39  ;;  %12622 = vst [vmem:[#allocation108_spill] sm:$0xff] %v8836_v14  ;;  %v8840_v9 = vld [vmem:[%s7159_s16 + $0x70] sm:$0xff]  ;;  %v8844_v1 = vld [vmem:[%s7159_s16 + $0x48] sm:$0xff] }
 0x533   : > { %2600 = vmatprep.subr.mxu1 %v8828_v2  ;;  %2671 = vmatprep.subr.mxu0 %v8832_v39  ;;  %12623 = vst [vmem:[#allocation109_spill] sm:$0xff] %v8840_v9  ;;  %12624 = vst [vmem:[#allocation110_spill] sm:$0xff] %v8844_v1  ;;  %v8848_v2 = vld [vmem:[%s7159_s16 + $0x58] sm:$0xff]  ;;  %v8852_v39 = vld [vmem:[%s7159_s16 + $0x40] sm:$0xff] }
 0x534   : > { %2601 = vmatpush1.msra.mxu1 %v8836_v14  ;;  %2672 = vmatpush1.msra.mxu0 %v8840_v9  ;;  %12625 = vst [vmem:[#allocation111_spill] sm:$0xff] %v8848_v2  ;;  %12626 = vst [vmem:[#allocation112_spill] sm:$0xff] %v8852_v39  ;;  %v8856_v14 = vld [vmem:[%s7159_s16 + $0x50] sm:$0xff]  ;;  %v8860_v9 = vld [vmem:[%s7159_s16 + $0x28] sm:$0xff] }
 0x535   : > { %2602 = vmatprep.subr.mxu1 %v8844_v1  ;;  %2673 = vmatprep.subr.mxu0 %v8848_v2  ;;  %12627 = vst [vmem:[#allocation113_spill] sm:$0xff] %v8856_v14  ;;  %12628 = vst [vmem:[#allocation114_spill] sm:$0xff] %v8860_v9  ;;  %v8864_v1 = vld [vmem:[%s7159_s16 + $0x38] sm:$0xff]  ;;  %v8868_v2 = vld [vmem:[%s7159_s16 + $0x20] sm:$0xff] }
 0x536   : > { %2603 = vmatpush1.msra.mxu1 %v8852_v39  ;;  %2674 = vmatpush1.msra.mxu0 %v8856_v14  ;;  %12629 = vst [vmem:[#allocation115_spill] sm:$0xff] %v8864_v1  ;;  %12630 = vst [vmem:[#allocation116_spill] sm:$0xff] %v8868_v2  ;;  %v8872_v39 = vld [vmem:[%s7159_s16 + $0x30] sm:$0xff]  ;;  %v8876_v14 = vld [vmem:[%s7159_s16 + $0x8] sm:$0xff] }
 0x537   : > { %2604 = vmatprep.subr.mxu1 %v8860_v9  ;;  %2675 = vmatprep.subr.mxu0 %v8864_v1  ;;  %12631 = vst [vmem:[#allocation117_spill] sm:$0xff] %v8872_v39  ;;  %12632 = vst [vmem:[#allocation118_spill] sm:$0xff] %v8876_v14  ;;  %v8880_v9 = vld [vmem:[%s7159_s16 + $0x18] sm:$0xff]  ;;  %v8884_v1 = vld [vmem:[%s7159_s16] sm:$0xff] }
 0x538   : > { %2605 = vmatpush1.msra.mxu1 %v8868_v2  ;;  %2676 = vmatpush1.msra.mxu0 %v8872_v39  ;;  %12633 = vst [vmem:[#allocation119_spill] sm:$0xff] %v8880_v9  ;;  %12634 = vst [vmem:[#allocation120_spill] sm:$0xff] %v8884_v1  ;;  %v8888_v2 = vld [vmem:[%s7159_s16 + $0x10] sm:$0xff]  ;;  %v8892_v39 = vld [vmem:[%s7159_s16 + $0x3e8] sm:$0xff] }
 0x539   : > { %2606 = vmatprep.subr.mxu1 %v8876_v14  ;;  %2677 = vmatprep.subr.mxu0 %v8880_v9  ;;  %12635 = vst [vmem:[#allocation121_spill] sm:$0xff] %v8888_v2  ;;  %12636 = vst [vmem:[#allocation122_spill] sm:$0xff] %v8892_v39  ;;  %v8896_v14 = vld [vmem:[%s7159_s16 + $0x3f8] sm:$0xff]  ;;  %v8900_v9 = vld [vmem:[%s7159_s16 + $0x3e0] sm:$0xff] }
 0x53a   : > { %2607 = vmatpush1.msra.mxu1 %v8884_v1  ;;  %2678 = vmatpush1.msra.mxu0 %v8888_v2  ;;  %12637 = vst [vmem:[#allocation123_spill] sm:$0xff] %v8896_v14  ;;  %12638 = vst [vmem:[#allocation124_spill] sm:$0xff] %v8900_v9  ;;  %v8904_v1 = vld [vmem:[%s7159_s16 + $0x3f0] sm:$0xff]  ;;  %v8908_v2 = vld [vmem:[%s7159_s16 + $0x3c8] sm:$0xff] }
 0x53b   : > { %2608 = vmatprep.subr.mxu1 %v8892_v39  ;;  %2679 = vmatprep.subr.mxu0 %v8896_v14  ;;  %12639 = vst [vmem:[#allocation125_spill] sm:$0xff] %v8904_v1  ;;  %12640 = vst [vmem:[#allocation126_spill] sm:$0xff] %v8908_v2  ;;  %v8912_v39 = vld [vmem:[%s7159_s16 + $0x3d8] sm:$0xff]  ;;  %v8916_v14 = vld [vmem:[%s7159_s16 + $0x3c0] sm:$0xff] }
 0x53c   : > { %2609 = vmatpush2.msra.mxu1 %v8900_v9  ;;  %2680 = vmatpush2.msra.mxu0 %v8904_v1  ;;  %12641 = vst [vmem:[#allocation127_spill] sm:$0xff] %v8912_v39  ;;  %12642 = vst [vmem:[#allocation128_spill] sm:$0xff] %v8916_v14  ;;  %v8920_v9 = vld [vmem:[%s7159_s16 + $0x3d0] sm:$0xff]  ;;  %v8924_v1 = vld [vmem:[%s7159_s16 + $0x3a8] sm:$0xff] }
 0x53d   : > { %2610 = vmatprep.subr.mxu1 %v8908_v2  ;;  %2681 = vmatprep.subr.mxu0 %v8912_v39  ;;  %12643 = vst [vmem:[#allocation129_spill] sm:$0xff] %v8920_v9  ;;  %12644 = vst [vmem:[#allocation130_spill] sm:$0xff] %v8924_v1  ;;  %v8928_v2 = vld [vmem:[%s7159_s16 + $0x3b8] sm:$0xff]  ;;  %v8932_v39 = vld [vmem:[%s7159_s16 + $0x3a0] sm:$0xff] }
 0x53e   : > { %2611 = vmatpush2.msra.mxu1 %v8916_v14  ;;  %2682 = vmatpush2.msra.mxu0 %v8920_v9  ;;  %12645 = vst [vmem:[#allocation131_spill] sm:$0xff] %v8928_v2  ;;  %12646 = vst [vmem:[#allocation132_spill] sm:$0xff] %v8932_v39  ;;  %v8936_v14 = vld [vmem:[%s7159_s16 + $0x3b0] sm:$0xff]  ;;  %v8940_v9 = vld [vmem:[%s7159_s16 + $0x388] sm:$0xff] }
 0x53f   : > { %2612 = vmatprep.subr.mxu1 %v8924_v1  ;;  %2683 = vmatprep.subr.mxu0 %v8928_v2  ;;  %12647 = vst [vmem:[#allocation133_spill] sm:$0xff] %v8936_v14  ;;  %12648 = vst [vmem:[#allocation134_spill] sm:$0xff] %v8940_v9  ;;  %v8944_v1 = vld [vmem:[%s7159_s16 + $0x398] sm:$0xff]  ;;  %v8948_v2 = vld [vmem:[%s7159_s16 + $0x380] sm:$0xff] }
 0x540   : > { %2613 = vmatpush2.msra.mxu1 %v8932_v39  ;;  %2684 = vmatpush2.msra.mxu0 %v8936_v14  ;;  %12649 = vst [vmem:[#allocation135_spill] sm:$0xff] %v8944_v1  ;;  %12650 = vst [vmem:[#allocation136_spill] sm:$0xff] %v8948_v2  ;;  %v8952_v39 = vld [vmem:[%s7159_s16 + $0x390] sm:$0xff]  ;;  %v8956_v14 = vld [vmem:[%s7159_s16 + $0x368] sm:$0xff] }
 0x541   : > { %2614 = vmatprep.subr.mxu1 %v8940_v9  ;;  %2685 = vmatprep.subr.mxu0 %v8944_v1  ;;  %12651 = vst [vmem:[#allocation137_spill] sm:$0xff] %v8952_v39  ;;  %12652 = vst [vmem:[#allocation138_spill] sm:$0xff] %v8956_v14  ;;  %v8960_v9 = vld [vmem:[%s7159_s16 + $0x378] sm:$0xff]  ;;  %v8964_v1 = vld [vmem:[%s7159_s16 + $0x360] sm:$0xff] }
 0x542   : > { %2615 = vmatpush2.msra.mxu1 %v8948_v2  ;;  %2686 = vmatpush2.msra.mxu0 %v8952_v39  ;;  %12653 = vst [vmem:[#allocation139_spill] sm:$0xff] %v8960_v9  ;;  %12654 = vst [vmem:[#allocation140_spill] sm:$0xff] %v8964_v1  ;;  %v8968_v2 = vld [vmem:[%s7159_s16 + $0x370] sm:$0xff]  ;;  %v8972_v39 = vld [vmem:[%s7159_s16 + $0x348] sm:$0xff] }
 0x543   : > { %2616 = vmatprep.subr.mxu1 %v8956_v14  ;;  %2687 = vmatprep.subr.mxu0 %v8960_v9  ;;  %12655 = vst [vmem:[#allocation141_spill] sm:$0xff] %v8968_v2  ;;  %12656 = vst [vmem:[#allocation142_spill] sm:$0xff] %v8972_v39  ;;  %v8976_v14 = vld [vmem:[%s7159_s16 + $0x358] sm:$0xff]  ;;  %v8980_v9 = vld [vmem:[%s7159_s16 + $0x340] sm:$0xff] }
 0x544   : > { %2617 = vmatpush2.msra.mxu1 %v8964_v1  ;;  %2688 = vmatpush2.msra.mxu0 %v8968_v2  ;;  %12657 = vst [vmem:[#allocation143_spill] sm:$0xff] %v8976_v14  ;;  %12658 = vst [vmem:[#allocation144_spill] sm:$0xff] %v8980_v9  ;;  %v8984_v1 = vld [vmem:[%s7159_s16 + $0x350] sm:$0xff]  ;;  %v8988_v2 = vld [vmem:[%s7159_s16 + $0x328] sm:$0xff] }
 0x545   : > { %2618 = vmatprep.subr.mxu1 %v8972_v39  ;;  %2689 = vmatprep.subr.mxu0 %v8976_v14  ;;  %12659 = vst [vmem:[#allocation145_spill] sm:$0xff] %v8984_v1  ;;  %12660 = vst [vmem:[#allocation146_spill] sm:$0xff] %v8988_v2  ;;  %v8992_v39 = vld [vmem:[%s7159_s16 + $0x338] sm:$0xff]  ;;  %v8996_v14 = vld [vmem:[%s7159_s16 + $0x320] sm:$0xff] }
 0x546   : > { %2619 = vmatpush2.msra.mxu1 %v8980_v9  ;;  %2690 = vmatpush2.msra.mxu0 %v8984_v1  ;;  %12661 = vst [vmem:[#allocation147_spill] sm:$0xff] %v8992_v39  ;;  %12662 = vst [vmem:[#allocation148_spill] sm:$0xff] %v8996_v14  ;;  %v9000_v9 = vld [vmem:[%s7159_s16 + $0x330] sm:$0xff]  ;;  %v9004_v1 = vld [vmem:[%s7159_s16 + $0x308] sm:$0xff] }
 0x547   : > { %2620 = vmatprep.subr.mxu1 %v8988_v2  ;;  %2691 = vmatprep.subr.mxu0 %v8992_v39  ;;  %12663 = vst [vmem:[#allocation149_spill] sm:$0xff] %v9000_v9  ;;  %12664 = vst [vmem:[#allocation150_spill] sm:$0xff] %v9004_v1  ;;  %v9008_v2 = vld [vmem:[%s7159_s16 + $0x318] sm:$0xff]  ;;  %v9012_v39 = vld [vmem:[%s7159_s16 + $0x300] sm:$0xff] }
 0x548   : > { %2621 = vmatpush2.msra.mxu1 %v8996_v14  ;;  %2692 = vmatpush2.msra.mxu0 %v9000_v9  ;;  %12665 = vst [vmem:[#allocation151_spill] sm:$0xff] %v9008_v2  ;;  %12666 = vst [vmem:[#allocation152_spill] sm:$0xff] %v9012_v39  ;;  %v9016_v14 = vld [vmem:[%s7159_s16 + $0x310] sm:$0xff]  ;;  %v9020_v9 = vld [vmem:[%s7159_s16 + $0x2e8] sm:$0xff] }
 0x549   : > { %2622 = vmatprep.subr.mxu1 %v9004_v1  ;;  %2693 = vmatprep.subr.mxu0 %v9008_v2  ;;  %12667 = vst [vmem:[#allocation153_spill] sm:$0xff] %v9016_v14  ;;  %12668 = vst [vmem:[#allocation154_spill] sm:$0xff] %v9020_v9  ;;  %v9024_v1 = vld [vmem:[%s7159_s16 + $0x2f8] sm:$0xff]  ;;  %v9028_v2 = vld [vmem:[%s7159_s16 + $0x2e0] sm:$0xff] }
 0x54a   : > { %2623 = vmatpush2.msra.mxu1 %v9012_v39  ;;  %2694 = vmatpush2.msra.mxu0 %v9016_v14  ;;  %12669 = vst [vmem:[#allocation155_spill] sm:$0xff] %v9024_v1  ;;  %12670 = vst [vmem:[#allocation156_spill] sm:$0xff] %v9028_v2  ;;  %v9032_v39 = vld [vmem:[%s7159_s16 + $0x2f0] sm:$0xff]  ;;  %v9036_v14 = vld [vmem:[%s7159_s16 + $0x2c8] sm:$0xff] }
 0x54b   : > { %2624 = vmatprep.subr.mxu1 %v9020_v9  ;;  %2695 = vmatprep.subr.mxu0 %v9024_v1  ;;  %12671 = vst [vmem:[#allocation157_spill] sm:$0xff] %v9032_v39  ;;  %12672 = vst [vmem:[#allocation158_spill] sm:$0xff] %v9036_v14  ;;  %v9040_v9 = vld [vmem:[%s7159_s16 + $0x2d8] sm:$0xff]  ;;  %v9044_v1 = vld [vmem:[%s7159_s16 + $0x2c0] sm:$0xff] }
 0x54c   : > { %2625 = vmatpush2.msra.mxu1 %v9028_v2  ;;  %2696 = vmatpush2.msra.mxu0 %v9032_v39  ;;  %12673 = vst [vmem:[#allocation159_spill] sm:$0xff] %v9040_v9  ;;  %12674 = vst [vmem:[#allocation160_spill] sm:$0xff] %v9044_v1  ;;  %v9048_v2 = vld [vmem:[%s7159_s16 + $0x2d0] sm:$0xff]  ;;  %v9052_v39 = vld [vmem:[%s7159_s16 + $0x2a8] sm:$0xff] }
 0x54d   : > { %2626 = vmatprep.subr.mxu1 %v9036_v14  ;;  %2697 = vmatprep.subr.mxu0 %v9040_v9  ;;  %12675 = vst [vmem:[#allocation161_spill] sm:$0xff] %v9048_v2  ;;  %12676 = vst [vmem:[#allocation162_spill] sm:$0xff] %v9052_v39  ;;  %v9056_v14 = vld [vmem:[%s7159_s16 + $0x2b8] sm:$0xff]  ;;  %v9060_v9 = vld [vmem:[%s7159_s16 + $0x2a0] sm:$0xff] }
 0x54e   : > { %2627 = vmatpush2.msra.mxu1 %v9044_v1  ;;  %2698 = vmatpush2.msra.mxu0 %v9048_v2  ;;  %12677 = vst [vmem:[#allocation163_spill] sm:$0xff] %v9056_v14  ;;  %12678 = vst [vmem:[#allocation164_spill] sm:$0xff] %v9060_v9  ;;  %v9064_v1 = vld [vmem:[%s7159_s16 + $0x2b0] sm:$0xff]  ;;  %v9068_v2 = vld [vmem:[%s7159_s16 + $0x288] sm:$0xff] }
 0x54f   : > { %2628 = vmatprep.subr.mxu1 %v9052_v39  ;;  %2699 = vmatprep.subr.mxu0 %v9056_v14  ;;  %12679 = vst [vmem:[#allocation165_spill] sm:$0xff] %v9064_v1  ;;  %12680 = vst [vmem:[#allocation166_spill] sm:$0xff] %v9068_v2  ;;  %v9072_v39 = vld [vmem:[%s7159_s16 + $0x298] sm:$0xff]  ;;  %v9076_v14 = vld [vmem:[%s7159_s16 + $0x280] sm:$0xff] }
 0x550   : > { %2629 = vmatpush2.msra.mxu1 %v9060_v9  ;;  %2700 = vmatpush2.msra.mxu0 %v9064_v1  ;;  %12681 = vst [vmem:[#allocation167_spill] sm:$0xff] %v9072_v39  ;;  %12682 = vst [vmem:[#allocation168_spill] sm:$0xff] %v9076_v14  ;;  %v9080_v9 = vld [vmem:[%s7159_s16 + $0x290] sm:$0xff]  ;;  %v9084_v1 = vld [vmem:[%s7159_s16 + $0x268] sm:$0xff] }
 0x551   : > { %2630 = vmatprep.subr.mxu1 %v9068_v2  ;;  %2701 = vmatprep.subr.mxu0 %v9072_v39  ;;  %12683 = vst [vmem:[#allocation169_spill] sm:$0xff] %v9080_v9  ;;  %12684 = vst [vmem:[#allocation170_spill] sm:$0xff] %v9084_v1  ;;  %v9088_v2 = vld [vmem:[%s7159_s16 + $0x278] sm:$0xff]  ;;  %v9092_v39 = vld [vmem:[%s7159_s16 + $0x260] sm:$0xff] }
 0x552   : > { %2631 = vmatpush2.msra.mxu1 %v9076_v14  ;;  %2702 = vmatpush2.msra.mxu0 %v9080_v9  ;;  %12685 = vst [vmem:[#allocation171_spill] sm:$0xff] %v9088_v2  ;;  %12686 = vst [vmem:[#allocation172_spill] sm:$0xff] %v9092_v39  ;;  %v9096_v14 = vld [vmem:[%s7159_s16 + $0x270] sm:$0xff]  ;;  %v9100_v9 = vld [vmem:[%s7159_s16 + $0x248] sm:$0xff] }
 0x553   : > { %2632 = vmatprep.subr.mxu1 %v9084_v1  ;;  %2703 = vmatprep.subr.mxu0 %v9088_v2  ;;  %12687 = vst [vmem:[#allocation173_spill] sm:$0xff] %v9096_v14  ;;  %12688 = vst [vmem:[#allocation174_spill] sm:$0xff] %v9100_v9  ;;  %v9104_v1 = vld [vmem:[%s7159_s16 + $0x258] sm:$0xff]  ;;  %v9108_v2 = vld [vmem:[%s7159_s16 + $0x240] sm:$0xff] }
 0x554   : > { %2633 = vmatpush2.msra.mxu1 %v9092_v39  ;;  %2704 = vmatpush2.msra.mxu0 %v9096_v14  ;;  %12689 = vst [vmem:[#allocation175_spill] sm:$0xff] %v9104_v1  ;;  %12690 = vst [vmem:[#allocation176_spill] sm:$0xff] %v9108_v2  ;;  %v9112_v39 = vld [vmem:[%s7159_s16 + $0x250] sm:$0xff]  ;;  %v9116_v14 = vld [vmem:[%s7159_s16 + $0x228] sm:$0xff] }
 0x555   : > { %2634 = vmatprep.subr.mxu1 %v9100_v9  ;;  %2705 = vmatprep.subr.mxu0 %v9104_v1  ;;  %12691 = vst [vmem:[#allocation177_spill] sm:$0xff] %v9112_v39  ;;  %12692 = vst [vmem:[#allocation178_spill] sm:$0xff] %v9116_v14  ;;  %v9120_v9 = vld [vmem:[%s7159_s16 + $0x238] sm:$0xff]  ;;  %v9128_v1 = vld [vmem:[%s7159_s16 + $0x230] sm:$0xff] }
 0x556   : > { %2635 = vmatpush2.msra.mxu1 %v9108_v2  ;;  %2706 = vmatpush2.msra.mxu0 %v9112_v39  ;;  %12693 = vst [vmem:[#allocation179_spill] sm:$0xff] %v9120_v9  ;;  %12695 = vst [vmem:[#allocation188_spill] sm:$0xff] %v9128_v1  ;;  %v9132_v2 = vld [vmem:[%s7159_s16 + $0x208] sm:$0xff]  ;;  %v9136_v39 = vld [vmem:[%s7159_s16 + $0x218] sm:$0xff] }
 0x557   : > { %2636 = vmatprep.subr.mxu1 %v9116_v14  ;;  %2707 = vmatprep.subr.mxu0 %v9120_v9  ;;  %12696 = vst [vmem:[#allocation189_spill] sm:$0xff] %v9132_v2  ;;  %12697 = vst [vmem:[#allocation190_spill] sm:$0xff] %v9136_v39  ;;  %v9140_v14 = vld [vmem:[%s7159_s16 + $0x200] sm:$0xff]  ;;  %v9144_v9 = vld [vmem:[%s7159_s16 + $0x210] sm:$0xff] }
 0x558   : > { %2637 = vmatpush2.msra.mxu1 %v9124_v58  ;;  %2708 = vmatpush2.msra.mxu0 %v9128_v1  ;;  %12698 = vst [vmem:[#allocation191_spill] sm:$0xff] %v9140_v14  ;;  %12699 = vst [vmem:[#allocation192_spill] sm:$0xff] %v9144_v9 }
 0x559   : > { %2638 = vmatprep.subr.mxu1 %v9132_v2  ;;  %2709 = vmatprep.subr.mxu0 %v9136_v39 }
 0x55a   : > { %2639 = vmatpush2.msra.mxu1 %v9140_v14  ;;  %2710 = vmatpush2.msra.mxu0 %v9144_v9 }
 0x55b   : > { %2743 = vmatprep.subr.mxu1 %v8339_v37  ;;  %2814 = vmatprep.subr.mxu0 %v8343_v38 }
 0x5b9   : > { %v2283_v1 = vpop.f32.mrf.mxu1  ;;  %v2354_v18 = vpop.f32.mrf.mxu0 }
 0x5ba   : > { %v2284_v58 = vadd.f32 %v2283_v1, %v8349_v4  ;;  %v2355_v14 = vadd.f32 %v2354_v18, %v8358_v10 }
 0x5bb   : > { %v2285_v2 = vpop.f32.mrf.mxu1  ;;  %v2356_v5 = vpop.f32.mrf.mxu0 }
 0x5bc   : > { %v5233_v22 = vmul.f32 -1.442695, %v2284_v58  ;;  %v2286_v11 = vadd.f32 %v2285_v2, %v8352_v12  ;;  %v5235_v17 = vmul.f32 -1.442695, %v2355_v14  ;;  %v2357_v37 = vadd.f32 %v2356_v5, %v8363_v63 }
 0x5be   : > { %5555 = vpow2.f32 %v5233_v22  ;;  %v5234_v39 = vmul.f32 -1.442695, %v2286_v11 }
 0x5c0   : > { %5557 = vpow2.f32 %v5234_v39 }
 0x5c1   : > { %5559 = vpow2.f32 %v5235_v17 }
 0x5cb   : > { %v5556_v9 = vpop.eup %5555 }
 0x5cc   : > { %v2368_v20 = vadd.f32 1.0, %v5556_v9 }
 0x5cd   : > { %v5558_v38 = vpop.eup %5557 }
 0x5ce   : > { %5561 = vrcp.f32 %v2368_v20  ;;  %v2369_v1 = vadd.f32 1.0, %v5558_v38  ;;  %v5560_v58 = vpop.eup %5559 }
 0x5cf   : > { %5563 = vtanh.f32 %v2357_v37  ;;  %v2370_v12 = vadd.f32 1.0, %v5560_v58 }
 0x5d0   : > { %5565 = vrcp.f32 %v2369_v1 }
 0x5d1   : > { %5567 = vrcp.f32 %v2370_v12 }
 0x5da   : > { %v2450_v2 = vpop.f32.mrf.mxu1  ;;  %v2521_v1 = vpop.f32.mrf.mxu0 }
 0x5db   : > { %v5562_v22 = vpop.eup %5561  ;;  %v2530_v11 = vrot.slane %v2450_v2, 4  ;;  %v2532_v58 = vrot.slane %v2521_v1, 4 }
 0x5dc   : > { %v5564_v39 = vpop.eup %5563  ;;  %v2452_v4 = vpop.f32.mrf.mxu1 }
 0x5dd   : > { %v5566_v18 = vpop.eup %5565  ;;  %v2538_v14 = vadd.f32 %v2530_v11, %v8114_v7  ;;  %v2531_v10 = vrot.slane %v2452_v4, 4  ;;  %v2379_v9 = vmul.f32 %v5564_v39, %v5562_v22  ;;  %v2523_v2 = vpop.f32.mrf.mxu0  ;;  %v2540_v11 = vadd.f32 %v2532_v58, %v8129_v21 }
 0x5de   : > { %v2378_v5 = vmul.f32 %v5566_v18, %v8370_v59  ;;  %v2533_v4 = vrot.slane %v2523_v2, 4  ;;  %v5568_v7 = vpop.eup %5567  ;;  %v2562_v58 = vrot.slane %v8376_v19, 6  ;;  %v12700_v19 = vld [vmem:[#allocation34_spill] sm:$0xff] }
 0x5df   : > { %v5236_v17 = vmul.f32 -1.442695, %v2538_v14  ;;  %v2539_v20 = vadd.f32 %v2531_v10, %v8118_v0  ;;  %v5238_v59 = vmul.f32 -1.442695, %v2540_v11 }
 0x5e0   : > { %v9156_v37 = vadd.f32 %v2379_v9, %v2378_v5  ;;  %v2541_v12 = vadd.f32 %v2533_v4, %v8131_v8 }
 0x5e1   : > { %5569 = vpow2.f32 %v5236_v17  ;;  %v5237_v38 = vmul.f32 -1.442695, %v2539_v20 }
 0x5e2   : > { %5571 = vtanh.f32 %v9156_v37 }
 0x5e3   : > { %5573 = vpow2.f32 %v5237_v38 }
 0x5e4   : > { %5575 = vpow2.f32 %v5238_v59 }
 0x5ee   : > { %v5570_v22 = vpop.eup %5569 }
 0x5ef   : > { %v5572_v39 = vpop.eup %5571  ;;  %v2551_v18 = vadd.f32 1.0, %v5570_v22 }
 0x5f0   : > { %v2382_v10 = vmul.f32 %v5572_v39, %v5568_v7  ;;  %v5574_v14 = vpop.eup %5573 }
 0x5f1   : > { %5577 = vrcp.f32 %v2551_v18  ;;  %v2552_v5 = vadd.f32 1.0, %v5574_v14  ;;  %v5576_v20 = vpop.eup %5575  ;;  %v12742_v14 = vld [vmem:[#allocation77_spill] sm:$0xff] }
 0x5f2   : > { %2383 = vst [vmem:[#allocation2 + $0x2] sm:$0x3] %v2382_v10  ;;  %v2570_v9 = vrot.slane %v2382_v10, 4  ;;  %5579 = vtanh.f32 %v2541_v12  ;;  %v2553_v11 = vadd.f32 1.0, %v5576_v20  ;;  %v12741_v10 = vld [vmem:[#allocation76_spill] sm:$0xff]  ;;  %v12746_v20 = vld [vmem:[#allocation81_spill] sm:$0xff] }
 0x5f3   : > { %5581 = vrcp.f32 %v2552_v5  ;;  %v12743_v5 = vld [vmem:[#allocation78_spill] sm:$0xff] }
 0x5f4   : > { %v2573_v17 = vrot.slane %v2570_v9, 4  ;;  %5583 = vrcp.f32 %v2553_v11  ;;  %v12744_v9 = vld [vmem:[#allocation79_spill] sm:$0xff]  ;;  %v12751_v11 = vld [vmem:[#allocation86_spill] sm:$0xff] }
 0x5f6   : > { %2640 = vmatprep.mubr.f32.mxu1 %v2573_v17  ;;  %2711 = vmatprep.mubr.f32.mxu0 %v2573_v17  ;;  %v12745_v17 = vld [vmem:[#allocation80_spill] sm:$0xff] }
 0x5fe   : > { %v5578_v38 = vpop.eup %5577 }
 0x5ff   : > { %v5580_v1 = vpop.eup %5579 }
 0x600   : > { %v5582_v2 = vpop.eup %5581  ;;  %v2565_v7 = vmul.f32 %v5580_v1, %v5578_v38  ;;  %v12747_v38 = vld [vmem:[#allocation82_spill] sm:$0xff]  ;;  %v12748_v1 = vld [vmem:[#allocation83_spill] sm:$0xff] }
 0x601   : > { %v2564_v4 = vmul.f32 %v5582_v2, %v2562_v58  ;;  %v5584_v59 = vpop.eup %5583  ;;  %v12749_v58 = vld [vmem:[#allocation84_spill] sm:$0xff]  ;;  %v12750_v2 = vld [vmem:[#allocation85_spill] sm:$0xff] }
 0x603   : > { %v9162_v22 = vadd.f32 %v2565_v7, %v2564_v4  ;;  %v12752_v4 = vld [vmem:[#allocation87_spill] sm:$0xff]  ;;  %v12753_v7 = vld [vmem:[#allocation88_spill] sm:$0xff] }
 0x605   : > { %5585 = vtanh.f32 %v9162_v22 }
 0x612   : > { %v5586_v39 = vpop.eup %5585 }
 0x613   : > { %v2568_v18 = vmul.f32 %v5586_v39, %v5584_v59  ;;  %v12754_v59 = vld [vmem:[#allocation89_spill] sm:$0xff]  ;;  %v12755_v39 = vld [vmem:[#allocation90_spill] sm:$0xff] }
 0x615   : > { %v9165_v12 = vrot.slane %v2568_v18, 4  ;;  %v12756_v18 = vld [vmem:[#allocation91_spill] sm:$0xff] }
 0x617   : > { %2641 = vmatmul.mubr.f32.vlgmr.msra.gmra.mxu1 %v9165_v12  ;;  %2712 = vmatmul.mubr.f32.vlgmr.msra.gmra.mxu0 %v9165_v12 }
 0x618   : > { %2744 = vmatpush1.msra.mxu1 %v8384_v15  ;;  %2815 = vmatpush1.msra.mxu0 %v8388_v40  ;;  %v12701_v15 = vld [vmem:[#allocation44_spill] sm:$0xff]  ;;  %v12702_v40 = vld [vmem:[#allocation35_spill] sm:$0xff] }
 0x619   : > { %2745 = vmatprep.subr.mxu1 %v8392_v41  ;;  %2816 = vmatprep.subr.mxu0 %v8396_v42  ;;  %v12703_v41 = vld [vmem:[#allocation45_spill] sm:$0xff]  ;;  %v12704_v42 = vld [vmem:[#allocation36_spill] sm:$0xff] }
 0x61a   : > { %2746 = vmatpush1.msra.mxu1 %v8400_v43  ;;  %2817 = vmatpush1.msra.mxu0 %v8404_v44  ;;  %v12705_v43 = vld [vmem:[#allocation46_spill] sm:$0xff]  ;;  %v12706_v44 = vld [vmem:[#allocation37_spill] sm:$0xff] }
 0x61b   : > { %2747 = vmatprep.subr.mxu1 %v8408_v45  ;;  %2818 = vmatprep.subr.mxu0 %v8412_v46  ;;  %v12707_v45 = vld [vmem:[#allocation47_spill] sm:$0xff]  ;;  %v12708_v46 = vld [vmem:[#allocation38_spill] sm:$0xff] }
 0x61c   : > { %2748 = vmatpush1.msra.mxu1 %v8416_v47  ;;  %2819 = vmatpush1.msra.mxu0 %v8420_v48  ;;  %v12709_v47 = vld [vmem:[#allocation48_spill] sm:$0xff]  ;;  %v12710_v48 = vld [vmem:[#allocation39_spill] sm:$0xff] }
 0x61d   : > { %2749 = vmatprep.subr.mxu1 %v8424_v49  ;;  %2820 = vmatprep.subr.mxu0 %v8428_v50  ;;  %v12711_v49 = vld [vmem:[#allocation49_spill] sm:$0xff]  ;;  %v12712_v50 = vld [vmem:[#allocation40_spill] sm:$0xff] }
 0x61e   : > { %2750 = vmatpush1.msra.mxu1 %v8432_v51  ;;  %2821 = vmatpush1.msra.mxu0 %v8436_v52  ;;  %v12713_v51 = vld [vmem:[#allocation50_spill] sm:$0xff]  ;;  %v12714_v52 = vld [vmem:[#allocation41_spill] sm:$0xff] }
 0x61f   : > { %2751 = vmatprep.subr.mxu1 %v8440_v53  ;;  %2822 = vmatprep.subr.mxu0 %v8444_v54  ;;  %v12715_v53 = vld [vmem:[#allocation51_spill] sm:$0xff]  ;;  %v12716_v54 = vld [vmem:[#allocation52_spill] sm:$0xff] }
 0x620   : > { %2752 = vmatpush1.msra.mxu1 %v8448_v55  ;;  %2823 = vmatpush1.msra.mxu0 %v8452_v56  ;;  %v12717_v55 = vld [vmem:[#allocation53_spill] sm:$0xff]  ;;  %v12718_v56 = vld [vmem:[#allocation54_spill] sm:$0xff] }
 0x621   : > { %2753 = vmatprep.subr.mxu1 %v8456_v57  ;;  %2824 = vmatprep.subr.mxu0 %v8460_v23  ;;  %v12719_v57 = vld [vmem:[#allocation55_spill] sm:$0xff]  ;;  %v12720_v23 = vld [vmem:[#allocation56_spill] sm:$0xff] }
 0x622   : > { %2754 = vmatpush1.msra.mxu1 %v8464_v24  ;;  %2825 = vmatpush1.msra.mxu0 %v8468_v25  ;;  %v12721_v24 = vmov 0.0   ;;  %v12722_v25 = vld [vmem:[#allocation57_spill] sm:$0xff] }
 0x623   : > { %2755 = vmatprep.subr.mxu1 %v8472_v26  ;;  %2826 = vmatprep.subr.mxu0 %v8476_v27  ;;  %v12723_v26 = vld [vmem:[#allocation58_spill] sm:$0xff]  ;;  %v12724_v27 = vld [vmem:[#allocation59_spill] sm:$0xff] }
 0x624   : > { %2756 = vmatpush1.msra.mxu1 %v8480_v28  ;;  %2827 = vmatpush1.msra.mxu0 %v8484_v29  ;;  %v12725_v28 = vld [vmem:[#allocation60_spill] sm:$0xff]  ;;  %v12726_v29 = vld [vmem:[#allocation61_spill] sm:$0xff] }
 0x625   : > { %2757 = vmatprep.subr.mxu1 %v8488_v30  ;;  %2828 = vmatprep.subr.mxu0 %v8492_v31  ;;  %v12727_v30 = vld [vmem:[#allocation62_spill] sm:$0xff]  ;;  %v12728_v31 = vld [vmem:[#allocation63_spill] sm:$0xff] }
 0x626   : > { %2758 = vmatpush1.msra.mxu1 %v8496_v32  ;;  %2829 = vmatpush1.msra.mxu0 %v8500_v33  ;;  %v12729_v32 = vld [vmem:[#allocation64_spill] sm:$0xff]  ;;  %v12730_v33 = vld [vmem:[#allocation65_spill] sm:$0xff] }
 0x627   : > { %2759 = vmatprep.subr.mxu1 %v8504_v34  ;;  %2830 = vmatprep.subr.mxu0 %v8508_v35  ;;  %v12731_v34 = vld [vmem:[#allocation66_spill] sm:$0xff]  ;;  %v12732_v35 = vld [vmem:[#allocation67_spill] sm:$0xff] }
 0x628   : > { %2760 = vmatpush1.msra.mxu1 %v8512_v36  ;;  %2831 = vmatpush1.msra.mxu0 %v8516_v61  ;;  %v12733_v36 = vld [vmem:[#allocation68_spill] sm:$0xff]  ;;  %v12734_v61 = vld [vmem:[#allocation69_spill] sm:$0xff] }
 0x629   : > { %2761 = vmatprep.subr.mxu1 %v8520_v6  ;;  %2832 = vmatprep.subr.mxu0 %v8524_v3  ;;  %v12735_v6 = vld [vmem:[#allocation70_spill] sm:$0xff]  ;;  %v12736_v3 = vld [vmem:[#allocation71_spill] sm:$0xff] }
 0x62a   : > { %2762 = vmatpush1.msra.mxu1 %v8528_v16  ;;  %2833 = vmatpush1.msra.mxu0 %v8532_v62  ;;  %v12737_v16 = vld [vmem:[#allocation72_spill] sm:$0xff]  ;;  %v12738_v62 = vld [vmem:[#allocation73_spill] sm:$0xff] }
 0x62b   : > { %2763 = vmatprep.subr.mxu1 %v8536_v13  ;;  %2834 = vmatprep.subr.mxu0 %v8540_v60  ;;  %v12739_v13 = vld [vmem:[#allocation74_spill] sm:$0xff]  ;;  %v12740_v60 = vld [vmem:[#allocation75_spill] sm:$0xff] }
 0x62c   : > { %2764 = vmatpush1.msra.mxu1 %v12700_v19  ;;  %2835 = vmatpush1.msra.mxu0 %v12701_v15  ;;  %v12758_v19 = vld [vmem:[#allocation93_spill] sm:$0xff]  ;;  %v12759_v15 = vld [vmem:[#allocation94_spill] sm:$0xff] }
 0x62d   : > { %2765 = vmatprep.subr.mxu1 %v12702_v40  ;;  %2836 = vmatprep.subr.mxu0 %v12703_v41  ;;  %v12760_v40 = vld [vmem:[#allocation95_spill] sm:$0xff]  ;;  %v12761_v41 = vld [vmem:[#allocation96_spill] sm:$0xff] }
 0x62e   : > { %2766 = vmatpush1.msra.mxu1 %v12704_v42  ;;  %2837 = vmatpush1.msra.mxu0 %v12705_v43  ;;  %v12762_v42 = vld [vmem:[#allocation97_spill] sm:$0xff]  ;;  %v12763_v43 = vld [vmem:[#allocation98_spill] sm:$0xff] }
 0x62f   : > { %2767 = vmatprep.subr.mxu1 %v12706_v44  ;;  %2838 = vmatprep.subr.mxu0 %v12707_v45  ;;  %v12764_v44 = vld [vmem:[#allocation99_spill] sm:$0xff]  ;;  %v12765_v45 = vld [vmem:[#allocation100_spill] sm:$0xff] }
 0x630   : > { %2768 = vmatpush1.msra.mxu1 %v12708_v46  ;;  %2839 = vmatpush1.msra.mxu0 %v12709_v47  ;;  %v12766_v46 = vld [vmem:[#allocation101_spill] sm:$0xff]  ;;  %v12767_v47 = vld [vmem:[#allocation102_spill] sm:$0xff] }
 0x631   : > { %2769 = vmatprep.subr.mxu1 %v12710_v48  ;;  %2840 = vmatprep.subr.mxu0 %v12711_v49  ;;  %v12768_v48 = vld [vmem:[#allocation103_spill] sm:$0xff]  ;;  %v12769_v49 = vld [vmem:[#allocation104_spill] sm:$0xff] }
 0x632   : > { %2770 = vmatpush1.msra.mxu1 %v12712_v50  ;;  %2841 = vmatpush1.msra.mxu0 %v12713_v51  ;;  %v12770_v50 = vld [vmem:[#allocation105_spill] sm:$0xff]  ;;  %v12771_v51 = vld [vmem:[#allocation106_spill] sm:$0xff] }
 0x633   : > { %2771 = vmatprep.subr.mxu1 %v12714_v52  ;;  %2842 = vmatprep.subr.mxu0 %v12715_v53  ;;  %v12772_v52 = vld [vmem:[#allocation107_spill] sm:$0xff]  ;;  %v12773_v53 = vld [vmem:[#allocation108_spill] sm:$0xff] }
 0x634   : > { %2772 = vmatpush1.msra.mxu1 %v12716_v54  ;;  %2843 = vmatpush1.msra.mxu0 %v12717_v55  ;;  %v12774_v54 = vld [vmem:[#allocation109_spill] sm:$0xff]  ;;  %v12775_v55 = vld [vmem:[#allocation110_spill] sm:$0xff] }
 0x635   : > { %2773 = vmatprep.subr.mxu1 %v12718_v56  ;;  %2844 = vmatprep.subr.mxu0 %v12719_v57  ;;  %v12776_v56 = vld [vmem:[#allocation111_spill] sm:$0xff]  ;;  %v12777_v57 = vld [vmem:[#allocation112_spill] sm:$0xff] }
 0x636   : > { %2774 = vmatpush1.msra.mxu1 %v12720_v23  ;;  %2807 = vmatprep.mubr.f32.mxu1 %v12721_v24  ;;  %v12778_v23 = vld [vmem:[#allocation113_spill] sm:$0xff] }
 0x637   : > { %2845 = vmatpush1.msra.mxu0 %v12722_v25  ;;  %2878 = vmatprep.mubr.f32.mxu0 %v12721_v24  ;;  %v12779_v25 = vld [vmem:[#allocation114_spill] sm:$0xff] }
 0x638   : > { %2808 = vmatmul.mubr.f32.vlgmr.msra.gmra.mxu1 %v9165_v12  ;;  %2879 = vmatmul.mubr.f32.vlgmr.msra.gmra.mxu0 %v9165_v12  ;;  %v12757_v12 = vld [vmem:[#allocation92_spill] sm:$0xff] }
 0x639   : > { %2935 = vmatprep.subr.mxu1 %v12723_v26  ;;  %3006 = vmatprep.subr.mxu0 %v12724_v27  ;;  %v12780_v26 = vld [vmem:[#allocation115_spill] sm:$0xff]  ;;  %v12781_v27 = vld [vmem:[#allocation116_spill] sm:$0xff] }
 0x63a   : > { %2936 = vmatpush1.msra.mxu1 %v12725_v28  ;;  %3007 = vmatpush1.msra.mxu0 %v12726_v29  ;;  %v12782_v28 = vld [vmem:[#allocation117_spill] sm:$0xff]  ;;  %v12783_v29 = vld [vmem:[#allocation118_spill] sm:$0xff] }
 0x63b   : > { %2937 = vmatprep.subr.mxu1 %v12727_v30  ;;  %3008 = vmatprep.subr.mxu0 %v12728_v31  ;;  %v12784_v30 = vld [vmem:[#allocation119_spill] sm:$0xff]  ;;  %v12785_v31 = vld [vmem:[#allocation120_spill] sm:$0xff] }
 0x63c   : > { %2938 = vmatpush1.msra.mxu1 %v12729_v32  ;;  %3009 = vmatpush1.msra.mxu0 %v12730_v33  ;;  %v12786_v32 = vld [vmem:[#allocation121_spill] sm:$0xff]  ;;  %v12787_v33 = vld [vmem:[#allocation122_spill] sm:$0xff] }
 0x63d   : > { %2939 = vmatprep.subr.mxu1 %v12731_v34  ;;  %3010 = vmatprep.subr.mxu0 %v12732_v35  ;;  %v12788_v34 = vld [vmem:[#allocation123_spill] sm:$0xff]  ;;  %v12789_v35 = vld [vmem:[#allocation124_spill] sm:$0xff] }
 0x63e   : > { %2940 = vmatpush1.msra.mxu1 %v12733_v36  ;;  %3011 = vmatpush1.msra.mxu0 %v12734_v61  ;;  %v12790_v36 = vld [vmem:[#allocation125_spill] sm:$0xff]  ;;  %v12791_v61 = vld [vmem:[#allocation126_spill] sm:$0xff] }
 0x63f   : > { %2941 = vmatprep.subr.mxu1 %v12735_v6  ;;  %3012 = vmatprep.subr.mxu0 %v12736_v3  ;;  %v12792_v6 = vld [vmem:[#allocation127_spill] sm:$0xff]  ;;  %v12793_v3 = vld [vmem:[#allocation128_spill] sm:$0xff] }
 0x640   : > { %2942 = vmatpush1.msra.mxu1 %v12737_v16  ;;  %3013 = vmatpush1.msra.mxu0 %v12738_v62  ;;  %v12794_v16 = vld [vmem:[#allocation129_spill] sm:$0xff]  ;;  %v12795_v62 = vld [vmem:[#allocation130_spill] sm:$0xff] }
 0x641   : > { %2943 = vmatprep.subr.mxu1 %v12739_v13  ;;  %3014 = vmatprep.subr.mxu0 %v12740_v60  ;;  %v12796_v13 = vld [vmem:[#allocation131_spill] sm:$0xff]  ;;  %v12797_v60 = vld [vmem:[#allocation132_spill] sm:$0xff] }
 0x642   : > { %2944 = vmatpush1.msra.mxu1 %v12741_v10  ;;  %3015 = vmatpush1.msra.mxu0 %v12742_v14  ;;  %v12798_v10 = vld [vmem:[#allocation133_spill] sm:$0xff]  ;;  %v12799_v14 = vld [vmem:[#allocation134_spill] sm:$0xff] }
 0x643   : > { %2945 = vmatprep.subr.mxu1 %v12743_v5  ;;  %3016 = vmatprep.subr.mxu0 %v12744_v9  ;;  %v12800_v5 = vld [vmem:[#allocation135_spill] sm:$0xff]  ;;  %v12801_v9 = vld [vmem:[#allocation136_spill] sm:$0xff] }
 0x644   : > { %2946 = vmatpush1.msra.mxu1 %v12745_v17  ;;  %3017 = vmatpush1.msra.mxu0 %v12746_v20  ;;  %v12802_v17 = vld [vmem:[#allocation137_spill] sm:$0xff]  ;;  %v12803_v20 = vld [vmem:[#allocation138_spill] sm:$0xff] }
 0x645   : > { %2947 = vmatprep.subr.mxu1 %v12747_v38  ;;  %3018 = vmatprep.subr.mxu0 %v12748_v1  ;;  %v12804_v38 = vld [vmem:[#allocation139_spill] sm:$0xff]  ;;  %v12805_v1 = vld [vmem:[#allocation140_spill] sm:$0xff] }
 0x646   : > { %2948 = vmatpush1.msra.mxu1 %v12749_v58  ;;  %3019 = vmatpush1.msra.mxu0 %v12750_v2  ;;  %v12806_v58 = vld [vmem:[#allocation141_spill] sm:$0xff]  ;;  %v12807_v2 = vld [vmem:[#allocation142_spill] sm:$0xff] }
 0x647   : > { %2949 = vmatprep.subr.mxu1 %v12751_v11  ;;  %3020 = vmatprep.subr.mxu0 %v12752_v4  ;;  %v12808_v11 = vld [vmem:[#allocation143_spill] sm:$0xff]  ;;  %v12809_v4 = vld [vmem:[#allocation144_spill] sm:$0xff] }
 0x648   : > { %2950 = vmatpush1.msra.mxu1 %v12753_v7  ;;  %3021 = vmatpush1.msra.mxu0 %v12754_v59  ;;  %v12810_v7 = vld [vmem:[#allocation145_spill] sm:$0xff]  ;;  %v12811_v59 = vld [vmem:[#allocation146_spill] sm:$0xff] }
 0x649   : > { %2951 = vmatprep.subr.mxu1 %v12755_v39  ;;  %3022 = vmatprep.subr.mxu0 %v12756_v18  ;;  %v12812_v39 = vld [vmem:[#allocation147_spill] sm:$0xff]  ;;  %v12813_v18 = vld [vmem:[#allocation148_spill] sm:$0xff] }
 0x64a   : > { %2952 = vmatpush1.msra.mxu1 %v12757_v12  ;;  %3023 = vmatpush1.msra.mxu0 %v12758_v19  ;;  %v12814_v12 = vld [vmem:[#allocation149_spill] sm:$0xff]  ;;  %v12815_v19 = vld [vmem:[#allocation150_spill] sm:$0xff] }
 0x64b   : > { %2953 = vmatprep.subr.mxu1 %v12759_v15  ;;  %3024 = vmatprep.subr.mxu0 %v12760_v40  ;;  %v12816_v15 = vld [vmem:[#allocation151_spill] sm:$0xff]  ;;  %v12817_v40 = vld [vmem:[#allocation152_spill] sm:$0xff] }
 0x64c   : > { %2954 = vmatpush1.msra.mxu1 %v12761_v41  ;;  %3025 = vmatpush1.msra.mxu0 %v12762_v42  ;;  %v12818_v41 = vld [vmem:[#allocation153_spill] sm:$0xff]  ;;  %v12819_v42 = vld [vmem:[#allocation154_spill] sm:$0xff] }
 0x64d   : > { %2955 = vmatprep.subr.mxu1 %v12763_v43  ;;  %3026 = vmatprep.subr.mxu0 %v12764_v44  ;;  %v12820_v43 = vld [vmem:[#allocation155_spill] sm:$0xff]  ;;  %v12821_v44 = vld [vmem:[#allocation156_spill] sm:$0xff] }
 0x64e   : > { %2956 = vmatpush1.msra.mxu1 %v12765_v45  ;;  %3027 = vmatpush1.msra.mxu0 %v12766_v46  ;;  %v12822_v45 = vld [vmem:[#allocation157_spill] sm:$0xff]  ;;  %v12823_v46 = vld [vmem:[#allocation158_spill] sm:$0xff] }
 0x64f   : > { %2957 = vmatprep.subr.mxu1 %v12767_v47  ;;  %3028 = vmatprep.subr.mxu0 %v12768_v48  ;;  %v12824_v47 = vld [vmem:[#allocation159_spill] sm:$0xff]  ;;  %v12825_v48 = vld [vmem:[#allocation160_spill] sm:$0xff] }
 0x650   : > { %2958 = vmatpush1.msra.mxu1 %v12769_v49  ;;  %3029 = vmatpush1.msra.mxu0 %v12770_v50  ;;  %v12826_v49 = vld [vmem:[#allocation161_spill] sm:$0xff]  ;;  %v12827_v50 = vld [vmem:[#allocation162_spill] sm:$0xff] }
 0x651   : > { %2959 = vmatprep.subr.mxu1 %v12771_v51  ;;  %3030 = vmatprep.subr.mxu0 %v12772_v52  ;;  %v12828_v51 = vld [vmem:[#allocation163_spill] sm:$0xff]  ;;  %v12829_v52 = vld [vmem:[#allocation164_spill] sm:$0xff] }
 0x652   : > { %2960 = vmatpush1.msra.mxu1 %v12773_v53  ;;  %3031 = vmatpush1.msra.mxu0 %v12774_v54  ;;  %v12830_v53 = vld [vmem:[#allocation165_spill] sm:$0xff]  ;;  %v12831_v54 = vld [vmem:[#allocation166_spill] sm:$0xff] }
 0x653   : > { %2961 = vmatprep.subr.mxu1 %v12775_v55  ;;  %3032 = vmatprep.subr.mxu0 %v12776_v56  ;;  %v12832_v55 = vld [vmem:[#allocation167_spill] sm:$0xff]  ;;  %v12833_v56 = vld [vmem:[#allocation168_spill] sm:$0xff] }
 0x654   : > { %2962 = vmatpush1.msra.mxu1 %v12777_v57  ;;  %3033 = vmatpush1.msra.mxu0 %v12778_v23  ;;  %v12834_v57 = vld [vmem:[#allocation169_spill] sm:$0xff]  ;;  %v12835_v23 = vld [vmem:[#allocation170_spill] sm:$0xff] }
 0x655   : > { %2963 = vmatprep.subr.mxu1 %v12779_v25  ;;  %3034 = vmatprep.subr.mxu0 %v12780_v26  ;;  %v12836_v25 = vld [vmem:[#allocation171_spill] sm:$0xff]  ;;  %v12837_v26 = vld [vmem:[#allocation172_spill] sm:$0xff] }
 0x656   : > { %2964 = vmatpush1.msra.mxu1 %v12781_v27  ;;  %3035 = vmatpush1.msra.mxu0 %v12782_v28  ;;  %v12838_v27 = vld [vmem:[#allocation173_spill] sm:$0xff]  ;;  %v12839_v28 = vld [vmem:[#allocation174_spill] sm:$0xff] }
 0x657   : > { %2965 = vmatprep.subr.mxu1 %v12783_v29  ;;  %3036 = vmatprep.subr.mxu0 %v12784_v30  ;;  %v12840_v29 = vld [vmem:[#allocation175_spill] sm:$0xff]  ;;  %v12841_v30 = vld [vmem:[#allocation176_spill] sm:$0xff] }
 0x658   : > { %2966 = vmatpush1.msra.mxu1 %v12785_v31  ;;  %3037 = vmatpush1.msra.mxu0 %v12786_v32  ;;  %v12842_v31 = vld [vmem:[#allocation177_spill] sm:$0xff]  ;;  %v12843_v32 = vld [vmem:[#allocation178_spill] sm:$0xff] }
 0x659   : > { %2967 = vmatprep.subr.mxu1 %v12787_v33  ;;  %3038 = vmatprep.subr.mxu0 %v12788_v34  ;;  %v12844_v33 = vld [vmem:[#allocation179_spill] sm:$0xff]  ;;  %v12845_v34 = vld [vmem:[#allocation180_spill] sm:$0xff] }
 0x65a   : > { %2968 = vmatpush2.msra.mxu1 %v12789_v35  ;;  %3039 = vmatpush2.msra.mxu0 %v12790_v36  ;;  %v12846_v35 = vld [vmem:[#allocation188_spill] sm:$0xff]  ;;  %v12847_v36 = vld [vmem:[#allocation189_spill] sm:$0xff] }
 0x65b   : > { %2969 = vmatprep.subr.mxu1 %v12791_v61  ;;  %3040 = vmatprep.subr.mxu0 %v12792_v6  ;;  %v12848_v61 = vld [vmem:[#allocation190_spill] sm:$0xff]  ;;  %v12849_v6 = vld [vmem:[#allocation191_spill] sm:$0xff] }
 0x65c   : > { %2970 = vmatpush2.msra.mxu1 %v12793_v3  ;;  %3041 = vmatpush2.msra.mxu0 %v12794_v16  ;;  %v12850_v3 = vld [vmem:[#allocation192_spill] sm:$0xff] }
 0x65d   : > { %2971 = vmatprep.subr.mxu1 %v12795_v62  ;;  %3042 = vmatprep.subr.mxu0 %v12796_v13  ;;  %v9364_v16 = vld [vmem:[%s7151_s3 + $0x1e8] sm:$0xff]  ;;  %v9368_v62 = vld [vmem:[%s7151_s3 + $0x1f8] sm:$0xff] }
 0x65e   : > { %2972 = vmatpush2.msra.mxu1 %v12797_v60  ;;  %3043 = vmatpush2.msra.mxu0 %v12798_v10  ;;  %v12851_v60 = vld [vmem:[#allocation32_spill] sm:$0xff] }
 0x65f   : > { %2973 = vmatprep.subr.mxu1 %v12799_v14  ;;  %3044 = vmatprep.subr.mxu0 %v12800_v5 }
 0x660   : > { %2974 = vmatpush2.msra.mxu1 %v12801_v9  ;;  %3045 = vmatpush2.msra.mxu0 %v12802_v17  ;;  %v12852_v9 = vld [vmem:[#allocation42_spill] sm:$0xff] }
 0x661   : > { %2975 = vmatprep.subr.mxu1 %v12803_v20  ;;  %3046 = vmatprep.subr.mxu0 %v12804_v38 }
 0x662   : > { %2976 = vmatpush2.msra.mxu1 %v12805_v1  ;;  %3047 = vmatpush2.msra.mxu0 %v12806_v58  ;;  %v12853_v1 = vld [vmem:[#allocation33_spill] sm:$0xff] }
 0x663   : > { %2977 = vmatprep.subr.mxu1 %v12807_v2  ;;  %3048 = vmatprep.subr.mxu0 %v12808_v11 }
 0x664   : > { %2978 = vmatpush2.msra.mxu1 %v12809_v4  ;;  %3049 = vmatpush2.msra.mxu0 %v12810_v7 }
 0x665   : > { %2979 = vmatprep.subr.mxu1 %v12811_v59  ;;  %3050 = vmatprep.subr.mxu0 %v12812_v39 }
 0x666   : > { %2980 = vmatpush2.msra.mxu1 %v12813_v18  ;;  %3051 = vmatpush2.msra.mxu0 %v12814_v12 }
 0x667   : > { %2981 = vmatprep.subr.mxu1 %v12815_v19  ;;  %3052 = vmatprep.subr.mxu0 %v12816_v15 }
 0x668   : > { %2982 = vmatpush2.msra.mxu1 %v12817_v40  ;;  %3053 = vmatpush2.msra.mxu0 %v12818_v41 }
 0x669   : > { %2983 = vmatprep.subr.mxu1 %v12819_v42  ;;  %3054 = vmatprep.subr.mxu0 %v12820_v43 }
 0x66a   : > { %2984 = vmatpush2.msra.mxu1 %v12821_v44  ;;  %3055 = vmatpush2.msra.mxu0 %v12822_v45  ;;  %v12854_v45 = vld [vmem:[#allocation185_spill] sm:$0xff] }
 0x66b   : > { %2985 = vmatprep.subr.mxu1 %v12823_v46  ;;  %3056 = vmatprep.subr.mxu0 %v12824_v47 }
 0x66c   : > { %2986 = vmatpush2.msra.mxu1 %v12825_v48  ;;  %3057 = vmatpush2.msra.mxu0 %v12826_v49 }
 0x66d   : > { %2987 = vmatprep.subr.mxu1 %v12827_v50  ;;  %3058 = vmatprep.subr.mxu0 %v12828_v51 }
 0x66e   : > { %2988 = vmatpush2.msra.mxu1 %v12829_v52  ;;  %3059 = vmatpush2.msra.mxu0 %v12830_v53 }
 0x66f   : > { %2989 = vmatprep.subr.mxu1 %v12831_v54  ;;  %3060 = vmatprep.subr.mxu0 %v12832_v55 }
 0x670   : > { %2990 = vmatpush2.msra.mxu1 %v12833_v56  ;;  %3061 = vmatpush2.msra.mxu0 %v12834_v57 }
 0x671   : > { %2991 = vmatprep.subr.mxu1 %v12835_v23  ;;  %3062 = vmatprep.subr.mxu0 %v12836_v25 }
 0x672   : > { %2992 = vmatpush2.msra.mxu1 %v12837_v26  ;;  %3063 = vmatpush2.msra.mxu0 %v12838_v27 }
 0x673   : > { %2993 = vmatprep.subr.mxu1 %v12839_v28  ;;  %3064 = vmatprep.subr.mxu0 %v12840_v29 }
 0x674   : > { %2994 = vmatpush2.msra.mxu1 %v12841_v30  ;;  %3065 = vmatpush2.msra.mxu0 %v12842_v31 }
 0x675   : > { %2995 = vmatprep.subr.mxu1 %v12843_v32  ;;  %3066 = vmatprep.subr.mxu0 %v12844_v33 }
 0x676   : > { %2996 = vmatpush2.msra.mxu1 %v12845_v34  ;;  %3067 = vmatpush2.msra.mxu0 %v12846_v35 }
 0x677   : > { %2997 = vmatprep.subr.mxu1 %v12847_v36  ;;  %3068 = vmatprep.subr.mxu0 %v12848_v61  ;;  %v2921_v36 = vrot.slane %v9162_v22, 6  ;;  %v9392_v22 = vld [vmem:[%s7151_s3 + $0x1e0] sm:$0xff] }
 0x678   : > { %2998 = vmatpush2.msra.mxu1 %v12849_v6  ;;  %3069 = vmatpush2.msra.mxu0 %v12850_v3 }
 0x679   : > { %3102 = vmatprep.subr.mxu1 %v9364_v16  ;;  %3173 = vmatprep.subr.mxu0 %v9368_v62 }
 0x6d7   : > { %v2642_v13 = vpop.f32.mrf.mxu1  ;;  %v2713_v38 = vpop.f32.mrf.mxu0 }
 0x6d8   : > { %v2643_v10 = vadd.f32 %v2642_v13, %v12851_v60  ;;  %v2714_v58 = vadd.f32 %v2713_v38, %v12853_v1  ;;  %v9400_v38 = vld [vmem:[%s7151_s3 + $0x1c8] sm:$0xff] }
 0x6d9   : > { %v2644_v14 = vpop.f32.mrf.mxu1  ;;  %v2715_v11 = vpop.f32.mrf.mxu0 }
 0x6da   : > { %v5239_v5 = vmul.f32 -1.442695, %v2643_v10  ;;  %v2645_v17 = vadd.f32 %v2644_v14, %v12852_v9  ;;  %v5241_v2 = vmul.f32 -1.442695, %v2714_v58  ;;  %v2716_v7 = vadd.f32 %v2715_v11, %v8363_v63  ;;  %v9404_v58 = vld [vmem:[%s7151_s3 + $0x1d8] sm:$0xff]  ;;  %v9412_v11 = vld [vmem:[%s7151_s3 + $0x1d0] sm:$0xff] }
 0x6dc   : > { %5587 = vpow2.f32 %v5239_v5  ;;  %v5240_v20 = vmul.f32 -1.442695, %v2645_v17 }
 0x6de   : > { %5589 = vpow2.f32 %v5240_v20  ;;  %v9396_v20 = vld [vmem:[%s7151_s3 + $0x1f0] sm:$0xff] }
 0x6df   : > { %5591 = vpow2.f32 %v5241_v2  ;;  %v9408_v2 = vld [vmem:[%s7151_s3 + $0x1c0] sm:$0xff] }
 0x6e9   : > { %v5588_v4 = vpop.eup %5587 }
 0x6ea   : > { %v2727_v59 = vadd.f32 1.0, %v5588_v4  ;;  %v9416_v4 = vld [vmem:[%s7151_s3 + $0x1a8] sm:$0xff] }
 0x6eb   : > { %v5590_v39 = vpop.eup %5589 }
 0x6ec   : > { %5593 = vrcp.f32 %v2727_v59  ;;  %v2728_v18 = vadd.f32 1.0, %v5590_v39  ;;  %v5592_v12 = vpop.eup %5591  ;;  %v9424_v59 = vld [vmem:[%s7151_s3 + $0x1a0] sm:$0xff]  ;;  %v9428_v39 = vld [vmem:[%s7151_s3 + $0x1b0] sm:$0xff] }
 0x6ed   : > { %5595 = vtanh.f32 %v2716_v7  ;;  %v2729_v42 = vadd.f32 1.0, %v5592_v12  ;;  %v9420_v7 = vld [vmem:[%s7151_s3 + $0x1b8] sm:$0xff] }
 0x6ee   : > { %5597 = vrcp.f32 %v2728_v18  ;;  %v9432_v18 = vld [vmem:[%s7151_s3 + $0x188] sm:$0xff]  ;;  %v9436_v12 = vld [vmem:[%s7151_s3 + $0x198] sm:$0xff] }
 0x6ef   : > { %5599 = vrcp.f32 %v2729_v42  ;;  %v9456_v42 = vld [vmem:[%s7151_s3 + $0x160] sm:$0xff] }
 0x6f8   : > { %v2809_v19 = vpop.f32.mrf.mxu1  ;;  %v2880_v54 = vpop.f32.mrf.mxu0 }
 0x6f9   : > { %v5594_v15 = vpop.eup %5593  ;;  %v2889_v40 = vrot.slane %v2809_v19, 2  ;;  %v2891_v55 = vrot.slane %v2880_v54, 2  ;;  %v9440_v19 = vld [vmem:[%s7151_s3 + $0x180] sm:$0xff]  ;;  %v9500_v54 = vld [vmem:[%s7151_s3 + $0x118] sm:$0xff] }
 0x6fa   : > { %v5596_v41 = vpop.eup %5595  ;;  %v2811_v43 = vpop.f32.mrf.mxu1 }
 0x6fb   : > { %v5598_v44 = vpop.eup %5597  ;;  %v2897_v46 = vadd.f32 %v2889_v40, %v12854_v45  ;;  %v2890_v47 = vrot.slane %v2811_v43, 2  ;;  %v2738_v49 = vmul.f32 %v5596_v41, %v5594_v15  ;;  %v2882_v56 = vpop.f32.mrf.mxu0  ;;  %v2899_v57 = vadd.f32 %v2891_v55, %v8129_v21  ;;  %v9444_v15 = vld [vmem:[%s7151_s3 + $0x190] sm:$0xff]  ;;  %v9448_v40 = vld [vmem:[%s7151_s3 + $0x168] sm:$0xff]  ;;  %v9452_v41 = vld [vmem:[%s7151_s3 + $0x178] sm:$0xff] }
 0x6fc   : > { %v2737_v48 = vmul.f32 %v5598_v44, %v9156_v37  ;;  %v2892_v23 = vrot.slane %v2882_v56, 2  ;;  %v5600_v25 = vpop.eup %5599  ;;  %v9460_v43 = vld [vmem:[%s7151_s3 + $0x170] sm:$0xff]  ;;  %v9464_v44 = vld [vmem:[%s7151_s3 + $0x148] sm:$0xff]  ;;  %v9468_v45 = vld [vmem:[%s7151_s3 + $0x158] sm:$0xff] }
 0x6fd   : > { %v5242_v50 = vmul.f32 -1.442695, %v2897_v46  ;;  %v2898_v51 = vadd.f32 %v2890_v47, %v8118_v0  ;;  %v5244_v37 = vmul.f32 -1.442695, %v2899_v57  ;;  %v9472_v46 = vld [vmem:[%s7151_s3 + $0x140] sm:$0xff]  ;;  %v9476_v47 = vld [vmem:[%s7151_s3 + $0x150] sm:$0xff] }
 0x6fe   : > { %v9378_v52 = vadd.f32 %v2738_v49, %v2737_v48  ;;  %v2900_v0 = vadd.f32 %v2892_v23, %v8131_v8  ;;  %v9480_v48 = vld [vmem:[%s7151_s3 + $0x128] sm:$0xff]  ;;  %v9484_v49 = vld [vmem:[%s7151_s3 + $0x138] sm:$0xff]  ;;  %v9504_v55 = vld [vmem:[%s7151_s3 + $0x100] sm:$0xff] }
 0x6ff   : > { %5601 = vpow2.f32 %v5242_v50  ;;  %v5243_v53 = vmul.f32 -1.442695, %v2898_v51  ;;  %v9488_v50 = vld [vmem:[%s7151_s3 + $0x120] sm:$0xff]  ;;  %v9492_v51 = vld [vmem:[%s7151_s3 + $0x130] sm:$0xff]  ;;  %v9512_v57 = vld [vmem:[%s7151_s3 + $0xe8] sm:$0xff] }
 0x700   : > { %5603 = vtanh.f32 %v9378_v52  ;;  %v9508_v56 = vld [vmem:[%s7151_s3 + $0x110] sm:$0xff]  ;;  %v9516_v23 = vld [vmem:[%s7151_s3 + $0xf8] sm:$0xff] }
 0x701   : > { %5605 = vpow2.f32 %v5243_v53  ;;  %v9496_v53 = vld [vmem:[%s7151_s3 + $0x108] sm:$0xff] }
 0x702   : > { %5607 = vpow2.f32 %v5244_v37  ;;  %v9524_v37 = vld [vmem:[%s7151_s3 + $0xf0] sm:$0xff] }
 0x70c   : > { %v5602_v26 = vpop.eup %5601 }
 0x70d   : > { %v5604_v27 = vpop.eup %5603  ;;  %v2910_v28 = vadd.f32 1.0, %v5602_v26  ;;  %v9528_v26 = vld [vmem:[%s7151_s3 + $0xc8] sm:$0xff] }
 0x70e   : > { %v2741_v29 = vmul.f32 %v5604_v27, %v5600_v25  ;;  %v5606_v30 = vpop.eup %5605  ;;  %v9520_v25 = vld [vmem:[%s7151_s3 + $0xe0] sm:$0xff]  ;;  %v9532_v27 = vld [vmem:[%s7151_s3 + $0xd8] sm:$0xff] }
 0x70f   : > { %5609 = vrcp.f32 %v2910_v28  ;;  %v2911_v31 = vadd.f32 1.0, %v5606_v30  ;;  %v5608_v21 = vpop.eup %5607  ;;  %v9536_v28 = vld [vmem:[%s7151_s3 + $0xc0] sm:$0xff]  ;;  %v9548_v30 = vld [vmem:[%s7151_s3 + $0xb8] sm:$0xff] }
 0x710   : > { %2742 = vst [vmem:[#allocation2 + $0x4] sm:$0x3] %v2741_v29  ;;  %v2929_v32 = vrot.slane %v2741_v29, 2  ;;  %5611 = vtanh.f32 %v2900_v0  ;;  %v2912_v61 = vadd.f32 1.0, %v5608_v21  ;;  %v9540_v0 = vld [vmem:[%s7151_s3 + $0xd0] sm:$0xff]  ;;  %v9544_v29 = vld [vmem:[%s7151_s3 + $0xa8] sm:$0xff] }
 0x711   : > { %5613 = vrcp.f32 %v2911_v31  ;;  %v9552_v31 = vld [vmem:[%s7151_s3 + $0xa0] sm:$0xff]  ;;  %v9564_v21 = vld [vmem:[%s7151_s3 + $0x98] sm:$0xff] }
 0x712   : > { %v2932_v33 = vrot.slane %v2929_v32, 6  ;;  %5615 = vrcp.f32 %v2912_v61  ;;  %v9556_v32 = vld [vmem:[%s7151_s3 + $0xb0] sm:$0xff]  ;;  %12856 = vst [vmem:[#allocation44_spill] sm:$0xff] %v9564_v21  ;;  %v9584_v61 = vld [vmem:[%s7151_s3 + $0x60] sm:$0xff] }
 0x713   : > { %12861 = vst [vmem:[#allocation37_spill] sm:$0xff] %v9584_v61 }
 0x714   : > { %2999 = vmatprep.mubr.f32.mxu1 %v2932_v33  ;;  %3070 = vmatprep.mubr.f32.mxu0 %v2932_v33  ;;  %v9560_v33 = vld [vmem:[%s7151_s3 + $0x88] sm:$0xff] }
 0x715   : > { %12855 = vst [vmem:[#allocation34_spill] sm:$0xff] %v9560_v33 }
 0x71c   : > { %v5610_v34 = vpop.eup %5609 }
 0x71d   : > { %v5612_v35 = vpop.eup %5611 }
 0x71e   : > { %v5614_v8 = vpop.eup %5613  ;;  %v2924_v3 = vmul.f32 %v5612_v35, %v5610_v34  ;;  %v9568_v34 = vld [vmem:[%s7151_s3 + $0x80] sm:$0xff]  ;;  %v9572_v35 = vld [vmem:[%s7151_s3 + $0x90] sm:$0xff] }
 0x71f   : > { %v2923_v6 = vmul.f32 %v5614_v8, %v2921_v36  ;;  %v5616_v10 = vpop.eup %5615  ;;  %12857 = vst [vmem:[#allocation35_spill] sm:$0xff] %v9568_v34  ;;  %12858 = vst [vmem:[#allocation45_spill] sm:$0xff] %v9572_v35  ;;  %v9576_v36 = vld [vmem:[%s7151_s3 + $0x68] sm:$0xff]  ;;  %v9580_v8 = vld [vmem:[%s7151_s3 + $0x78] sm:$0xff] }
 0x720   : > { %12859 = vst [vmem:[#allocation36_spill] sm:$0xff] %v9576_v36  ;;  %12860 = vst [vmem:[#allocation46_spill] sm:$0xff] %v9580_v8 }
 0x721   : > { %v9384_v13 = vadd.f32 %v2924_v3, %v2923_v6  ;;  %v9588_v6 = vld [vmem:[%s7151_s3 + $0x70] sm:$0xff]  ;;  %v9592_v3 = vld [vmem:[%s7151_s3 + $0x48] sm:$0xff] }
 0x722   : > { %12862 = vst [vmem:[#allocation47_spill] sm:$0xff] %v9588_v6  ;;  %12863 = vst [vmem:[#allocation38_spill] sm:$0xff] %v9592_v3 }
 0x723   : > { %5617 = vtanh.f32 %v9384_v13 }
 0x730   : > { %v5618_v14 = vpop.eup %5617 }
 0x731   : > { %v2927_v5 = vmul.f32 %v5618_v14, %v5616_v10  ;;  %v9596_v10 = vld [vmem:[%s7151_s3 + $0x58] sm:$0xff]  ;;  %v9600_v14 = vld [vmem:[%s7151_s3 + $0x40] sm:$0xff] }
 0x732   : > { %12864 = vst [vmem:[#allocation48_spill] sm:$0xff] %v9596_v10  ;;  %12865 = vst [vmem:[#allocation39_spill] sm:$0xff] %v9600_v14 }
 0x733   : > { %v9387_v17 = vrot.slane %v2927_v5, 6  ;;  %v9604_v5 = vld [vmem:[%s7151_s3 + $0x50] sm:$0xff] }
 0x734   : > { %12866 = vst [vmem:[#allocation49_spill] sm:$0xff] %v9604_v5 }
 0x735   : > { %3000 = vmatmul.mubr.f32.vlgmr.msra.gmra.mxu1 %v9387_v17  ;;  %3071 = vmatmul.mubr.f32.vlgmr.msra.gmra.mxu0 %v9387_v17 }
 0x736   : > { %3103 = vmatpush1.msra.mxu1 %v9392_v22  ;;  %3174 = vmatpush1.msra.mxu0 %v9396_v20 }
 0x737   : > { %3104 = vmatprep.subr.mxu1 %v9400_v38  ;;  %3175 = vmatprep.subr.mxu0 %v9404_v58 }
 0x738   : > { %3105 = vmatpush1.msra.mxu1 %v9408_v2  ;;  %3176 = vmatpush1.msra.mxu0 %v9412_v11 }
 0x739   : > { %3106 = vmatprep.subr.mxu1 %v9416_v4  ;;  %3177 = vmatprep.subr.mxu0 %v9420_v7 }
 0x73a   : > { %3107 = vmatpush1.msra.mxu1 %v9424_v59  ;;  %3178 = vmatpush1.msra.mxu0 %v9428_v39 }
 0x73b   : > { %3108 = vmatprep.subr.mxu1 %v9432_v18  ;;  %3179 = vmatprep.subr.mxu0 %v9436_v12 }
 0x73c   : > { %3109 = vmatpush1.msra.mxu1 %v9440_v19  ;;  %3180 = vmatpush1.msra.mxu0 %v9444_v15 }
 0x73d   : > { %3110 = vmatprep.subr.mxu1 %v9448_v40  ;;  %3181 = vmatprep.subr.mxu0 %v9452_v41 }
 0x73e   : > { %3111 = vmatpush1.msra.mxu1 %v9456_v42  ;;  %3182 = vmatpush1.msra.mxu0 %v9460_v43 }
 0x73f   : > { %3112 = vmatprep.subr.mxu1 %v9464_v44  ;;  %3183 = vmatprep.subr.mxu0 %v9468_v45 }
 0x740   : > { %3113 = vmatpush1.msra.mxu1 %v9472_v46  ;;  %3184 = vmatpush1.msra.mxu0 %v9476_v47 }
 0x741   : > { %3114 = vmatprep.subr.mxu1 %v9480_v48  ;;  %3185 = vmatprep.subr.mxu0 %v9484_v49 }
 0x742   : > { %3115 = vmatpush1.msra.mxu1 %v9488_v50  ;;  %3186 = vmatpush1.msra.mxu0 %v9492_v51 }
 0x743   : > { %3116 = vmatprep.subr.mxu1 %v9496_v53  ;;  %3187 = vmatprep.subr.mxu0 %v9500_v54 }
 0x744   : > { %3117 = vmatpush1.msra.mxu1 %v9504_v55  ;;  %3188 = vmatpush1.msra.mxu0 %v9508_v56 }
 0x745   : > { %3118 = vmatprep.subr.mxu1 %v9512_v57  ;;  %3189 = vmatprep.subr.mxu0 %v9516_v23 }
 0x746   : > { %3119 = vmatpush1.msra.mxu1 %v9520_v25  ;;  %3190 = vmatpush1.msra.mxu0 %v9524_v37 }
 0x747   : > { %3120 = vmatprep.subr.mxu1 %v9528_v26  ;;  %3191 = vmatprep.subr.mxu0 %v9532_v27 }
 0x748   : > { %3121 = vmatpush1.msra.mxu1 %v9536_v28  ;;  %3192 = vmatpush1.msra.mxu0 %v9540_v0 }
 0x749   : > { %3122 = vmatprep.subr.mxu1 %v9544_v29  ;;  %3193 = vmatprep.subr.mxu0 %v9548_v30 }
 0x74a   : > { %3123 = vmatpush1.msra.mxu1 %v9552_v31  ;;  %3194 = vmatpush1.msra.mxu0 %v9556_v32 }
 0x74b   : > { %3124 = vmatprep.subr.mxu1 %v9560_v33  ;;  %3195 = vmatprep.subr.mxu0 %v9564_v21 }
 0x74c   : > { %3125 = vmatpush1.msra.mxu1 %v9568_v34  ;;  %3196 = vmatpush1.msra.mxu0 %v9572_v35 }
 0x74d   : > { %3126 = vmatprep.subr.mxu1 %v9576_v36  ;;  %3197 = vmatprep.subr.mxu0 %v9580_v8 }
 0x74e   : > { %3127 = vmatpush1.msra.mxu1 %v9584_v61  ;;  %3198 = vmatpush1.msra.mxu0 %v9588_v6  ;;  %v9608_v6 = vld [vmem:[%s7151_s3 + $0x28] sm:$0xff]  ;;  %v9616_v61 = vld [vmem:[%s7151_s3 + $0x20] sm:$0xff] }
 0x74f   : > { %3128 = vmatprep.subr.mxu1 %v9592_v3  ;;  %3199 = vmatprep.subr.mxu0 %v9596_v10  ;;  %12867 = vst [vmem:[#allocation40_spill] sm:$0xff] %v9608_v6  ;;  %v9612_v3 = vld [vmem:[%s7151_s3 + $0x38] sm:$0xff]  ;;  %12869 = vst [vmem:[#allocation41_spill] sm:$0xff] %v9616_v61  ;;  %v9620_v10 = vld [vmem:[%s7151_s3 + $0x30] sm:$0xff] }
 0x750   : > { %3129 = vmatpush1.msra.mxu1 %v9600_v14  ;;  %3200 = vmatpush1.msra.mxu0 %v9604_v5  ;;  %12868 = vst [vmem:[#allocation50_spill] sm:$0xff] %v9612_v3  ;;  %12870 = vst [vmem:[#allocation51_spill] sm:$0xff] %v9620_v10  ;;  %v9624_v5 = vld [vmem:[%s7151_s3 + $0x8] sm:$0xff] }
 0x751   : > { %3130 = vmatprep.subr.mxu1 %v9608_v6  ;;  %3201 = vmatprep.subr.mxu0 %v9612_v3  ;;  %12871 = vst [vmem:[#allocation52_spill] sm:$0xff] %v9624_v5  ;;  %v9628_v6 = vld [vmem:[%s7151_s3 + $0x18] sm:$0xff]  ;;  %v9632_v3 = vld [vmem:[%s7151_s3] sm:$0xff] }
 0x752   : > { %3131 = vmatpush1.msra.mxu1 %v9616_v61  ;;  %3202 = vmatpush1.msra.mxu0 %v9620_v10  ;;  %12872 = vst [vmem:[#allocation53_spill] sm:$0xff] %v9628_v6  ;;  %12873 = vst [vmem:[#allocation54_spill] sm:$0xff] %v9632_v3  ;;  %v9637_v61 = vld [vmem:[%s7151_s3 + $0x10] sm:$0xff] }
 0x753   : > { %3132 = vmatprep.subr.mxu1 %v9624_v5  ;;  %3203 = vmatprep.subr.mxu0 %v9628_v6  ;;  %12874 = vst [vmem:[#allocation55_spill] sm:$0xff] %v9637_v61  ;;  %v9644_v6 = vld [vmem:[%s7159_s16 + $0x1e8] sm:$0xff]  ;;  %v9652_v5 = vld [vmem:[%s7159_s16 + $0x1e0] sm:$0xff] }
 0x754   : > { %3133 = vmatpush1.msra.mxu1 %v9632_v3  ;;  %3166 = vmatprep.mubr.f32.mxu1 %v12721_v24  ;;  %12875 = vst [vmem:[#allocation56_spill] sm:$0xff] %v9644_v6  ;;  %v9648_v3 = vld [vmem:[%s7159_s16 + $0x1f8] sm:$0xff]  ;;  %12877 = vst [vmem:[#allocation58_spill] sm:$0xff] %v9652_v5 }
 0x755   : > { %3204 = vmatpush1.msra.mxu0 %v9637_v61  ;;  %3237 = vmatprep.mubr.f32.mxu0 %v12721_v24  ;;  %12876 = vst [vmem:[#allocation57_spill] sm:$0xff] %v9648_v3  ;;  %v9656_v61 = vld [vmem:[%s7159_s16 + $0x1f0] sm:$0xff]  ;;  %v10132_v24 = vld [vmem:[%s7159_s16 + $0x220] sm:$0xff] }
 0x756   : > { %3167 = vmatmul.mubr.f32.vlgmr.msra.gmra.mxu1 %v9387_v17  ;;  %3238 = vmatmul.mubr.f32.vlgmr.msra.gmra.mxu0 %v9387_v17  ;;  %12878 = vst [vmem:[#allocation59_spill] sm:$0xff] %v9656_v61  ;;  %v9660_v17 = vld [vmem:[%s7159_s16 + $0x1c8] sm:$0xff]  ;;  %12997 = vst [vmem:[#allocation178_spill] sm:$0xff] %v10132_v24 }
 0x757   : > { %3275 = vmatprep.subr.mxu1 %v9644_v6  ;;  %3346 = vmatprep.subr.mxu0 %v9648_v3  ;;  %12879 = vst [vmem:[#allocation60_spill] sm:$0xff] %v9660_v17  ;;  %v9664_v6 = vld [vmem:[%s7159_s16 + $0x1d8] sm:$0xff]  ;;  %v9668_v3 = vld [vmem:[%s7159_s16 + $0x1c0] sm:$0xff] }
 0x758   : > { %3276 = vmatpush1.msra.mxu1 %v9652_v5  ;;  %3347 = vmatpush1.msra.mxu0 %v9656_v61  ;;  %12880 = vst [vmem:[#allocation61_spill] sm:$0xff] %v9664_v6  ;;  %12881 = vst [vmem:[#allocation62_spill] sm:$0xff] %v9668_v3  ;;  %v9672_v5 = vld [vmem:[%s7159_s16 + $0x1d0] sm:$0xff]  ;;  %v9676_v61 = vld [vmem:[%s7159_s16 + $0x1a8] sm:$0xff] }
 0x759   : > { %3277 = vmatprep.subr.mxu1 %v9660_v17  ;;  %3348 = vmatprep.subr.mxu0 %v9664_v6  ;;  %12882 = vst [vmem:[#allocation63_spill] sm:$0xff] %v9672_v5  ;;  %12883 = vst [vmem:[#allocation64_spill] sm:$0xff] %v9676_v61  ;;  %v9680_v17 = vld [vmem:[%s7159_s16 + $0x1b8] sm:$0xff]  ;;  %v9684_v6 = vld [vmem:[%s7159_s16 + $0x1a0] sm:$0xff] }
 0x75a   : > { %3278 = vmatpush1.msra.mxu1 %v9668_v3  ;;  %3349 = vmatpush1.msra.mxu0 %v9672_v5  ;;  %12884 = vst [vmem:[#allocation65_spill] sm:$0xff] %v9680_v17  ;;  %12885 = vst [vmem:[#allocation66_spill] sm:$0xff] %v9684_v6  ;;  %v9688_v3 = vld [vmem:[%s7159_s16 + $0x1b0] sm:$0xff]  ;;  %v9692_v5 = vld [vmem:[%s7159_s16 + $0x188] sm:$0xff] }
 0x75b   : > { %3279 = vmatprep.subr.mxu1 %v9676_v61  ;;  %3350 = vmatprep.subr.mxu0 %v9680_v17  ;;  %12886 = vst [vmem:[#allocation67_spill] sm:$0xff] %v9688_v3  ;;  %12887 = vst [vmem:[#allocation68_spill] sm:$0xff] %v9692_v5  ;;  %v9696_v61 = vld [vmem:[%s7159_s16 + $0x198] sm:$0xff]  ;;  %v9700_v17 = vld [vmem:[%s7159_s16 + $0x180] sm:$0xff] }
 0x75c   : > { %3280 = vmatpush1.msra.mxu1 %v9684_v6  ;;  %3351 = vmatpush1.msra.mxu0 %v9688_v3  ;;  %12888 = vst [vmem:[#allocation69_spill] sm:$0xff] %v9696_v61  ;;  %12889 = vst [vmem:[#allocation70_spill] sm:$0xff] %v9700_v17  ;;  %v9704_v6 = vld [vmem:[%s7159_s16 + $0x190] sm:$0xff]  ;;  %v9708_v3 = vld [vmem:[%s7159_s16 + $0x168] sm:$0xff] }
 0x75d   : > { %3281 = vmatprep.subr.mxu1 %v9692_v5  ;;  %3352 = vmatprep.subr.mxu0 %v9696_v61  ;;  %12890 = vst [vmem:[#allocation71_spill] sm:$0xff] %v9704_v6  ;;  %12891 = vst [vmem:[#allocation72_spill] sm:$0xff] %v9708_v3  ;;  %v9712_v5 = vld [vmem:[%s7159_s16 + $0x178] sm:$0xff]  ;;  %v9716_v61 = vld [vmem:[%s7159_s16 + $0x160] sm:$0xff] }
 0x75e   : > { %3282 = vmatpush1.msra.mxu1 %v9700_v17  ;;  %3353 = vmatpush1.msra.mxu0 %v9704_v6  ;;  %12892 = vst [vmem:[#allocation73_spill] sm:$0xff] %v9712_v5  ;;  %12893 = vst [vmem:[#allocation74_spill] sm:$0xff] %v9716_v61  ;;  %v9720_v17 = vld [vmem:[%s7159_s16 + $0x170] sm:$0xff]  ;;  %v9724_v6 = vld [vmem:[%s7159_s16 + $0x148] sm:$0xff] }
 0x75f   : > { %3283 = vmatprep.subr.mxu1 %v9708_v3  ;;  %3354 = vmatprep.subr.mxu0 %v9712_v5  ;;  %12894 = vst [vmem:[#allocation75_spill] sm:$0xff] %v9720_v17  ;;  %12895 = vst [vmem:[#allocation76_spill] sm:$0xff] %v9724_v6  ;;  %v9728_v3 = vld [vmem:[%s7159_s16 + $0x158] sm:$0xff]  ;;  %v9732_v5 = vld [vmem:[%s7159_s16 + $0x140] sm:$0xff] }
 0x760   : > { %3284 = vmatpush1.msra.mxu1 %v9716_v61  ;;  %3355 = vmatpush1.msra.mxu0 %v9720_v17  ;;  %12896 = vst [vmem:[#allocation77_spill] sm:$0xff] %v9728_v3  ;;  %12897 = vst [vmem:[#allocation78_spill] sm:$0xff] %v9732_v5  ;;  %v9736_v61 = vld [vmem:[%s7159_s16 + $0x150] sm:$0xff]  ;;  %v9740_v17 = vld [vmem:[%s7159_s16 + $0x128] sm:$0xff] }
 0x761   : > { %3285 = vmatprep.subr.mxu1 %v9724_v6  ;;  %3356 = vmatprep.subr.mxu0 %v9728_v3  ;;  %12898 = vst [vmem:[#allocation79_spill] sm:$0xff] %v9736_v61  ;;  %12899 = vst [vmem:[#allocation80_spill] sm:$0xff] %v9740_v17  ;;  %v9744_v6 = vld [vmem:[%s7159_s16 + $0x138] sm:$0xff]  ;;  %v9748_v3 = vld [vmem:[%s7159_s16 + $0x120] sm:$0xff] }
 0x762   : > { %3286 = vmatpush1.msra.mxu1 %v9732_v5  ;;  %3357 = vmatpush1.msra.mxu0 %v9736_v61  ;;  %12900 = vst [vmem:[#allocation81_spill] sm:$0xff] %v9744_v6  ;;  %12901 = vst [vmem:[#allocation82_spill] sm:$0xff] %v9748_v3  ;;  %v9752_v5 = vld [vmem:[%s7159_s16 + $0x130] sm:$0xff]  ;;  %v9756_v61 = vld [vmem:[%s7159_s16 + $0x108] sm:$0xff] }
 0x763   : > { %3287 = vmatprep.subr.mxu1 %v9740_v17  ;;  %3358 = vmatprep.subr.mxu0 %v9744_v6  ;;  %12902 = vst [vmem:[#allocation83_spill] sm:$0xff] %v9752_v5  ;;  %12903 = vst [vmem:[#allocation84_spill] sm:$0xff] %v9756_v61  ;;  %v9760_v17 = vld [vmem:[%s7159_s16 + $0x118] sm:$0xff]  ;;  %v9764_v6 = vld [vmem:[%s7159_s16 + $0x100] sm:$0xff] }
 0x764   : > { %3288 = vmatpush1.msra.mxu1 %v9748_v3  ;;  %3359 = vmatpush1.msra.mxu0 %v9752_v5  ;;  %12904 = vst [vmem:[#allocation85_spill] sm:$0xff] %v9760_v17  ;;  %12905 = vst [vmem:[#allocation86_spill] sm:$0xff] %v9764_v6  ;;  %v9768_v3 = vld [vmem:[%s7159_s16 + $0x110] sm:$0xff]  ;;  %v9772_v5 = vld [vmem:[%s7159_s16 + $0xe8] sm:$0xff] }
 0x765   : > { %3289 = vmatprep.subr.mxu1 %v9756_v61  ;;  %3360 = vmatprep.subr.mxu0 %v9760_v17  ;;  %12906 = vst [vmem:[#allocation87_spill] sm:$0xff] %v9768_v3  ;;  %12907 = vst [vmem:[#allocation88_spill] sm:$0xff] %v9772_v5  ;;  %v9776_v61 = vld [vmem:[%s7159_s16 + $0xf8] sm:$0xff]  ;;  %v9780_v17 = vld [vmem:[%s7159_s16 + $0xe0] sm:$0xff] }
 0x766   : > { %3290 = vmatpush1.msra.mxu1 %v9764_v6  ;;  %3361 = vmatpush1.msra.mxu0 %v9768_v3  ;;  %12908 = vst [vmem:[#allocation89_spill] sm:$0xff] %v9776_v61  ;;  %12909 = vst [vmem:[#allocation90_spill] sm:$0xff] %v9780_v17  ;;  %v9784_v6 = vld [vmem:[%s7159_s16 + $0xf0] sm:$0xff]  ;;  %v9788_v3 = vld [vmem:[%s7159_s16 + $0xc8] sm:$0xff] }
 0x767   : > { %3291 = vmatprep.subr.mxu1 %v9772_v5  ;;  %3362 = vmatprep.subr.mxu0 %v9776_v61  ;;  %12910 = vst [vmem:[#allocation91_spill] sm:$0xff] %v9784_v6  ;;  %12911 = vst [vmem:[#allocation92_spill] sm:$0xff] %v9788_v3  ;;  %v9792_v5 = vld [vmem:[%s7159_s16 + $0xd8] sm:$0xff]  ;;  %v9796_v61 = vld [vmem:[%s7159_s16 + $0xc0] sm:$0xff] }
 0x768   : > { %3292 = vmatpush1.msra.mxu1 %v9780_v17  ;;  %3363 = vmatpush1.msra.mxu0 %v9784_v6  ;;  %12912 = vst [vmem:[#allocation93_spill] sm:$0xff] %v9792_v5  ;;  %12913 = vst [vmem:[#allocation94_spill] sm:$0xff] %v9796_v61  ;;  %v9800_v17 = vld [vmem:[%s7159_s16 + $0xd0] sm:$0xff]  ;;  %v9804_v6 = vld [vmem:[%s7159_s16 + $0xa8] sm:$0xff] }
 0x769   : > { %3293 = vmatprep.subr.mxu1 %v9788_v3  ;;  %3364 = vmatprep.subr.mxu0 %v9792_v5  ;;  %12914 = vst [vmem:[#allocation95_spill] sm:$0xff] %v9800_v17  ;;  %12915 = vst [vmem:[#allocation96_spill] sm:$0xff] %v9804_v6  ;;  %v9808_v3 = vld [vmem:[%s7159_s16 + $0xb8] sm:$0xff]  ;;  %v9812_v5 = vld [vmem:[%s7159_s16 + $0xa0] sm:$0xff] }
 0x76a   : > { %3294 = vmatpush1.msra.mxu1 %v9796_v61  ;;  %3365 = vmatpush1.msra.mxu0 %v9800_v17  ;;  %12916 = vst [vmem:[#allocation97_spill] sm:$0xff] %v9808_v3  ;;  %12917 = vst [vmem:[#allocation98_spill] sm:$0xff] %v9812_v5  ;;  %v9816_v61 = vld [vmem:[%s7159_s16 + $0xb0] sm:$0xff]  ;;  %v9820_v17 = vld [vmem:[%s7159_s16 + $0x88] sm:$0xff] }
 0x76b   : > { %3295 = vmatprep.subr.mxu1 %v9804_v6  ;;  %3366 = vmatprep.subr.mxu0 %v9808_v3  ;;  %12918 = vst [vmem:[#allocation99_spill] sm:$0xff] %v9816_v61  ;;  %12919 = vst [vmem:[#allocation100_spill] sm:$0xff] %v9820_v17  ;;  %v9824_v6 = vld [vmem:[%s7159_s16 + $0x98] sm:$0xff]  ;;  %v9828_v3 = vld [vmem:[%s7159_s16 + $0x80] sm:$0xff] }
 0x76c   : > { %3296 = vmatpush1.msra.mxu1 %v9812_v5  ;;  %3367 = vmatpush1.msra.mxu0 %v9816_v61  ;;  %12920 = vst [vmem:[#allocation101_spill] sm:$0xff] %v9824_v6  ;;  %12921 = vst [vmem:[#allocation102_spill] sm:$0xff] %v9828_v3  ;;  %v9832_v5 = vld [vmem:[%s7159_s16 + $0x90] sm:$0xff]  ;;  %v9836_v61 = vld [vmem:[%s7159_s16 + $0x68] sm:$0xff] }
 0x76d   : > { %3297 = vmatprep.subr.mxu1 %v9820_v17  ;;  %3368 = vmatprep.subr.mxu0 %v9824_v6  ;;  %12922 = vst [vmem:[#allocation103_spill] sm:$0xff] %v9832_v5  ;;  %12923 = vst [vmem:[#allocation104_spill] sm:$0xff] %v9836_v61  ;;  %v9840_v17 = vld [vmem:[%s7159_s16 + $0x78] sm:$0xff]  ;;  %v9844_v6 = vld [vmem:[%s7159_s16 + $0x60] sm:$0xff] }
 0x76e   : > { %3298 = vmatpush1.msra.mxu1 %v9828_v3  ;;  %3369 = vmatpush1.msra.mxu0 %v9832_v5  ;;  %12924 = vst [vmem:[#allocation105_spill] sm:$0xff] %v9840_v17  ;;  %12925 = vst [vmem:[#allocation106_spill] sm:$0xff] %v9844_v6  ;;  %v9848_v3 = vld [vmem:[%s7159_s16 + $0x70] sm:$0xff]  ;;  %v9852_v5 = vld [vmem:[%s7159_s16 + $0x48] sm:$0xff] }
 0x76f   : > { %3299 = vmatprep.subr.mxu1 %v9836_v61  ;;  %3370 = vmatprep.subr.mxu0 %v9840_v17  ;;  %12926 = vst [vmem:[#allocation107_spill] sm:$0xff] %v9848_v3  ;;  %12927 = vst [vmem:[#allocation108_spill] sm:$0xff] %v9852_v5  ;;  %v9856_v61 = vld [vmem:[%s7159_s16 + $0x58] sm:$0xff]  ;;  %v9860_v17 = vld [vmem:[%s7159_s16 + $0x40] sm:$0xff] }
 0x770   : > { %3300 = vmatpush1.msra.mxu1 %v9844_v6  ;;  %3371 = vmatpush1.msra.mxu0 %v9848_v3  ;;  %12928 = vst [vmem:[#allocation109_spill] sm:$0xff] %v9856_v61  ;;  %12929 = vst [vmem:[#allocation110_spill] sm:$0xff] %v9860_v17  ;;  %v9864_v6 = vld [vmem:[%s7159_s16 + $0x50] sm:$0xff]  ;;  %v9868_v3 = vld [vmem:[%s7159_s16 + $0x28] sm:$0xff] }
 0x771   : > { %3301 = vmatprep.subr.mxu1 %v9852_v5  ;;  %3372 = vmatprep.subr.mxu0 %v9856_v61  ;;  %12930 = vst [vmem:[#allocation111_spill] sm:$0xff] %v9864_v6  ;;  %12931 = vst [vmem:[#allocation112_spill] sm:$0xff] %v9868_v3  ;;  %v9872_v5 = vld [vmem:[%s7159_s16 + $0x38] sm:$0xff]  ;;  %v9876_v61 = vld [vmem:[%s7159_s16 + $0x20] sm:$0xff] }
 0x772   : > { %3302 = vmatpush1.msra.mxu1 %v9860_v17  ;;  %3373 = vmatpush1.msra.mxu0 %v9864_v6  ;;  %12932 = vst [vmem:[#allocation113_spill] sm:$0xff] %v9872_v5  ;;  %12933 = vst [vmem:[#allocation114_spill] sm:$0xff] %v9876_v61  ;;  %v9880_v17 = vld [vmem:[%s7159_s16 + $0x30] sm:$0xff]  ;;  %v9884_v6 = vld [vmem:[%s7159_s16 + $0x8] sm:$0xff] }
 0x773   : > { %3303 = vmatprep.subr.mxu1 %v9868_v3  ;;  %3374 = vmatprep.subr.mxu0 %v9872_v5  ;;  %12934 = vst [vmem:[#allocation115_spill] sm:$0xff] %v9880_v17  ;;  %12935 = vst [vmem:[#allocation116_spill] sm:$0xff] %v9884_v6  ;;  %v9888_v3 = vld [vmem:[%s7159_s16 + $0x18] sm:$0xff]  ;;  %v9892_v5 = vld [vmem:[%s7159_s16] sm:$0xff] }
 0x774   : > { %3304 = vmatpush1.msra.mxu1 %v9876_v61  ;;  %3375 = vmatpush1.msra.mxu0 %v9880_v17  ;;  %12936 = vst [vmem:[#allocation117_spill] sm:$0xff] %v9888_v3  ;;  %12937 = vst [vmem:[#allocation118_spill] sm:$0xff] %v9892_v5  ;;  %v9896_v61 = vld [vmem:[%s7159_s16 + $0x10] sm:$0xff]  ;;  %v9900_v17 = vld [vmem:[%s7159_s16 + $0x3e8] sm:$0xff] }
 0x775   : > { %3305 = vmatprep.subr.mxu1 %v9884_v6  ;;  %3376 = vmatprep.subr.mxu0 %v9888_v3  ;;  %12938 = vst [vmem:[#allocation119_spill] sm:$0xff] %v9896_v61  ;;  %12939 = vst [vmem:[#allocation120_spill] sm:$0xff] %v9900_v17  ;;  %v9904_v6 = vld [vmem:[%s7159_s16 + $0x3f8] sm:$0xff]  ;;  %v9908_v3 = vld [vmem:[%s7159_s16 + $0x3e0] sm:$0xff] }
 0x776   : > { %3306 = vmatpush1.msra.mxu1 %v9892_v5  ;;  %3377 = vmatpush1.msra.mxu0 %v9896_v61  ;;  %12940 = vst [vmem:[#allocation121_spill] sm:$0xff] %v9904_v6  ;;  %12941 = vst [vmem:[#allocation122_spill] sm:$0xff] %v9908_v3  ;;  %v9912_v5 = vld [vmem:[%s7159_s16 + $0x3f0] sm:$0xff]  ;;  %v9916_v61 = vld [vmem:[%s7159_s16 + $0x3c8] sm:$0xff] }
 0x777   : > { %3307 = vmatprep.subr.mxu1 %v9900_v17  ;;  %3378 = vmatprep.subr.mxu0 %v9904_v6  ;;  %12942 = vst [vmem:[#allocation123_spill] sm:$0xff] %v9912_v5  ;;  %12943 = vst [vmem:[#allocation124_spill] sm:$0xff] %v9916_v61  ;;  %v9920_v17 = vld [vmem:[%s7159_s16 + $0x3d8] sm:$0xff]  ;;  %v9924_v6 = vld [vmem:[%s7159_s16 + $0x3c0] sm:$0xff] }
 0x778   : > { %3308 = vmatpush2.msra.mxu1 %v9908_v3  ;;  %3379 = vmatpush2.msra.mxu0 %v9912_v5  ;;  %12944 = vst [vmem:[#allocation125_spill] sm:$0xff] %v9920_v17  ;;  %12945 = vst [vmem:[#allocation126_spill] sm:$0xff] %v9924_v6  ;;  %v9928_v3 = vld [vmem:[%s7159_s16 + $0x3d0] sm:$0xff]  ;;  %v9932_v5 = vld [vmem:[%s7159_s16 + $0x3a8] sm:$0xff] }
 0x779   : > { %3309 = vmatprep.subr.mxu1 %v9916_v61  ;;  %3380 = vmatprep.subr.mxu0 %v9920_v17  ;;  %12946 = vst [vmem:[#allocation127_spill] sm:$0xff] %v9928_v3  ;;  %12947 = vst [vmem:[#allocation128_spill] sm:$0xff] %v9932_v5  ;;  %v9936_v61 = vld [vmem:[%s7159_s16 + $0x3b8] sm:$0xff]  ;;  %v9940_v17 = vld [vmem:[%s7159_s16 + $0x3a0] sm:$0xff] }
 0x77a   : > { %3310 = vmatpush2.msra.mxu1 %v9924_v6  ;;  %3381 = vmatpush2.msra.mxu0 %v9928_v3  ;;  %12948 = vst [vmem:[#allocation129_spill] sm:$0xff] %v9936_v61  ;;  %12949 = vst [vmem:[#allocation130_spill] sm:$0xff] %v9940_v17  ;;  %v9944_v6 = vld [vmem:[%s7159_s16 + $0x3b0] sm:$0xff]  ;;  %v9948_v3 = vld [vmem:[%s7159_s16 + $0x388] sm:$0xff] }
 0x77b   : > { %3311 = vmatprep.subr.mxu1 %v9932_v5  ;;  %3382 = vmatprep.subr.mxu0 %v9936_v61  ;;  %12950 = vst [vmem:[#allocation131_spill] sm:$0xff] %v9944_v6  ;;  %12951 = vst [vmem:[#allocation132_spill] sm:$0xff] %v9948_v3  ;;  %v9952_v5 = vld [vmem:[%s7159_s16 + $0x398] sm:$0xff]  ;;  %v9956_v61 = vld [vmem:[%s7159_s16 + $0x380] sm:$0xff] }
 0x77c   : > { %3312 = vmatpush2.msra.mxu1 %v9940_v17  ;;  %3383 = vmatpush2.msra.mxu0 %v9944_v6  ;;  %12952 = vst [vmem:[#allocation133_spill] sm:$0xff] %v9952_v5  ;;  %12953 = vst [vmem:[#allocation134_spill] sm:$0xff] %v9956_v61  ;;  %v9960_v17 = vld [vmem:[%s7159_s16 + $0x390] sm:$0xff]  ;;  %v9964_v6 = vld [vmem:[%s7159_s16 + $0x368] sm:$0xff] }
 0x77d   : > { %3313 = vmatprep.subr.mxu1 %v9948_v3  ;;  %3384 = vmatprep.subr.mxu0 %v9952_v5  ;;  %12954 = vst [vmem:[#allocation135_spill] sm:$0xff] %v9960_v17  ;;  %12955 = vst [vmem:[#allocation136_spill] sm:$0xff] %v9964_v6  ;;  %v9968_v3 = vld [vmem:[%s7159_s16 + $0x378] sm:$0xff]  ;;  %v9972_v5 = vld [vmem:[%s7159_s16 + $0x360] sm:$0xff] }
 0x77e   : > { %3314 = vmatpush2.msra.mxu1 %v9956_v61  ;;  %3385 = vmatpush2.msra.mxu0 %v9960_v17  ;;  %12956 = vst [vmem:[#allocation137_spill] sm:$0xff] %v9968_v3  ;;  %12957 = vst [vmem:[#allocation138_spill] sm:$0xff] %v9972_v5  ;;  %v9976_v61 = vld [vmem:[%s7159_s16 + $0x370] sm:$0xff]  ;;  %v9980_v17 = vld [vmem:[%s7159_s16 + $0x348] sm:$0xff] }
 0x77f   : > { %3315 = vmatprep.subr.mxu1 %v9964_v6  ;;  %3386 = vmatprep.subr.mxu0 %v9968_v3  ;;  %12958 = vst [vmem:[#allocation139_spill] sm:$0xff] %v9976_v61  ;;  %12959 = vst [vmem:[#allocation140_spill] sm:$0xff] %v9980_v17  ;;  %v9984_v6 = vld [vmem:[%s7159_s16 + $0x358] sm:$0xff]  ;;  %v9988_v3 = vld [vmem:[%s7159_s16 + $0x340] sm:$0xff] }
 0x780   : > { %3316 = vmatpush2.msra.mxu1 %v9972_v5  ;;  %3387 = vmatpush2.msra.mxu0 %v9976_v61  ;;  %12960 = vst [vmem:[#allocation141_spill] sm:$0xff] %v9984_v6  ;;  %12961 = vst [vmem:[#allocation142_spill] sm:$0xff] %v9988_v3  ;;  %v9992_v5 = vld [vmem:[%s7159_s16 + $0x350] sm:$0xff]  ;;  %v9996_v61 = vld [vmem:[%s7159_s16 + $0x328] sm:$0xff] }
 0x781   : > { %3317 = vmatprep.subr.mxu1 %v9980_v17  ;;  %3388 = vmatprep.subr.mxu0 %v9984_v6  ;;  %12962 = vst [vmem:[#allocation143_spill] sm:$0xff] %v9992_v5  ;;  %12963 = vst [vmem:[#allocation144_spill] sm:$0xff] %v9996_v61  ;;  %v10000_v17 = vld [vmem:[%s7159_s16 + $0x338] sm:$0xff]  ;;  %v10004_v6 = vld [vmem:[%s7159_s16 + $0x320] sm:$0xff] }
 0x782   : > { %3318 = vmatpush2.msra.mxu1 %v9988_v3  ;;  %3389 = vmatpush2.msra.mxu0 %v9992_v5  ;;  %12964 = vst [vmem:[#allocation145_spill] sm:$0xff] %v10000_v17  ;;  %12965 = vst [vmem:[#allocation146_spill] sm:$0xff] %v10004_v6  ;;  %v10008_v3 = vld [vmem:[%s7159_s16 + $0x330] sm:$0xff]  ;;  %v10012_v5 = vld [vmem:[%s7159_s16 + $0x308] sm:$0xff] }
 0x783   : > { %3319 = vmatprep.subr.mxu1 %v9996_v61  ;;  %3390 = vmatprep.subr.mxu0 %v10000_v17  ;;  %12966 = vst [vmem:[#allocation147_spill] sm:$0xff] %v10008_v3  ;;  %12967 = vst [vmem:[#allocation148_spill] sm:$0xff] %v10012_v5  ;;  %v10016_v61 = vld [vmem:[%s7159_s16 + $0x318] sm:$0xff]  ;;  %v10020_v17 = vld [vmem:[%s7159_s16 + $0x300] sm:$0xff] }
 0x784   : > { %3320 = vmatpush2.msra.mxu1 %v10004_v6  ;;  %3391 = vmatpush2.msra.mxu0 %v10008_v3  ;;  %12968 = vst [vmem:[#allocation149_spill] sm:$0xff] %v10016_v61  ;;  %12969 = vst [vmem:[#allocation150_spill] sm:$0xff] %v10020_v17  ;;  %v10024_v6 = vld [vmem:[%s7159_s16 + $0x310] sm:$0xff]  ;;  %v10028_v3 = vld [vmem:[%s7159_s16 + $0x2e8] sm:$0xff] }
 0x785   : > { %3321 = vmatprep.subr.mxu1 %v10012_v5  ;;  %3392 = vmatprep.subr.mxu0 %v10016_v61  ;;  %12970 = vst [vmem:[#allocation151_spill] sm:$0xff] %v10024_v6  ;;  %12971 = vst [vmem:[#allocation152_spill] sm:$0xff] %v10028_v3  ;;  %v10032_v5 = vld [vmem:[%s7159_s16 + $0x2f8] sm:$0xff]  ;;  %v10036_v61 = vld [vmem:[%s7159_s16 + $0x2e0] sm:$0xff] }
 0x786   : > { %3322 = vmatpush2.msra.mxu1 %v10020_v17  ;;  %3393 = vmatpush2.msra.mxu0 %v10024_v6  ;;  %12972 = vst [vmem:[#allocation153_spill] sm:$0xff] %v10032_v5  ;;  %12973 = vst [vmem:[#allocation154_spill] sm:$0xff] %v10036_v61  ;;  %v10040_v17 = vld [vmem:[%s7159_s16 + $0x2f0] sm:$0xff]  ;;  %v10044_v6 = vld [vmem:[%s7159_s16 + $0x2c8] sm:$0xff] }
 0x787   : > { %3323 = vmatprep.subr.mxu1 %v10028_v3  ;;  %3394 = vmatprep.subr.mxu0 %v10032_v5  ;;  %12974 = vst [vmem:[#allocation155_spill] sm:$0xff] %v10040_v17  ;;  %12975 = vst [vmem:[#allocation156_spill] sm:$0xff] %v10044_v6  ;;  %v10048_v3 = vld [vmem:[%s7159_s16 + $0x2d8] sm:$0xff]  ;;  %v10052_v5 = vld [vmem:[%s7159_s16 + $0x2c0] sm:$0xff] }
 0x788   : > { %3324 = vmatpush2.msra.mxu1 %v10036_v61  ;;  %3395 = vmatpush2.msra.mxu0 %v10040_v17  ;;  %12976 = vst [vmem:[#allocation157_spill] sm:$0xff] %v10048_v3  ;;  %12977 = vst [vmem:[#allocation158_spill] sm:$0xff] %v10052_v5  ;;  %v10056_v61 = vld [vmem:[%s7159_s16 + $0x2d0] sm:$0xff]  ;;  %v10060_v17 = vld [vmem:[%s7159_s16 + $0x2a8] sm:$0xff] }
 0x789   : > { %3325 = vmatprep.subr.mxu1 %v10044_v6  ;;  %3396 = vmatprep.subr.mxu0 %v10048_v3  ;;  %12978 = vst [vmem:[#allocation159_spill] sm:$0xff] %v10056_v61  ;;  %12979 = vst [vmem:[#allocation160_spill] sm:$0xff] %v10060_v17  ;;  %v10064_v6 = vld [vmem:[%s7159_s16 + $0x2b8] sm:$0xff]  ;;  %v10068_v3 = vld [vmem:[%s7159_s16 + $0x2a0] sm:$0xff] }
 0x78a   : > { %3326 = vmatpush2.msra.mxu1 %v10052_v5  ;;  %3397 = vmatpush2.msra.mxu0 %v10056_v61  ;;  %12980 = vst [vmem:[#allocation161_spill] sm:$0xff] %v10064_v6  ;;  %12981 = vst [vmem:[#allocation162_spill] sm:$0xff] %v10068_v3  ;;  %v10072_v5 = vld [vmem:[%s7159_s16 + $0x2b0] sm:$0xff]  ;;  %v10076_v61 = vld [vmem:[%s7159_s16 + $0x288] sm:$0xff] }
 0x78b   : > { %3327 = vmatprep.subr.mxu1 %v10060_v17  ;;  %3398 = vmatprep.subr.mxu0 %v10064_v6  ;;  %12982 = vst [vmem:[#allocation163_spill] sm:$0xff] %v10072_v5  ;;  %12983 = vst [vmem:[#allocation164_spill] sm:$0xff] %v10076_v61  ;;  %v10080_v17 = vld [vmem:[%s7159_s16 + $0x298] sm:$0xff]  ;;  %v10084_v6 = vld [vmem:[%s7159_s16 + $0x280] sm:$0xff] }
 0x78c   : > { %3328 = vmatpush2.msra.mxu1 %v10068_v3  ;;  %3399 = vmatpush2.msra.mxu0 %v10072_v5  ;;  %12984 = vst [vmem:[#allocation165_spill] sm:$0xff] %v10080_v17  ;;  %12985 = vst [vmem:[#allocation166_spill] sm:$0xff] %v10084_v6  ;;  %v10088_v3 = vld [vmem:[%s7159_s16 + $0x290] sm:$0xff]  ;;  %v10092_v5 = vld [vmem:[%s7159_s16 + $0x268] sm:$0xff] }
 0x78d   : > { %3329 = vmatprep.subr.mxu1 %v10076_v61  ;;  %3400 = vmatprep.subr.mxu0 %v10080_v17  ;;  %12986 = vst [vmem:[#allocation167_spill] sm:$0xff] %v10088_v3  ;;  %12987 = vst [vmem:[#allocation168_spill] sm:$0xff] %v10092_v5  ;;  %v10096_v61 = vld [vmem:[%s7159_s16 + $0x278] sm:$0xff]  ;;  %v10100_v17 = vld [vmem:[%s7159_s16 + $0x260] sm:$0xff] }
 0x78e   : > { %3330 = vmatpush2.msra.mxu1 %v10084_v6  ;;  %3401 = vmatpush2.msra.mxu0 %v10088_v3  ;;  %12988 = vst [vmem:[#allocation169_spill] sm:$0xff] %v10096_v61  ;;  %12989 = vst [vmem:[#allocation170_spill] sm:$0xff] %v10100_v17  ;;  %v10104_v6 = vld [vmem:[%s7159_s16 + $0x270] sm:$0xff]  ;;  %v10108_v3 = vld [vmem:[%s7159_s16 + $0x248] sm:$0xff] }
 0x78f   : > { %3331 = vmatprep.subr.mxu1 %v10092_v5  ;;  %3402 = vmatprep.subr.mxu0 %v10096_v61  ;;  %12990 = vst [vmem:[#allocation171_spill] sm:$0xff] %v10104_v6  ;;  %12991 = vst [vmem:[#allocation172_spill] sm:$0xff] %v10108_v3  ;;  %v10112_v5 = vld [vmem:[%s7159_s16 + $0x258] sm:$0xff]  ;;  %v10116_v61 = vld [vmem:[%s7159_s16 + $0x240] sm:$0xff] }
 0x790   : > { %3332 = vmatpush2.msra.mxu1 %v10100_v17  ;;  %3403 = vmatpush2.msra.mxu0 %v10104_v6  ;;  %12992 = vst [vmem:[#allocation173_spill] sm:$0xff] %v10112_v5  ;;  %12993 = vst [vmem:[#allocation174_spill] sm:$0xff] %v10116_v61  ;;  %v10120_v17 = vld [vmem:[%s7159_s16 + $0x250] sm:$0xff]  ;;  %v10124_v6 = vld [vmem:[%s7159_s16 + $0x228] sm:$0xff] }
 0x791   : > { %3333 = vmatprep.subr.mxu1 %v10108_v3  ;;  %3404 = vmatprep.subr.mxu0 %v10112_v5  ;;  %12994 = vst [vmem:[#allocation175_spill] sm:$0xff] %v10120_v17  ;;  %12995 = vst [vmem:[#allocation176_spill] sm:$0xff] %v10124_v6  ;;  %v10128_v3 = vld [vmem:[%s7159_s16 + $0x238] sm:$0xff]  ;;  %v10136_v5 = vld [vmem:[%s7159_s16 + $0x230] sm:$0xff] }
 0x792   : > { %3334 = vmatpush2.msra.mxu1 %v10116_v61  ;;  %3405 = vmatpush2.msra.mxu0 %v10120_v17  ;;  %12996 = vst [vmem:[#allocation177_spill] sm:$0xff] %v10128_v3  ;;  %12998 = vst [vmem:[#allocation179_spill] sm:$0xff] %v10136_v5  ;;  %v10140_v61 = vld [vmem:[%s7159_s16 + $0x208] sm:$0xff]  ;;  %v10144_v17 = vld [vmem:[%s7159_s16 + $0x218] sm:$0xff] }
 0x793   : > { %3335 = vmatprep.subr.mxu1 %v10124_v6  ;;  %3406 = vmatprep.subr.mxu0 %v10128_v3  ;;  %12999 = vst [vmem:[#allocation180_spill] sm:$0xff] %v10140_v61  ;;  %13000 = vst [vmem:[#allocation188_spill] sm:$0xff] %v10144_v17  ;;  %v10148_v6 = vld [vmem:[%s7159_s16 + $0x200] sm:$0xff]  ;;  %v10152_v3 = vld [vmem:[%s7159_s16 + $0x210] sm:$0xff] }
 0x794   : > { %3336 = vmatpush2.msra.mxu1 %v10132_v24  ;;  %3407 = vmatpush2.msra.mxu0 %v10136_v5  ;;  %13001 = vst [vmem:[#allocation189_spill] sm:$0xff] %v10148_v6  ;;  %13002 = vst [vmem:[#allocation190_spill] sm:$0xff] %v10152_v3 }
 0x795   : > { %3337 = vmatprep.subr.mxu1 %v10140_v61  ;;  %3408 = vmatprep.subr.mxu0 %v10144_v17 }
 0x796   : > { %3338 = vmatpush2.msra.mxu1 %v10148_v6  ;;  %3409 = vmatpush2.msra.mxu0 %v10152_v3 }
 0x797   : > { %3442 = vmatprep.subr.mxu1 %v9364_v16  ;;  %3513 = vmatprep.subr.mxu0 %v9368_v62 }
 0x7f5   : > { %v3001_v5 = vpop.f32.mrf.mxu1  ;;  %v3072_v8 = vpop.f32.mrf.mxu0 }
 0x7f6   : > { %v3002_v24 = vadd.f32 %v3001_v5, %v12851_v60  ;;  %v3073_v6 = vadd.f32 %v3072_v8, %v12853_v1 }
 0x7f7   : > { %v3003_v61 = vpop.f32.mrf.mxu1  ;;  %v3074_v36 = vpop.f32.mrf.mxu0 }
 0x7f8   : > { %v5245_v10 = vmul.f32 -1.442695, %v3002_v24  ;;  %v3004_v14 = vadd.f32 %v3003_v61, %v12852_v9  ;;  %v5247_v35 = vmul.f32 -1.442695, %v3073_v6  ;;  %v3075_v16 = vadd.f32 %v3074_v36, %v8363_v63  ;;  %v13004_v6 = vld [vmem:[#allocation184_spill] sm:$0xff]  ;;  %v13006_v63 = vld [vmem:[#allocation187_spill] sm:$0xff] }
 0x7fa   : > { %5619 = vpow2.f32 %v5245_v10  ;;  %v5246_v17 = vmul.f32 -1.442695, %v3004_v14  ;;  %v13003_v14 = vld [vmem:[#allocation183_spill] sm:$0xff] }
 0x7fc   : > { %5621 = vpow2.f32 %v5246_v17 }
 0x7fd   : > { %5623 = vpow2.f32 %v5247_v35 }
 0x807   : > { %v5620_v3 = vpop.eup %5619 }
 0x808   : > { %v3086_v34 = vadd.f32 1.0, %v5620_v3 }
 0x809   : > { %v5622_v62 = vpop.eup %5621 }
 0x80a   : > { %5625 = vrcp.f32 %v3086_v34  ;;  %v3087_v5 = vadd.f32 1.0, %v5622_v62  ;;  %v5624_v24 = vpop.eup %5623  ;;  %v13005_v62 = vld [vmem:[#allocation186_spill] sm:$0xff] }
 0x80b   : > { %5627 = vtanh.f32 %v3075_v16  ;;  %v3088_v33 = vadd.f32 1.0, %v5624_v24 }
 0x80c   : > { %5629 = vrcp.f32 %v3087_v5 }
 0x816   : > { %v3168_v61 = vpop.f32.mrf.mxu1  ;;  %v3239_v16 = vpop.f32.mrf.mxu0 }
 0x817   : > { %v5626_v10 = vpop.eup %5625  ;;  %v3244_v17 = vadd.f32 %v3168_v61, %v13003_v14  ;;  %v3246_v5 = vadd.f32 %v3239_v16, %v13005_v62 }
 0x818   : > { %v5628_v9 = vpop.eup %5627  ;;  %v3170_v60 = vpop.f32.mrf.mxu1 }
 0x819   : > { %v5630_v8 = vpop.eup %5629  ;;  %v5248_v1 = vmul.f32 -1.442695, %v3244_v17  ;;  %v3245_v21 = vadd.f32 %v3170_v60, %v13004_v6  ;;  %v3097_v3 = vmul.f32 %v5628_v9, %v5626_v10  ;;  %v3241_v61 = vpop.f32.mrf.mxu0  ;;  %v5250_v14 = vmul.f32 -1.442695, %v3246_v5 }
 0x81a   : > { %v3096_v36 = vmul.f32 %v5630_v8, %v9378_v52  ;;  %v3247_v60 = vadd.f32 %v3241_v61, %v13006_v63 }
 0x81b   : > { %5631 = vpow2.f32 %v5248_v1  ;;  %v5249_v34 = vmul.f32 -1.442695, %v3245_v21 }
 0x81c   : > { %v10164_v35 = vadd.f32 %v3097_v3, %v3096_v36  ;;  %v3268_v36 = vrot.slane %v9384_v13, 6  ;;  %v13007_v13 = vld [vmem:[#allocation34_spill] sm:$0xff] }
 0x81d   : > { %5633 = vpow2.f32 %v5249_v34 }
 0x81e   : > { %5635 = vrcp.f32 %v3088_v33 }
 0x81f   : > { %5637 = vtanh.f32 %v10164_v35 }
 0x820   : > { %5639 = vpow2.f32 %v5250_v14 }
 0x828   : > { %v5632_v17 = vpop.eup %5631 }
 0x829   : > { %v3257_v24 = vadd.f32 1.0, %v5632_v17 }
 0x82a   : > { %v5634_v6 = vpop.eup %5633 }
 0x82b   : > { %v5636_v9 = vpop.eup %5635  ;;  %5641 = vrcp.f32 %v3257_v24  ;;  %v3258_v1 = vadd.f32 1.0, %v5634_v6  ;;  %v13051_v24 = vld [vmem:[#allocation79_spill] sm:$0xff] }
 0x82c   : > { %v5638_v52 = vpop.eup %5637  ;;  %5643 = vtanh.f32 %v3247_v60  ;;  %v13050_v60 = vld [vmem:[#allocation78_spill] sm:$0xff] }
 0x82d   : > { %5645 = vrcp.f32 %v3258_v1  ;;  %v3100_v33 = vmul.f32 %v5638_v52, %v5636_v9  ;;  %v5640_v21 = vpop.eup %5639  ;;  %v13052_v9 = vld [vmem:[#allocation80_spill] sm:$0xff]  ;;  %v13053_v1 = vld [vmem:[#allocation81_spill] sm:$0xff]  ;;  %v13054_v52 = vld [vmem:[#allocation82_spill] sm:$0xff] }
 0x82e   : > { %v3259_v34 = vadd.f32 1.0, %v5640_v21  ;;  %v13056_v21 = vld [vmem:[#allocation84_spill] sm:$0xff] }
 0x82f   : > { %3101 = vst [vmem:[#allocation2 + $0x6] sm:$0x3] %v3100_v33  ;;  %3339 = vmatprep.mubr.f32.mxu1 %v3100_v33  ;;  %3410 = vmatprep.mubr.f32.mxu0 %v3100_v33  ;;  %v13055_v33 = vld [vmem:[#allocation83_spill] sm:$0xff] }
 0x830   : > { %5647 = vrcp.f32 %v3259_v34  ;;  %v13061_v34 = vld [vmem:[#allocation89_spill] sm:$0xff] }
 0x838   : > { %v5642_v10 = vpop.eup %5641 }
 0x839   : > { %v5644_v8 = vpop.eup %5643 }
 0x83a   : > { %v5646_v3 = vpop.eup %5645  ;;  %v3271_v5 = vmul.f32 %v5644_v8, %v5642_v10  ;;  %v13057_v10 = vld [vmem:[#allocation85_spill] sm:$0xff]  ;;  %v13058_v8 = vld [vmem:[#allocation86_spill] sm:$0xff] }
 0x83b   : > { %v3270_v16 = vmul.f32 %v5646_v3, %v3268_v36  ;;  %v13059_v36 = vld [vmem:[#allocation87_spill] sm:$0xff]  ;;  %v13060_v3 = vld [vmem:[#allocation88_spill] sm:$0xff] }
 0x83d   : > { %v10170_v14 = vadd.f32 %v3271_v5, %v3270_v16  ;;  %v5648_v6 = vpop.eup %5647  ;;  %v13062_v16 = vld [vmem:[#allocation90_spill] sm:$0xff]  ;;  %v13063_v5 = vld [vmem:[#allocation91_spill] sm:$0xff] }
 0x83f   : > { %5649 = vtanh.f32 %v10170_v14 }
 0x84c   : > { %v5650_v61 = vpop.eup %5649 }
 0x84d   : > { %v10173_v17 = vmul.f32 %v5650_v61, %v5648_v6  ;;  %v13064_v6 = vld [vmem:[#allocation92_spill] sm:$0xff]  ;;  %v13065_v61 = vld [vmem:[#allocation93_spill] sm:$0xff] }
 0x84f   : > { %3340 = vmatmul.mubr.f32.vlgmr.msra.gmra.mxu1 %v10173_v17  ;;  %3411 = vmatmul.mubr.f32.vlgmr.msra.gmra.mxu0 %v10173_v17 }
 0x850   : > { %3443 = vmatpush1.msra.mxu1 %v9392_v22  ;;  %3514 = vmatpush1.msra.mxu0 %v9396_v20  ;;  %v13008_v22 = vld [vmem:[#allocation44_spill] sm:$0xff]  ;;  %v13009_v20 = vld [vmem:[#allocation35_spill] sm:$0xff] }
 0x851   : > { %3444 = vmatprep.subr.mxu1 %v9400_v38  ;;  %3515 = vmatprep.subr.mxu0 %v9404_v58  ;;  %v13010_v38 = vld [vmem:[#allocation45_spill] sm:$0xff]  ;;  %v13011_v58 = vld [vmem:[#allocation36_spill] sm:$0xff] }
 0x852   : > { %3445 = vmatpush1.msra.mxu1 %v9408_v2  ;;  %3516 = vmatpush1.msra.mxu0 %v9412_v11  ;;  %v13012_v2 = vld [vmem:[#allocation46_spill] sm:$0xff]  ;;  %v13013_v11 = vld [vmem:[#allocation37_spill] sm:$0xff] }
 0x853   : > { %3446 = vmatprep.subr.mxu1 %v9416_v4  ;;  %3517 = vmatprep.subr.mxu0 %v9420_v7  ;;  %v13014_v4 = vld [vmem:[#allocation47_spill] sm:$0xff]  ;;  %v13015_v7 = vld [vmem:[#allocation38_spill] sm:$0xff] }
 0x854   : > { %3447 = vmatpush1.msra.mxu1 %v9424_v59  ;;  %3518 = vmatpush1.msra.mxu0 %v9428_v39  ;;  %v13016_v59 = vld [vmem:[#allocation48_spill] sm:$0xff]  ;;  %v13017_v39 = vld [vmem:[#allocation39_spill] sm:$0xff] }
 0x855   : > { %3448 = vmatprep.subr.mxu1 %v9432_v18  ;;  %3519 = vmatprep.subr.mxu0 %v9436_v12  ;;  %v13018_v18 = vld [vmem:[#allocation49_spill] sm:$0xff]  ;;  %v13019_v12 = vld [vmem:[#allocation40_spill] sm:$0xff] }
 0x856   : > { %3449 = vmatpush1.msra.mxu1 %v9440_v19  ;;  %3520 = vmatpush1.msra.mxu0 %v9444_v15  ;;  %v13020_v19 = vld [vmem:[#allocation50_spill] sm:$0xff]  ;;  %v13021_v15 = vld [vmem:[#allocation41_spill] sm:$0xff] }
 0x857   : > { %3450 = vmatprep.subr.mxu1 %v9448_v40  ;;  %3521 = vmatprep.subr.mxu0 %v9452_v41  ;;  %v13022_v40 = vld [vmem:[#allocation51_spill] sm:$0xff]  ;;  %v13023_v41 = vld [vmem:[#allocation52_spill] sm:$0xff] }
 0x858   : > { %3451 = vmatpush1.msra.mxu1 %v9456_v42  ;;  %3522 = vmatpush1.msra.mxu0 %v9460_v43  ;;  %v13024_v42 = vld [vmem:[#allocation53_spill] sm:$0xff]  ;;  %v13025_v43 = vld [vmem:[#allocation54_spill] sm:$0xff] }
 0x859   : > { %3452 = vmatprep.subr.mxu1 %v9464_v44  ;;  %3523 = vmatprep.subr.mxu0 %v9468_v45  ;;  %v13026_v44 = vmov 0.0   ;;  %v13027_v45 = vld [vmem:[#allocation55_spill] sm:$0xff] }
 0x85a   : > { %3453 = vmatpush1.msra.mxu1 %v9472_v46  ;;  %3524 = vmatpush1.msra.mxu0 %v9476_v47  ;;  %v13028_v46 = vld [vmem:[#allocation56_spill] sm:$0xff]  ;;  %v13029_v47 = vld [vmem:[#allocation57_spill] sm:$0xff] }
 0x85b   : > { %3454 = vmatprep.subr.mxu1 %v9480_v48  ;;  %3525 = vmatprep.subr.mxu0 %v9484_v49  ;;  %v13030_v48 = vld [vmem:[#allocation58_spill] sm:$0xff]  ;;  %v13031_v49 = vld [vmem:[#allocation59_spill] sm:$0xff] }
 0x85c   : > { %3455 = vmatpush1.msra.mxu1 %v9488_v50  ;;  %3526 = vmatpush1.msra.mxu0 %v9492_v51  ;;  %v13032_v50 = vld [vmem:[#allocation60_spill] sm:$0xff]  ;;  %v13033_v51 = vld [vmem:[#allocation61_spill] sm:$0xff] }
 0x85d   : > { %3456 = vmatprep.subr.mxu1 %v9496_v53  ;;  %3527 = vmatprep.subr.mxu0 %v9500_v54  ;;  %v13034_v53 = vld [vmem:[#allocation62_spill] sm:$0xff]  ;;  %v13035_v54 = vld [vmem:[#allocation63_spill] sm:$0xff] }
 0x85e   : > { %3457 = vmatpush1.msra.mxu1 %v9504_v55  ;;  %3528 = vmatpush1.msra.mxu0 %v9508_v56  ;;  %v13036_v55 = vld [vmem:[#allocation64_spill] sm:$0xff]  ;;  %v13037_v56 = vld [vmem:[#allocation65_spill] sm:$0xff] }
 0x85f   : > { %3458 = vmatprep.subr.mxu1 %v9512_v57  ;;  %3529 = vmatprep.subr.mxu0 %v9516_v23  ;;  %v13038_v57 = vld [vmem:[#allocation66_spill] sm:$0xff]  ;;  %v13039_v23 = vld [vmem:[#allocation67_spill] sm:$0xff] }
 0x860   : > { %3459 = vmatpush1.msra.mxu1 %v9520_v25  ;;  %3530 = vmatpush1.msra.mxu0 %v9524_v37  ;;  %v13040_v25 = vld [vmem:[#allocation68_spill] sm:$0xff]  ;;  %v13041_v37 = vld [vmem:[#allocation69_spill] sm:$0xff] }
 0x861   : > { %3460 = vmatprep.subr.mxu1 %v9528_v26  ;;  %3531 = vmatprep.subr.mxu0 %v9532_v27  ;;  %v13042_v26 = vld [vmem:[#allocation70_spill] sm:$0xff]  ;;  %v13043_v27 = vld [vmem:[#allocation71_spill] sm:$0xff] }
 0x862   : > { %3461 = vmatpush1.msra.mxu1 %v9536_v28  ;;  %3532 = vmatpush1.msra.mxu0 %v9540_v0  ;;  %v13044_v28 = vld [vmem:[#allocation72_spill] sm:$0xff]  ;;  %v13045_v0 = vld [vmem:[#allocation73_spill] sm:$0xff] }
 0x863   : > { %3462 = vmatprep.subr.mxu1 %v9544_v29  ;;  %3533 = vmatprep.subr.mxu0 %v9548_v30  ;;  %v13046_v29 = vld [vmem:[#allocation74_spill] sm:$0xff]  ;;  %v13047_v30 = vld [vmem:[#allocation75_spill] sm:$0xff] }
 0x864   : > { %3463 = vmatpush1.msra.mxu1 %v9552_v31  ;;  %3534 = vmatpush1.msra.mxu0 %v9556_v32  ;;  %v13048_v31 = vld [vmem:[#allocation76_spill] sm:$0xff]  ;;  %v13049_v32 = vld [vmem:[#allocation77_spill] sm:$0xff] }
 0x865   : > { %3464 = vmatprep.subr.mxu1 %v13007_v13  ;;  %3535 = vmatprep.subr.mxu0 %v13008_v22  ;;  %v13067_v13 = vld [vmem:[#allocation95_spill] sm:$0xff]  ;;  %v13068_v22 = vld [vmem:[#allocation96_spill] sm:$0xff] }
 0x866   : > { %3465 = vmatpush1.msra.mxu1 %v13009_v20  ;;  %3536 = vmatpush1.msra.mxu0 %v13010_v38  ;;  %v13069_v20 = vld [vmem:[#allocation97_spill] sm:$0xff]  ;;  %v13070_v38 = vld [vmem:[#allocation98_spill] sm:$0xff] }
 0x867   : > { %3466 = vmatprep.subr.mxu1 %v13011_v58  ;;  %3537 = vmatprep.subr.mxu0 %v13012_v2  ;;  %v13071_v58 = vld [vmem:[#allocation99_spill] sm:$0xff]  ;;  %v13072_v2 = vld [vmem:[#allocation100_spill] sm:$0xff] }
 0x868   : > { %3467 = vmatpush1.msra.mxu1 %v13013_v11  ;;  %3538 = vmatpush1.msra.mxu0 %v13014_v4  ;;  %v13073_v11 = vld [vmem:[#allocation101_spill] sm:$0xff]  ;;  %v13074_v4 = vld [vmem:[#allocation102_spill] sm:$0xff] }
 0x869   : > { %3468 = vmatprep.subr.mxu1 %v13015_v7  ;;  %3539 = vmatprep.subr.mxu0 %v13016_v59  ;;  %v13075_v7 = vld [vmem:[#allocation103_spill] sm:$0xff]  ;;  %v13076_v59 = vld [vmem:[#allocation104_spill] sm:$0xff] }
 0x86a   : > { %3469 = vmatpush1.msra.mxu1 %v13017_v39  ;;  %3540 = vmatpush1.msra.mxu0 %v13018_v18  ;;  %v13077_v39 = vld [vmem:[#allocation105_spill] sm:$0xff]  ;;  %v13078_v18 = vld [vmem:[#allocation106_spill] sm:$0xff] }
 0x86b   : > { %3470 = vmatprep.subr.mxu1 %v13019_v12  ;;  %3541 = vmatprep.subr.mxu0 %v13020_v19  ;;  %v13079_v12 = vld [vmem:[#allocation107_spill] sm:$0xff]  ;;  %v13080_v19 = vld [vmem:[#allocation108_spill] sm:$0xff] }
 0x86c   : > { %3471 = vmatpush1.msra.mxu1 %v13021_v15  ;;  %3542 = vmatpush1.msra.mxu0 %v13022_v40  ;;  %v13081_v15 = vld [vmem:[#allocation109_spill] sm:$0xff]  ;;  %v13082_v40 = vld [vmem:[#allocation110_spill] sm:$0xff] }
 0x86d   : > { %3472 = vmatprep.subr.mxu1 %v13023_v41  ;;  %3543 = vmatprep.subr.mxu0 %v13024_v42  ;;  %v13083_v41 = vld [vmem:[#allocation111_spill] sm:$0xff]  ;;  %v13084_v42 = vld [vmem:[#allocation112_spill] sm:$0xff] }
 0x86e   : > { %3473 = vmatpush1.msra.mxu1 %v13025_v43  ;;  %3506 = vmatprep.mubr.f32.mxu1 %v13026_v44  ;;  %v13085_v43 = vld [vmem:[#allocation113_spill] sm:$0xff] }
 0x86f   : > { %3544 = vmatpush1.msra.mxu0 %v13027_v45  ;;  %3577 = vmatprep.mubr.f32.mxu0 %v13026_v44  ;;  %v13086_v45 = vld [vmem:[#allocation114_spill] sm:$0xff] }
 0x870   : > { %3507 = vmatmul.mubr.f32.vlgmr.msra.gmra.mxu1 %v10173_v17  ;;  %3578 = vmatmul.mubr.f32.vlgmr.msra.gmra.mxu0 %v10173_v17  ;;  %v13066_v17 = vld [vmem:[#allocation94_spill] sm:$0xff] }
 0x871   : > { %3634 = vmatprep.subr.mxu1 %v13028_v46  ;;  %3705 = vmatprep.subr.mxu0 %v13029_v47  ;;  %v13087_v46 = vld [vmem:[#allocation115_spill] sm:$0xff]  ;;  %v13088_v47 = vld [vmem:[#allocation116_spill] sm:$0xff] }
 0x872   : > { %3635 = vmatpush1.msra.mxu1 %v13030_v48  ;;  %3706 = vmatpush1.msra.mxu0 %v13031_v49  ;;  %v13089_v48 = vld [vmem:[#allocation117_spill] sm:$0xff]  ;;  %v13090_v49 = vld [vmem:[#allocation118_spill] sm:$0xff] }
 0x873   : > { %3636 = vmatprep.subr.mxu1 %v13032_v50  ;;  %3707 = vmatprep.subr.mxu0 %v13033_v51  ;;  %v13091_v50 = vld [vmem:[#allocation119_spill] sm:$0xff]  ;;  %v13092_v51 = vld [vmem:[#allocation120_spill] sm:$0xff] }
 0x874   : > { %3637 = vmatpush1.msra.mxu1 %v13034_v53  ;;  %3708 = vmatpush1.msra.mxu0 %v13035_v54  ;;  %v13093_v53 = vld [vmem:[#allocation121_spill] sm:$0xff]  ;;  %v13094_v54 = vld [vmem:[#allocation122_spill] sm:$0xff] }
 0x875   : > { %3638 = vmatprep.subr.mxu1 %v13036_v55  ;;  %3709 = vmatprep.subr.mxu0 %v13037_v56  ;;  %v13095_v55 = vld [vmem:[#allocation123_spill] sm:$0xff]  ;;  %v13096_v56 = vld [vmem:[#allocation124_spill] sm:$0xff] }
 0x876   : > { %3639 = vmatpush1.msra.mxu1 %v13038_v57  ;;  %3710 = vmatpush1.msra.mxu0 %v13039_v23  ;;  %v13097_v57 = vld [vmem:[#allocation125_spill] sm:$0xff]  ;;  %v13098_v23 = vld [vmem:[#allocation126_spill] sm:$0xff] }
 0x877   : > { %3640 = vmatprep.subr.mxu1 %v13040_v25  ;;  %3711 = vmatprep.subr.mxu0 %v13041_v37  ;;  %v13099_v25 = vld [vmem:[#allocation127_spill] sm:$0xff]  ;;  %v13100_v37 = vld [vmem:[#allocation128_spill] sm:$0xff] }
 0x878   : > { %3641 = vmatpush1.msra.mxu1 %v13042_v26  ;;  %3712 = vmatpush1.msra.mxu0 %v13043_v27  ;;  %v13101_v26 = vld [vmem:[#allocation129_spill] sm:$0xff]  ;;  %v13102_v27 = vld [vmem:[#allocation130_spill] sm:$0xff] }
 0x879   : > { %3642 = vmatprep.subr.mxu1 %v13044_v28  ;;  %3713 = vmatprep.subr.mxu0 %v13045_v0  ;;  %v13103_v28 = vld [vmem:[#allocation131_spill] sm:$0xff]  ;;  %v13104_v0 = vld [vmem:[#allocation132_spill] sm:$0xff] }
 0x87a   : > { %3643 = vmatpush1.msra.mxu1 %v13046_v29  ;;  %3714 = vmatpush1.msra.mxu0 %v13047_v30  ;;  %v13105_v29 = vld [vmem:[#allocation133_spill] sm:$0xff]  ;;  %v13106_v30 = vld [vmem:[#allocation134_spill] sm:$0xff] }
 0x87b   : > { %3644 = vmatprep.subr.mxu1 %v13048_v31  ;;  %3715 = vmatprep.subr.mxu0 %v13049_v32  ;;  %v13107_v31 = vld [vmem:[#allocation135_spill] sm:$0xff]  ;;  %v13108_v32 = vld [vmem:[#allocation136_spill] sm:$0xff] }
 0x87c   : > { %3645 = vmatpush1.msra.mxu1 %v13050_v60  ;;  %3716 = vmatpush1.msra.mxu0 %v13051_v24  ;;  %v13109_v60 = vld [vmem:[#allocation137_spill] sm:$0xff]  ;;  %v13110_v24 = vld [vmem:[#allocation138_spill] sm:$0xff] }
 0x87d   : > { %3646 = vmatprep.subr.mxu1 %v13052_v9  ;;  %3717 = vmatprep.subr.mxu0 %v13053_v1  ;;  %v13111_v9 = vld [vmem:[#allocation139_spill] sm:$0xff]  ;;  %v13112_v1 = vld [vmem:[#allocation140_spill] sm:$0xff] }
 0x87e   : > { %3647 = vmatpush1.msra.mxu1 %v13054_v52  ;;  %3718 = vmatpush1.msra.mxu0 %v13055_v33  ;;  %v13113_v52 = vld [vmem:[#allocation141_spill] sm:$0xff]  ;;  %v13114_v33 = vld [vmem:[#allocation142_spill] sm:$0xff] }
 0x87f   : > { %3648 = vmatprep.subr.mxu1 %v13056_v21  ;;  %3719 = vmatprep.subr.mxu0 %v13057_v10  ;;  %v13115_v21 = vld [vmem:[#allocation143_spill] sm:$0xff]  ;;  %v13116_v10 = vld [vmem:[#allocation144_spill] sm:$0xff] }
 0x880   : > { %3649 = vmatpush1.msra.mxu1 %v13058_v8  ;;  %3720 = vmatpush1.msra.mxu0 %v13059_v36  ;;  %v13117_v8 = vld [vmem:[#allocation145_spill] sm:$0xff]  ;;  %v13118_v36 = vld [vmem:[#allocation146_spill] sm:$0xff] }
 0x881   : > { %3650 = vmatprep.subr.mxu1 %v13060_v3  ;;  %3721 = vmatprep.subr.mxu0 %v13061_v34  ;;  %v13119_v3 = vld [vmem:[#allocation147_spill] sm:$0xff]  ;;  %v13120_v34 = vld [vmem:[#allocation148_spill] sm:$0xff] }
 0x882   : > { %3651 = vmatpush1.msra.mxu1 %v13062_v16  ;;  %3722 = vmatpush1.msra.mxu0 %v13063_v5  ;;  %v13121_v16 = vld [vmem:[#allocation149_spill] sm:$0xff]  ;;  %v13122_v5 = vld [vmem:[#allocation150_spill] sm:$0xff] }
 0x883   : > { %3652 = vmatprep.subr.mxu1 %v13064_v6  ;;  %3723 = vmatprep.subr.mxu0 %v13065_v61  ;;  %v13123_v6 = vld [vmem:[#allocation151_spill] sm:$0xff]  ;;  %v13124_v61 = vld [vmem:[#allocation152_spill] sm:$0xff] }
 0x884   : > { %3653 = vmatpush1.msra.mxu1 %v13066_v17  ;;  %3724 = vmatpush1.msra.mxu0 %v13067_v13  ;;  %v13125_v17 = vld [vmem:[#allocation153_spill] sm:$0xff]  ;;  %v13126_v13 = vld [vmem:[#allocation154_spill] sm:$0xff] }
 0x885   : > { %3654 = vmatprep.subr.mxu1 %v13068_v22  ;;  %3725 = vmatprep.subr.mxu0 %v13069_v20  ;;  %v13127_v22 = vld [vmem:[#allocation155_spill] sm:$0xff]  ;;  %v13128_v20 = vld [vmem:[#allocation156_spill] sm:$0xff] }
 0x886   : > { %3655 = vmatpush1.msra.mxu1 %v13070_v38  ;;  %3726 = vmatpush1.msra.mxu0 %v13071_v58  ;;  %v13129_v38 = vld [vmem:[#allocation157_spill] sm:$0xff]  ;;  %v13130_v58 = vld [vmem:[#allocation158_spill] sm:$0xff] }
 0x887   : > { %3656 = vmatprep.subr.mxu1 %v13072_v2  ;;  %3727 = vmatprep.subr.mxu0 %v13073_v11  ;;  %v13131_v2 = vld [vmem:[#allocation159_spill] sm:$0xff]  ;;  %v13132_v11 = vld [vmem:[#allocation160_spill] sm:$0xff] }
 0x888   : > { %3657 = vmatpush1.msra.mxu1 %v13074_v4  ;;  %3728 = vmatpush1.msra.mxu0 %v13075_v7  ;;  %v13133_v4 = vld [vmem:[#allocation161_spill] sm:$0xff]  ;;  %v13134_v7 = vld [vmem:[#allocation162_spill] sm:$0xff] }
 0x889   : > { %3658 = vmatprep.subr.mxu1 %v13076_v59  ;;  %3729 = vmatprep.subr.mxu0 %v13077_v39  ;;  %v13135_v59 = vld [vmem:[#allocation163_spill] sm:$0xff]  ;;  %v13136_v39 = vld [vmem:[#allocation164_spill] sm:$0xff] }
 0x88a   : > { %3659 = vmatpush1.msra.mxu1 %v13078_v18  ;;  %3730 = vmatpush1.msra.mxu0 %v13079_v12  ;;  %v13137_v18 = vld [vmem:[#allocation165_spill] sm:$0xff]  ;;  %v13138_v12 = vld [vmem:[#allocation166_spill] sm:$0xff] }
 0x88b   : > { %3660 = vmatprep.subr.mxu1 %v13080_v19  ;;  %3731 = vmatprep.subr.mxu0 %v13081_v15  ;;  %v13139_v19 = vld [vmem:[#allocation167_spill] sm:$0xff]  ;;  %v13140_v15 = vld [vmem:[#allocation168_spill] sm:$0xff] }
 0x88c   : > { %3661 = vmatpush1.msra.mxu1 %v13082_v40  ;;  %3732 = vmatpush1.msra.mxu0 %v13083_v41  ;;  %v13141_v40 = vld [vmem:[#allocation169_spill] sm:$0xff]  ;;  %v13142_v41 = vld [vmem:[#allocation170_spill] sm:$0xff] }
 0x88d   : > { %3662 = vmatprep.subr.mxu1 %v13084_v42  ;;  %3733 = vmatprep.subr.mxu0 %v13085_v43  ;;  %v13143_v42 = vld [vmem:[#allocation171_spill] sm:$0xff]  ;;  %v13144_v43 = vld [vmem:[#allocation172_spill] sm:$0xff] }
 0x88e   : > { %3663 = vmatpush1.msra.mxu1 %v13086_v45  ;;  %3734 = vmatpush1.msra.mxu0 %v13087_v46  ;;  %v13145_v45 = vld [vmem:[#allocation173_spill] sm:$0xff]  ;;  %v13146_v46 = vld [vmem:[#allocation174_spill] sm:$0xff] }
 0x88f   : > { %3664 = vmatprep.subr.mxu1 %v13088_v47  ;;  %3735 = vmatprep.subr.mxu0 %v13089_v48  ;;  %v13147_v47 = vld [vmem:[#allocation175_spill] sm:$0xff]  ;;  %v13148_v48 = vld [vmem:[#allocation176_spill] sm:$0xff] }
 0x890   : > { %3665 = vmatpush1.msra.mxu1 %v13090_v49  ;;  %3736 = vmatpush1.msra.mxu0 %v13091_v50  ;;  %v13149_v49 = vld [vmem:[#allocation177_spill] sm:$0xff]  ;;  %v13150_v50 = vld [vmem:[#allocation178_spill] sm:$0xff] }
 0x891   : > { %3666 = vmatprep.subr.mxu1 %v13092_v51  ;;  %3737 = vmatprep.subr.mxu0 %v13093_v53  ;;  %v13151_v51 = vld [vmem:[#allocation179_spill] sm:$0xff]  ;;  %v13152_v53 = vld [vmem:[#allocation180_spill] sm:$0xff] }
 0x892   : > { %3667 = vmatpush2.msra.mxu1 %v13094_v54  ;;  %3738 = vmatpush2.msra.mxu0 %v13095_v55  ;;  %v13153_v54 = vld [vmem:[#allocation188_spill] sm:$0xff]  ;;  %v13154_v55 = vld [vmem:[#allocation189_spill] sm:$0xff] }
 0x893   : > { %3668 = vmatprep.subr.mxu1 %v13096_v56  ;;  %3739 = vmatprep.subr.mxu0 %v13097_v57  ;;  %v13155_v56 = vld [vmem:[#allocation190_spill] sm:$0xff]  ;;  %v10372_v57 = vld [vmem:[%s7151_s3 + $0x1e8] sm:$0xff] }
 0x894   : > { %3669 = vmatpush2.msra.mxu1 %v13098_v23  ;;  %3740 = vmatpush2.msra.mxu0 %v13099_v25  ;;  %v10376_v23 = vld [vmem:[%s7151_s3 + $0x1f8] sm:$0xff] }
 0x895   : > { %3670 = vmatprep.subr.mxu1 %v13100_v37  ;;  %3741 = vmatprep.subr.mxu0 %v13101_v26  ;;  %v13156_v37 = vld [vmem:[#allocation32_spill] sm:$0xff] }
 0x896   : > { %3671 = vmatpush2.msra.mxu1 %v13102_v27  ;;  %3742 = vmatpush2.msra.mxu0 %v13103_v28 }
 0x897   : > { %3672 = vmatprep.subr.mxu1 %v13104_v0  ;;  %3743 = vmatprep.subr.mxu0 %v13105_v29  ;;  %v13157_v0 = vld [vmem:[#allocation42_spill] sm:$0xff] }
 0x898   : > { %3673 = vmatpush2.msra.mxu1 %v13106_v30  ;;  %3744 = vmatpush2.msra.mxu0 %v13107_v31 }
 0x899   : > { %3674 = vmatprep.subr.mxu1 %v13108_v32  ;;  %3745 = vmatprep.subr.mxu0 %v13109_v60  ;;  %v13158_v32 = vld [vmem:[#allocation33_spill] sm:$0xff] }
 0x89a   : > { %3675 = vmatpush2.msra.mxu1 %v13110_v24  ;;  %3746 = vmatpush2.msra.mxu0 %v13111_v9 }
 0x89b   : > { %3676 = vmatprep.subr.mxu1 %v13112_v1  ;;  %3747 = vmatprep.subr.mxu0 %v13113_v52  ;;  %v13159_v52 = vld [vmem:[#allocation43_spill] sm:$0xff] }
 0x89c   : > { %3677 = vmatpush2.msra.mxu1 %v13114_v33  ;;  %3748 = vmatpush2.msra.mxu0 %v13115_v21 }
 0x89d   : > { %3678 = vmatprep.subr.mxu1 %v13116_v10  ;;  %3749 = vmatprep.subr.mxu0 %v13117_v8 }
 0x89e   : > { %3679 = vmatpush2.msra.mxu1 %v13118_v36  ;;  %3750 = vmatpush2.msra.mxu0 %v13119_v3 }
 0x89f   : > { %3680 = vmatprep.subr.mxu1 %v13120_v34  ;;  %3751 = vmatprep.subr.mxu0 %v13121_v16 }
 0x8a0   : > { %3681 = vmatpush2.msra.mxu1 %v13122_v5  ;;  %3752 = vmatpush2.msra.mxu0 %v13123_v6 }
 0x8a1   : > { %3682 = vmatprep.subr.mxu1 %v13124_v61  ;;  %3753 = vmatprep.subr.mxu0 %v13125_v17 }
 0x8a2   : > { %3683 = vmatpush2.msra.mxu1 %v13126_v13  ;;  %3754 = vmatpush2.msra.mxu0 %v13127_v22  ;;  %v13160_v13 = vld [vmem:[#allocation183_spill] sm:$0xff] }
 0x8a3   : > { %3684 = vmatprep.subr.mxu1 %v13128_v20  ;;  %3755 = vmatprep.subr.mxu0 %v13129_v38 }
 0x8a4   : > { %3685 = vmatpush2.msra.mxu1 %v13130_v58  ;;  %3756 = vmatpush2.msra.mxu0 %v13131_v2 }
 0x8a5   : > { %3686 = vmatprep.subr.mxu1 %v13132_v11  ;;  %3757 = vmatprep.subr.mxu0 %v13133_v4  ;;  %v13161_v11 = vld [vmem:[#allocation184_spill] sm:$0xff] }
 0x8a6   : > { %3687 = vmatpush2.msra.mxu1 %v13134_v7  ;;  %3758 = vmatpush2.msra.mxu0 %v13135_v59 }
 0x8a7   : > { %3688 = vmatprep.subr.mxu1 %v13136_v39  ;;  %3759 = vmatprep.subr.mxu0 %v13137_v18 }
 0x8a8   : > { %3689 = vmatpush2.msra.mxu1 %v13138_v12  ;;  %3760 = vmatpush2.msra.mxu0 %v13139_v19 }
 0x8a9   : > { %3690 = vmatprep.subr.mxu1 %v13140_v15  ;;  %3761 = vmatprep.subr.mxu0 %v13141_v40 }
 0x8aa   : > { %3691 = vmatpush2.msra.mxu1 %v13142_v41  ;;  %3762 = vmatpush2.msra.mxu0 %v13143_v42 }
 0x8ab   : > { %3692 = vmatprep.subr.mxu1 %v13144_v43  ;;  %3763 = vmatprep.subr.mxu0 %v13145_v45 }
 0x8ac   : > { %3693 = vmatpush2.msra.mxu1 %v13146_v46  ;;  %3764 = vmatpush2.msra.mxu0 %v13147_v47 }
 0x8ad   : > { %3694 = vmatprep.subr.mxu1 %v13148_v48  ;;  %3765 = vmatprep.subr.mxu0 %v13149_v49 }
 0x8ae   : > { %3695 = vmatpush2.msra.mxu1 %v13150_v50  ;;  %3766 = vmatpush2.msra.mxu0 %v13151_v51 }
 0x8af   : > { %3696 = vmatprep.subr.mxu1 %v13152_v53  ;;  %3767 = vmatprep.subr.mxu0 %v13153_v54 }
 0x8b0   : > { %3697 = vmatpush2.msra.mxu1 %v13154_v55  ;;  %3768 = vmatpush2.msra.mxu0 %v13155_v56  ;;  %v3620_v55 = vrot.slane %v10170_v14, 6  ;;  %v10400_v14 = vld [vmem:[%s7151_s3 + $0x1e0] sm:$0xff] }
 0x8b1   : > { %3801 = vmatprep.subr.mxu1 %v10372_v57  ;;  %3872 = vmatprep.subr.mxu0 %v10376_v23 }
 0x90f   : > { %v3341_v25 = vpop.f32.mrf.mxu1  ;;  %v3412_v31 = vpop.f32.mrf.mxu0 }
 0x910   : > { %v3342_v26 = vadd.f32 %v3341_v25, %v13156_v37  ;;  %v3413_v60 = vadd.f32 %v3412_v31, %v13158_v32 }
 0x911   : > { %v3343_v27 = vpop.f32.mrf.mxu1  ;;  %v3414_v9 = vpop.f32.mrf.mxu0 }
 0x912   : > { %v5251_v28 = vmul.f32 -1.442695, %v3342_v26  ;;  %v3344_v29 = vadd.f32 %v3343_v27, %v13157_v0  ;;  %v5253_v24 = vmul.f32 -1.442695, %v3413_v60  ;;  %v3415_v33 = vadd.f32 %v3414_v9, %v13159_v52  ;;  %v10408_v9 = vld [vmem:[%s7151_s3 + $0x1c8] sm:$0xff] }
 0x914   : > { %5651 = vpow2.f32 %v5251_v28  ;;  %v5252_v30 = vmul.f32 -1.442695, %v3344_v29 }
 0x916   : > { %5653 = vpow2.f32 %v5252_v30 }
 0x917   : > { %5655 = vpow2.f32 %v5253_v24  ;;  %v10404_v24 = vld [vmem:[%s7151_s3 + $0x1f0] sm:$0xff] }
 0x921   : > { %v5652_v1 = vpop.eup %5651 }
 0x922   : > { %v3426_v21 = vadd.f32 1.0, %v5652_v1  ;;  %v10412_v1 = vld [vmem:[%s7151_s3 + $0x1d8] sm:$0xff] }
 0x923   : > { %v5654_v10 = vpop.eup %5653 }
 0x924   : > { %5657 = vrcp.f32 %v3426_v21  ;;  %v3427_v8 = vadd.f32 1.0, %v5654_v10  ;;  %v5656_v36 = vpop.eup %5655  ;;  %v10420_v21 = vld [vmem:[%s7151_s3 + $0x1d0] sm:$0xff]  ;;  %v10424_v10 = vld [vmem:[%s7151_s3 + $0x1a8] sm:$0xff] }
 0x925   : > { %5659 = vtanh.f32 %v3415_v33  ;;  %v3428_v6 = vadd.f32 1.0, %v5656_v36  ;;  %v10416_v33 = vld [vmem:[%s7151_s3 + $0x1c0] sm:$0xff] }
 0x926   : > { %5661 = vrcp.f32 %v3427_v8  ;;  %v10428_v8 = vld [vmem:[%s7151_s3 + $0x1b8] sm:$0xff]  ;;  %v10432_v36 = vld [vmem:[%s7151_s3 + $0x1a0] sm:$0xff] }
 0x927   : > { %5663 = vrcp.f32 %v3428_v6  ;;  %v10452_v6 = vld [vmem:[%s7151_s3 + $0x190] sm:$0xff] }
 0x930   : > { %v3508_v3 = vpop.f32.mrf.mxu1  ;;  %v3579_v39 = vpop.f32.mrf.mxu0 }
 0x931   : > { %v5658_v34 = vpop.eup %5657  ;;  %v3588_v16 = vrot.slane %v3508_v3, 6  ;;  %v3590_v18 = vrot.slane %v3579_v39, 6  ;;  %v10436_v3 = vld [vmem:[%s7151_s3 + $0x1b0] sm:$0xff]  ;;  %v10492_v39 = vld [vmem:[%s7151_s3 + $0x138] sm:$0xff] }
 0x932   : > { %v5660_v5 = vpop.eup %5659  ;;  %v3510_v61 = vpop.f32.mrf.mxu1 }
 0x933   : > { %v5662_v17 = vpop.eup %5661  ;;  %v3596_v22 = vadd.f32 %v3588_v16, %v13160_v13  ;;  %v3589_v20 = vrot.slane %v3510_v61, 6  ;;  %v3437_v58 = vmul.f32 %v5660_v5, %v5658_v34  ;;  %v3581_v12 = vpop.f32.mrf.mxu0  ;;  %v3598_v19 = vadd.f32 %v3590_v18, %v13005_v62  ;;  %v10440_v34 = vld [vmem:[%s7151_s3 + $0x188] sm:$0xff]  ;;  %v10444_v16 = vld [vmem:[%s7151_s3 + $0x198] sm:$0xff]  ;;  %v10448_v5 = vld [vmem:[%s7151_s3 + $0x180] sm:$0xff] }
 0x934   : > { %v3436_v38 = vmul.f32 %v5662_v17, %v10164_v35  ;;  %v3591_v15 = vrot.slane %v3581_v12, 6  ;;  %v5664_v40 = vpop.eup %5663  ;;  %v10456_v61 = vld [vmem:[%s7151_s3 + $0x168] sm:$0xff]  ;;  %v10460_v17 = vld [vmem:[%s7151_s3 + $0x178] sm:$0xff]  ;;  %v10496_v18 = vld [vmem:[%s7151_s3 + $0x120] sm:$0xff] }
 0x935   : > { %v5254_v2 = vmul.f32 -1.442695, %v3596_v22  ;;  %v3597_v4 = vadd.f32 %v3589_v20, %v13161_v11  ;;  %v5256_v35 = vmul.f32 -1.442695, %v3598_v19  ;;  %v10464_v22 = vld [vmem:[%s7151_s3 + $0x160] sm:$0xff]  ;;  %v10468_v20 = vld [vmem:[%s7151_s3 + $0x170] sm:$0xff] }
 0x936   : > { %v10386_v7 = vadd.f32 %v3437_v58, %v3436_v38  ;;  %v3599_v45 = vadd.f32 %v3591_v15, %v13006_v63  ;;  %v10472_v38 = vld [vmem:[%s7151_s3 + $0x148] sm:$0xff]  ;;  %v10476_v58 = vld [vmem:[%s7151_s3 + $0x158] sm:$0xff]  ;;  %v10500_v12 = vld [vmem:[%s7151_s3 + $0x130] sm:$0xff] }
 0x937   : > { %5665 = vpow2.f32 %v5254_v2  ;;  %v5255_v59 = vmul.f32 -1.442695, %v3597_v4  ;;  %v10480_v2 = vld [vmem:[%s7151_s3 + $0x140] sm:$0xff]  ;;  %v10484_v4 = vld [vmem:[%s7151_s3 + $0x150] sm:$0xff]  ;;  %v10504_v19 = vld [vmem:[%s7151_s3 + $0x108] sm:$0xff] }
 0x938   : > { %5667 = vtanh.f32 %v10386_v7  ;;  %v10508_v15 = vld [vmem:[%s7151_s3 + $0x118] sm:$0xff] }
 0x939   : > { %5669 = vpow2.f32 %v5255_v59  ;;  %v10488_v59 = vld [vmem:[%s7151_s3 + $0x128] sm:$0xff] }
 0x93a   : > { %5671 = vpow2.f32 %v5256_v35  ;;  %v10516_v35 = vld [vmem:[%s7151_s3 + $0x110] sm:$0xff] }
 0x944   : > { %v5666_v41 = vpop.eup %5665 }
 0x945   : > { %v5668_v42 = vpop.eup %5667  ;;  %v3609_v43 = vadd.f32 1.0, %v5666_v41  ;;  %v10520_v41 = vld [vmem:[%s7151_s3 + $0xe8] sm:$0xff] }
 0x946   : > { %v3440_v46 = vmul.f32 %v5668_v42, %v5664_v40  ;;  %v5670_v47 = vpop.eup %5669  ;;  %v10512_v40 = vld [vmem:[%s7151_s3 + $0x100] sm:$0xff]  ;;  %v10524_v42 = vld [vmem:[%s7151_s3 + $0xf8] sm:$0xff] }
 0x947   : > { %5673 = vrcp.f32 %v3609_v43  ;;  %v3610_v48 = vadd.f32 1.0, %v5670_v47  ;;  %v5672_v51 = vpop.eup %5671  ;;  %v10528_v43 = vld [vmem:[%s7151_s3 + $0xe0] sm:$0xff]  ;;  %v10540_v47 = vld [vmem:[%s7151_s3 + $0xd8] sm:$0xff] }
 0x948   : > { %3441 = vst [vmem:[#allocation2 + $0x8] sm:$0x3] %v3440_v46  ;;  %v3628_v49 = vrot.slane %v3440_v46, 6  ;;  %5675 = vtanh.f32 %v3599_v45  ;;  %v3611_v25 = vadd.f32 1.0, %v5672_v51  ;;  %v10532_v45 = vld [vmem:[%s7151_s3 + $0xf0] sm:$0xff]  ;;  %v10536_v46 = vld [vmem:[%s7151_s3 + $0xc8] sm:$0xff] }
 0x949   : > { %5677 = vrcp.f32 %v3610_v48  ;;  %v10544_v48 = vld [vmem:[%s7151_s3 + $0xc0] sm:$0xff]  ;;  %v10556_v51 = vld [vmem:[%s7151_s3 + $0xb8] sm:$0xff] }
 0x94a   : > { %v3631_v50 = vrot.slane %v3628_v49, 2  ;;  %5679 = vrcp.f32 %v3611_v25  ;;  %v10548_v49 = vld [vmem:[%s7151_s3 + $0xd0] sm:$0xff]  ;;  %v10576_v25 = vld [vmem:[%s7151_s3 + $0x80] sm:$0xff] }
 0x94b   : > { %13166 = vst [vmem:[#allocation187_spill] sm:$0xff] %v10576_v25 }
 0x94c   : > { %3698 = vmatprep.mubr.f32.mxu1 %v3631_v50  ;;  %3769 = vmatprep.mubr.f32.mxu0 %v3631_v50  ;;  %v10552_v50 = vld [vmem:[%s7151_s3 + $0xa8] sm:$0xff] }
 0x954   : > { %v5674_v53 = vpop.eup %5673 }
 0x955   : > { %v5676_v54 = vpop.eup %5675 }
 0x956   : > { %v5678_v56 = vpop.eup %5677  ;;  %v3623_v27 = vmul.f32 %v5676_v54, %v5674_v53  ;;  %v10560_v53 = vld [vmem:[%s7151_s3 + $0xa0] sm:$0xff]  ;;  %v10564_v54 = vld [vmem:[%s7151_s3 + $0xb0] sm:$0xff] }
 0x957   : > { %v3622_v26 = vmul.f32 %v5678_v56, %v3620_v55  ;;  %v5680_v29 = vpop.eup %5679  ;;  %13162 = vst [vmem:[#allocation191_spill] sm:$0xff] %v10560_v53  ;;  %13163 = vst [vmem:[#allocation192_spill] sm:$0xff] %v10564_v54  ;;  %v10568_v55 = vld [vmem:[%s7151_s3 + $0x88] sm:$0xff]  ;;  %v10572_v56 = vld [vmem:[%s7151_s3 + $0x98] sm:$0xff] }
 0x958   : > { %13164 = vst [vmem:[#allocation185_spill] sm:$0xff] %v10568_v55  ;;  %13165 = vst [vmem:[#allocation186_spill] sm:$0xff] %v10572_v56 }
 0x959   : > { %v10392_v28 = vadd.f32 %v3623_v27, %v3622_v26  ;;  %v10580_v26 = vld [vmem:[%s7151_s3 + $0x90] sm:$0xff]  ;;  %v10584_v27 = vld [vmem:[%s7151_s3 + $0x68] sm:$0xff] }
 0x95a   : > { %13167 = vst [vmem:[#allocation34_spill] sm:$0xff] %v10580_v26  ;;  %13168 = vst [vmem:[#allocation44_spill] sm:$0xff] %v10584_v27 }
 0x95b   : > { %5681 = vtanh.f32 %v10392_v28 }
 0x968   : > { %v5682_v30 = vpop.eup %5681 }
 0x969   : > { %v3626_v31 = vmul.f32 %v5682_v30, %v5680_v29  ;;  %v10588_v29 = vld [vmem:[%s7151_s3 + $0x78] sm:$0xff]  ;;  %v10592_v30 = vld [vmem:[%s7151_s3 + $0x60] sm:$0xff] }
 0x96a   : > { %13169 = vst [vmem:[#allocation35_spill] sm:$0xff] %v10588_v29  ;;  %13170 = vst [vmem:[#allocation45_spill] sm:$0xff] %v10592_v30 }
 0x96b   : > { %v10395_v60 = vrot.slane %v3626_v31, 2  ;;  %v10596_v31 = vld [vmem:[%s7151_s3 + $0x70] sm:$0xff] }
 0x96c   : > { %13171 = vst [vmem:[#allocation36_spill] sm:$0xff] %v10596_v31 }
 0x96d   : > { %3699 = vmatmul.mubr.f32.vlgmr.msra.gmra.mxu1 %v10395_v60  ;;  %3770 = vmatmul.mubr.f32.vlgmr.msra.gmra.mxu0 %v10395_v60 }
 0x96e   : > { %3802 = vmatpush1.msra.mxu1 %v10400_v14  ;;  %3873 = vmatpush1.msra.mxu0 %v10404_v24 }
 0x96f   : > { %3803 = vmatprep.subr.mxu1 %v10408_v9  ;;  %3874 = vmatprep.subr.mxu0 %v10412_v1 }
 0x970   : > { %3804 = vmatpush1.msra.mxu1 %v10416_v33  ;;  %3875 = vmatpush1.msra.mxu0 %v10420_v21 }
 0x971   : > { %3805 = vmatprep.subr.mxu1 %v10424_v10  ;;  %3876 = vmatprep.subr.mxu0 %v10428_v8 }
 0x972   : > { %3806 = vmatpush1.msra.mxu1 %v10432_v36  ;;  %3877 = vmatpush1.msra.mxu0 %v10436_v3 }
 0x973   : > { %3807 = vmatprep.subr.mxu1 %v10440_v34  ;;  %3878 = vmatprep.subr.mxu0 %v10444_v16 }
 0x974   : > { %3808 = vmatpush1.msra.mxu1 %v10448_v5  ;;  %3879 = vmatpush1.msra.mxu0 %v10452_v6 }
 0x975   : > { %3809 = vmatprep.subr.mxu1 %v10456_v61  ;;  %3880 = vmatprep.subr.mxu0 %v10460_v17 }
 0x976   : > { %3810 = vmatpush1.msra.mxu1 %v10464_v22  ;;  %3881 = vmatpush1.msra.mxu0 %v10468_v20 }
 0x977   : > { %3811 = vmatprep.subr.mxu1 %v10472_v38  ;;  %3882 = vmatprep.subr.mxu0 %v10476_v58 }
 0x978   : > { %3812 = vmatpush1.msra.mxu1 %v10480_v2  ;;  %3883 = vmatpush1.msra.mxu0 %v10484_v4 }
 0x979   : > { %3813 = vmatprep.subr.mxu1 %v10488_v59  ;;  %3884 = vmatprep.subr.mxu0 %v10492_v39 }
 0x97a   : > { %3814 = vmatpush1.msra.mxu1 %v10496_v18  ;;  %3885 = vmatpush1.msra.mxu0 %v10500_v12 }
 0x97b   : > { %3815 = vmatprep.subr.mxu1 %v10504_v19  ;;  %3886 = vmatprep.subr.mxu0 %v10508_v15 }
 0x97c   : > { %3816 = vmatpush1.msra.mxu1 %v10512_v40  ;;  %3887 = vmatpush1.msra.mxu0 %v10516_v35 }
 0x97d   : > { %3817 = vmatprep.subr.mxu1 %v10520_v41  ;;  %3888 = vmatprep.subr.mxu0 %v10524_v42 }
 0x97e   : > { %3818 = vmatpush1.msra.mxu1 %v10528_v43  ;;  %3889 = vmatpush1.msra.mxu0 %v10532_v45 }
 0x97f   : > { %3819 = vmatprep.subr.mxu1 %v10536_v46  ;;  %3890 = vmatprep.subr.mxu0 %v10540_v47 }
 0x980   : > { %3820 = vmatpush1.msra.mxu1 %v10544_v48  ;;  %3891 = vmatpush1.msra.mxu0 %v10548_v49 }
 0x981   : > { %3821 = vmatprep.subr.mxu1 %v10552_v50  ;;  %3892 = vmatprep.subr.mxu0 %v10556_v51 }
 0x982   : > { %3822 = vmatpush1.msra.mxu1 %v10560_v53  ;;  %3893 = vmatpush1.msra.mxu0 %v10564_v54 }
 0x983   : > { %3823 = vmatprep.subr.mxu1 %v10568_v55  ;;  %3894 = vmatprep.subr.mxu0 %v10572_v56 }
 0x984   : > { %3824 = vmatpush1.msra.mxu1 %v10576_v25  ;;  %3895 = vmatpush1.msra.mxu0 %v10580_v26  ;;  %v10600_v26 = vld [vmem:[%s7151_s3 + $0x48] sm:$0xff]  ;;  %v10624_v25 = vld [vmem:[%s7151_s3 + $0x20] sm:$0xff] }
 0x985   : > { %3825 = vmatprep.subr.mxu1 %v10584_v27  ;;  %3896 = vmatprep.subr.mxu0 %v10588_v29  ;;  %13172 = vst [vmem:[#allocation46_spill] sm:$0xff] %v10600_v26  ;;  %v10604_v27 = vld [vmem:[%s7151_s3 + $0x58] sm:$0xff]  ;;  %v10608_v29 = vld [vmem:[%s7151_s3 + $0x40] sm:$0xff]  ;;  %13178 = vst [vmem:[#allocation49_spill] sm:$0xff] %v10624_v25 }
 0x986   : > { %3826 = vmatpush1.msra.mxu1 %v10592_v30  ;;  %3897 = vmatpush1.msra.mxu0 %v10596_v31  ;;  %13173 = vst [vmem:[#allocation37_spill] sm:$0xff] %v10604_v27  ;;  %13174 = vst [vmem:[#allocation47_spill] sm:$0xff] %v10608_v29  ;;  %v10612_v30 = vld [vmem:[%s7151_s3 + $0x50] sm:$0xff]  ;;  %v10616_v31 = vld [vmem:[%s7151_s3 + $0x28] sm:$0xff] }
 0x987   : > { %3827 = vmatprep.subr.mxu1 %v10600_v26  ;;  %3898 = vmatprep.subr.mxu0 %v10604_v27  ;;  %13175 = vst [vmem:[#allocation38_spill] sm:$0xff] %v10612_v30  ;;  %13176 = vst [vmem:[#allocation48_spill] sm:$0xff] %v10616_v31  ;;  %v10620_v26 = vld [vmem:[%s7151_s3 + $0x38] sm:$0xff]  ;;  %v10628_v27 = vld [vmem:[%s7151_s3 + $0x30] sm:$0xff] }
 0x988   : > { %3828 = vmatpush1.msra.mxu1 %v10608_v29  ;;  %3899 = vmatpush1.msra.mxu0 %v10612_v30  ;;  %13177 = vst [vmem:[#allocation39_spill] sm:$0xff] %v10620_v26  ;;  %13179 = vst [vmem:[#allocation40_spill] sm:$0xff] %v10628_v27  ;;  %v10632_v30 = vld [vmem:[%s7151_s3 + $0x8] sm:$0xff] }
 0x989   : > { %3829 = vmatprep.subr.mxu1 %v10616_v31  ;;  %3900 = vmatprep.subr.mxu0 %v10620_v26  ;;  %13180 = vst [vmem:[#allocation50_spill] sm:$0xff] %v10632_v30  ;;  %v10636_v31 = vld [vmem:[%s7151_s3 + $0x18] sm:$0xff]  ;;  %v10640_v26 = vld [vmem:[%s7151_s3] sm:$0xff] }
 0x98a   : > { %3830 = vmatpush1.msra.mxu1 %v10624_v25  ;;  %3901 = vmatpush1.msra.mxu0 %v10628_v27  ;;  %13181 = vst [vmem:[#allocation41_spill] sm:$0xff] %v10636_v31  ;;  %13182 = vst [vmem:[#allocation51_spill] sm:$0xff] %v10640_v26  ;;  %v10645_v25 = vld [vmem:[%s7151_s3 + $0x10] sm:$0xff]  ;;  %s6704_s3 = smov 125  }
 0x98b   : > { %3831 = vmatprep.subr.mxu1 %v10632_v30  ;;  %3902 = vmatprep.subr.mxu0 %v10636_v31  ;;  %13183 = vst [vmem:[#allocation52_spill] sm:$0xff] %v10645_v25  ;;  %v10652_v31 = vld [vmem:[%s7159_s16 + $0x1e8] sm:$0xff]  ;;  %v10660_v30 = vld [vmem:[%s7159_s16 + $0x1e0] sm:$0xff] }
 0x98c   : > { %3832 = vmatpush1.msra.mxu1 %v10640_v26  ;;  %3865 = vmatprep.mubr.f32.mxu1 %v13026_v44  ;;  %13184 = vst [vmem:[#allocation53_spill] sm:$0xff] %v10652_v31  ;;  %v10656_v26 = vld [vmem:[%s7159_s16 + $0x1f8] sm:$0xff]  ;;  %13186 = vst [vmem:[#allocation55_spill] sm:$0xff] %v10660_v30 }
 0x98d   : > { %3903 = vmatpush1.msra.mxu0 %v10645_v25  ;;  %3936 = vmatprep.mubr.f32.mxu0 %v13026_v44  ;;  %13185 = vst [vmem:[#allocation54_spill] sm:$0xff] %v10656_v26  ;;  %v10664_v25 = vld [vmem:[%s7159_s16 + $0x1f0] sm:$0xff]  ;;  %v11140_v44 = vld [vmem:[%s7159_s16 + $0x220] sm:$0xff] }
 0x98e   : > { %3866 = vmatmul.mubr.f32.vlgmr.msra.gmra.mxu1 %v10395_v60  ;;  %3937 = vmatmul.mubr.f32.vlgmr.msra.gmra.mxu0 %v10395_v60  ;;  %13187 = vst [vmem:[#allocation56_spill] sm:$0xff] %v10664_v25  ;;  %v10668_v60 = vld [vmem:[%s7159_s16 + $0x1c8] sm:$0xff]  ;;  %13306 = vst [vmem:[#allocation175_spill] sm:$0xff] %v11140_v44 }
 0x98f   : > { %3993 = vmatprep.subr.mxu1 %v10652_v31  ;;  %4064 = vmatprep.subr.mxu0 %v10656_v26  ;;  %13188 = vst [vmem:[#allocation57_spill] sm:$0xff] %v10668_v60  ;;  %v10672_v31 = vld [vmem:[%s7159_s16 + $0x1d8] sm:$0xff]  ;;  %v10676_v26 = vld [vmem:[%s7159_s16 + $0x1c0] sm:$0xff] }
 0x990   : > { %3994 = vmatpush1.msra.mxu1 %v10660_v30  ;;  %4065 = vmatpush1.msra.mxu0 %v10664_v25  ;;  %13189 = vst [vmem:[#allocation58_spill] sm:$0xff] %v10672_v31  ;;  %13190 = vst [vmem:[#allocation59_spill] sm:$0xff] %v10676_v26  ;;  %v10680_v30 = vld [vmem:[%s7159_s16 + $0x1d0] sm:$0xff]  ;;  %v10684_v25 = vld [vmem:[%s7159_s16 + $0x1a8] sm:$0xff] }
 0x991   : > { %3995 = vmatprep.subr.mxu1 %v10668_v60  ;;  %4066 = vmatprep.subr.mxu0 %v10672_v31  ;;  %13191 = vst [vmem:[#allocation60_spill] sm:$0xff] %v10680_v30  ;;  %13192 = vst [vmem:[#allocation61_spill] sm:$0xff] %v10684_v25  ;;  %v10688_v60 = vld [vmem:[%s7159_s16 + $0x1b8] sm:$0xff]  ;;  %v10692_v31 = vld [vmem:[%s7159_s16 + $0x1a0] sm:$0xff] }
 0x992   : > { %3996 = vmatpush1.msra.mxu1 %v10676_v26  ;;  %4067 = vmatpush1.msra.mxu0 %v10680_v30  ;;  %13193 = vst [vmem:[#allocation62_spill] sm:$0xff] %v10688_v60  ;;  %13194 = vst [vmem:[#allocation63_spill] sm:$0xff] %v10692_v31  ;;  %v10696_v26 = vld [vmem:[%s7159_s16 + $0x1b0] sm:$0xff]  ;;  %v10700_v30 = vld [vmem:[%s7159_s16 + $0x188] sm:$0xff] }
 0x993   : > { %3997 = vmatprep.subr.mxu1 %v10684_v25  ;;  %4068 = vmatprep.subr.mxu0 %v10688_v60  ;;  %13195 = vst [vmem:[#allocation64_spill] sm:$0xff] %v10696_v26  ;;  %13196 = vst [vmem:[#allocation65_spill] sm:$0xff] %v10700_v30  ;;  %v10704_v25 = vld [vmem:[%s7159_s16 + $0x198] sm:$0xff]  ;;  %v10708_v60 = vld [vmem:[%s7159_s16 + $0x180] sm:$0xff] }
 0x994   : > { %3998 = vmatpush1.msra.mxu1 %v10692_v31  ;;  %4069 = vmatpush1.msra.mxu0 %v10696_v26  ;;  %13197 = vst [vmem:[#allocation66_spill] sm:$0xff] %v10704_v25  ;;  %13198 = vst [vmem:[#allocation67_spill] sm:$0xff] %v10708_v60  ;;  %v10712_v31 = vld [vmem:[%s7159_s16 + $0x190] sm:$0xff]  ;;  %v10716_v26 = vld [vmem:[%s7159_s16 + $0x168] sm:$0xff] }
 0x995   : > { %3999 = vmatprep.subr.mxu1 %v10700_v30  ;;  %4070 = vmatprep.subr.mxu0 %v10704_v25  ;;  %13199 = vst [vmem:[#allocation68_spill] sm:$0xff] %v10712_v31  ;;  %13200 = vst [vmem:[#allocation69_spill] sm:$0xff] %v10716_v26  ;;  %v10720_v30 = vld [vmem:[%s7159_s16 + $0x178] sm:$0xff]  ;;  %v10724_v25 = vld [vmem:[%s7159_s16 + $0x160] sm:$0xff] }
 0x996   : > { %4000 = vmatpush1.msra.mxu1 %v10708_v60  ;;  %4071 = vmatpush1.msra.mxu0 %v10712_v31  ;;  %13201 = vst [vmem:[#allocation70_spill] sm:$0xff] %v10720_v30  ;;  %13202 = vst [vmem:[#allocation71_spill] sm:$0xff] %v10724_v25  ;;  %v10728_v60 = vld [vmem:[%s7159_s16 + $0x170] sm:$0xff]  ;;  %v10732_v31 = vld [vmem:[%s7159_s16 + $0x148] sm:$0xff] }
 0x997   : > { %4001 = vmatprep.subr.mxu1 %v10716_v26  ;;  %4072 = vmatprep.subr.mxu0 %v10720_v30  ;;  %13203 = vst [vmem:[#allocation72_spill] sm:$0xff] %v10728_v60  ;;  %13204 = vst [vmem:[#allocation73_spill] sm:$0xff] %v10732_v31  ;;  %v10736_v26 = vld [vmem:[%s7159_s16 + $0x158] sm:$0xff]  ;;  %v10740_v30 = vld [vmem:[%s7159_s16 + $0x140] sm:$0xff] }
 0x998   : > { %4002 = vmatpush1.msra.mxu1 %v10724_v25  ;;  %4073 = vmatpush1.msra.mxu0 %v10728_v60  ;;  %13205 = vst [vmem:[#allocation74_spill] sm:$0xff] %v10736_v26  ;;  %13206 = vst [vmem:[#allocation75_spill] sm:$0xff] %v10740_v30  ;;  %v10744_v25 = vld [vmem:[%s7159_s16 + $0x150] sm:$0xff]  ;;  %v10748_v60 = vld [vmem:[%s7159_s16 + $0x128] sm:$0xff] }
 0x999   : > { %4003 = vmatprep.subr.mxu1 %v10732_v31  ;;  %4074 = vmatprep.subr.mxu0 %v10736_v26  ;;  %13207 = vst [vmem:[#allocation76_spill] sm:$0xff] %v10744_v25  ;;  %13208 = vst [vmem:[#allocation77_spill] sm:$0xff] %v10748_v60  ;;  %v10752_v31 = vld [vmem:[%s7159_s16 + $0x138] sm:$0xff]  ;;  %v10756_v26 = vld [vmem:[%s7159_s16 + $0x120] sm:$0xff] }
 0x99a   : > { %4004 = vmatpush1.msra.mxu1 %v10740_v30  ;;  %4075 = vmatpush1.msra.mxu0 %v10744_v25  ;;  %13209 = vst [vmem:[#allocation78_spill] sm:$0xff] %v10752_v31  ;;  %13210 = vst [vmem:[#allocation79_spill] sm:$0xff] %v10756_v26  ;;  %v10760_v30 = vld [vmem:[%s7159_s16 + $0x130] sm:$0xff]  ;;  %v10764_v25 = vld [vmem:[%s7159_s16 + $0x108] sm:$0xff] }
 0x99b   : > { %4005 = vmatprep.subr.mxu1 %v10748_v60  ;;  %4076 = vmatprep.subr.mxu0 %v10752_v31  ;;  %13211 = vst [vmem:[#allocation80_spill] sm:$0xff] %v10760_v30  ;;  %13212 = vst [vmem:[#allocation81_spill] sm:$0xff] %v10764_v25  ;;  %v10768_v60 = vld [vmem:[%s7159_s16 + $0x118] sm:$0xff]  ;;  %v10772_v31 = vld [vmem:[%s7159_s16 + $0x100] sm:$0xff] }
 0x99c   : > { %4006 = vmatpush1.msra.mxu1 %v10756_v26  ;;  %4077 = vmatpush1.msra.mxu0 %v10760_v30  ;;  %13213 = vst [vmem:[#allocation82_spill] sm:$0xff] %v10768_v60  ;;  %13214 = vst [vmem:[#allocation83_spill] sm:$0xff] %v10772_v31  ;;  %v10776_v26 = vld [vmem:[%s7159_s16 + $0x110] sm:$0xff]  ;;  %v10780_v30 = vld [vmem:[%s7159_s16 + $0xe8] sm:$0xff] }
 0x99d   : > { %4007 = vmatprep.subr.mxu1 %v10764_v25  ;;  %4078 = vmatprep.subr.mxu0 %v10768_v60  ;;  %13215 = vst [vmem:[#allocation84_spill] sm:$0xff] %v10776_v26  ;;  %13216 = vst [vmem:[#allocation85_spill] sm:$0xff] %v10780_v30  ;;  %v10784_v25 = vld [vmem:[%s7159_s16 + $0xf8] sm:$0xff]  ;;  %v10788_v60 = vld [vmem:[%s7159_s16 + $0xe0] sm:$0xff] }
 0x99e   : > { %4008 = vmatpush1.msra.mxu1 %v10772_v31  ;;  %4079 = vmatpush1.msra.mxu0 %v10776_v26  ;;  %13217 = vst [vmem:[#allocation86_spill] sm:$0xff] %v10784_v25  ;;  %13218 = vst [vmem:[#allocation87_spill] sm:$0xff] %v10788_v60  ;;  %v10792_v31 = vld [vmem:[%s7159_s16 + $0xf0] sm:$0xff]  ;;  %v10796_v26 = vld [vmem:[%s7159_s16 + $0xc8] sm:$0xff] }
 0x99f   : > { %4009 = vmatprep.subr.mxu1 %v10780_v30  ;;  %4080 = vmatprep.subr.mxu0 %v10784_v25  ;;  %13219 = vst [vmem:[#allocation88_spill] sm:$0xff] %v10792_v31  ;;  %13220 = vst [vmem:[#allocation89_spill] sm:$0xff] %v10796_v26  ;;  %v10800_v30 = vld [vmem:[%s7159_s16 + $0xd8] sm:$0xff]  ;;  %v10804_v25 = vld [vmem:[%s7159_s16 + $0xc0] sm:$0xff] }
 0x9a0   : > { %4010 = vmatpush1.msra.mxu1 %v10788_v60  ;;  %4081 = vmatpush1.msra.mxu0 %v10792_v31  ;;  %13221 = vst [vmem:[#allocation90_spill] sm:$0xff] %v10800_v30  ;;  %13222 = vst [vmem:[#allocation91_spill] sm:$0xff] %v10804_v25  ;;  %v10808_v60 = vld [vmem:[%s7159_s16 + $0xd0] sm:$0xff]  ;;  %v10812_v31 = vld [vmem:[%s7159_s16 + $0xa8] sm:$0xff] }
 0x9a1   : > { %4011 = vmatprep.subr.mxu1 %v10796_v26  ;;  %4082 = vmatprep.subr.mxu0 %v10800_v30  ;;  %13223 = vst [vmem:[#allocation92_spill] sm:$0xff] %v10808_v60  ;;  %13224 = vst [vmem:[#allocation93_spill] sm:$0xff] %v10812_v31  ;;  %v10816_v26 = vld [vmem:[%s7159_s16 + $0xb8] sm:$0xff]  ;;  %v10820_v30 = vld [vmem:[%s7159_s16 + $0xa0] sm:$0xff] }
 0x9a2   : > { %4012 = vmatpush1.msra.mxu1 %v10804_v25  ;;  %4083 = vmatpush1.msra.mxu0 %v10808_v60  ;;  %13225 = vst [vmem:[#allocation94_spill] sm:$0xff] %v10816_v26  ;;  %13226 = vst [vmem:[#allocation95_spill] sm:$0xff] %v10820_v30  ;;  %v10824_v25 = vld [vmem:[%s7159_s16 + $0xb0] sm:$0xff]  ;;  %v10828_v60 = vld [vmem:[%s7159_s16 + $0x88] sm:$0xff] }
 0x9a3   : > { %4013 = vmatprep.subr.mxu1 %v10812_v31  ;;  %4084 = vmatprep.subr.mxu0 %v10816_v26  ;;  %13227 = vst [vmem:[#allocation96_spill] sm:$0xff] %v10824_v25  ;;  %13228 = vst [vmem:[#allocation97_spill] sm:$0xff] %v10828_v60  ;;  %v10832_v31 = vld [vmem:[%s7159_s16 + $0x98] sm:$0xff]  ;;  %v10836_v26 = vld [vmem:[%s7159_s16 + $0x80] sm:$0xff] }
 0x9a4   : > { %4014 = vmatpush1.msra.mxu1 %v10820_v30  ;;  %4085 = vmatpush1.msra.mxu0 %v10824_v25  ;;  %13229 = vst [vmem:[#allocation98_spill] sm:$0xff] %v10832_v31  ;;  %13230 = vst [vmem:[#allocation99_spill] sm:$0xff] %v10836_v26  ;;  %v10840_v30 = vld [vmem:[%s7159_s16 + $0x90] sm:$0xff]  ;;  %v10844_v25 = vld [vmem:[%s7159_s16 + $0x68] sm:$0xff] }
 0x9a5   : > { %4015 = vmatprep.subr.mxu1 %v10828_v60  ;;  %4086 = vmatprep.subr.mxu0 %v10832_v31  ;;  %13231 = vst [vmem:[#allocation100_spill] sm:$0xff] %v10840_v30  ;;  %13232 = vst [vmem:[#allocation101_spill] sm:$0xff] %v10844_v25  ;;  %v10848_v60 = vld [vmem:[%s7159_s16 + $0x78] sm:$0xff]  ;;  %v10852_v31 = vld [vmem:[%s7159_s16 + $0x60] sm:$0xff] }
 0x9a6   : > { %4016 = vmatpush1.msra.mxu1 %v10836_v26  ;;  %4087 = vmatpush1.msra.mxu0 %v10840_v30  ;;  %13233 = vst [vmem:[#allocation102_spill] sm:$0xff] %v10848_v60  ;;  %13234 = vst [vmem:[#allocation103_spill] sm:$0xff] %v10852_v31  ;;  %v10856_v26 = vld [vmem:[%s7159_s16 + $0x70] sm:$0xff]  ;;  %v10860_v30 = vld [vmem:[%s7159_s16 + $0x48] sm:$0xff] }
 0x9a7   : > { %4017 = vmatprep.subr.mxu1 %v10844_v25  ;;  %4088 = vmatprep.subr.mxu0 %v10848_v60  ;;  %13235 = vst [vmem:[#allocation104_spill] sm:$0xff] %v10856_v26  ;;  %13236 = vst [vmem:[#allocation105_spill] sm:$0xff] %v10860_v30  ;;  %v10864_v25 = vld [vmem:[%s7159_s16 + $0x58] sm:$0xff]  ;;  %v10868_v60 = vld [vmem:[%s7159_s16 + $0x40] sm:$0xff] }
 0x9a8   : > { %4018 = vmatpush1.msra.mxu1 %v10852_v31  ;;  %4089 = vmatpush1.msra.mxu0 %v10856_v26  ;;  %13237 = vst [vmem:[#allocation106_spill] sm:$0xff] %v10864_v25  ;;  %13238 = vst [vmem:[#allocation107_spill] sm:$0xff] %v10868_v60  ;;  %v10872_v31 = vld [vmem:[%s7159_s16 + $0x50] sm:$0xff]  ;;  %v10876_v26 = vld [vmem:[%s7159_s16 + $0x28] sm:$0xff] }
 0x9a9   : > { %4019 = vmatprep.subr.mxu1 %v10860_v30  ;;  %4090 = vmatprep.subr.mxu0 %v10864_v25  ;;  %13239 = vst [vmem:[#allocation108_spill] sm:$0xff] %v10872_v31  ;;  %13240 = vst [vmem:[#allocation109_spill] sm:$0xff] %v10876_v26  ;;  %v10880_v30 = vld [vmem:[%s7159_s16 + $0x38] sm:$0xff]  ;;  %v10884_v25 = vld [vmem:[%s7159_s16 + $0x20] sm:$0xff] }
 0x9aa   : > { %4020 = vmatpush1.msra.mxu1 %v10868_v60  ;;  %4091 = vmatpush1.msra.mxu0 %v10872_v31  ;;  %13241 = vst [vmem:[#allocation110_spill] sm:$0xff] %v10880_v30  ;;  %13242 = vst [vmem:[#allocation111_spill] sm:$0xff] %v10884_v25  ;;  %v10888_v60 = vld [vmem:[%s7159_s16 + $0x30] sm:$0xff]  ;;  %v10892_v31 = vld [vmem:[%s7159_s16 + $0x8] sm:$0xff] }
 0x9ab   : > { %4021 = vmatprep.subr.mxu1 %v10876_v26  ;;  %4092 = vmatprep.subr.mxu0 %v10880_v30  ;;  %13243 = vst [vmem:[#allocation112_spill] sm:$0xff] %v10888_v60  ;;  %13244 = vst [vmem:[#allocation113_spill] sm:$0xff] %v10892_v31  ;;  %v10896_v26 = vld [vmem:[%s7159_s16 + $0x18] sm:$0xff]  ;;  %v10900_v30 = vld [vmem:[%s7159_s16] sm:$0xff] }
 0x9ac   : > { %4022 = vmatpush1.msra.mxu1 %v10884_v25  ;;  %4093 = vmatpush1.msra.mxu0 %v10888_v60  ;;  %13245 = vst [vmem:[#allocation114_spill] sm:$0xff] %v10896_v26  ;;  %13246 = vst [vmem:[#allocation115_spill] sm:$0xff] %v10900_v30  ;;  %v10904_v25 = vld [vmem:[%s7159_s16 + $0x10] sm:$0xff]  ;;  %v10908_v60 = vld [vmem:[%s7159_s16 + $0x3e8] sm:$0xff] }
 0x9ad   : > { %4023 = vmatprep.subr.mxu1 %v10892_v31  ;;  %4094 = vmatprep.subr.mxu0 %v10896_v26  ;;  %13247 = vst [vmem:[#allocation116_spill] sm:$0xff] %v10904_v25  ;;  %13248 = vst [vmem:[#allocation117_spill] sm:$0xff] %v10908_v60  ;;  %v10912_v31 = vld [vmem:[%s7159_s16 + $0x3f8] sm:$0xff]  ;;  %v10916_v26 = vld [vmem:[%s7159_s16 + $0x3e0] sm:$0xff] }
 0x9ae   : > { %4024 = vmatpush1.msra.mxu1 %v10900_v30  ;;  %4095 = vmatpush1.msra.mxu0 %v10904_v25  ;;  %13249 = vst [vmem:[#allocation118_spill] sm:$0xff] %v10912_v31  ;;  %13250 = vst [vmem:[#allocation119_spill] sm:$0xff] %v10916_v26  ;;  %v10920_v30 = vld [vmem:[%s7159_s16 + $0x3f0] sm:$0xff]  ;;  %v10924_v25 = vld [vmem:[%s7159_s16 + $0x3c8] sm:$0xff] }
 0x9af   : > { %4025 = vmatprep.subr.mxu1 %v10908_v60  ;;  %4096 = vmatprep.subr.mxu0 %v10912_v31  ;;  %13251 = vst [vmem:[#allocation120_spill] sm:$0xff] %v10920_v30  ;;  %13252 = vst [vmem:[#allocation121_spill] sm:$0xff] %v10924_v25  ;;  %v10928_v60 = vld [vmem:[%s7159_s16 + $0x3d8] sm:$0xff]  ;;  %v10932_v31 = vld [vmem:[%s7159_s16 + $0x3c0] sm:$0xff] }
 0x9b0   : > { %4026 = vmatpush2.msra.mxu1 %v10916_v26  ;;  %4097 = vmatpush2.msra.mxu0 %v10920_v30  ;;  %13253 = vst [vmem:[#allocation122_spill] sm:$0xff] %v10928_v60  ;;  %13254 = vst [vmem:[#allocation123_spill] sm:$0xff] %v10932_v31  ;;  %v10936_v26 = vld [vmem:[%s7159_s16 + $0x3d0] sm:$0xff]  ;;  %v10940_v30 = vld [vmem:[%s7159_s16 + $0x3a8] sm:$0xff] }
 0x9b1   : > { %4027 = vmatprep.subr.mxu1 %v10924_v25  ;;  %4098 = vmatprep.subr.mxu0 %v10928_v60  ;;  %13255 = vst [vmem:[#allocation124_spill] sm:$0xff] %v10936_v26  ;;  %13256 = vst [vmem:[#allocation125_spill] sm:$0xff] %v10940_v30  ;;  %v10944_v25 = vld [vmem:[%s7159_s16 + $0x3b8] sm:$0xff]  ;;  %v10948_v60 = vld [vmem:[%s7159_s16 + $0x3a0] sm:$0xff] }
 0x9b2   : > { %4028 = vmatpush2.msra.mxu1 %v10932_v31  ;;  %4099 = vmatpush2.msra.mxu0 %v10936_v26  ;;  %13257 = vst [vmem:[#allocation126_spill] sm:$0xff] %v10944_v25  ;;  %13258 = vst [vmem:[#allocation127_spill] sm:$0xff] %v10948_v60  ;;  %v10952_v31 = vld [vmem:[%s7159_s16 + $0x3b0] sm:$0xff]  ;;  %v10956_v26 = vld [vmem:[%s7159_s16 + $0x388] sm:$0xff] }
 0x9b3   : > { %4029 = vmatprep.subr.mxu1 %v10940_v30  ;;  %4100 = vmatprep.subr.mxu0 %v10944_v25  ;;  %13259 = vst [vmem:[#allocation128_spill] sm:$0xff] %v10952_v31  ;;  %13260 = vst [vmem:[#allocation129_spill] sm:$0xff] %v10956_v26  ;;  %v10960_v30 = vld [vmem:[%s7159_s16 + $0x398] sm:$0xff]  ;;  %v10964_v25 = vld [vmem:[%s7159_s16 + $0x380] sm:$0xff] }
 0x9b4   : > { %4030 = vmatpush2.msra.mxu1 %v10948_v60  ;;  %4101 = vmatpush2.msra.mxu0 %v10952_v31  ;;  %13261 = vst [vmem:[#allocation130_spill] sm:$0xff] %v10960_v30  ;;  %13262 = vst [vmem:[#allocation131_spill] sm:$0xff] %v10964_v25  ;;  %v10968_v60 = vld [vmem:[%s7159_s16 + $0x390] sm:$0xff]  ;;  %v10972_v31 = vld [vmem:[%s7159_s16 + $0x368] sm:$0xff] }
 0x9b5   : > { %4031 = vmatprep.subr.mxu1 %v10956_v26  ;;  %4102 = vmatprep.subr.mxu0 %v10960_v30  ;;  %13263 = vst [vmem:[#allocation132_spill] sm:$0xff] %v10968_v60  ;;  %13264 = vst [vmem:[#allocation133_spill] sm:$0xff] %v10972_v31  ;;  %v10976_v26 = vld [vmem:[%s7159_s16 + $0x378] sm:$0xff]  ;;  %v10980_v30 = vld [vmem:[%s7159_s16 + $0x360] sm:$0xff] }
 0x9b6   : > { %4032 = vmatpush2.msra.mxu1 %v10964_v25  ;;  %4103 = vmatpush2.msra.mxu0 %v10968_v60  ;;  %13265 = vst [vmem:[#allocation134_spill] sm:$0xff] %v10976_v26  ;;  %13266 = vst [vmem:[#allocation135_spill] sm:$0xff] %v10980_v30  ;;  %v10984_v25 = vld [vmem:[%s7159_s16 + $0x370] sm:$0xff]  ;;  %v10988_v60 = vld [vmem:[%s7159_s16 + $0x348] sm:$0xff] }
 0x9b7   : > { %4033 = vmatprep.subr.mxu1 %v10972_v31  ;;  %4104 = vmatprep.subr.mxu0 %v10976_v26  ;;  %13267 = vst [vmem:[#allocation136_spill] sm:$0xff] %v10984_v25  ;;  %13268 = vst [vmem:[#allocation137_spill] sm:$0xff] %v10988_v60  ;;  %v10992_v31 = vld [vmem:[%s7159_s16 + $0x358] sm:$0xff]  ;;  %v10996_v26 = vld [vmem:[%s7159_s16 + $0x340] sm:$0xff] }
 0x9b8   : > { %4034 = vmatpush2.msra.mxu1 %v10980_v30  ;;  %4105 = vmatpush2.msra.mxu0 %v10984_v25  ;;  %13269 = vst [vmem:[#allocation138_spill] sm:$0xff] %v10992_v31  ;;  %13270 = vst [vmem:[#allocation139_spill] sm:$0xff] %v10996_v26  ;;  %v11000_v30 = vld [vmem:[%s7159_s16 + $0x350] sm:$0xff]  ;;  %v11004_v25 = vld [vmem:[%s7159_s16 + $0x328] sm:$0xff] }
 0x9b9   : > { %4035 = vmatprep.subr.mxu1 %v10988_v60  ;;  %4106 = vmatprep.subr.mxu0 %v10992_v31  ;;  %13271 = vst [vmem:[#allocation140_spill] sm:$0xff] %v11000_v30  ;;  %13272 = vst [vmem:[#allocation141_spill] sm:$0xff] %v11004_v25  ;;  %v11008_v60 = vld [vmem:[%s7159_s16 + $0x338] sm:$0xff]  ;;  %v11012_v31 = vld [vmem:[%s7159_s16 + $0x320] sm:$0xff] }
 0x9ba   : > { %4036 = vmatpush2.msra.mxu1 %v10996_v26  ;;  %4107 = vmatpush2.msra.mxu0 %v11000_v30  ;;  %13273 = vst [vmem:[#allocation142_spill] sm:$0xff] %v11008_v60  ;;  %13274 = vst [vmem:[#allocation143_spill] sm:$0xff] %v11012_v31  ;;  %v11016_v26 = vld [vmem:[%s7159_s16 + $0x330] sm:$0xff]  ;;  %v11020_v30 = vld [vmem:[%s7159_s16 + $0x308] sm:$0xff] }
 0x9bb   : > { %4037 = vmatprep.subr.mxu1 %v11004_v25  ;;  %4108 = vmatprep.subr.mxu0 %v11008_v60  ;;  %13275 = vst [vmem:[#allocation144_spill] sm:$0xff] %v11016_v26  ;;  %13276 = vst [vmem:[#allocation145_spill] sm:$0xff] %v11020_v30  ;;  %v11024_v25 = vld [vmem:[%s7159_s16 + $0x318] sm:$0xff]  ;;  %v11028_v60 = vld [vmem:[%s7159_s16 + $0x300] sm:$0xff] }
 0x9bc   : > { %4038 = vmatpush2.msra.mxu1 %v11012_v31  ;;  %4109 = vmatpush2.msra.mxu0 %v11016_v26  ;;  %13277 = vst [vmem:[#allocation146_spill] sm:$0xff] %v11024_v25  ;;  %13278 = vst [vmem:[#allocation147_spill] sm:$0xff] %v11028_v60  ;;  %v11032_v31 = vld [vmem:[%s7159_s16 + $0x310] sm:$0xff]  ;;  %v11036_v26 = vld [vmem:[%s7159_s16 + $0x2e8] sm:$0xff] }
 0x9bd   : > { %4039 = vmatprep.subr.mxu1 %v11020_v30  ;;  %4110 = vmatprep.subr.mxu0 %v11024_v25  ;;  %13279 = vst [vmem:[#allocation148_spill] sm:$0xff] %v11032_v31  ;;  %13280 = vst [vmem:[#allocation149_spill] sm:$0xff] %v11036_v26  ;;  %v11040_v30 = vld [vmem:[%s7159_s16 + $0x2f8] sm:$0xff]  ;;  %v11044_v25 = vld [vmem:[%s7159_s16 + $0x2e0] sm:$0xff] }
 0x9be   : > { %4040 = vmatpush2.msra.mxu1 %v11028_v60  ;;  %4111 = vmatpush2.msra.mxu0 %v11032_v31  ;;  %13281 = vst [vmem:[#allocation150_spill] sm:$0xff] %v11040_v30  ;;  %13282 = vst [vmem:[#allocation151_spill] sm:$0xff] %v11044_v25  ;;  %v11048_v60 = vld [vmem:[%s7159_s16 + $0x2f0] sm:$0xff]  ;;  %v11052_v31 = vld [vmem:[%s7159_s16 + $0x2c8] sm:$0xff] }
 0x9bf   : > { %4041 = vmatprep.subr.mxu1 %v11036_v26  ;;  %4112 = vmatprep.subr.mxu0 %v11040_v30  ;;  %13283 = vst [vmem:[#allocation152_spill] sm:$0xff] %v11048_v60  ;;  %13284 = vst [vmem:[#allocation153_spill] sm:$0xff] %v11052_v31  ;;  %v11056_v26 = vld [vmem:[%s7159_s16 + $0x2d8] sm:$0xff]  ;;  %v11060_v30 = vld [vmem:[%s7159_s16 + $0x2c0] sm:$0xff] }
 0x9c0   : > { %4042 = vmatpush2.msra.mxu1 %v11044_v25  ;;  %4113 = vmatpush2.msra.mxu0 %v11048_v60  ;;  %13285 = vst [vmem:[#allocation154_spill] sm:$0xff] %v11056_v26  ;;  %13286 = vst [vmem:[#allocation155_spill] sm:$0xff] %v11060_v30  ;;  %v11064_v25 = vld [vmem:[%s7159_s16 + $0x2d0] sm:$0xff]  ;;  %v11068_v60 = vld [vmem:[%s7159_s16 + $0x2a8] sm:$0xff] }
 0x9c1   : > { %4043 = vmatprep.subr.mxu1 %v11052_v31  ;;  %4114 = vmatprep.subr.mxu0 %v11056_v26  ;;  %13287 = vst [vmem:[#allocation156_spill] sm:$0xff] %v11064_v25  ;;  %13288 = vst [vmem:[#allocation157_spill] sm:$0xff] %v11068_v60  ;;  %v11072_v31 = vld [vmem:[%s7159_s16 + $0x2b8] sm:$0xff]  ;;  %v11076_v26 = vld [vmem:[%s7159_s16 + $0x2a0] sm:$0xff] }
 0x9c2   : > { %4044 = vmatpush2.msra.mxu1 %v11060_v30  ;;  %4115 = vmatpush2.msra.mxu0 %v11064_v25  ;;  %13289 = vst [vmem:[#allocation158_spill] sm:$0xff] %v11072_v31  ;;  %13290 = vst [vmem:[#allocation159_spill] sm:$0xff] %v11076_v26  ;;  %v11080_v30 = vld [vmem:[%s7159_s16 + $0x2b0] sm:$0xff]  ;;  %v11084_v25 = vld [vmem:[%s7159_s16 + $0x288] sm:$0xff] }
 0x9c3   : > { %4045 = vmatprep.subr.mxu1 %v11068_v60  ;;  %4116 = vmatprep.subr.mxu0 %v11072_v31  ;;  %13291 = vst [vmem:[#allocation160_spill] sm:$0xff] %v11080_v30  ;;  %13292 = vst [vmem:[#allocation161_spill] sm:$0xff] %v11084_v25  ;;  %v11088_v60 = vld [vmem:[%s7159_s16 + $0x298] sm:$0xff]  ;;  %v11092_v31 = vld [vmem:[%s7159_s16 + $0x280] sm:$0xff] }
 0x9c4   : > { %4046 = vmatpush2.msra.mxu1 %v11076_v26  ;;  %4117 = vmatpush2.msra.mxu0 %v11080_v30  ;;  %13293 = vst [vmem:[#allocation162_spill] sm:$0xff] %v11088_v60  ;;  %13294 = vst [vmem:[#allocation163_spill] sm:$0xff] %v11092_v31  ;;  %v11096_v26 = vld [vmem:[%s7159_s16 + $0x290] sm:$0xff]  ;;  %v11100_v30 = vld [vmem:[%s7159_s16 + $0x268] sm:$0xff] }
 0x9c5   : > { %4047 = vmatprep.subr.mxu1 %v11084_v25  ;;  %4118 = vmatprep.subr.mxu0 %v11088_v60  ;;  %13295 = vst [vmem:[#allocation164_spill] sm:$0xff] %v11096_v26  ;;  %13296 = vst [vmem:[#allocation165_spill] sm:$0xff] %v11100_v30  ;;  %v11104_v25 = vld [vmem:[%s7159_s16 + $0x278] sm:$0xff]  ;;  %v11108_v60 = vld [vmem:[%s7159_s16 + $0x260] sm:$0xff] }
 0x9c6   : > { %4048 = vmatpush2.msra.mxu1 %v11092_v31  ;;  %4119 = vmatpush2.msra.mxu0 %v11096_v26  ;;  %13297 = vst [vmem:[#allocation166_spill] sm:$0xff] %v11104_v25  ;;  %13298 = vst [vmem:[#allocation167_spill] sm:$0xff] %v11108_v60  ;;  %v11112_v31 = vld [vmem:[%s7159_s16 + $0x270] sm:$0xff]  ;;  %v11116_v26 = vld [vmem:[%s7159_s16 + $0x248] sm:$0xff] }
 0x9c7   : > { %4049 = vmatprep.subr.mxu1 %v11100_v30  ;;  %4120 = vmatprep.subr.mxu0 %v11104_v25  ;;  %13299 = vst [vmem:[#allocation168_spill] sm:$0xff] %v11112_v31  ;;  %13300 = vst [vmem:[#allocation169_spill] sm:$0xff] %v11116_v26  ;;  %v11120_v30 = vld [vmem:[%s7159_s16 + $0x258] sm:$0xff]  ;;  %v11124_v25 = vld [vmem:[%s7159_s16 + $0x240] sm:$0xff] }
 0x9c8   : > { %4050 = vmatpush2.msra.mxu1 %v11108_v60  ;;  %4121 = vmatpush2.msra.mxu0 %v11112_v31  ;;  %13301 = vst [vmem:[#allocation170_spill] sm:$0xff] %v11120_v30  ;;  %13302 = vst [vmem:[#allocation171_spill] sm:$0xff] %v11124_v25  ;;  %v11128_v60 = vld [vmem:[%s7159_s16 + $0x250] sm:$0xff]  ;;  %v11132_v31 = vld [vmem:[%s7159_s16 + $0x228] sm:$0xff] }
 0x9c9   : > { %4051 = vmatprep.subr.mxu1 %v11116_v26  ;;  %4122 = vmatprep.subr.mxu0 %v11120_v30  ;;  %13303 = vst [vmem:[#allocation172_spill] sm:$0xff] %v11128_v60  ;;  %13304 = vst [vmem:[#allocation173_spill] sm:$0xff] %v11132_v31  ;;  %v11136_v26 = vld [vmem:[%s7159_s16 + $0x238] sm:$0xff]  ;;  %v11144_v30 = vld [vmem:[%s7159_s16 + $0x230] sm:$0xff] }
 0x9ca   : > { %4052 = vmatpush2.msra.mxu1 %v11124_v25  ;;  %4123 = vmatpush2.msra.mxu0 %v11128_v60  ;;  %13305 = vst [vmem:[#allocation174_spill] sm:$0xff] %v11136_v26  ;;  %13307 = vst [vmem:[#allocation176_spill] sm:$0xff] %v11144_v30  ;;  %v11148_v25 = vld [vmem:[%s7159_s16 + $0x208] sm:$0xff]  ;;  %v11152_v60 = vld [vmem:[%s7159_s16 + $0x218] sm:$0xff] }
 0x9cb   : > { %4053 = vmatprep.subr.mxu1 %v11132_v31  ;;  %4124 = vmatprep.subr.mxu0 %v11136_v26  ;;  %13308 = vst [vmem:[#allocation177_spill] sm:$0xff] %v11148_v25  ;;  %13309 = vst [vmem:[#allocation178_spill] sm:$0xff] %v11152_v60  ;;  %v11156_v31 = vld [vmem:[%s7159_s16 + $0x200] sm:$0xff]  ;;  %v11160_v26 = vld [vmem:[%s7159_s16 + $0x210] sm:$0xff]  ;;  %s6705_s16 = smov 123  }
 0x9cc   : > { %4054 = vmatpush2.msra.mxu1 %v11140_v44  ;;  %4125 = vmatpush2.msra.mxu0 %v11144_v30  ;;  %13310 = vst [vmem:[#allocation179_spill] sm:$0xff] %v11156_v31  ;;  %13311 = vst [vmem:[#allocation180_spill] sm:$0xff] %v11160_v26 }
 0x9cd   : > { %4055 = vmatprep.subr.mxu1 %v11148_v25  ;;  %4126 = vmatprep.subr.mxu0 %v11152_v60 }
 0x9ce   : > { %4056 = vmatpush2.msra.mxu1 %v11156_v31  ;;  %4127 = vmatpush2.msra.mxu0 %v11160_v26 }
 0x9cf   : > { %4160 = vmatprep.subr.mxu1 %v10372_v57  ;;  %4231 = vmatprep.subr.mxu0 %v10376_v23 }
 0xa2d   : > { %v3700_v30 = vpop.f32.mrf.mxu1  ;;  %v3771_v56 = vpop.f32.mrf.mxu0 }
 0xa2e   : > { %v3701_v44 = vadd.f32 %v3700_v30, %v13156_v37  ;;  %v3772_v31 = vadd.f32 %v3771_v56, %v13158_v32 }
 0xa2f   : > { %v3702_v25 = vpop.f32.mrf.mxu1  ;;  %v3773_v54 = vpop.f32.mrf.mxu0 }
 0xa30   : > { %v5257_v27 = vmul.f32 -1.442695, %v3701_v44  ;;  %v3703_v29 = vadd.f32 %v3702_v25, %v13157_v0  ;;  %v5259_v55 = vmul.f32 -1.442695, %v3772_v31  ;;  %v3774_v57 = vadd.f32 %v3773_v54, %v13159_v52 }
 0xa32   : > { %5683 = vpow2.f32 %v5257_v27  ;;  %v5258_v60 = vmul.f32 -1.442695, %v3703_v29 }
 0xa34   : > { %5685 = vpow2.f32 %v5258_v60 }
 0xa35   : > { %5687 = vpow2.f32 %v5259_v55 }
 0xa3f   : > { %v5684_v26 = vpop.eup %5683 }
 0xa40   : > { %v3785_v53 = vadd.f32 1.0, %v5684_v26 }
 0xa41   : > { %v5686_v23 = vpop.eup %5685 }
 0xa42   : > { %5689 = vrcp.f32 %v3785_v53  ;;  %v3786_v30 = vadd.f32 1.0, %v5686_v23  ;;  %v5688_v44 = vpop.eup %5687 }
 0xa43   : > { %5691 = vtanh.f32 %v3774_v57  ;;  %v3787_v0 = vadd.f32 1.0, %v5688_v44 }
 0xa44   : > { %5693 = vrcp.f32 %v3786_v30 }
 0xa45   : > { %5695 = vrcp.f32 %v3787_v0 }
 0xa4e   : > { %v3867_v25 = vpop.f32.mrf.mxu1  ;;  %v3938_v30 = vpop.f32.mrf.mxu0 }
 0xa4f   : > { %v5690_v27 = vpop.eup %5689  ;;  %v3947_v29 = vrot.slane %v3867_v25, 4  ;;  %v3949_v44 = vrot.slane %v3938_v30, 4 }
 0xa50   : > { %v5692_v60 = vpop.eup %5691  ;;  %v3869_v37 = vpop.f32.mrf.mxu1 }
 0xa51   : > { %v5694_v56 = vpop.eup %5693  ;;  %v3955_v31 = vadd.f32 %v3947_v29, %v13160_v13  ;;  %v3948_v32 = vrot.slane %v3869_v37, 4  ;;  %v3796_v26 = vmul.f32 %v5692_v60, %v5690_v27  ;;  %v3940_v25 = vpop.f32.mrf.mxu0  ;;  %v3957_v29 = vadd.f32 %v3949_v44, %v13005_v62 }
 0xa52   : > { %v3795_v54 = vmul.f32 %v5694_v56, %v10386_v7  ;;  %v3950_v37 = vrot.slane %v3940_v25, 4  ;;  %v5696_v13 = vpop.eup %5695  ;;  %v3979_v44 = vrot.slane %v10392_v28, 6  ;;  %v13312_v28 = vld [vmem:[#allocation191_spill] sm:$0xff] }
 0xa53   : > { %v5260_v55 = vmul.f32 -1.442695, %v3955_v31  ;;  %v3956_v53 = vadd.f32 %v3948_v32, %v13161_v11  ;;  %v5262_v7 = vmul.f32 -1.442695, %v3957_v29 }
 0xa54   : > { %v11172_v57 = vadd.f32 %v3796_v26, %v3795_v54  ;;  %v3958_v0 = vadd.f32 %v3950_v37, %v13006_v63 }
 0xa55   : > { %5697 = vpow2.f32 %v5260_v55  ;;  %v5261_v23 = vmul.f32 -1.442695, %v3956_v53 }
 0xa56   : > { %5699 = vtanh.f32 %v11172_v57 }
 0xa57   : > { %5701 = vpow2.f32 %v5261_v23 }
 0xa58   : > { %5703 = vpow2.f32 %v5262_v7 }
 0xa62   : > { %v5698_v27 = vpop.eup %5697 }
 0xa63   : > { %v5700_v60 = vpop.eup %5699  ;;  %v3968_v56 = vadd.f32 1.0, %v5698_v27 }
 0xa64   : > { %v3799_v32 = vmul.f32 %v5700_v60, %v5696_v13  ;;  %v5702_v31 = vpop.eup %5701 }
 0xa65   : > { %5705 = vrcp.f32 %v3968_v56  ;;  %v3969_v54 = vadd.f32 1.0, %v5702_v31  ;;  %v5704_v53 = vpop.eup %5703  ;;  %v13354_v31 = vld [vmem:[#allocation72_spill] sm:$0xff] }
 0xa66   : > { %3800 = vst [vmem:[#allocation2 + $0xa] sm:$0x3] %v3799_v32  ;;  %v3987_v26 = vrot.slane %v3799_v32, 4  ;;  %5707 = vtanh.f32 %v3958_v0  ;;  %v3970_v29 = vadd.f32 1.0, %v5704_v53  ;;  %v13353_v32 = vld [vmem:[#allocation71_spill] sm:$0xff]  ;;  %v13358_v53 = vld [vmem:[#allocation76_spill] sm:$0xff] }
 0xa67   : > { %5709 = vrcp.f32 %v3969_v54  ;;  %v13355_v54 = vld [vmem:[#allocation73_spill] sm:$0xff] }
 0xa68   : > { %v3990_v55 = vrot.slane %v3987_v26, 4  ;;  %5711 = vrcp.f32 %v3970_v29  ;;  %v13356_v26 = vld [vmem:[#allocation74_spill] sm:$0xff]  ;;  %v13363_v29 = vld [vmem:[#allocation81_spill] sm:$0xff] }
 0xa6a   : > { %4057 = vmatprep.mubr.f32.mxu1 %v3990_v55  ;;  %4128 = vmatprep.mubr.f32.mxu0 %v3990_v55  ;;  %v13357_v55 = vld [vmem:[#allocation75_spill] sm:$0xff] }
 0xa72   : > { %v5706_v23 = vpop.eup %5705 }
 0xa73   : > { %v5708_v30 = vpop.eup %5707 }
 0xa74   : > { %v5710_v25 = vpop.eup %5709  ;;  %v3982_v13 = vmul.f32 %v5708_v30, %v5706_v23  ;;  %v13359_v23 = vld [vmem:[#allocation77_spill] sm:$0xff]  ;;  %v13360_v30 = vld [vmem:[#allocation78_spill] sm:$0xff] }
 0xa75   : > { %v3981_v37 = vmul.f32 %v5710_v25, %v3979_v44  ;;  %v5712_v7 = vpop.eup %5711  ;;  %v13361_v44 = vld [vmem:[#allocation79_spill] sm:$0xff]  ;;  %v13362_v25 = vld [vmem:[#allocation80_spill] sm:$0xff] }
 0xa77   : > { %v11178_v27 = vadd.f32 %v3982_v13, %v3981_v37  ;;  %v13364_v37 = vld [vmem:[#allocation82_spill] sm:$0xff]  ;;  %v13365_v13 = vld [vmem:[#allocation83_spill] sm:$0xff] }
 0xa79   : > { %5713 = vtanh.f32 %v11178_v27 }
 0xa86   : > { %v5714_v60 = vpop.eup %5713 }
 0xa87   : > { %v3985_v56 = vmul.f32 %v5714_v60, %v5712_v7  ;;  %v13366_v7 = vld [vmem:[#allocation84_spill] sm:$0xff]  ;;  %v13367_v60 = vld [vmem:[#allocation85_spill] sm:$0xff] }
 0xa89   : > { %v11181_v0 = vrot.slane %v3985_v56, 4  ;;  %v13368_v56 = vld [vmem:[#allocation86_spill] sm:$0xff] }
 0xa8b   : > { %4058 = vmatmul.mubr.f32.vlgmr.msra.gmra.mxu1 %v11181_v0  ;;  %4129 = vmatmul.mubr.f32.vlgmr.msra.gmra.mxu0 %v11181_v0 }
 0xa8c   : > { %4161 = vmatpush1.msra.mxu1 %v10400_v14  ;;  %4232 = vmatpush1.msra.mxu0 %v10404_v24  ;;  %v13313_v14 = vld [vmem:[#allocation192_spill] sm:$0xff]  ;;  %v13314_v24 = vld [vmem:[#allocation185_spill] sm:$0xff] }
 0xa8d   : > { %4162 = vmatprep.subr.mxu1 %v10408_v9  ;;  %4233 = vmatprep.subr.mxu0 %v10412_v1  ;;  %v13315_v9 = vld [vmem:[#allocation186_spill] sm:$0xff]  ;;  %v13316_v1 = vld [vmem:[#allocation187_spill] sm:$0xff] }
 0xa8e   : > { %4163 = vmatpush1.msra.mxu1 %v10416_v33  ;;  %4234 = vmatpush1.msra.mxu0 %v10420_v21  ;;  %v13317_v33 = vld [vmem:[#allocation34_spill] sm:$0xff]  ;;  %v13318_v21 = vld [vmem:[#allocation44_spill] sm:$0xff] }
 0xa8f   : > { %4164 = vmatprep.subr.mxu1 %v10424_v10  ;;  %4235 = vmatprep.subr.mxu0 %v10428_v8  ;;  %v13319_v10 = vld [vmem:[#allocation35_spill] sm:$0xff]  ;;  %v13320_v8 = vld [vmem:[#allocation45_spill] sm:$0xff] }
 0xa90   : > { %4165 = vmatpush1.msra.mxu1 %v10432_v36  ;;  %4236 = vmatpush1.msra.mxu0 %v10436_v3  ;;  %v13321_v36 = vld [vmem:[#allocation36_spill] sm:$0xff]  ;;  %v13322_v3 = vld [vmem:[#allocation46_spill] sm:$0xff] }
 0xa91   : > { %4166 = vmatprep.subr.mxu1 %v10440_v34  ;;  %4237 = vmatprep.subr.mxu0 %v10444_v16  ;;  %v13323_v34 = vld [vmem:[#allocation37_spill] sm:$0xff]  ;;  %v13324_v16 = vld [vmem:[#allocation47_spill] sm:$0xff] }
 0xa92   : > { %4167 = vmatpush1.msra.mxu1 %v10448_v5  ;;  %4238 = vmatpush1.msra.mxu0 %v10452_v6  ;;  %v13325_v5 = vld [vmem:[#allocation38_spill] sm:$0xff]  ;;  %v13326_v6 = vld [vmem:[#allocation48_spill] sm:$0xff] }
 0xa93   : > { %4168 = vmatprep.subr.mxu1 %v10456_v61  ;;  %4239 = vmatprep.subr.mxu0 %v10460_v17  ;;  %v13327_v61 = vld [vmem:[#allocation39_spill] sm:$0xff]  ;;  %v13328_v17 = vld [vmem:[#allocation49_spill] sm:$0xff] }
 0xa94   : > { %4169 = vmatpush1.msra.mxu1 %v10464_v22  ;;  %4240 = vmatpush1.msra.mxu0 %v10468_v20  ;;  %v13329_v22 = vld [vmem:[#allocation40_spill] sm:$0xff]  ;;  %v13330_v20 = vld [vmem:[#allocation50_spill] sm:$0xff] }
 0xa95   : > { %4170 = vmatprep.subr.mxu1 %v10472_v38  ;;  %4241 = vmatprep.subr.mxu0 %v10476_v58  ;;  %v13331_v38 = vld [vmem:[#allocation41_spill] sm:$0xff]  ;;  %v13332_v58 = vld [vmem:[#allocation51_spill] sm:$0xff] }
 0xa96   : > { %4171 = vmatpush1.msra.mxu1 %v10480_v2  ;;  %4242 = vmatpush1.msra.mxu0 %v10484_v4  ;;  %v13333_v2 = vmov 0.0   ;;  %v13334_v4 = vld [vmem:[#allocation52_spill] sm:$0xff] }
 0xa97   : > { %4172 = vmatprep.subr.mxu1 %v10488_v59  ;;  %4243 = vmatprep.subr.mxu0 %v10492_v39  ;;  %v13335_v59 = vld [vmem:[#allocation53_spill] sm:$0xff]  ;;  %v13336_v39 = vld [vmem:[#allocation54_spill] sm:$0xff] }
 0xa98   : > { %4173 = vmatpush1.msra.mxu1 %v10496_v18  ;;  %4244 = vmatpush1.msra.mxu0 %v10500_v12  ;;  %v13337_v18 = vld [vmem:[#allocation55_spill] sm:$0xff]  ;;  %v13338_v12 = vld [vmem:[#allocation56_spill] sm:$0xff] }
 0xa99   : > { %4174 = vmatprep.subr.mxu1 %v10504_v19  ;;  %4245 = vmatprep.subr.mxu0 %v10508_v15  ;;  %v13339_v19 = vld [vmem:[#allocation57_spill] sm:$0xff]  ;;  %v13340_v15 = vld [vmem:[#allocation58_spill] sm:$0xff] }
 0xa9a   : > { %4175 = vmatpush1.msra.mxu1 %v10512_v40  ;;  %4246 = vmatpush1.msra.mxu0 %v10516_v35  ;;  %v13341_v40 = vld [vmem:[#allocation59_spill] sm:$0xff]  ;;  %v13342_v35 = vld [vmem:[#allocation60_spill] sm:$0xff] }
 0xa9b   : > { %4176 = vmatprep.subr.mxu1 %v10520_v41  ;;  %4247 = vmatprep.subr.mxu0 %v10524_v42  ;;  %v13343_v41 = vld [vmem:[#allocation61_spill] sm:$0xff]  ;;  %v13344_v42 = vld [vmem:[#allocation62_spill] sm:$0xff] }
 0xa9c   : > { %4177 = vmatpush1.msra.mxu1 %v10528_v43  ;;  %4248 = vmatpush1.msra.mxu0 %v10532_v45  ;;  %v13345_v43 = vld [vmem:[#allocation63_spill] sm:$0xff]  ;;  %v13346_v45 = vld [vmem:[#allocation64_spill] sm:$0xff] }
 0xa9d   : > { %4178 = vmatprep.subr.mxu1 %v10536_v46  ;;  %4249 = vmatprep.subr.mxu0 %v10540_v47  ;;  %v13347_v46 = vld [vmem:[#allocation65_spill] sm:$0xff]  ;;  %v13348_v47 = vld [vmem:[#allocation66_spill] sm:$0xff] }
 0xa9e   : > { %4179 = vmatpush1.msra.mxu1 %v10544_v48  ;;  %4250 = vmatpush1.msra.mxu0 %v10548_v49  ;;  %v13349_v48 = vld [vmem:[#allocation67_spill] sm:$0xff]  ;;  %v13350_v49 = vld [vmem:[#allocation68_spill] sm:$0xff] }
 0xa9f   : > { %4180 = vmatprep.subr.mxu1 %v10552_v50  ;;  %4251 = vmatprep.subr.mxu0 %v10556_v51  ;;  %v13351_v50 = vld [vmem:[#allocation69_spill] sm:$0xff]  ;;  %v13352_v51 = vld [vmem:[#allocation70_spill] sm:$0xff] }
 0xaa0   : > { %4181 = vmatpush1.msra.mxu1 %v13312_v28  ;;  %4252 = vmatpush1.msra.mxu0 %v13313_v14  ;;  %v13370_v28 = vld [vmem:[#allocation88_spill] sm:$0xff]  ;;  %v13371_v14 = vld [vmem:[#allocation89_spill] sm:$0xff] }
 0xaa1   : > { %4182 = vmatprep.subr.mxu1 %v13314_v24  ;;  %4253 = vmatprep.subr.mxu0 %v13315_v9  ;;  %v13372_v24 = vld [vmem:[#allocation90_spill] sm:$0xff]  ;;  %v13373_v9 = vld [vmem:[#allocation91_spill] sm:$0xff] }
 0xaa2   : > { %4183 = vmatpush1.msra.mxu1 %v13316_v1  ;;  %4254 = vmatpush1.msra.mxu0 %v13317_v33  ;;  %v13374_v1 = vld [vmem:[#allocation92_spill] sm:$0xff]  ;;  %v13375_v33 = vld [vmem:[#allocation93_spill] sm:$0xff] }
 0xaa3   : > { %4184 = vmatprep.subr.mxu1 %v13318_v21  ;;  %4255 = vmatprep.subr.mxu0 %v13319_v10  ;;  %v13376_v21 = vld [vmem:[#allocation94_spill] sm:$0xff]  ;;  %v13377_v10 = vld [vmem:[#allocation95_spill] sm:$0xff] }
 0xaa4   : > { %4185 = vmatpush1.msra.mxu1 %v13320_v8  ;;  %4256 = vmatpush1.msra.mxu0 %v13321_v36  ;;  %v13378_v8 = vld [vmem:[#allocation96_spill] sm:$0xff]  ;;  %v13379_v36 = vld [vmem:[#allocation97_spill] sm:$0xff] }
 0xaa5   : > { %4186 = vmatprep.subr.mxu1 %v13322_v3  ;;  %4257 = vmatprep.subr.mxu0 %v13323_v34  ;;  %v13380_v3 = vld [vmem:[#allocation98_spill] sm:$0xff]  ;;  %v13381_v34 = vld [vmem:[#allocation99_spill] sm:$0xff] }
 0xaa6   : > { %4187 = vmatpush1.msra.mxu1 %v13324_v16  ;;  %4258 = vmatpush1.msra.mxu0 %v13325_v5  ;;  %v13382_v16 = vld [vmem:[#allocation100_spill] sm:$0xff]  ;;  %v13383_v5 = vld [vmem:[#allocation101_spill] sm:$0xff] }
 0xaa7   : > { %4188 = vmatprep.subr.mxu1 %v13326_v6  ;;  %4259 = vmatprep.subr.mxu0 %v13327_v61  ;;  %v13384_v6 = vld [vmem:[#allocation102_spill] sm:$0xff]  ;;  %v13385_v61 = vld [vmem:[#allocation103_spill] sm:$0xff] }
 0xaa8   : > { %4189 = vmatpush1.msra.mxu1 %v13328_v17  ;;  %4260 = vmatpush1.msra.mxu0 %v13329_v22  ;;  %v13386_v17 = vld [vmem:[#allocation104_spill] sm:$0xff]  ;;  %v13387_v22 = vld [vmem:[#allocation105_spill] sm:$0xff] }
 0xaa9   : > { %4190 = vmatprep.subr.mxu1 %v13330_v20  ;;  %4261 = vmatprep.subr.mxu0 %v13331_v38  ;;  %v13388_v20 = vld [vmem:[#allocation106_spill] sm:$0xff]  ;;  %v13389_v38 = vld [vmem:[#allocation107_spill] sm:$0xff] }
 0xaaa   : > { %4191 = vmatpush1.msra.mxu1 %v13332_v58  ;;  %4224 = vmatprep.mubr.f32.mxu1 %v13333_v2  ;;  %v13390_v58 = vld [vmem:[#allocation108_spill] sm:$0xff] }
 0xaab   : > { %4262 = vmatpush1.msra.mxu0 %v13334_v4  ;;  %4295 = vmatprep.mubr.f32.mxu0 %v13333_v2  ;;  %v13391_v4 = vld [vmem:[#allocation109_spill] sm:$0xff] }
 0xaac   : > { %4225 = vmatmul.mubr.f32.vlgmr.msra.gmra.mxu1 %v11181_v0  ;;  %4296 = vmatmul.mubr.f32.vlgmr.msra.gmra.mxu0 %v11181_v0  ;;  %v13369_v0 = vld [vmem:[#allocation87_spill] sm:$0xff] }
 0xaad   : > { %4352 = vmatprep.subr.mxu1 %v13335_v59  ;;  %4423 = vmatprep.subr.mxu0 %v13336_v39  ;;  %v13392_v59 = vld [vmem:[#allocation110_spill] sm:$0xff]  ;;  %v13393_v39 = vld [vmem:[#allocation111_spill] sm:$0xff] }
 0xaae   : > { %4353 = vmatpush1.msra.mxu1 %v13337_v18  ;;  %4424 = vmatpush1.msra.mxu0 %v13338_v12  ;;  %v13394_v18 = vld [vmem:[#allocation112_spill] sm:$0xff]  ;;  %v13395_v12 = vld [vmem:[#allocation113_spill] sm:$0xff] }
 0xaaf   : > { %4354 = vmatprep.subr.mxu1 %v13339_v19  ;;  %4425 = vmatprep.subr.mxu0 %v13340_v15  ;;  %v13396_v19 = vld [vmem:[#allocation114_spill] sm:$0xff]  ;;  %v13397_v15 = vld [vmem:[#allocation115_spill] sm:$0xff] }
 0xab0   : > { %4355 = vmatpush1.msra.mxu1 %v13341_v40  ;;  %4426 = vmatpush1.msra.mxu0 %v13342_v35  ;;  %v13398_v40 = vld [vmem:[#allocation116_spill] sm:$0xff]  ;;  %v13399_v35 = vld [vmem:[#allocation117_spill] sm:$0xff] }
 0xab1   : > { %4356 = vmatprep.subr.mxu1 %v13343_v41  ;;  %4427 = vmatprep.subr.mxu0 %v13344_v42  ;;  %v13400_v41 = vld [vmem:[#allocation118_spill] sm:$0xff]  ;;  %v13401_v42 = vld [vmem:[#allocation119_spill] sm:$0xff] }
 0xab2   : > { %4357 = vmatpush1.msra.mxu1 %v13345_v43  ;;  %4428 = vmatpush1.msra.mxu0 %v13346_v45  ;;  %v13402_v43 = vld [vmem:[#allocation120_spill] sm:$0xff]  ;;  %v13403_v45 = vld [vmem:[#allocation121_spill] sm:$0xff] }
 0xab3   : > { %4358 = vmatprep.subr.mxu1 %v13347_v46  ;;  %4429 = vmatprep.subr.mxu0 %v13348_v47  ;;  %v13404_v46 = vld [vmem:[#allocation122_spill] sm:$0xff]  ;;  %v13405_v47 = vld [vmem:[#allocation123_spill] sm:$0xff] }
 0xab4   : > { %4359 = vmatpush1.msra.mxu1 %v13349_v48  ;;  %4430 = vmatpush1.msra.mxu0 %v13350_v49  ;;  %v13406_v48 = vld [vmem:[#allocation124_spill] sm:$0xff]  ;;  %v13407_v49 = vld [vmem:[#allocation125_spill] sm:$0xff] }
 0xab5   : > { %4360 = vmatprep.subr.mxu1 %v13351_v50  ;;  %4431 = vmatprep.subr.mxu0 %v13352_v51  ;;  %v13408_v50 = vld [vmem:[#allocation126_spill] sm:$0xff]  ;;  %v13409_v51 = vld [vmem:[#allocation127_spill] sm:$0xff] }
 0xab6   : > { %4361 = vmatpush1.msra.mxu1 %v13353_v32  ;;  %4432 = vmatpush1.msra.mxu0 %v13354_v31  ;;  %v13410_v32 = vld [vmem:[#allocation128_spill] sm:$0xff]  ;;  %v13411_v31 = vld [vmem:[#allocation129_spill] sm:$0xff] }
 0xab7   : > { %4362 = vmatprep.subr.mxu1 %v13355_v54  ;;  %4433 = vmatprep.subr.mxu0 %v13356_v26  ;;  %v13412_v54 = vld [vmem:[#allocation130_spill] sm:$0xff]  ;;  %v13413_v26 = vld [vmem:[#allocation131_spill] sm:$0xff] }
 0xab8   : > { %4363 = vmatpush1.msra.mxu1 %v13357_v55  ;;  %4434 = vmatpush1.msra.mxu0 %v13358_v53  ;;  %v13414_v55 = vld [vmem:[#allocation132_spill] sm:$0xff]  ;;  %v13415_v53 = vld [vmem:[#allocation133_spill] sm:$0xff] }
 0xab9   : > { %4364 = vmatprep.subr.mxu1 %v13359_v23  ;;  %4435 = vmatprep.subr.mxu0 %v13360_v30  ;;  %v13416_v23 = vld [vmem:[#allocation134_spill] sm:$0xff]  ;;  %v13417_v30 = vld [vmem:[#allocation135_spill] sm:$0xff] }
 0xaba   : > { %4365 = vmatpush1.msra.mxu1 %v13361_v44  ;;  %4436 = vmatpush1.msra.mxu0 %v13362_v25  ;;  %v13418_v44 = vld [vmem:[#allocation136_spill] sm:$0xff]  ;;  %v13419_v25 = vld [vmem:[#allocation137_spill] sm:$0xff] }
 0xabb   : > { %4366 = vmatprep.subr.mxu1 %v13363_v29  ;;  %4437 = vmatprep.subr.mxu0 %v13364_v37  ;;  %v13420_v29 = vld [vmem:[#allocation138_spill] sm:$0xff]  ;;  %v13421_v37 = vld [vmem:[#allocation139_spill] sm:$0xff] }
 0xabc   : > { %4367 = vmatpush1.msra.mxu1 %v13365_v13  ;;  %4438 = vmatpush1.msra.mxu0 %v13366_v7  ;;  %v13422_v13 = vld [vmem:[#allocation140_spill] sm:$0xff]  ;;  %v13423_v7 = vld [vmem:[#allocation141_spill] sm:$0xff] }
 0xabd   : > { %4368 = vmatprep.subr.mxu1 %v13367_v60  ;;  %4439 = vmatprep.subr.mxu0 %v13368_v56  ;;  %v13424_v60 = vld [vmem:[#allocation142_spill] sm:$0xff]  ;;  %v13425_v56 = vld [vmem:[#allocation143_spill] sm:$0xff] }
 0xabe   : > { %4369 = vmatpush1.msra.mxu1 %v13369_v0  ;;  %4440 = vmatpush1.msra.mxu0 %v13370_v28  ;;  %v13426_v0 = vld [vmem:[#allocation144_spill] sm:$0xff]  ;;  %v13427_v28 = vld [vmem:[#allocation145_spill] sm:$0xff] }
 0xabf   : > { %4370 = vmatprep.subr.mxu1 %v13371_v14  ;;  %4441 = vmatprep.subr.mxu0 %v13372_v24  ;;  %v13428_v14 = vld [vmem:[#allocation146_spill] sm:$0xff]  ;;  %v13429_v24 = vld [vmem:[#allocation147_spill] sm:$0xff] }
 0xac0   : > { %4371 = vmatpush1.msra.mxu1 %v13373_v9  ;;  %4442 = vmatpush1.msra.mxu0 %v13374_v1  ;;  %v13430_v9 = vld [vmem:[#allocation148_spill] sm:$0xff]  ;;  %v13431_v1 = vld [vmem:[#allocation149_spill] sm:$0xff] }
 0xac1   : > { %4372 = vmatprep.subr.mxu1 %v13375_v33  ;;  %4443 = vmatprep.subr.mxu0 %v13376_v21  ;;  %v13432_v33 = vld [vmem:[#allocation150_spill] sm:$0xff]  ;;  %v13433_v21 = vld [vmem:[#allocation151_spill] sm:$0xff] }
 0xac2   : > { %4373 = vmatpush1.msra.mxu1 %v13377_v10  ;;  %4444 = vmatpush1.msra.mxu0 %v13378_v8  ;;  %v13434_v10 = vld [vmem:[#allocation152_spill] sm:$0xff]  ;;  %v13435_v8 = vld [vmem:[#allocation153_spill] sm:$0xff] }
 0xac3   : > { %4374 = vmatprep.subr.mxu1 %v13379_v36  ;;  %4445 = vmatprep.subr.mxu0 %v13380_v3  ;;  %v13436_v36 = vld [vmem:[#allocation154_spill] sm:$0xff]  ;;  %v13437_v3 = vld [vmem:[#allocation155_spill] sm:$0xff] }
 0xac4   : > { %4375 = vmatpush1.msra.mxu1 %v13381_v34  ;;  %4446 = vmatpush1.msra.mxu0 %v13382_v16  ;;  %v13438_v34 = vld [vmem:[#allocation156_spill] sm:$0xff]  ;;  %v13439_v16 = vld [vmem:[#allocation157_spill] sm:$0xff] }
 0xac5   : > { %4376 = vmatprep.subr.mxu1 %v13383_v5  ;;  %4447 = vmatprep.subr.mxu0 %v13384_v6  ;;  %v13440_v5 = vld [vmem:[#allocation158_spill] sm:$0xff]  ;;  %v13441_v6 = vld [vmem:[#allocation159_spill] sm:$0xff] }
 0xac6   : > { %4377 = vmatpush1.msra.mxu1 %v13385_v61  ;;  %4448 = vmatpush1.msra.mxu0 %v13386_v17  ;;  %v13442_v61 = vld [vmem:[#allocation160_spill] sm:$0xff]  ;;  %v13443_v17 = vld [vmem:[#allocation161_spill] sm:$0xff] }
 0xac7   : > { %4378 = vmatprep.subr.mxu1 %v13387_v22  ;;  %4449 = vmatprep.subr.mxu0 %v13388_v20  ;;  %v13444_v22 = vld [vmem:[#allocation162_spill] sm:$0xff]  ;;  %v13445_v20 = vld [vmem:[#allocation163_spill] sm:$0xff] }
 0xac8   : > { %4379 = vmatpush1.msra.mxu1 %v13389_v38  ;;  %4450 = vmatpush1.msra.mxu0 %v13390_v58  ;;  %v13446_v38 = vld [vmem:[#allocation164_spill] sm:$0xff]  ;;  %v13447_v58 = vld [vmem:[#allocation165_spill] sm:$0xff] }
 0xac9   : > { %4380 = vmatprep.subr.mxu1 %v13391_v4  ;;  %4451 = vmatprep.subr.mxu0 %v13392_v59  ;;  %v13448_v4 = vld [vmem:[#allocation166_spill] sm:$0xff]  ;;  %v13449_v59 = vld [vmem:[#allocation167_spill] sm:$0xff] }
 0xaca   : > { %4381 = vmatpush1.msra.mxu1 %v13393_v39  ;;  %4452 = vmatpush1.msra.mxu0 %v13394_v18  ;;  %v13450_v39 = vld [vmem:[#allocation168_spill] sm:$0xff]  ;;  %v13451_v18 = vld [vmem:[#allocation169_spill] sm:$0xff] }
 0xacb   : > { %4382 = vmatprep.subr.mxu1 %v13395_v12  ;;  %4453 = vmatprep.subr.mxu0 %v13396_v19  ;;  %v13452_v12 = vld [vmem:[#allocation170_spill] sm:$0xff]  ;;  %v13453_v19 = vld [vmem:[#allocation171_spill] sm:$0xff] }
 0xacc   : > { %4383 = vmatpush1.msra.mxu1 %v13397_v15  ;;  %4454 = vmatpush1.msra.mxu0 %v13398_v40  ;;  %v13454_v15 = vld [vmem:[#allocation172_spill] sm:$0xff]  ;;  %v13455_v40 = vld [vmem:[#allocation173_spill] sm:$0xff] }
 0xacd   : > { %4384 = vmatprep.subr.mxu1 %v13399_v35  ;;  %4455 = vmatprep.subr.mxu0 %v13400_v41  ;;  %v13456_v35 = vld [vmem:[#allocation174_spill] sm:$0xff]  ;;  %v13457_v41 = vld [vmem:[#allocation175_spill] sm:$0xff] }
 0xace   : > { %4385 = vmatpush2.msra.mxu1 %v13401_v42  ;;  %4456 = vmatpush2.msra.mxu0 %v13402_v43  ;;  %v13458_v42 = vld [vmem:[#allocation176_spill] sm:$0xff]  ;;  %v13459_v43 = vld [vmem:[#allocation177_spill] sm:$0xff] }
 0xacf   : > { %4386 = vmatprep.subr.mxu1 %v13403_v45  ;;  %4457 = vmatprep.subr.mxu0 %v13404_v46  ;;  %v13460_v45 = vld [vmem:[#allocation178_spill] sm:$0xff]  ;;  %v13461_v46 = vld [vmem:[#allocation179_spill] sm:$0xff] }
 0xad0   : > { %4387 = vmatpush2.msra.mxu1 %v13405_v47  ;;  %4458 = vmatpush2.msra.mxu0 %v13406_v48  ;;  %v13462_v47 = vld [vmem:[#allocation180_spill] sm:$0xff] }
 0xad1   : > { %4388 = vmatprep.subr.mxu1 %v13407_v49  ;;  %4459 = vmatprep.subr.mxu0 %v13408_v50  ;;  %v4552_v48 = vld [vmem:[%s7167_s9 + $0xf8] sm:$0xff] }
 0xad2   : > { %4389 = vmatpush2.msra.mxu1 %v13409_v51  ;;  %4460 = vmatpush2.msra.mxu0 %v13410_v32  ;;  %v13463_v50 = vld [vmem:[#allocation32_spill] sm:$0xff] }
 0xad3   : > { %4390 = vmatprep.subr.mxu1 %v13411_v31  ;;  %4461 = vmatprep.subr.mxu0 %v13412_v54  ;;  %v13464_v54 = vld [vmem:[#allocation42_spill] sm:$0xff] }
 0xad4   : > { %4391 = vmatpush2.msra.mxu1 %v13413_v26  ;;  %4462 = vmatpush2.msra.mxu0 %v13414_v55 }
 0xad5   : > { %4392 = vmatprep.subr.mxu1 %v13415_v53  ;;  %4463 = vmatprep.subr.mxu0 %v13416_v23  ;;  %v13465_v23 = vld [vmem:[#allocation33_spill] sm:$0xff] }
 0xad6   : > { %4393 = vmatpush2.msra.mxu1 %v13417_v30  ;;  %4464 = vmatpush2.msra.mxu0 %v13418_v44 }
 0xad7   : > { %4394 = vmatprep.subr.mxu1 %v13419_v25  ;;  %4465 = vmatprep.subr.mxu0 %v13420_v29 }
 0xad8   : > { %4395 = vmatpush2.msra.mxu1 %v13421_v37  ;;  %4466 = vmatpush2.msra.mxu0 %v13422_v13 }
 0xad9   : > { %4396 = vmatprep.subr.mxu1 %v13423_v7  ;;  %4467 = vmatprep.subr.mxu0 %v13424_v60 }
 0xada   : > { %4397 = vmatpush2.msra.mxu1 %v13425_v56  ;;  %4468 = vmatpush2.msra.mxu0 %v13426_v0 }
 0xadb   : > { %4398 = vmatprep.subr.mxu1 %v13427_v28  ;;  %4469 = vmatprep.subr.mxu0 %v13428_v14 }
 0xadc   : > { %4399 = vmatpush2.msra.mxu1 %v13429_v24  ;;  %4470 = vmatpush2.msra.mxu0 %v13430_v9 }
 0xadd   : > { %4400 = vmatprep.subr.mxu1 %v13431_v1  ;;  %4471 = vmatprep.subr.mxu0 %v13432_v33 }
 0xade   : > { %4401 = vmatpush2.msra.mxu1 %v13433_v21  ;;  %4472 = vmatpush2.msra.mxu0 %v13434_v10  ;;  %v13466_v21 = vld [vmem:[#allocation183_spill] sm:$0xff] }
 0xadf   : > { %4402 = vmatprep.subr.mxu1 %v13435_v8  ;;  %4473 = vmatprep.subr.mxu0 %v13436_v36 }
 0xae0   : > { %4403 = vmatpush2.msra.mxu1 %v13437_v3  ;;  %4474 = vmatpush2.msra.mxu0 %v13438_v34 }
 0xae1   : > { %4404 = vmatprep.subr.mxu1 %v13439_v16  ;;  %4475 = vmatprep.subr.mxu0 %v13440_v5 }
 0xae2   : > { %4405 = vmatpush2.msra.mxu1 %v13441_v6  ;;  %4476 = vmatpush2.msra.mxu0 %v13442_v61 }
 0xae3   : > { %4406 = vmatprep.subr.mxu1 %v13443_v17  ;;  %4477 = vmatprep.subr.mxu0 %v13444_v22 }
 0xae4   : > { %4407 = vmatpush2.msra.mxu1 %v13445_v20  ;;  %4478 = vmatpush2.msra.mxu0 %v13446_v38 }
 0xae5   : > { %4408 = vmatprep.subr.mxu1 %v13447_v58  ;;  %4479 = vmatprep.subr.mxu0 %v13448_v4 }
 0xae6   : > { %4409 = vmatpush2.msra.mxu1 %v13449_v59  ;;  %4480 = vmatpush2.msra.mxu0 %v13450_v39 }
 0xae7   : > { %4410 = vmatprep.subr.mxu1 %v13451_v18  ;;  %4481 = vmatprep.subr.mxu0 %v13452_v12 }
 0xae8   : > { %4411 = vmatpush2.msra.mxu1 %v13453_v19  ;;  %4482 = vmatpush2.msra.mxu0 %v13454_v15 }
 0xae9   : > { %4412 = vmatprep.subr.mxu1 %v13455_v40  ;;  %4483 = vmatprep.subr.mxu0 %v13456_v35 }
 0xaea   : > { %4413 = vmatpush2.msra.mxu1 %v13457_v41  ;;  %4484 = vmatpush2.msra.mxu0 %v13458_v42  ;;  %v4338_v42 = vrot.slane %v11178_v27, 6  ;;  %v4551_v27 = vld [vmem:[%s7167_s9 + $0xf0] sm:$0xff] }
 0xaeb   : > { %4414 = vmatprep.subr.mxu1 %v13459_v43  ;;  %4485 = vmatprep.subr.mxu0 %v13460_v45 }
 0xaec   : > { %4415 = vmatpush2.msra.mxu1 %v13461_v46  ;;  %4486 = vmatpush2.msra.mxu0 %v13462_v47 }
 0xaed   : > { %4565 = vmatprep.subr.mxu1 %v4552_v48 }
 0xb4b   : > { %v4059_v49 = vpop.f32.mrf.mxu1  ;;  %v4130_v53 = vpop.f32.mrf.mxu0 }
 0xb4c   : > { %v4060_v51 = vadd.f32 %v4059_v49, %v13463_v50  ;;  %v4131_v30 = vadd.f32 %v4130_v53, %v13465_v23  ;;  %v4547_v53 = vld [vmem:[%s7167_s9 + $0xd0] sm:$0xff] }
 0xb4d   : > { %v4061_v32 = vpop.f32.mrf.mxu1  ;;  %v4132_v25 = vpop.f32.mrf.mxu0 }
 0xb4e   : > { %v5263_v31 = vmul.f32 -1.442695, %v4060_v51  ;;  %v4062_v26 = vadd.f32 %v4061_v32, %v13464_v54  ;;  %v5265_v44 = vmul.f32 -1.442695, %v4131_v30  ;;  %v4133_v37 = vadd.f32 %v4132_v25, %v13159_v52  ;;  %v4546_v30 = vld [vmem:[%s7167_s9 + $0xc8] sm:$0xff]  ;;  %v4544_v25 = vld [vmem:[%s7167_s9 + $0xb8] sm:$0xff] }
 0xb50   : > { %5715 = vpow2.f32 %v5263_v31  ;;  %v5264_v55 = vmul.f32 -1.442695, %v4062_v26  ;;  %v4550_v31 = vld [vmem:[%s7167_s9 + $0xe8] sm:$0xff]  ;;  %v4549_v26 = vld [vmem:[%s7167_s9 + $0xe0] sm:$0xff] }
 0xb52   : > { %5717 = vpow2.f32 %v5264_v55  ;;  %v4548_v55 = vld [vmem:[%s7167_s9 + $0xd8] sm:$0xff] }
 0xb53   : > { %5719 = vpow2.f32 %v5265_v44  ;;  %v4545_v44 = vld [vmem:[%s7167_s9 + $0xc0] sm:$0xff] }
 0xb5d   : > { %v5716_v29 = vpop.eup %5715 }
 0xb5e   : > { %v4144_v13 = vadd.f32 1.0, %v5716_v29  ;;  %v4543_v29 = vld [vmem:[%s7167_s9 + $0xb0] sm:$0xff] }
 0xb5f   : > { %v5718_v7 = vpop.eup %5717 }
 0xb60   : > { %5721 = vrcp.f32 %v4144_v13  ;;  %v4145_v60 = vadd.f32 1.0, %v5718_v7  ;;  %v5720_v56 = vpop.eup %5719  ;;  %v4541_v13 = vld [vmem:[%s7167_s9 + $0xa0] sm:$0xff]  ;;  %v4540_v7 = vld [vmem:[%s7167_s9 + $0x98] sm:$0xff] }
 0xb61   : > { %5723 = vtanh.f32 %v4133_v37  ;;  %v4146_v9 = vadd.f32 1.0, %v5720_v56  ;;  %v4542_v37 = vld [vmem:[%s7167_s9 + $0xa8] sm:$0xff] }
 0xb62   : > { %5725 = vrcp.f32 %v4145_v60  ;;  %v4539_v60 = vld [vmem:[%s7167_s9 + $0x90] sm:$0xff]  ;;  %v4538_v56 = vld [vmem:[%s7167_s9 + $0x88] sm:$0xff] }
 0xb63   : > { %5727 = vrcp.f32 %v4146_v9  ;;  %v4533_v9 = vld [vmem:[%s7167_s9 + $0x60] sm:$0xff] }
 0xb6c   : > { %v4226_v0 = vpop.f32.mrf.mxu1  ;;  %v4297_v61 = vpop.f32.mrf.mxu0 }
 0xb6d   : > { %v5722_v28 = vpop.eup %5721  ;;  %v4306_v14 = vrot.slane %v4226_v0, 2  ;;  %v4308_v17 = vrot.slane %v4297_v61, 2  ;;  %v4537_v0 = vld [vmem:[%s7167_s9 + $0x80] sm:$0xff]  ;;  %v4522_v61 = vld [vmem:[%s7167_s9 + $0x8] sm:$0xff] }
 0xb6e   : > { %v5724_v24 = vpop.eup %5723  ;;  %v4228_v1 = vpop.f32.mrf.mxu1 }
 0xb6f   : > { %v5726_v33 = vpop.eup %5725  ;;  %v4314_v10 = vadd.f32 %v4306_v14, %v13466_v21  ;;  %v4307_v8 = vrot.slane %v4228_v1, 2  ;;  %v4155_v3 = vmul.f32 %v5724_v24, %v5722_v28  ;;  %v4299_v22 = vpop.f32.mrf.mxu0  ;;  %v4316_v20 = vadd.f32 %v4308_v17, %v13005_v62  ;;  %v4536_v28 = vld [vmem:[%s7167_s9 + $0x78] sm:$0xff]  ;;  %v4535_v14 = vld [vmem:[%s7167_s9 + $0x70] sm:$0xff]  ;;  %v4534_v24 = vld [vmem:[%s7167_s9 + $0x68] sm:$0xff] }
 0xb70   : > { %v4154_v36 = vmul.f32 %v5726_v33, %v11172_v57  ;;  %v4309_v38 = vrot.slane %v4299_v22, 2  ;;  %v5728_v58 = vpop.eup %5727  ;;  %v4532_v1 = vld [vmem:[%s7167_s9 + $0x58] sm:$0xff]  ;;  %v4531_v33 = vld [vmem:[%s7167_s9 + $0x50] sm:$0xff]  ;;  %v4530_v21 = vld [vmem:[%s7167_s9 + $0x48] sm:$0xff] }
 0xb71   : > { %v5266_v34 = vmul.f32 -1.442695, %v4314_v10  ;;  %v4315_v16 = vadd.f32 %v4307_v8, %v13161_v11  ;;  %v5268_v57 = vmul.f32 -1.442695, %v4316_v20  ;;  %v4529_v10 = vld [vmem:[%s7167_s9 + $0x40] sm:$0xff]  ;;  %v4528_v8 = vld [vmem:[%s7167_s9 + $0x38] sm:$0xff] }
 0xb72   : > { %v11387_v5 = vadd.f32 %v4155_v3, %v4154_v36  ;;  %v4317_v11 = vadd.f32 %v4309_v38, %v13006_v63  ;;  %v4527_v36 = vld [vmem:[%s7167_s9 + $0x30] sm:$0xff]  ;;  %v4526_v3 = vld [vmem:[%s7167_s9 + $0x28] sm:$0xff]  ;;  %v4521_v17 = vld [vmem:[%s7167_s9] sm:$0xff] }
 0xb73   : > { %5729 = vpow2.f32 %v5266_v34  ;;  %v5267_v6 = vmul.f32 -1.442695, %v4315_v16  ;;  %v4525_v34 = vld [vmem:[%s7167_s9 + $0x20] sm:$0xff]  ;;  %v4524_v16 = vld [vmem:[%s7167_s9 + $0x18] sm:$0xff]  ;;  %v11428_v22 = vld [vmem:[#allocation2] sm:$0xff] }
 0xb74   : > { %5731 = vtanh.f32 %v11387_v5 }
 0xb75   : > { %5733 = vpow2.f32 %v5267_v6  ;;  %v4523_v6 = vld [vmem:[%s7167_s9 + $0x10] sm:$0xff]  ;;  %s6707_s9 = smov 121  }
 0xb76   : > { %5735 = vpow2.f32 %v5268_v57 }
 0xb80   : > { %v5730_v4 = vpop.eup %5729 }
 0xb81   : > { %v5732_v59 = vpop.eup %5731  ;;  %v4327_v39 = vadd.f32 1.0, %v5730_v4 }
 0xb82   : > { %v4158_v18 = vmul.f32 %v5732_v59, %v5728_v58  ;;  %v5734_v12 = vpop.eup %5733 }
 0xb83   : > { %5737 = vrcp.f32 %v4327_v39  ;;  %v4328_v19 = vadd.f32 1.0, %v5734_v12  ;;  %v5736_v62 = vpop.eup %5735 }
 0xb84   : > { %4159 = vst [vmem:[#allocation2 + $0xc] sm:$0x3] %v4158_v18  ;;  %v4346_v15 = vrot.slane %v4158_v18, 2  ;;  %5739 = vtanh.f32 %v4317_v11  ;;  %v4329_v43 = vadd.f32 1.0, %v5736_v62 }
 0xb85   : > { %5741 = vrcp.f32 %v4328_v19 }
 0xb86   : > { %v4349_v40 = vrot.slane %v4346_v15, 6  ;;  %5743 = vrcp.f32 %v4329_v43 }
 0xb88   : > { %4416 = vmatprep.mubr.f32.mxu1 %v4349_v40  ;;  %4487 = vmatprep.mubr.f32.mxu0 %v4349_v40 }
 0xb90   : > { %v5738_v35 = vpop.eup %5737 }
 0xb91   : > { %v5740_v41 = vpop.eup %5739 }
 0xb92   : > { %v5742_v63 = vpop.eup %5741  ;;  %v4341_v46 = vmul.f32 %v5740_v41, %v5738_v35  ;;  %v13467_v41 = vld [vmem:[#allocation181_spill] sm:$0xff] }
 0xb93   : > { %v4340_v45 = vmul.f32 %v5742_v63, %v4338_v42  ;;  %v5744_v48 = vpop.eup %5743 }
 0xb95   : > { %v4342_v47 = vadd.f32 %v4341_v46, %v4340_v45 }
 0xb97   : > { %5745 = vtanh.f32 %v4342_v47 }
 0xba4   : > { %v5746_v49 = vpop.eup %5745 }
 0xba5   : > { %v11393_v51 = vmul.f32 %v5746_v49, %v5744_v48  ;;  %v13468_v49 = vld [vmem:[#allocation182_spill] sm:$0xff] }
 0xba7   : > { %v4348_v32 = vrot.slane %v11393_v51, 6 }
 0xba9   : > { %4417 = vmatmul.mubr.f32.vlgmr.msra.gmra.mxu1 %v4348_v32  ;;  %4488 = vmatmul.mubr.f32.vlgmr.msra.gmra.mxu0 %v4348_v32 }
 0xbaa   : > { %4566 = vmatpush1.msra.mxu1 %v4551_v27  ;;  %4629 = vmatprep.mubr.f32.mxu1 %v13333_v2 }
 0xbab   : > { %4567 = vmatprep.subr.mxu1 %v4550_v31 }
 0xbac   : > { %4568 = vmatpush1.msra.mxu1 %v4549_v26 }
 0xbad   : > { %4569 = vmatprep.subr.mxu1 %v4548_v55 }
 0xbae   : > { %4570 = vmatpush1.msra.mxu1 %v4547_v53  ;;  %v4649_v53 = vmul.f32 0.70710677, %v11393_v51 }
 0xbaf   : > { %4571 = vmatprep.subr.mxu1 %v4546_v30 }
 0xbb0   : > { %4572 = vmatpush1.msra.mxu1 %v4545_v44  ;;  %v4677_v51 = vrot.slane %v4649_v53, 2 }
 0xbb1   : > { %4573 = vmatprep.subr.mxu1 %v4544_v25 }
 0xbb2   : > { %4574 = vmatpush1.msra.mxu1 %v4543_v29  ;;  %v4665_v29 = vrot.slane %v4649_v53, 4 }
 0xbb3   : > { %4575 = vmatprep.subr.mxu1 %v4542_v37 }
 0xbb4   : > { %4576 = vmatpush1.msra.mxu1 %v4541_v13 }
 0xbb5   : > { %4577 = vmatprep.subr.mxu1 %v4540_v7 }
 0xbb6   : > { %4578 = vmatpush1.msra.mxu1 %v4539_v60  ;;  %v4653_v60 = vrot.slane %v4649_v53, 6 }
 0xbb7   : > { %4579 = vmatprep.subr.mxu1 %v4538_v56 }
 0xbb8   : > { %4580 = vmatpush1.msra.mxu1 %v4537_v0 }
 0xbb9   : > { %4581 = vmatprep.subr.mxu1 %v4536_v28 }
 0xbba   : > { %4582 = vmatpush1.msra.mxu1 %v4535_v14 }
 0xbbb   : > { %4583 = vmatprep.subr.mxu1 %v4534_v24 }
 0xbbc   : > { %4584 = vmatpush1.msra.mxu1 %v4533_v9 }
 0xbbd   : > { %4585 = vmatprep.subr.mxu1 %v4532_v1 }
 0xbbe   : > { %4586 = vmatpush1.msra.mxu1 %v4531_v33 }
 0xbbf   : > { %4587 = vmatprep.subr.mxu1 %v4530_v21 }
 0xbc0   : > { %4588 = vmatpush1.msra.mxu1 %v4529_v10 }
 0xbc1   : > { %4589 = vmatprep.subr.mxu1 %v4528_v8 }
 0xbc2   : > { %4590 = vmatpush1.msra.mxu1 %v4527_v36 }
 0xbc3   : > { %4591 = vmatprep.subr.mxu1 %v4526_v3 }
 0xbc4   : > { %4592 = vmatpush1.msra.mxu1 %v4525_v34 }
 0xbc5   : > { %4593 = vmatprep.subr.mxu1 %v4524_v16 }
 0xbc6   : > { %4594 = vmatpush1.msra.mxu1 %v4523_v6 }
 0xbc7   : > { %4595 = vmatprep.subr.mxu1 %v4522_v61 }
 0xbc8   : > { %4596 = vmatpush1.msra.mxu1 %v4521_v17 }
 0xbc9   : > { %4630 = vmatmul.mubr.f32.vlgmr.msra.gmra.mxu1 %v11428_v22 }
 0xbca   : > { %4635 = vmatprep.mubr.f32.mxu1 %v13333_v2 }
 0xc69   : > { %v4418_v20 = vpop.f32.mrf.mxu1  ;;  %v4489_v39 = vpop.f32.mrf.mxu0 }
 0xc6a   : > { %v4419_v38 = vadd.f32 %v4418_v20, %v13463_v50  ;;  %v4490_v11 = vadd.f32 %v4489_v39, %v13465_v23 }
 0xc6b   : > { %v4420_v58 = vpop.f32.mrf.mxu1  ;;  %v4491_v18 = vpop.f32.mrf.mxu0 }
 0xc6c   : > { %v5269_v57 = vmul.f32 -1.442695, %v4419_v38  ;;  %v4421_v4 = vadd.f32 %v4420_v58, %v13464_v54  ;;  %v5271_v12 = vmul.f32 -1.442695, %v4490_v11  ;;  %v4492_v15 = vadd.f32 %v4491_v18, %v13159_v52  ;;  %v4553_v54 = vld [vmem:[%s7175_s25] sm:$0x3] }
 0xc6d   : > { %v4558_v42 = vrot.slane %v4553_v54, %v13467_v41  ;;  %v4562_v32 = vrot.slane %v4553_v54, %v13468_v49  ;;  %s6708_s25 = smov 122  }
 0xc6e   : > { %5747 = vpow2.f32 %v5269_v57  ;;  %v5270_v59 = vmul.f32 -1.442695, %v4421_v4 }
 0xc70   : > { %5749 = vpow2.f32 %v5270_v59 }
 0xc71   : > { %5751 = vpow2.f32 %v5271_v12 }
 0xc7b   : > { %v5748_v19 = vpop.eup %5747 }
 0xc7c   : > { %v4503_v2 = vadd.f32 1.0, %v5748_v19 }
 0xc7d   : > { %v5750_v40 = vpop.eup %5749 }
 0xc7e   : > { %5753 = vrcp.f32 %v4503_v2  ;;  %v4504_v50 = vadd.f32 1.0, %v5750_v40  ;;  %v5752_v62 = vpop.eup %5751 }
 0xc7f   : > { %5755 = vtanh.f32 %v4492_v15  ;;  %v4505_v45 = vadd.f32 1.0, %v5752_v62 }
 0xc80   : > { %5757 = vrcp.f32 %v4504_v50 }
 0xc81   : > { %5759 = vrcp.f32 %v4505_v45 }
 0xc89   : > { %v4631_v43 = vpop.f32.mrf.mxu1 }
 0xc8a   : > { %v4632_v52 = vadd.f32 %v4631_v43, %v4558_v42 }
 0xc8b   : > { %v5754_v35 = vpop.eup %5753  ;;  %v4633_v27 = vpop.f32.mrf.mxu1 }
 0xc8c   : > { %v5756_v63 = vpop.eup %5755  ;;  %v4634_v31 = vadd.f32 %v4633_v27, %v4562_v32 }
 0xc8d   : > { %v5758_v23 = vpop.eup %5757  ;;  %v4514_v47 = vmul.f32 %v5756_v63, %v5754_v35 }
 0xc8e   : > { %v4513_v46 = vmul.f32 %v5758_v23, %v11387_v5  ;;  %v5760_v26 = vpop.eup %5759 }
 0xc90   : > { %v4515_v48 = vadd.f32 %v4514_v47, %v4513_v46 }
 0xc92   : > { %5761 = vtanh.f32 %v4515_v48 }
 0xc93   : > { %5763 = vtanh.f32 %v4632_v52 }
 0xc94   : > { %5765 = vtanh.f32 %v4634_v31 }
 0xc9f   : > { %v5762_v55 = vpop.eup %5761 }
 0xca0   : > { %v5764_v30 = vpop.eup %5763  ;;  %v4517_v44 = vmul.f32 %v5762_v55, %v5760_v26 }
 0xca1   : > { %v4689_v5 = vmul.f32 %v5764_v30, %v4649_v53  ;;  %v5766_v13 = vpop.eup %5765  ;;  %v4669_v7 = vmul.f32 %v5764_v30, %v4665_v29  ;;  %v4657_v9 = vmul.f32 %v5764_v30, %v4653_v60  ;;  %v4681_v6 = vmul.f32 %v5764_v30, %v4677_v51 }
 0xca2   : > { %4518 = vst [vmem:[#allocation2 + $0xe] sm:$0x3] %v4517_v44  ;;  %v4647_v25 = vrot.slane %v4517_v44, 2 }
 0xca3   : > { %v4692_v24 = vsel %vm4691_vm3, %v4689_v5, 0.0  ;;  %v4672_v3 = vsel %vm4671_vm4, %v4669_v7, 0.0  ;;  %v4660_v17 = vsel %vm4659_vm5, %v4657_v9, 0.0  ;;  %v4684_v58 = vsel %vm4683_vm6, %v4681_v6, 0.0 }
 0xca4   : > { %v4650_v37 = vmul.f32 0.70710677, %v4647_v25 }
 0xca6   : > { %v4690_v56 = vmul.f32 %v5766_v13, %v4650_v37  ;;  %v4666_v0 = vrot.slane %v4650_v37, 4  ;;  %v4654_v28 = vrot.slane %v4650_v37, 6  ;;  %v4678_v14 = vrot.slane %v4650_v37, 2 }
 0xca8   : > { %v4693_v1 = vsel %vm4691_vm3, %v4690_v56, 0.0  ;;  %v4670_v33 = vmul.f32 %v5766_v13, %v4666_v0  ;;  %v4658_v21 = vmul.f32 %v5766_v13, %v4654_v28  ;;  %v4682_v10 = vmul.f32 %v5766_v13, %v4678_v14 }
 0xca9   : > { %v11443_v8 = vld [vmem:[#allocation2 + $0x8] sm:$0xff]  ;;  %v4694_v36 = vadd.f32 %v4693_v1, %v4692_v24 }
 0xcaa   : > { %4636 = vmatmul.mubr.f32.gmra.mxu1 %v11443_v8  ;;  %v4673_v34 = vsel %vm4671_vm4, %v4670_v33, 0.0  ;;  %v4661_v16 = vsel %vm4659_vm5, %v4658_v21, 0.0  ;;  %v4685_v20 = vsel %vm4683_vm6, %v4682_v10, 0.0 }
 0xcab   : > { %4695 = vadd.xlane.f32.xlu1 %v4694_v36  ;;  %v4674_v61 = vadd.f32 %v4673_v34, %v4672_v3  ;;  %v4662_v38 = vadd.f32 %v4661_v16, %v4660_v17  ;;  %v4686_v57 = vadd.f32 %v4685_v20, %v4684_v58  ;;  %v6701_v16 = vmov 0  }
 0xcac   : > { %5503 = vset.pattern.permute.xlu1 %v6701_v16  ;;  %5504 = vset.pattern.permute.xlu0 %v6701_v16 }
 0xcad   : > { %4675 = vadd.xlane.f32.xlu0 %v4674_v61 }
 0xcaf   : > { %4663 = vadd.xlane.f32.xlu1 %v4662_v38 }
 0xcb1   : > { %4687 = vadd.xlane.f32.xlu0 %v4686_v57 }
 0xd34   : > { %v4696_v31 = vpop.xlane.xlu1 %4695 }
 0xd35   : > { %v4732_v5 = vrot.slane %v4696_v31, 6 }
 0xd36   : > { %v4676_v27 = vpop.xlane.xlu0 %4675 }
 0xd37   : > { %v4726_v55 = vrot.slane %v4676_v27, 2 }
 0xd3a   : > { %v4688_v26 = vpop.xlane.xlu0 %4687 }
 0xd3b   : > { %v4729_v30 = vrot.slane %v4688_v26, 4 }
 0xd6a   : > { %v4637_v4 = vpop.f32.mrf.mxu1 }
 0xd6b   : > { %v4638_v59 = vadd.f32 %v4637_v4, %v4558_v42 }
 0xd6c   : > { %v4639_v39 = vpop.f32.mrf.mxu1 }
 0xd6d   : > { %5767 = vtanh.f32 %v4638_v59  ;;  %v4640_v11 = vadd.f32 %v4639_v39, %v4562_v32 }
 0xd6f   : > { %5769 = vtanh.f32 %v4640_v11 }
 0xd7a   : > { %v5768_v18 = vpop.eup %5767 }
 0xd7b   : > { %v4704_v12 = vmul.f32 %v5768_v18, %v4665_v29  ;;  %v4697_v19 = vmul.f32 %v5768_v18, %v4653_v60  ;;  %v4711_v50 = vmul.f32 %v5768_v18, %v4677_v51  ;;  %v4718_v62 = vmul.f32 %v5768_v18, %v4649_v53  ;;  %v4664_v53 = vpop.xlane.xlu1 %4663 }
 0xd7c   : > { %v5770_v15 = vpop.eup %5769  ;;  %v4744_v44 = vsel %vm4743_vm7, %v4664_v53, %v4726_v55 }
 0xd7d   : > { %v4705_v2 = vmul.f32 %v5770_v15, %v4666_v0  ;;  %v4698_v40 = vmul.f32 %v5770_v15, %v4654_v28  ;;  %v4712_v54 = vmul.f32 %v5770_v15, %v4678_v14  ;;  %v4719_v35 = vmul.f32 %v5770_v15, %v4650_v37 }
 0xd7e   : > { %v4706_v41 = vsel %vm4671_vm4, %v4704_v12, 0.0  ;;  %v4699_v42 = vsel %vm4659_vm5, %v4697_v19, 0.0  ;;  %v4713_v52 = vsel %vm4683_vm6, %v4711_v50, 0.0  ;;  %v4720_v48 = vsel %vm4691_vm3, %v4718_v62, 0.0 }
 0xd7f   : > { %v4707_v63 = vsel %vm4671_vm4, %v4705_v2, 0.0  ;;  %v4700_v43 = vsel %vm4659_vm5, %v4698_v40, 0.0  ;;  %v4714_v46 = vsel %vm4683_vm6, %v4712_v54, 0.0  ;;  %v4721_v47 = vsel %vm4691_vm3, %v4719_v35, 0.0 }
 0xd80   : > { %v4708_v23 = vadd.f32 %v4707_v63, %v4706_v41  ;;  %v4701_v45 = vadd.f32 %v4700_v43, %v4699_v42  ;;  %v4715_v49 = vadd.f32 %v4714_v46, %v4713_v52  ;;  %v4722_v32 = vadd.f32 %v4721_v47, %v4720_v48 }
 0xd81   : > { %v4746_v25 = vsel %vm4745_vm8, %v4744_v44, %v4729_v30 }
 0xd82   : > { %4709 = vadd.xlane.f32.xlu0 %v4708_v23  ;;  %4702 = vadd.xlane.f32.xlu1 %v4701_v45  ;;  %v4748_v7 = vsel %vm4747_vm9, %v4746_v25, %v4732_v5 }
 0xd86   : > { %4716 = vadd.xlane.f32.xlu0 %v4715_v49  ;;  %4723 = vadd.xlane.f32.xlu1 %v4722_v32 }
 0xe0b   : > { %v4710_v29 = vpop.xlane.xlu0 %4709  ;;  %v4703_v37 = vpop.xlane.xlu1 %4702 }
 0xe0c   : > { %v4735_v13 = vrot.slane %v4710_v29, 2  ;;  %v4750_v60 = vsel %vm4749_vm10, %v4748_v7, %v4703_v37 }
 0xe0e   : > { %v4752_v24 = vsel %vm4751_vm11, %v4750_v60, %v4735_v13 }
 0xe0f   : > { %v4717_v56 = vpop.xlane.xlu0 %4716  ;;  %v4724_v0 = vpop.xlane.xlu1 %4723 }
 0xe10   : > { %v4738_v28 = vrot.slane %v4717_v56, 4  ;;  %v4741_v14 = vrot.slane %v4724_v0, 6 }
 0xe12   : > { %v4754_v9 = vsel %vm4753_vm12, %v4752_v24, %v4738_v28 }
 0xe13   : > { %v4756_v51 = vsel %vm4755_vm13, %v4754_v9, %v4741_v14 }
 0xe14   : > { %v4758_v1 = vsel %vm4757_vm14, %v4756_v51, -inf }
 0xe15   : > { %4759 = vmax.xlane.f32.xlu0 %v4758_v1 }
 0xe9e   : > { %v4760_v33 = vpop.xlane.xlu0 %4759 }
 0xe9f   : > { %v4761_v21 = vsub.f32 %v4756_v51, %v4760_v33 }
 0xea1   : > { %v4762_v10 = vmul.f32 1.442695, %v4761_v21 }
 0xea3   : > { %5771 = vpow2.f32 %v4762_v10 }
 0xeb0   : > { %v5772_v36 = vpop.eup %5771 }
 0xeb1   : > { %v4764_v3 = vsel %vm4757_vm14, %v5772_v36, 0.0 }
 0xeb2   : > { %4765 = vadd.xlane.f32.xlu1 %v4764_v3 }
 0xf3b   : > { %v4766_v34 = vpop.xlane.xlu1 %4765 }
 0xf3c   : > { %5773 = vrcp.f32 %v4766_v34 }
 0xf49   : > { %v5774_v6 = vpop.eup %5773 }
 0xf4a   : > { %v4768_v61 = vmul.f32 %v5774_v6, %v5772_v36 }
 0xf4c   : > { %4775 = vrot.lane.b32.xlu1 %v4768_v61, %s6702_s12  ;;  %4771 = vrot.lane.b32.xlu0 %v4768_v61, %s6703_s29  ;;  %4769 = vst.msk [vmem:[#allocation3] sm:$0x3] %vm1278_vm2, %v4768_v61 }
 0xf50   : > { %4779 = vrot.lane.b32.xlu1 %v4768_v61, %s6704_s3  ;;  %4787 = vrot.lane.b32.xlu0 %v4768_v61, %s6705_s16 }
 0xf54   : > { %4783 = vrot.lane.b32.xlu1 %v4768_v61, %s6706_s1  ;;  %4795 = vrot.lane.b32.xlu0 %v4768_v61, %s6707_s9 }
 0xf58   : > { %4791 = vrot.lane.b32.xlu1 %v4768_v61, %s6708_s25 }
 0xfbe   : > { %v4776_v17 = vpop.permute.xlu1 %4775  ;;  %v4772_v20 = vpop.permute.xlu0 %4771 }
 0xfbf   : > { %4778 = vst.msk [vmem:[#allocation3 + $0x4] sm:$0x3] %vm1278_vm2, %v4776_v17  ;;  %4774 = vst.msk [vmem:[#allocation3 + $0x2] sm:$0x3] %vm1278_vm2, %v4772_v20 }
 0xfc2   : > { %v4780_v38 = vpop.permute.xlu1 %4779  ;;  %v4788_v58 = vpop.permute.xlu0 %4787 }
 0xfc3   : > { %4782 = vst.msk [vmem:[#allocation3 + $0x6] sm:$0x3] %vm1278_vm2, %v4780_v38  ;;  %4790 = vst.msk [vmem:[#allocation3 + $0xa] sm:$0x3] %vm1278_vm2, %v4788_v58 }
 0xfc6   : > { %v4784_v57 = vpop.permute.xlu1 %4783  ;;  %v4796_v4 = vpop.permute.xlu0 %4795 }
 0xfc7   : > { %4786 = vst.msk [vmem:[#allocation3 + $0x8] sm:$0x3] %vm1278_vm2, %v4784_v57  ;;  %4798 = vst.msk [vmem:[#allocation3 + $0xe] sm:$0x3] %vm1278_vm2, %v4796_v4 }
 0xfca   : > { %v4792_v59 = vpop.permute.xlu1 %4791  ;;  %v4799_v39 = vld [vmem:[#allocation3] sm:$0xff] }
 0xfcb   : > { %4794 = vst.msk [vmem:[#allocation3 + $0xc] sm:$0x3] %vm1278_vm2, %v4792_v59  ;;  %4803 = vperm.xlu1 %5503, %v4799_v39  }
 0xfd2   : > { %v4800_v11 = vld [vmem:[#allocation3 + $0x8] sm:$0xff] }
 0xfd3   : > { %4808 = vperm.xlu0 %5504, %v4800_v11  }
0x1046   : > { %v4804_v18 = vpop.permute.xlu1 %4803 }
0x1047   : > { %v4811_v12 = vmul.f32 %v4804_v18, %v11428_v22 }
0x1049   : > { %4813 = vst [vmem:[%s975_s5] sm:$0xff] %v4811_v12 }
0x104e   : > { %v4809_v19 = vpop.permute.xlu0 %4808 }
0x104f   : > { %v4812_v15 = vmul.f32 %v4809_v19, %v11443_v8 }
0x1051   : > { %4814 = vst [vmem:[%s975_s5 + $0x8] sm:$0xff] %v4812_v15 }
0x1052   : > { %6616 = shalt.err (!%p6613_p12)
}
0x1053   : > { %s6617_s18 = scalar_lea.hbm %s11476_s7, 256  ;;  %s6621_s29 = scalar_lea.hbm %s13470_s21, 512 }
0x1054   : > { %p6618_p0 = scmp.ne.s32.totalorder %s11476_s7, %s6617_s18  ;;  %p6622_p5 = scmp.lt.s32.totalorder %s11476_s7, %s13470_s21 }
0x1055   : > { %p6623_p2 = scmp.lt.s32.totalorder %s6621_s29, %s6617_s18 }
0x1056   : > { %p6619_p11 = pnand %p6618_p0, %p13471_p8 }
0x1057   : > { %p6624_p13 = por %p6623_p2, %p6622_p5 }
0x1058   : > { %p6620_p4 = pneg %p6619_p11 }
0x105a   : > { %p6625_p7 = pnand %p6624_p13, %p6620_p4 }
0x105c   : > { %6628 = shalt.err (!%p6625_p7)
}
0x105d   : > { %s6710_s1 = smov 128   ;;  %s6711_s9 = smov 8  }
0x105e   : > { %5418 = dma.vmem_to_hbm [thread:$0]  (%p13471_p8), %s11471_s2, 256, %s11476_s7, %s4820_s15, %s6710_s1, %s6710_s1, %s6711_s9  }
0x105f PF: > { %s13472_s25 = sld [smem:[#allocation26_spill]]  ;;  %p13475_p1 = scmp.ge.s32.totalorder %s6683_s30, 2 }
0x1060   : > { %s13473_s4 = sld [smem:[#allocation31_spill]] }
0x1065   : > { %s4858_s5 = sand.u32 1, %s13472_s25  }
0x1066   : > { %p13474_p10 = scmp.ne.s32.totalorder %s13473_s4, 0  ;;  %s4859_s24 = scalar_lea.sflag [#allocation6], %s4858_s5 }
0x1068   : > { %p5449_p3 = pnand %p13475_p1, %p13474_p10 }
0x106a   : > { %p5450_p9 = pneg %p5449_p3 }
0x106c   : > { %6666 = dma.done.wait (%p5450_p9), %s4859_s24, 256  }
0x106d   : > { %6668 = vsyncadd (%p5450_p9), %s4859_s24, 4294967040  ;;  %s13476_s30 = sld [smem:[#allocation28_spill]]  ;;  %s13479_s27 = smov %s6675_s28 }
0x106e   : > { %s13477_s26 = sld [smem:[#allocation27_spill]] }
0x106f   : > { %s13478_s29 = sld [smem:[#allocation29_spill]] }
0x1073   : > { %p44_p6 = scmp.ge.s32.totalorder %s13476_s30, 4  }
0x1074   : > { %s13480_s28 = smov %s13477_s26 }
0x1075   :  { %46 = sbr.rel (!%p44_p6) target bundleno = 29 (0x1d), region = 261 }
0x107a   :  { %4864 = vsyncpa [#allocation5], 1 }
0x107b   :  { %4866 = vsyncpa [#allocation5 + $0x1], 1 }
0x107c   :  { %4867 = vsyncpa [#allocation8], 1 }
0x107d   :  { %4869 = vsyncpa [#allocation8 + $0x1], 1 }
0x107e   :  { %4870 = vsyncpa [#allocation11], 1 }
0x107f   :  { %4872 = vsyncpa [#allocation11 + $0x1], 1 }
0x1080   :  { %4873 = vsyncpa [#allocation14], 1 }
0x1081   :  { %4875 = vsyncpa [#allocation14 + $0x1], 1 }
0x1082   :  { %4876 = vsyncpa [#allocation17], 1 }
0x1083   :  { %4878 = vsyncpa [#allocation17 + $0x1], 1 }
0x1084   :  { %4879 = vsyncpa [#allocation6], 1 }
0x1085   :  { %4881 = vsyncpa [#allocation6 + $0x1], 1 }

</bundles_post_ra>
